<compile_context>
chip_gen: v6e
topology: v6e:2x2x1
jax: 0.10.0
libtpu: 0.0.40
codegen_flags: <defaults>
</compile_context>

<pallas_src>
import functools
import math
from itertools import product

import jax
import jax.numpy as jnp
from jax.experimental import pallas as pl
from jax.experimental.pallas import tpu as pltpu


# ------------------------- synthetic global `config` --------------------------
class _Config:
    feat_mult = 1
    name = "mobilenetv2-cifar"     # not resnet18/34 -> expand_ratio = 4
    min_dec_depth = 1
    max_dec_depth = 3              # -> possible_num_layers = [2, 3]


config = _Config()
BN_EPS = 1e-5
CP = 128        # padded channel width (lane-dense)
CLP = 128       # padded number of classes
DW_ROWS = 16    # 3x3 depthwise weight rows: 9 taps padded to 16 sublanes


def _round_up(v, m):
    return (v + m - 1) // m * m


# =========================== in-kernel building blocks ========================
def _dw3x3_s1(pad_ref, act, w9, bias, hin, win):
    """Stride-1 3x3 depthwise conv (+folded-BN bias, ReLU).

    Writes `act` into a zero-FRAMED pad scratch (frame-only zeroing -- the interior
    is fully overwritten), then accumulates 9 contiguous tap slices on the VPU (f32).
    """
    bsz = act.shape[0]
    pad_ref[:, 1:hin + 1, 1:win + 1, :] = act
    zrow = jnp.zeros((bsz, 1, win + 2, CP), jnp.float32)
    zcol = jnp.zeros((bsz, hin, 1, CP), jnp.float32)
    pad_ref[:, 0:1, 0:win + 2, :] = zrow
    pad_ref[:, hin + 1:hin + 2, 0:win + 2, :] = zrow
    pad_ref[:, 1:hin + 1, 0:1, :] = zcol
    pad_ref[:, 1:hin + 1, win + 1:win + 2, :] = zcol

    taps = [w9[k:k + 1, :].reshape(1, 1, 1, CP) for k in range(9)]   # hoisted
    acc = jnp.zeros((bsz, hin, win, CP), jnp.float32)
    for kh in range(3):
        for kw in range(3):
            acc = acc + pad_ref[:, kh:kh + hin, kw:kw + win, :] * taps[kh * 3 + kw]
    return jnp.maximum(acc + bias.reshape(1, 1, 1, CP), 0.0)


def _dw3x3_s2(plane_refs, act, w9, bias, hin, win):
    """Stride-2 3x3 depthwise conv (+folded-BN bias, ReLU).

    Deinterleaves `act` ONCE into four zero-framed parity planes
        plane[ph][pw][r, c, :] == padded_input[2r + ph, 2c + pw, :]
    held in VMEM scratch; every one of the 9 taps is then a plain contiguous slice
    (no per-tap cross-lane relayout).
    """
    ee_ref, eo_ref, oe_ref, oo_ref = plane_refs
    bsz = act.shape[0]
    ho, wo = hin // 2, win // 2

    # Row-parity split (alternate row-block gather, no cross-lane work).
    r = act.reshape(bsz * ho, 2, win, CP)
    r_even = r[:, 0]                          # act rows 0,2,...  -> (B*ho, win, CP)
    r_odd = r[:, 1]                           # act rows 1,3,...

    # Column-parity split: the single cross-lane relayout, done once per layer.
    def _cols(v):
        v2 = v.reshape(bsz, ho, wo, 2 * CP)
        return v2[..., :CP], v2[..., CP:]

    a_ee, a_eo = _cols(r_even)                # act[0::2,0::2], act[0::2,1::2]
    a_oe, a_oo = _cols(r_odd)                 # act[1::2,0::2], act[1::2,1::2]

    # Scatter into padded parity planes; zero only the frame cells that get read.
    pdim = ho + 1
    zrow = jnp.zeros((bsz, 1, wo + 1, CP), jnp.float32)
    zrow_s = jnp.zeros((bsz, 1, wo, CP), jnp.float32)
    zcol = jnp.zeros((bsz, ho, 1, CP), jnp.float32)
    ee_ref[:, 1:pdim, 1:wo + 1, :] = a_oo     # pad[2r,   2c  ] = act[2r-1, 2c-1]
    ee_ref[:, 0:1, 0:wo + 1, :] = zrow
    ee_ref[:, 1:pdim, 0:1, :] = zcol
    eo_ref[:, 1:pdim, 0:wo, :] = a_oe         # pad[2r,   2c+1] = act[2r-1, 2c  ]
    eo_ref[:, 0:1, 0:wo, :] = zrow_s
    oe_ref[:, 0:ho, 1:wo + 1, :] = a_eo       # pad[2r+1, 2c  ] = act[2r,   2c-1]
    oe_ref[:, 0:ho, 0:1, :] = zcol
    oo_ref[:, 0:ho, 0:wo, :] = a_ee           # pad[2r+1, 2c+1] = act[2r,   2c  ]

    planes = {(0, 0): ee_ref, (0, 1): eo_ref, (1, 0): oe_ref, (1, 1): oo_ref}
    taps = [w9[k:k + 1, :].reshape(1, 1, 1, CP) for k in range(9)]   # hoisted
    acc = jnp.zeros((bsz, ho, wo, CP), jnp.float32)
    for kh in range(3):
        for kw in range(3):
            pr = planes[(kh % 2, kw % 2)]
            oh, ow = kh // 2, kw // 2
            acc = acc + pr[:, oh:oh + ho, ow:ow + wo, :] * taps[kh * 3 + kw]
    return jnp.maximum(acc + bias.reshape(1, 1, 1, CP), 0.0)


def _pw1x1(act, w, b, relu):
    """1x1 conv == MXU matmul on (B*H*W, Cin) with bf16 operands, f32 accumulate."""
    bsz, hsz, wsz, cin = act.shape
    cout = w.shape[-1]
    y = jnp.dot(act.reshape(bsz * hsz * wsz, cin).astype(jnp.bfloat16), w,
                preferred_element_type=jnp.float32) + b
    if relu:
        y = jnp.maximum(y, 0.0)
    return y.reshape(bsz, hsz, wsz, cout)


def _decoder_body(plan, wrefs, x_ref, pad1_ref, plane_refs):
    """One full PredConvLightDecoder forward for the WHOLE batch.  Returns (B, CLP)."""
    wit = iter(wrefs)

    def nxt():
        return next(wit)[...]

    bsz = x_ref.shape[0]
    hsz = wsz = plan["S"]

    # ---- SepConvBNAct: dw3x3 stride 2 + BN + ReLU, then 1x1 + BN + ReLU ----
    act = x_ref[...].astype(jnp.float32)                 # (B, S, S, CP) lane-dense
    dw_w, dw_b = nxt(), nxt()
    act = _dw3x3_s2(plane_refs, act, dw_w, dw_b, hsz, wsz)
    hsz, wsz = hsz // 2, wsz // 2
    act = _pw1x1(act, nxt(), nxt(), relu=True)

    # ---- InvertedResidual blocks ----
    for blk in plan["irs"]:
        inp = act
        if blk["has_expand"]:
            act = _pw1x1(act, nxt(), nxt(), relu=True)
        dw_w, dw_b = nxt(), nxt()
        if blk["stride"] == 2:
            act = _dw3x3_s2(plane_refs, act, dw_w, dw_b, hsz, wsz)
            hsz, wsz = hsz // 2, wsz // 2
        else:
            act = _dw3x3_s1(pad1_ref, act, dw_w, dw_b, hsz, wsz)
        act = _pw1x1(act, nxt(), nxt(), relu=False)      # linear projection (no ReLU)
        if blk["use_res"]:
            act = act + inp

    # ---- ConvBNAct 1x1 -> final_dim, GAP (1/(H*W) folded into lin_w), Linear ----
    act = _pw1x1(act, nxt(), nxt(), relu=True)           # (B, H, W, FD)
    fd = act.shape[-1]
    pooled = jnp.sum(act.reshape(bsz, hsz * wsz, fd), axis=1)        # (B, FD)
    lin_w, lin_b = nxt(), nxt()
    return jnp.dot(pooled.astype(jnp.bfloat16), lin_w,
                   preferred_element_type=jnp.float32) + lin_b       # (B, CLP)


def _mixed_kernel(x_ref, coeff_ref, *refs, plans, n_weights):
    """Grid step d runs decoder d for the whole batch and writes its WEIGHTED logits."""
    nw_tot = sum(n_weights)
    out_ref = refs[nw_tot]
    pad1_ref = refs[nw_tot + 1]
    plane_refs = refs[nw_tot + 2:nw_tot + 6]
    d = pl.program_id(0)
    off = 0
    for di, plan in enumerate(plans):
        wrefs = refs[off:off + n_weights[di]]
        off += n_weights[di]

        @pl.when(d == di)
        def _(plan=plan, wrefs=wrefs):
            logits = _decoder_body(plan, wrefs, x_ref, pad1_ref, plane_refs)
            bsz = logits.shape[0]
            # per-decoder mixing coefficient applied in-kernel (lane-broadcast row)
            out_ref[...] = logits.reshape(1, bsz, CLP) * coeff_ref[...]


def run_mixed(decoders, x_pad, coeff_arr):
    """ONE fused pallas_call for ALL decoders: grid=(num_decoders,), 'parallel'."""
    num_dec = len(decoders)
    bsz, s, _, _ = x_pad.shape
    plans = tuple(p for p, _ in decoders)
    all_w, n_weights = [], []
    for _, wl in decoders:
        all_w.extend(wl)
        n_weights.append(len(wl))

    # Scratch sizes derived from the plans (shared by both decoders' bodies).
    s1_sizes, s2_sizes = [], []
    for p in plans:
        sz = p["S"]
        s2_sizes.append(sz)                   # SepConv dw is always stride 2
        sz //= 2
        for blk in p["irs"]:
            if blk["stride"] == 2:
                s2_sizes.append(sz)
                sz //= 2
            else:
                s1_sizes.append(sz)
    h1 = (max(s1_sizes) + 2) if s1_sizes else 8
    w1 = _round_up(h1, 8)                                   # sublane-aligned halo width
    pdim = (max(s2_sizes) // 2 + 1) if s2_sizes else 8
    wpl = _round_up(pdim, 8)                                # sublane-aligned plane width

    in_specs = [
        pl.BlockSpec((bsz, s, s, CP), lambda d: (0, 0, 0, 0)),     # x: fetched once
        pl.BlockSpec((1, bsz, CLP), lambda d: (d, 0, 0)),          # per-decoder coeff row
    ]
    for wgt in all_w:                                              # VMEM-resident weights
        in_specs.append(pl.BlockSpec(wgt.shape, lambda d, _n=wgt.ndim: (0,) * _n))

    return pl.pallas_call(
        functools.partial(_mixed_kernel, plans=plans, n_weights=tuple(n_weights)),
        out_shape=jax.ShapeDtypeStruct((num_dec, bsz, CLP), jnp.float32),
        grid=(num_dec,),
        in_specs=in_specs,
        out_specs=pl.BlockSpec((1, bsz, CLP), lambda d: (d, 0, 0)),
        scratch_shapes=[pltpu.VMEM((bsz, h1, w1, CP), jnp.float32)]       # stride-1 halo
                      + [pltpu.VMEM((bsz, pdim, wpl, CP), jnp.float32)] * 4,  # parity planes
        compiler_params=pltpu.CompilerParams(dimension_semantics=("parallel",)),
    )(x_pad, coeff_arr, *all_w)


# ======================= deterministic parameter setup ========================
def _fold_bn(key, c):
    k1, k2, k3, k4 = jax.random.split(key, 4)
    gamma = 1.0 + 0.1 * jax.random.normal(k1, (c,), jnp.float32)
    beta = 0.1 * jax.random.normal(k2, (c,), jnp.float32)
    mean = 0.1 * jax.random.normal(k3, (c,), jnp.float32)
    var = jax.random.uniform(k4, (c,), jnp.float32, 0.5, 1.5)
    scale = gamma / jnp.sqrt(var + BN_EPS)
    shift = beta - mean * scale
    return scale, shift


def _dw_weight(key, c):
    return 0.2 * jax.random.normal(key, (3, 3, c), jnp.float32)


def _pw_weight(key, cin, cout):
    return jax.random.normal(key, (cin, cout), jnp.float32) * math.sqrt(2.0 / cin)


def _pad2(a, rows, cols):
    return jnp.pad(a, ((0, rows - a.shape[0]), (0, cols - a.shape[1])))


def _pad_row(v, n):
    return jnp.pad(v.reshape(1, -1), ((0, 0), (0, n - v.shape[0])))


def build_decoder_params(key, channels, size, classes, dim_in_decoder,
                         expand_ratio, num_layers, final_dim, bias):
    """Mirrors PredConvLightDecoder.__init__ (BN folded, channels padded to 128 lanes)."""
    keys = iter(jax.random.split(key, 8 * (num_layers + 4)))
    weights = []
    plan = {"S": size, "FD": final_dim, "classes": classes,
            "num_layers": num_layers, "irs": []}

    def add_dw(c):
        dw = _dw_weight(next(keys), c)
        sc, sh = _fold_bn(next(keys), c)
        weights.append(_pad2((dw * sc[None, None, :]).reshape(9, c),
                             DW_ROWS, CP).astype(jnp.float32))
        weights.append(_pad_row(sh, CP).astype(jnp.float32))

    def add_pw(cin, cout, pad_out):
        pw = _pw_weight(next(keys), cin, cout)
        sc, sh = _fold_bn(next(keys), cout)
        weights.append(_pad2(pw * sc[None, :], CP, pad_out).astype(jnp.bfloat16))
        weights.append(_pad_row(sh, pad_out).astype(jnp.float32))

    in_planes = channels
    curr_size = size
    planes = dim_in_decoder
    channel_increment = planes // 2 if expand_ratio > 1 else planes

    # SepConvBNAct(in_planes -> planes, stride=2)
    add_dw(in_planes)
    add_pw(in_planes, planes, CP)
    in_planes = planes
    curr_size //= 2
    out_planes = planes

    for i in range(num_layers - 1):
        stride = 2 if curr_size >= 2 and i % 2 == 1 else 1
        out_planes = out_planes + channel_increment if stride == 2 else out_planes
        hidden = in_planes * expand_ratio
        blk = {"stride": stride,
               "use_res": stride == 1 and in_planes == out_planes,
               "has_expand": expand_ratio != 1}
        if expand_ratio != 1:
            add_pw(in_planes, hidden, CP)          # expand
        add_dw(hidden)                             # depthwise
        add_pw(hidden, out_planes, CP)             # project (no ReLU in kernel)
        plan["irs"].append(blk)
        in_planes = out_planes
        curr_size = curr_size // 2 if stride == 2 else curr_size

    # ConvBNAct(in_planes -> final_dim, 1x1) + ReLU
    add_pw(in_planes, final_dim, final_dim)

    # Linear(final_dim -> classes); fold the GAP's 1/(H*W) into the weight offline.
    lw = jax.random.normal(next(keys), (final_dim, classes), jnp.float32) / math.sqrt(final_dim)
    lb = (0.1 * jax.random.normal(next(keys), (classes,), jnp.float32)
          if bias else jnp.zeros((classes,), jnp.float32))
    inv_hw = 1.0 / float(curr_size * curr_size)
    weights.append(_pad2(lw * inv_hw, final_dim, CLP).astype(jnp.bfloat16))
    weights.append(_pad_row(lb, CLP).astype(jnp.float32))   # padded classes stay exactly 0
    return plan, weights


def build_mixed_decoder_params(key, channels, size, classes, bias=True):
    """Mirrors MixedPredConvLightDecoder.__init__."""
    feat_mult = config.feat_mult
    expand_ratio = 1 if config.name.split('-')[0] in ('resnet18', 'resnet34') else 4
    possible_dim_in_decoders = [channels // expand_ratio]
    possible_num_layers = [i + 1 for i in range(config.min_dec_depth, config.max_dec_depth)]
    final_dim = 512 * feat_mult
    combos = list(product(possible_dim_in_decoders, possible_num_layers))
    keys = jax.random.split(key, len(combos))
    return [build_decoder_params(k, channels, size, classes, d, expand_ratio, n, final_dim, bias)
            for k, (d, n) in zip(keys, combos)]


# ================================ forward pass ================================
def mixed_pred_conv_light_decoder_forward(decoders, x_nchw, weights=None, categorical=False):
    num_dec = len(decoders)
    classes = decoders[0][0]["classes"]
    bsz = x_nchw.shape[0]

    # Layout glue: NCHW -> NHWC, zero-pad channels to 128 lanes (lane-dense DMA).
    x = jnp.transpose(x_nchw, (0, 2, 3, 1)).astype(jnp.float32)
    cin = x.shape[-1]
    x_pad = jnp.pad(x, ((0, 0), (0, 0), (0, 0), (0, CP - cin)))

    # Per-decoder mixing coefficients (applied in-kernel).
    if weights is None:
        coeffs = jnp.full((num_dec,), 1.0 / num_dec, jnp.float32)       # mean of decoders
    else:
        w = weights.astype(jnp.float32)
        if categorical:
            # TODO(synk): PyTorch evaluates only decoders[argmax]; here both run (the
            # non-selected one is scaled by 0), which gives the same result and keeps
            # the path jit-safe (no host-side .item() sync).
            idx = jnp.argmax(w)
            coeffs = jnp.where(jnp.arange(num_dec) == idx, w, 0.0)
        else:
            coeffs = w                                                   # sum(w_i * dec_i)
    coeff_arr = jnp.broadcast_to(coeffs.reshape(num_dec, 1, 1), (num_dec, bsz, CLP))

    per_dec = run_mixed(decoders, x_pad, coeff_arr)        # (num_dec, B, 128), pre-weighted
    # Only the race-free cross-decoder sum + class slice stay in XLA (a few hundred
    # bytes) so the decoder grid axis can remain "parallel" (one decoder per TC on v7x).
    return jnp.sum(per_dec, axis=0)[:, :classes]


# ==================================== main ====================================
if __name__ == "__main__":
    key = jax.random.PRNGKey(0)
    kp, kx = jax.random.split(key)
    B, C, S, CLASSES = 2, 16, 16, 10

    decoders = build_mixed_decoder_params(kp, channels=C, size=S, classes=CLASSES, bias=True)

    x = jax.random.normal(kx, (B, C, S, S), jnp.float32)   # NCHW, like the PyTorch module

    out = mixed_pred_conv_light_decoder_forward(decoders, x)   # default: mean of decoders
    out = jax.block_until_ready(out)
    assert out.shape == (B, CLASSES), out.shape
    print("KERNEL_OK")
</pallas_src>

<mosaic_0001>
module attributes {stable_mosaic.version = 11 : i64} {
  func.func @_mixed_kernel(%arg0: i32, %arg1: memref<2x16x16x128xf32, #tpu.memory_space<vmem>>, %arg2: memref<1x2x128xf32, #tpu.memory_space<vmem>>, %arg3: memref<16x128xf32, #tpu.memory_space<vmem>>, %arg4: memref<1x128xf32, #tpu.memory_space<vmem>>, %arg5: memref<128x128xbf16, #tpu.memory_space<vmem>>, %arg6: memref<1x128xf32, #tpu.memory_space<vmem>>, %arg7: memref<128x128xbf16, #tpu.memory_space<vmem>>, %arg8: memref<1x128xf32, #tpu.memory_space<vmem>>, %arg9: memref<16x128xf32, #tpu.memory_space<vmem>>, %arg10: memref<1x128xf32, #tpu.memory_space<vmem>>, %arg11: memref<128x128xbf16, #tpu.memory_space<vmem>>, %arg12: memref<1x128xf32, #tpu.memory_space<vmem>>, %arg13: memref<128x512xbf16, #tpu.memory_space<vmem>>, %arg14: memref<1x512xf32, #tpu.memory_space<vmem>>, %arg15: memref<512x128xbf16, #tpu.memory_space<vmem>>, %arg16: memref<1x128xf32, #tpu.memory_space<vmem>>, %arg17: memref<16x128xf32, #tpu.memory_space<vmem>>, %arg18: memref<1x128xf32, #tpu.memory_space<vmem>>, %arg19: memref<128x128xbf16, #tpu.memory_space<vmem>>, %arg20: memref<1x128xf32, #tpu.memory_space<vmem>>, %arg21: memref<128x128xbf16, #tpu.memory_space<vmem>>, %arg22: memref<1x128xf32, #tpu.memory_space<vmem>>, %arg23: memref<16x128xf32, #tpu.memory_space<vmem>>, %arg24: memref<1x128xf32, #tpu.memory_space<vmem>>, %arg25: memref<128x128xbf16, #tpu.memory_space<vmem>>, %arg26: memref<1x128xf32, #tpu.memory_space<vmem>>, %arg27: memref<128x128xbf16, #tpu.memory_space<vmem>>, %arg28: memref<1x128xf32, #tpu.memory_space<vmem>>, %arg29: memref<16x128xf32, #tpu.memory_space<vmem>>, %arg30: memref<1x128xf32, #tpu.memory_space<vmem>>, %arg31: memref<128x128xbf16, #tpu.memory_space<vmem>>, %arg32: memref<1x128xf32, #tpu.memory_space<vmem>>, %arg33: memref<128x512xbf16, #tpu.memory_space<vmem>>, %arg34: memref<1x512xf32, #tpu.memory_space<vmem>>, %arg35: memref<512x128xbf16, #tpu.memory_space<vmem>>, %arg36: memref<1x128xf32, #tpu.memory_space<vmem>>, %arg37: memref<1x2x128xf32, #tpu.memory_space<vmem>>, %arg38: memref<2x10x16x128xf32, #tpu.memory_space<vmem>>, %arg39: memref<2x9x16x128xf32, #tpu.memory_space<vmem>>, %arg40: memref<2x9x16x128xf32, #tpu.memory_space<vmem>>, %arg41: memref<2x9x16x128xf32, #tpu.memory_space<vmem>>, %arg42: memref<2x9x16x128xf32, #tpu.memory_space<vmem>>) attributes {dimension_semantics = [#tpu.dimension_semantics<parallel>], iteration_bounds = array<i64: 2>, scalar_prefetch = 0 : i64, scratch_operands = 5 : i64, tpu.core_type = #tpu.core_type<tc>, window_params = [{pipeline_mode = #tpu.pipeline_mode<synchronous>, transform_indices = @transform_0, window_bounds = array<i64: 2, 16, 16, 128>}, {transform_indices = @transform_1, window_bounds = array<i64: 1, 2, 128>}, {pipeline_mode = #tpu.pipeline_mode<synchronous>, transform_indices = @transform_2, window_bounds = array<i64: 16, 128>}, {pipeline_mode = #tpu.pipeline_mode<synchronous>, transform_indices = @transform_3, window_bounds = array<i64: 1, 128>}, {pipeline_mode = #tpu.pipeline_mode<synchronous>, transform_indices = @transform_4, window_bounds = array<i64: 128, 128>}, {pipeline_mode = #tpu.pipeline_mode<synchronous>, transform_indices = @transform_5, window_bounds = array<i64: 1, 128>}, {pipeline_mode = #tpu.pipeline_mode<synchronous>, transform_indices = @transform_6, window_bounds = array<i64: 128, 128>}, {pipeline_mode = #tpu.pipeline_mode<synchronous>, transform_indices = @transform_7, window_bounds = array<i64: 1, 128>}, {pipeline_mode = #tpu.pipeline_mode<synchronous>, transform_indices = @transform_8, window_bounds = array<i64: 16, 128>}, {pipeline_mode = #tpu.pipeline_mode<synchronous>, transform_indices = @transform_9, window_bounds = array<i64: 1, 128>}, {pipeline_mode = #tpu.pipeline_mode<synchronous>, transform_indices = @transform_10, window_bounds = array<i64: 128, 128>}, {pipeline_mode = #tpu.pipeline_mode<synchronous>, transform_indices = @transform_11, window_bounds = array<i64: 1, 128>}, {pipeline_mode = #tpu.pipeline_mode<synchronous>, transform_indices = @transform_12, window_bounds = array<i64: 128, 512>}, {pipeline_mode = #tpu.pipeline_mode<synchronous>, transform_indices = @transform_13, window_bounds = array<i64: 1, 512>}, {pipeline_mode = #tpu.pipeline_mode<synchronous>, transform_indices = @transform_14, window_bounds = array<i64: 512, 128>}, {pipeline_mode = #tpu.pipeline_mode<synchronous>, transform_indices = @transform_15, window_bounds = array<i64: 1, 128>}, {pipeline_mode = #tpu.pipeline_mode<synchronous>, transform_indices = @transform_16, window_bounds = array<i64: 16, 128>}, {pipeline_mode = #tpu.pipeline_mode<synchronous>, transform_indices = @transform_17, window_bounds = array<i64: 1, 128>}, {pipeline_mode = #tpu.pipeline_mode<synchronous>, transform_indices = @transform_18, window_bounds = array<i64: 128, 128>}, {pipeline_mode = #tpu.pipeline_mode<synchronous>, transform_indices = @transform_19, window_bounds = array<i64: 1, 128>}, {pipeline_mode = #tpu.pipeline_mode<synchronous>, transform_indices = @transform_20, window_bounds = array<i64: 128, 128>}, {pipeline_mode = #tpu.pipeline_mode<synchronous>, transform_indices = @transform_21, window_bounds = array<i64: 1, 128>}, {pipeline_mode = #tpu.pipeline_mode<synchronous>, transform_indices = @transform_22, window_bounds = array<i64: 16, 128>}, {pipeline_mode = #tpu.pipeline_mode<synchronous>, transform_indices = @transform_23, window_bounds = array<i64: 1, 128>}, {pipeline_mode = #tpu.pipeline_mode<synchronous>, transform_indices = @transform_24, window_bounds = array<i64: 128, 128>}, {pipeline_mode = #tpu.pipeline_mode<synchronous>, transform_indices = @transform_25, window_bounds = array<i64: 1, 128>}, {pipeline_mode = #tpu.pipeline_mode<synchronous>, transform_indices = @transform_26, window_bounds = array<i64: 128, 128>}, {pipeline_mode = #tpu.pipeline_mode<synchronous>, transform_indices = @transform_27, window_bounds = array<i64: 1, 128>}, {pipeline_mode = #tpu.pipeline_mode<synchronous>, transform_indices = @transform_28, window_bounds = array<i64: 16, 128>}, {pipeline_mode = #tpu.pipeline_mode<synchronous>, transform_indices = @transform_29, window_bounds = array<i64: 1, 128>}, {pipeline_mode = #tpu.pipeline_mode<synchronous>, transform_indices = @transform_30, window_bounds = array<i64: 128, 128>}, {pipeline_mode = #tpu.pipeline_mode<synchronous>, transform_indices = @transform_31, window_bounds = array<i64: 1, 128>}, {pipeline_mode = #tpu.pipeline_mode<synchronous>, transform_indices = @transform_32, window_bounds = array<i64: 128, 512>}, {pipeline_mode = #tpu.pipeline_mode<synchronous>, transform_indices = @transform_33, window_bounds = array<i64: 1, 512>}, {pipeline_mode = #tpu.pipeline_mode<synchronous>, transform_indices = @transform_34, window_bounds = array<i64: 512, 128>}, {pipeline_mode = #tpu.pipeline_mode<synchronous>, transform_indices = @transform_35, window_bounds = array<i64: 1, 128>}, {transform_indices = @transform_36, window_bounds = array<i64: 1, 2, 128>}]} {
    %c0_i32 = arith.constant 0 : i32
    %0 = arith.cmpi eq, %arg0, %c0_i32 : i32
    %1 = arith.extui %0 : i1 to i32
    %c0_i32_0 = arith.constant 0 : i32
    %2 = arith.cmpi ne, %1, %c0_i32_0 : i32
    scf.if %2 {
      %c0 = arith.constant 0 : index
      %c0_2 = arith.constant 0 : index
      %c0_3 = arith.constant 0 : index
      %c0_4 = arith.constant 0 : index
      %6 = vector.load %arg1[%c0, %c0_2, %c0_3, %c0_4] : memref<2x16x16x128xf32, #tpu.memory_space<vmem>>, vector<2x16x16x128xf32>
      %c0_5 = arith.constant 0 : index
      %c0_6 = arith.constant 0 : index
      %7 = vector.load %arg3[%c0_5, %c0_6] : memref<16x128xf32, #tpu.memory_space<vmem>>, vector<16x128xf32>
      %c0_7 = arith.constant 0 : index
      %c0_8 = arith.constant 0 : index
      %8 = vector.load %arg4[%c0_7, %c0_8] : memref<1x128xf32, #tpu.memory_space<vmem>>, vector<1x128xf32>
      %9 = vector.shape_cast %6 : vector<2x16x16x128xf32> to vector<16x2x16x128xf32>
      %10 = vector.extract_strided_slice %9 {offsets = [0, 0, 0, 0], sizes = [16, 1, 16, 128], strides = [1, 1, 1, 1]} : vector<16x2x16x128xf32> to vector<16x1x16x128xf32>
      %11 = vector.shape_cast %10 : vector<16x1x16x128xf32> to vector<16x16x128xf32>
      %12 = vector.extract_strided_slice %9 {offsets = [0, 1, 0, 0], sizes = [16, 1, 16, 128], strides = [1, 1, 1, 1]} : vector<16x2x16x128xf32> to vector<16x1x16x128xf32>
      %13 = vector.shape_cast %12 : vector<16x1x16x128xf32> to vector<16x16x128xf32>
      %14 = vector.shape_cast %11 : vector<16x16x128xf32> to vector<2x8x8x256xf32>
      %15 = vector.extract_strided_slice %14 {offsets = [0, 0, 0, 0], sizes = [2, 8, 8, 128], strides = [1, 1, 1, 1]} : vector<2x8x8x256xf32> to vector<2x8x8x128xf32>
      %16 = vector.extract_strided_slice %14 {offsets = [0, 0, 0, 128], sizes = [2, 8, 8, 128], strides = [1, 1, 1, 1]} : vector<2x8x8x256xf32> to vector<2x8x8x128xf32>
      %17 = vector.shape_cast %13 : vector<16x16x128xf32> to vector<2x8x8x256xf32>
      %18 = vector.extract_strided_slice %17 {offsets = [0, 0, 0, 0], sizes = [2, 8, 8, 128], strides = [1, 1, 1, 1]} : vector<2x8x8x256xf32> to vector<2x8x8x128xf32>
      %19 = vector.extract_strided_slice %17 {offsets = [0, 0, 0, 128], sizes = [2, 8, 8, 128], strides = [1, 1, 1, 1]} : vector<2x8x8x256xf32> to vector<2x8x8x128xf32>
      %cst = arith.constant 0.000000e+00 : f32
      %20 = vector.broadcast %cst : f32 to vector<2x1x9x128xf32>
      %cst_9 = arith.constant 0.000000e+00 : f32
      %21 = vector.broadcast %cst_9 : f32 to vector<2x1x8x128xf32>
      %cst_10 = arith.constant 0.000000e+00 : f32
      %22 = vector.broadcast %cst_10 : f32 to vector<2x8x1x128xf32>
      %c0_11 = arith.constant 0 : index
      %c1 = arith.constant 1 : index
      %c1_12 = arith.constant 1 : index
      %c0_13 = arith.constant 0 : index
      %23 = vector.load %arg39[%c0_11, %c1, %c1_12, %c0_13] : memref<2x9x16x128xf32, #tpu.memory_space<vmem>>, vector<2x8x8x128xf32>
      tpu.vector_store %arg39[%c0_11, %c1, %c1_12, %c0_13], %19 {strides = array<i32>} : memref<2x9x16x128xf32, #tpu.memory_space<vmem>>, vector<2x8x8x128xf32>,
      %c0_14 = arith.constant 0 : index
      %c0_15 = arith.constant 0 : index
      %c0_16 = arith.constant 0 : index
      %c0_17 = arith.constant 0 : index
      %24 = vector.load %arg39[%c0_14, %c0_15, %c0_16, %c0_17] : memref<2x9x16x128xf32, #tpu.memory_space<vmem>>, vector<2x1x9x128xf32>
      tpu.vector_store %arg39[%c0_14, %c0_15, %c0_16, %c0_17], %20 {strides = array<i32>} : memref<2x9x16x128xf32, #tpu.memory_space<vmem>>, vector<2x1x9x128xf32>,
      %c0_18 = arith.constant 0 : index
      %c1_19 = arith.constant 1 : index
      %c0_20 = arith.constant 0 : index
      %c0_21 = arith.constant 0 : index
      %25 = vector.load %arg39[%c0_18, %c1_19, %c0_20, %c0_21] : memref<2x9x16x128xf32, #tpu.memory_space<vmem>>, vector<2x8x1x128xf32>
      tpu.vector_store %arg39[%c0_18, %c1_19, %c0_20, %c0_21], %22 {strides = array<i32>} : memref<2x9x16x128xf32, #tpu.memory_space<vmem>>, vector<2x8x1x128xf32>,
      %c0_22 = arith.constant 0 : index
      %c1_23 = arith.constant 1 : index
      %c0_24 = arith.constant 0 : index
      %c0_25 = arith.constant 0 : index
      %26 = vector.load %arg40[%c0_22, %c1_23, %c0_24, %c0_25] : memref<2x9x16x128xf32, #tpu.memory_space<vmem>>, vector<2x8x8x128xf32>
      tpu.vector_store %arg40[%c0_22, %c1_23, %c0_24, %c0_25], %18 {strides = array<i32>} : memref<2x9x16x128xf32, #tpu.memory_space<vmem>>, vector<2x8x8x128xf32>,
      %c0_26 = arith.constant 0 : index
      %c0_27 = arith.constant 0 : index
      %c0_28 = arith.constant 0 : index
      %c0_29 = arith.constant 0 : index
      %27 = vector.load %arg40[%c0_26, %c0_27, %c0_28, %c0_29] : memref<2x9x16x128xf32, #tpu.memory_space<vmem>>, vector<2x1x8x128xf32>
      tpu.vector_store %arg40[%c0_26, %c0_27, %c0_28, %c0_29], %21 {strides = array<i32>} : memref<2x9x16x128xf32, #tpu.memory_space<vmem>>, vector<2x1x8x128xf32>,
      %c0_30 = arith.constant 0 : index
      %c0_31 = arith.constant 0 : index
      %c1_32 = arith.constant 1 : index
      %c0_33 = arith.constant 0 : index
      %28 = vector.load %arg41[%c0_30, %c0_31, %c1_32, %c0_33] : memref<2x9x16x128xf32, #tpu.memory_space<vmem>>, vector<2x8x8x128xf32>
      tpu.vector_store %arg41[%c0_30, %c0_31, %c1_32, %c0_33], %16 {strides = array<i32>} : memref<2x9x16x128xf32, #tpu.memory_space<vmem>>, vector<2x8x8x128xf32>,
      %c0_34 = arith.constant 0 : index
      %c0_35 = arith.constant 0 : index
      %c0_36 = arith.constant 0 : index
      %c0_37 = arith.constant 0 : index
      %29 = vector.load %arg41[%c0_34, %c0_35, %c0_36, %c0_37] : memref<2x9x16x128xf32, #tpu.memory_space<vmem>>, vector<2x8x1x128xf32>
      tpu.vector_store %arg41[%c0_34, %c0_35, %c0_36, %c0_37], %22 {strides = array<i32>} : memref<2x9x16x128xf32, #tpu.memory_space<vmem>>, vector<2x8x1x128xf32>,
      %c0_38 = arith.constant 0 : index
      %c0_39 = arith.constant 0 : index
      %c0_40 = arith.constant 0 : index
      %c0_41 = arith.constant 0 : index
      %30 = vector.load %arg42[%c0_38, %c0_39, %c0_40, %c0_41] : memref<2x9x16x128xf32, #tpu.memory_space<vmem>>, vector<2x8x8x128xf32>
      tpu.vector_store %arg42[%c0_38, %c0_39, %c0_40, %c0_41], %15 {strides = array<i32>} : memref<2x9x16x128xf32, #tpu.memory_space<vmem>>, vector<2x8x8x128xf32>,
      %31 = vector.extract_strided_slice %7 {offsets = [0, 0], sizes = [1, 128], strides = [1, 1]} : vector<16x128xf32> to vector<1x128xf32>
      %32 = vector.shape_cast %31 : vector<1x128xf32> to vector<1x1x1x128xf32>
      %33 = vector.extract_strided_slice %7 {offsets = [1, 0], sizes = [1, 128], strides = [1, 1]} : vector<16x128xf32> to vector<1x128xf32>
      %34 = vector.shape_cast %33 : vector<1x128xf32> to vector<1x1x1x128xf32>
      %35 = vector.extract_strided_slice %7 {offsets = [2, 0], sizes = [1, 128], strides = [1, 1]} : vector<16x128xf32> to vector<1x128xf32>
      %36 = vector.shape_cast %35 : vector<1x128xf32> to vector<1x1x1x128xf32>
      %37 = vector.extract_strided_slice %7 {offsets = [3, 0], sizes = [1, 128], strides = [1, 1]} : vector<16x128xf32> to vector<1x128xf32>
      %38 = vector.shape_cast %37 : vector<1x128xf32> to vector<1x1x1x128xf32>
      %39 = vector.extract_strided_slice %7 {offsets = [4, 0], sizes = [1, 128], strides = [1, 1]} : vector<16x128xf32> to vector<1x128xf32>
      %40 = vector.shape_cast %39 : vector<1x128xf32> to vector<1x1x1x128xf32>
      %41 = vector.extract_strided_slice %7 {offsets = [5, 0], sizes = [1, 128], strides = [1, 1]} : vector<16x128xf32> to vector<1x128xf32>
      %42 = vector.shape_cast %41 : vector<1x128xf32> to vector<1x1x1x128xf32>
      %43 = vector.extract_strided_slice %7 {offsets = [6, 0], sizes = [1, 128], strides = [1, 1]} : vector<16x128xf32> to vector<1x128xf32>
      %44 = vector.shape_cast %43 : vector<1x128xf32> to vector<1x1x1x128xf32>
      %45 = vector.extract_strided_slice %7 {offsets = [7, 0], sizes = [1, 128], strides = [1, 1]} : vector<16x128xf32> to vector<1x128xf32>
      %46 = vector.shape_cast %45 : vector<1x128xf32> to vector<1x1x1x128xf32>
      %47 = vector.extract_strided_slice %7 {offsets = [8, 0], sizes = [1, 128], strides = [1, 1]} : vector<16x128xf32> to vector<1x128xf32>
      %48 = vector.shape_cast %47 : vector<1x128xf32> to vector<1x1x1x128xf32>
      %cst_42 = arith.constant 0.000000e+00 : f32
      %49 = vector.broadcast %cst_42 : f32 to vector<2x8x8x128xf32>
      %c0_43 = arith.constant 0 : index
      %c0_44 = arith.constant 0 : index
      %c0_45 = arith.constant 0 : index
      %c0_46 = arith.constant 0 : index
      %50 = vector.load %arg39[%c0_43, %c0_44, %c0_45, %c0_46] : memref<2x9x16x128xf32, #tpu.memory_space<vmem>>, vector<2x8x8x128xf32>
      %51 = vector.broadcast %32 : vector<1x1x1x128xf32> to vector<2x8x8x128xf32>
      %52 = arith.mulf %50, %51 : vector<2x8x8x128xf32>
      %53 = arith.addf %49, %52 : vector<2x8x8x128xf32>
      %c0_47 = arith.constant 0 : index
      %c0_48 = arith.constant 0 : index
      %c0_49 = arith.constant 0 : index
      %c0_50 = arith.constant 0 : index
      %54 = vector.load %arg40[%c0_47, %c0_48, %c0_49, %c0_50] : memref<2x9x16x128xf32, #tpu.memory_space<vmem>>, vector<2x8x8x128xf32>
      %55 = vector.broadcast %34 : vector<1x1x1x128xf32> to vector<2x8x8x128xf32>
      %56 = arith.mulf %54, %55 : vector<2x8x8x128xf32>
      %57 = arith.addf %53, %56 : vector<2x8x8x128xf32>
      %c0_51 = arith.constant 0 : index
      %c0_52 = arith.constant 0 : index
      %c1_53 = arith.constant 1 : index
      %c0_54 = arith.constant 0 : index
      %58 = vector.load %arg39[%c0_51, %c0_52, %c1_53, %c0_54] : memref<2x9x16x128xf32, #tpu.memory_space<vmem>>, vector<2x8x8x128xf32>
      %59 = vector.broadcast %36 : vector<1x1x1x128xf32> to vector<2x8x8x128xf32>
      %60 = arith.mulf %58, %59 : vector<2x8x8x128xf32>
      %61 = arith.addf %57, %60 : vector<2x8x8x128xf32>
      %c0_55 = arith.constant 0 : index
      %c0_56 = arith.constant 0 : index
      %c0_57 = arith.constant 0 : index
      %c0_58 = arith.constant 0 : index
      %62 = vector.load %arg41[%c0_55, %c0_56, %c0_57, %c0_58] : memref<2x9x16x128xf32, #tpu.memory_space<vmem>>, vector<2x8x8x128xf32>
      %63 = vector.broadcast %38 : vector<1x1x1x128xf32> to vector<2x8x8x128xf32>
      %64 = arith.mulf %62, %63 : vector<2x8x8x128xf32>
      %65 = arith.addf %61, %64 : vector<2x8x8x128xf32>
      %c0_59 = arith.constant 0 : index
      %c0_60 = arith.constant 0 : index
      %c0_61 = arith.constant 0 : index
      %c0_62 = arith.constant 0 : index
      %66 = vector.load %arg42[%c0_59, %c0_60, %c0_61, %c0_62] : memref<2x9x16x128xf32, #tpu.memory_space<vmem>>, vector<2x8x8x128xf32>
      %67 = vector.broadcast %40 : vector<1x1x1x128xf32> to vector<2x8x8x128xf32>
      %68 = arith.mulf %66, %67 : vector<2x8x8x128xf32>
      %69 = arith.addf %65, %68 : vector<2x8x8x128xf32>
      %c0_63 = arith.constant 0 : index
      %c0_64 = arith.constant 0 : index
      %c1_65 = arith.constant 1 : index
      %c0_66 = arith.constant 0 : index
      %70 = vector.load %arg41[%c0_63, %c0_64, %c1_65, %c0_66] : memref<2x9x16x128xf32, #tpu.memory_space<vmem>>, vector<2x8x8x128xf32>
      %71 = vector.broadcast %42 : vector<1x1x1x128xf32> to vector<2x8x8x128xf32>
      %72 = arith.mulf %70, %71 : vector<2x8x8x128xf32>
      %73 = arith.addf %69, %72 : vector<2x8x8x128xf32>
      %c0_67 = arith.constant 0 : index
      %c1_68 = arith.constant 1 : index
      %c0_69 = arith.constant 0 : index
      %c0_70 = arith.constant 0 : index
      %74 = vector.load %arg39[%c0_67, %c1_68, %c0_69, %c0_70] : memref<2x9x16x128xf32, #tpu.memory_space<vmem>>, vector<2x8x8x128xf32>
      %75 = vector.broadcast %44 : vector<1x1x1x128xf32> to vector<2x8x8x128xf32>
      %76 = arith.mulf %74, %75 : vector<2x8x8x128xf32>
      %77 = arith.addf %73, %76 : vector<2x8x8x128xf32>
      %c0_71 = arith.constant 0 : index
      %c1_72 = arith.constant 1 : index
      %c0_73 = arith.constant 0 : index
      %c0_74 = arith.constant 0 : index
      %78 = vector.load %arg40[%c0_71, %c1_72, %c0_73, %c0_74] : memref<2x9x16x128xf32, #tpu.memory_space<vmem>>, vector<2x8x8x128xf32>
      %79 = vector.broadcast %46 : vector<1x1x1x128xf32> to vector<2x8x8x128xf32>
      %80 = arith.mulf %78, %79 : vector<2x8x8x128xf32>
      %81 = arith.addf %77, %80 : vector<2x8x8x128xf32>
      %c0_75 = arith.constant 0 : index
      %c1_76 = arith.constant 1 : index
      %c1_77 = arith.constant 1 : index
      %c0_78 = arith.constant 0 : index
      %82 = vector.load %arg39[%c0_75, %c1_76, %c1_77, %c0_78] : memref<2x9x16x128xf32, #tpu.memory_space<vmem>>, vector<2x8x8x128xf32>
      %83 = vector.broadcast %48 : vector<1x1x1x128xf32> to vector<2x8x8x128xf32>
      %84 = arith.mulf %82, %83 : vector<2x8x8x128xf32>
      %85 = arith.addf %81, %84 : vector<2x8x8x128xf32>
      %86 = vector.shape_cast %8 : vector<1x128xf32> to vector<1x1x1x128xf32>
      %87 = vector.broadcast %86 : vector<1x1x1x128xf32> to vector<2x8x8x128xf32>
      %88 = arith.addf %85, %87 : vector<2x8x8x128xf32>
      %cst_79 = arith.constant 0.000000e+00 : f32
      %89 = vector.broadcast %cst_79 : f32 to vector<2x8x8x128xf32>
      %90 = arith.maximumf %88, %89 : vector<2x8x8x128xf32>
      %c0_80 = arith.constant 0 : index
      %c0_81 = arith.constant 0 : index
      %91 = vector.load %arg5[%c0_80, %c0_81] : memref<128x128xbf16, #tpu.memory_space<vmem>>, vector<128x128xbf16>
      %c0_82 = arith.constant 0 : index
      %c0_83 = arith.constant 0 : index
      %92 = vector.load %arg6[%c0_82, %c0_83] : memref<1x128xf32, #tpu.memory_space<vmem>>, vector<1x128xf32>
      %93 = vector.shape_cast %90 : vector<2x8x8x128xf32> to vector<128x128xf32>
      %94 = arith.truncf %93 : vector<128x128xf32> to vector<128x128xbf16>
      %cst_84 = arith.constant dense<0.000000e+00> : vector<128x128xf32>
      %95 = tpu.matmul %94, %91, %cst_84 {dimension_numbers = #tpu.dot_dimension_numbers<[1], [0], [0], [1], [0, 0, 1, 1], [], []>} : vector<128x128xbf16>, vector<128x128xbf16>, vector<128x128xf32> -> vector<128x128xf32>
      %96 = vector.broadcast %92 : vector<1x128xf32> to vector<128x128xf32>
      %97 = arith.addf %95, %96 : vector<128x128xf32>
      %cst_85 = arith.constant 0.000000e+00 : f32
      %98 = vector.broadcast %cst_85 : f32 to vector<128x128xf32>
      %99 = arith.maximumf %97, %98 : vector<128x128xf32>
      %100 = vector.shape_cast %99 : vector<128x128xf32> to vector<2x8x8x128xf32>
      %c0_86 = arith.constant 0 : index
      %c0_87 = arith.constant 0 : index
      %101 = vector.load %arg7[%c0_86, %c0_87] : memref<128x128xbf16, #tpu.memory_space<vmem>>, vector<128x128xbf16>
      %c0_88 = arith.constant 0 : index
      %c0_89 = arith.constant 0 : index
      %102 = vector.load %arg8[%c0_88, %c0_89] : memref<1x128xf32, #tpu.memory_space<vmem>>, vector<1x128xf32>
      %103 = vector.shape_cast %100 : vector<2x8x8x128xf32> to vector<128x128xf32>
      %104 = arith.truncf %103 : vector<128x128xf32> to vector<128x128xbf16>
      %cst_90 = arith.constant dense<0.000000e+00> : vector<128x128xf32>
      %105 = tpu.matmul %104, %101, %cst_90 {dimension_numbers = #tpu.dot_dimension_numbers<[1], [0], [0], [1], [0, 0, 1, 1], [], []>} : vector<128x128xbf16>, vector<128x128xbf16>, vector<128x128xf32> -> vector<128x128xf32>
      %106 = vector.broadcast %102 : vector<1x128xf32> to vector<128x128xf32>
      %107 = arith.addf %105, %106 : vector<128x128xf32>
      %cst_91 = arith.constant 0.000000e+00 : f32
      %108 = vector.broadcast %cst_91 : f32 to vector<128x128xf32>
      %109 = arith.maximumf %107, %108 : vector<128x128xf32>
      %110 = vector.shape_cast %109 : vector<128x128xf32> to vector<2x8x8x128xf32>
      %c0_92 = arith.constant 0 : index
      %c0_93 = arith.constant 0 : index
      %111 = vector.load %arg9[%c0_92, %c0_93] : memref<16x128xf32, #tpu.memory_space<vmem>>, vector<16x128xf32>
      %c0_94 = arith.constant 0 : index
      %c0_95 = arith.constant 0 : index
      %112 = vector.load %arg10[%c0_94, %c0_95] : memref<1x128xf32, #tpu.memory_space<vmem>>, vector<1x128xf32>
      %c0_96 = arith.constant 0 : index
      %c1_97 = arith.constant 1 : index
      %c1_98 = arith.constant 1 : index
      %c0_99 = arith.constant 0 : index
      %113 = vector.load %arg38[%c0_96, %c1_97, %c1_98, %c0_99] : memref<2x10x16x128xf32, #tpu.memory_space<vmem>>, vector<2x8x8x128xf32>
      tpu.vector_store %arg38[%c0_96, %c1_97, %c1_98, %c0_99], %110 {strides = array<i32>} : memref<2x10x16x128xf32, #tpu.memory_space<vmem>>, vector<2x8x8x128xf32>,
      %cst_100 = arith.constant 0.000000e+00 : f32
      %114 = vector.broadcast %cst_100 : f32 to vector<2x1x10x128xf32>
      %cst_101 = arith.constant 0.000000e+00 : f32
      %115 = vector.broadcast %cst_101 : f32 to vector<2x8x1x128xf32>
      %c0_102 = arith.constant 0 : index
      %c0_103 = arith.constant 0 : index
      %c0_104 = arith.constant 0 : index
      %c0_105 = arith.constant 0 : index
      %116 = vector.load %arg38[%c0_102, %c0_103, %c0_104, %c0_105] : memref<2x10x16x128xf32, #tpu.memory_space<vmem>>, vector<2x1x10x128xf32>
      tpu.vector_store %arg38[%c0_102, %c0_103, %c0_104, %c0_105], %114 {strides = array<i32>} : memref<2x10x16x128xf32, #tpu.memory_space<vmem>>, vector<2x1x10x128xf32>,
      %c0_106 = arith.constant 0 : index
      %c9 = arith.constant 9 : index
      %c0_107 = arith.constant 0 : index
      %c0_108 = arith.constant 0 : index
      %117 = vector.load %arg38[%c0_106, %c9, %c0_107, %c0_108] : memref<2x10x16x128xf32, #tpu.memory_space<vmem>>, vector<2x1x10x128xf32>
      tpu.vector_store %arg38[%c0_106, %c9, %c0_107, %c0_108], %114 {strides = array<i32>} : memref<2x10x16x128xf32, #tpu.memory_space<vmem>>, vector<2x1x10x128xf32>,
      %c0_109 = arith.constant 0 : index
      %c1_110 = arith.constant 1 : index
      %c0_111 = arith.constant 0 : index
      %c0_112 = arith.constant 0 : index
      %118 = vector.load %arg38[%c0_109, %c1_110, %c0_111, %c0_112] : memref<2x10x16x128xf32, #tpu.memory_space<vmem>>, vector<2x8x1x128xf32>
      tpu.vector_store %arg38[%c0_109, %c1_110, %c0_111, %c0_112], %115 {strides = array<i32>} : memref<2x10x16x128xf32, #tpu.memory_space<vmem>>, vector<2x8x1x128xf32>,
      %c0_113 = arith.constant 0 : index
      %c1_114 = arith.constant 1 : index
      %c9_115 = arith.constant 9 : index
      %c0_116 = arith.constant 0 : index
      %119 = vector.load %arg38[%c0_113, %c1_114, %c9_115, %c0_116] : memref<2x10x16x128xf32, #tpu.memory_space<vmem>>, vector<2x8x1x128xf32>
      tpu.vector_store %arg38[%c0_113, %c1_114, %c9_115, %c0_116], %115 {strides = array<i32>} : memref<2x10x16x128xf32, #tpu.memory_space<vmem>>, vector<2x8x1x128xf32>,
      %120 = vector.extract_strided_slice %111 {offsets = [0, 0], sizes = [1, 128], strides = [1, 1]} : vector<16x128xf32> to vector<1x128xf32>
      %121 = vector.shape_cast %120 : vector<1x128xf32> to vector<1x1x1x128xf32>
      %122 = vector.extract_strided_slice %111 {offsets = [1, 0], sizes = [1, 128], strides = [1, 1]} : vector<16x128xf32> to vector<1x128xf32>
      %123 = vector.shape_cast %122 : vector<1x128xf32> to vector<1x1x1x128xf32>
      %124 = vector.extract_strided_slice %111 {offsets = [2, 0], sizes = [1, 128], strides = [1, 1]} : vector<16x128xf32> to vector<1x128xf32>
      %125 = vector.shape_cast %124 : vector<1x128xf32> to vector<1x1x1x128xf32>
      %126 = vector.extract_strided_slice %111 {offsets = [3, 0], sizes = [1, 128], strides = [1, 1]} : vector<16x128xf32> to vector<1x128xf32>
      %127 = vector.shape_cast %126 : vector<1x128xf32> to vector<1x1x1x128xf32>
      %128 = vector.extract_strided_slice %111 {offsets = [4, 0], sizes = [1, 128], strides = [1, 1]} : vector<16x128xf32> to vector<1x128xf32>
      %129 = vector.shape_cast %128 : vector<1x128xf32> to vector<1x1x1x128xf32>
      %130 = vector.extract_strided_slice %111 {offsets = [5, 0], sizes = [1, 128], strides = [1, 1]} : vector<16x128xf32> to vector<1x128xf32>
      %131 = vector.shape_cast %130 : vector<1x128xf32> to vector<1x1x1x128xf32>
      %132 = vector.extract_strided_slice %111 {offsets = [6, 0], sizes = [1, 128], strides = [1, 1]} : vector<16x128xf32> to vector<1x128xf32>
      %133 = vector.shape_cast %132 : vector<1x128xf32> to vector<1x1x1x128xf32>
      %134 = vector.extract_strided_slice %111 {offsets = [7, 0], sizes = [1, 128], strides = [1, 1]} : vector<16x128xf32> to vector<1x128xf32>
      %135 = vector.shape_cast %134 : vector<1x128xf32> to vector<1x1x1x128xf32>
      %136 = vector.extract_strided_slice %111 {offsets = [8, 0], sizes = [1, 128], strides = [1, 1]} : vector<16x128xf32> to vector<1x128xf32>
      %137 = vector.shape_cast %136 : vector<1x128xf32> to vector<1x1x1x128xf32>
      %cst_117 = arith.constant 0.000000e+00 : f32
      %138 = vector.broadcast %cst_117 : f32 to vector<2x8x8x128xf32>
      %c0_118 = arith.constant 0 : index
      %c0_119 = arith.constant 0 : index
      %c0_120 = arith.constant 0 : index
      %c0_121 = arith.constant 0 : index
      %139 = vector.load %arg38[%c0_118, %c0_119, %c0_120, %c0_121] : memref<2x10x16x128xf32, #tpu.memory_space<vmem>>, vector<2x8x8x128xf32>
      %140 = vector.broadcast %121 : vector<1x1x1x128xf32> to vector<2x8x8x128xf32>
      %141 = arith.mulf %139, %140 : vector<2x8x8x128xf32>
      %142 = arith.addf %138, %141 : vector<2x8x8x128xf32>
      %c0_122 = arith.constant 0 : index
      %c0_123 = arith.constant 0 : index
      %c1_124 = arith.constant 1 : index
      %c0_125 = arith.constant 0 : index
      %143 = vector.load %arg38[%c0_122, %c0_123, %c1_124, %c0_125] : memref<2x10x16x128xf32, #tpu.memory_space<vmem>>, vector<2x8x8x128xf32>
      %144 = vector.broadcast %123 : vector<1x1x1x128xf32> to vector<2x8x8x128xf32>
      %145 = arith.mulf %143, %144 : vector<2x8x8x128xf32>
      %146 = arith.addf %142, %145 : vector<2x8x8x128xf32>
      %c0_126 = arith.constant 0 : index
      %c0_127 = arith.constant 0 : index
      %c2 = arith.constant 2 : index
      %c0_128 = arith.constant 0 : index
      %147 = vector.load %arg38[%c0_126, %c0_127, %c2, %c0_128] : memref<2x10x16x128xf32, #tpu.memory_space<vmem>>, vector<2x8x8x128xf32>
      %148 = vector.broadcast %125 : vector<1x1x1x128xf32> to vector<2x8x8x128xf32>
      %149 = arith.mulf %147, %148 : vector<2x8x8x128xf32>
      %150 = arith.addf %146, %149 : vector<2x8x8x128xf32>
      %c0_129 = arith.constant 0 : index
      %c1_130 = arith.constant 1 : index
      %c0_131 = arith.constant 0 : index
      %c0_132 = arith.constant 0 : index
      %151 = vector.load %arg38[%c0_129, %c1_130, %c0_131, %c0_132] : memref<2x10x16x128xf32, #tpu.memory_space<vmem>>, vector<2x8x8x128xf32>
      %152 = vector.broadcast %127 : vector<1x1x1x128xf32> to vector<2x8x8x128xf32>
      %153 = arith.mulf %151, %152 : vector<2x8x8x128xf32>
      %154 = arith.addf %150, %153 : vector<2x8x8x128xf32>
      %c0_133 = arith.constant 0 : index
      %c1_134 = arith.constant 1 : index
      %c1_135 = arith.constant 1 : index
      %c0_136 = arith.constant 0 : index
      %155 = vector.load %arg38[%c0_133, %c1_134, %c1_135, %c0_136] : memref<2x10x16x128xf32, #tpu.memory_space<vmem>>, vector<2x8x8x128xf32>
      %156 = vector.broadcast %129 : vector<1x1x1x128xf32> to vector<2x8x8x128xf32>
      %157 = arith.mulf %155, %156 : vector<2x8x8x128xf32>
      %158 = arith.addf %154, %157 : vector<2x8x8x128xf32>
      %c0_137 = arith.constant 0 : index
      %c1_138 = arith.constant 1 : index
      %c2_139 = arith.constant 2 : index
      %c0_140 = arith.constant 0 : index
      %159 = vector.load %arg38[%c0_137, %c1_138, %c2_139, %c0_140] : memref<2x10x16x128xf32, #tpu.memory_space<vmem>>, vector<2x8x8x128xf32>
      %160 = vector.broadcast %131 : vector<1x1x1x128xf32> to vector<2x8x8x128xf32>
      %161 = arith.mulf %159, %160 : vector<2x8x8x128xf32>
      %162 = arith.addf %158, %161 : vector<2x8x8x128xf32>
      %c0_141 = arith.constant 0 : index
      %c2_142 = arith.constant 2 : index
      %c0_143 = arith.constant 0 : index
      %c0_144 = arith.constant 0 : index
      %163 = vector.load %arg38[%c0_141, %c2_142, %c0_143, %c0_144] : memref<2x10x16x128xf32, #tpu.memory_space<vmem>>, vector<2x8x8x128xf32>
      %164 = vector.broadcast %133 : vector<1x1x1x128xf32> to vector<2x8x8x128xf32>
      %165 = arith.mulf %163, %164 : vector<2x8x8x128xf32>
      %166 = arith.addf %162, %165 : vector<2x8x8x128xf32>
      %c0_145 = arith.constant 0 : index
      %c2_146 = arith.constant 2 : index
      %c1_147 = arith.constant 1 : index
      %c0_148 = arith.constant 0 : index
      %167 = vector.load %arg38[%c0_145, %c2_146, %c1_147, %c0_148] : memref<2x10x16x128xf32, #tpu.memory_space<vmem>>, vector<2x8x8x128xf32>
      %168 = vector.broadcast %135 : vector<1x1x1x128xf32> to vector<2x8x8x128xf32>
      %169 = arith.mulf %167, %168 : vector<2x8x8x128xf32>
      %170 = arith.addf %166, %169 : vector<2x8x8x128xf32>
      %c0_149 = arith.constant 0 : index
      %c2_150 = arith.constant 2 : index
      %c2_151 = arith.constant 2 : index
      %c0_152 = arith.constant 0 : index
      %171 = vector.load %arg38[%c0_149, %c2_150, %c2_151, %c0_152] : memref<2x10x16x128xf32, #tpu.memory_space<vmem>>, vector<2x8x8x128xf32>
      %172 = vector.broadcast %137 : vector<1x1x1x128xf32> to vector<2x8x8x128xf32>
      %173 = arith.mulf %171, %172 : vector<2x8x8x128xf32>
      %174 = arith.addf %170, %173 : vector<2x8x8x128xf32>
      %175 = vector.shape_cast %112 : vector<1x128xf32> to vector<1x1x1x128xf32>
      %176 = vector.broadcast %175 : vector<1x1x1x128xf32> to vector<2x8x8x128xf32>
      %177 = arith.addf %174, %176 : vector<2x8x8x128xf32>
      %cst_153 = arith.constant 0.000000e+00 : f32
      %178 = vector.broadcast %cst_153 : f32 to vector<2x8x8x128xf32>
      %179 = arith.maximumf %177, %178 : vector<2x8x8x128xf32>
      %c0_154 = arith.constant 0 : index
      %c0_155 = arith.constant 0 : index
      %180 = vector.load %arg11[%c0_154, %c0_155] : memref<128x128xbf16, #tpu.memory_space<vmem>>, vector<128x128xbf16>
      %c0_156 = arith.constant 0 : index
      %c0_157 = arith.constant 0 : index
      %181 = vector.load %arg12[%c0_156, %c0_157] : memref<1x128xf32, #tpu.memory_space<vmem>>, vector<1x128xf32>
      %182 = vector.shape_cast %179 : vector<2x8x8x128xf32> to vector<128x128xf32>
      %183 = arith.truncf %182 : vector<128x128xf32> to vector<128x128xbf16>
      %cst_158 = arith.constant dense<0.000000e+00> : vector<128x128xf32>
      %184 = tpu.matmul %183, %180, %cst_158 {dimension_numbers = #tpu.dot_dimension_numbers<[1], [0], [0], [1], [0, 0, 1, 1], [], []>} : vector<128x128xbf16>, vector<128x128xbf16>, vector<128x128xf32> -> vector<128x128xf32>
      %185 = vector.broadcast %181 : vector<1x128xf32> to vector<128x128xf32>
      %186 = arith.addf %184, %185 : vector<128x128xf32>
      %187 = vector.shape_cast %186 : vector<128x128xf32> to vector<2x8x8x128xf32>
      %188 = arith.addf %187, %100 : vector<2x8x8x128xf32>
      %c0_159 = arith.constant 0 : index
      %c0_160 = arith.constant 0 : index
      %189 = vector.load %arg13[%c0_159, %c0_160] : memref<128x512xbf16, #tpu.memory_space<vmem>>, vector<128x512xbf16>
      %c0_161 = arith.constant 0 : index
      %c0_162 = arith.constant 0 : index
      %190 = vector.load %arg14[%c0_161, %c0_162] : memref<1x512xf32, #tpu.memory_space<vmem>>, vector<1x512xf32>
      %191 = vector.shape_cast %188 : vector<2x8x8x128xf32> to vector<128x128xf32>
      %192 = arith.truncf %191 : vector<128x128xf32> to vector<128x128xbf16>
      %cst_163 = arith.constant dense<0.000000e+00> : vector<128x512xf32>
      %193 = tpu.matmul %192, %189, %cst_163 {dimension_numbers = #tpu.dot_dimension_numbers<[1], [0], [0], [1], [0, 0, 1, 1], [], []>} : vector<128x128xbf16>, vector<128x512xbf16>, vector<128x512xf32> -> vector<128x512xf32>
      %194 = vector.broadcast %190 : vector<1x512xf32> to vector<128x512xf32>
      %195 = arith.addf %193, %194 : vector<128x512xf32>
      %cst_164 = arith.constant 0.000000e+00 : f32
      %196 = vector.broadcast %cst_164 : f32 to vector<128x512xf32>
      %197 = arith.maximumf %195, %196 : vector<128x512xf32>
      %198 = vector.shape_cast %197 : vector<128x512xf32> to vector<2x8x8x512xf32>
      %199 = vector.shape_cast %198 : vector<2x8x8x512xf32> to vector<2x64x512xf32>
      %cst_165 = arith.constant dense<0.000000e+00> : vector<2x512xf32>
      %200 = vector.multi_reduction <add>, %199, %cst_165 [1] : vector<2x64x512xf32> to vector<2x512xf32>
      %c0_166 = arith.constant 0 : index
      %c0_167 = arith.constant 0 : index
      %201 = vector.load %arg15[%c0_166, %c0_167] : memref<512x128xbf16, #tpu.memory_space<vmem>>, vector<512x128xbf16>
      %c0_168 = arith.constant 0 : index
      %c0_169 = arith.constant 0 : index
      %202 = vector.load %arg16[%c0_168, %c0_169] : memref<1x128xf32, #tpu.memory_space<vmem>>, vector<1x128xf32>
      %203 = arith.truncf %200 : vector<2x512xf32> to vector<2x512xbf16>
      %cst_170 = arith.constant dense<0.000000e+00> : vector<2x128xf32>
      %204 = tpu.matmul %203, %201, %cst_170 {dimension_numbers = #tpu.dot_dimension_numbers<[1], [0], [0], [1], [0, 0, 1, 1], [], []>} : vector<2x512xbf16>, vector<512x128xbf16>, vector<2x128xf32> -> vector<2x128xf32>
      %205 = vector.broadcast %202 : vector<1x128xf32> to vector<2x128xf32>
      %206 = arith.addf %204, %205 : vector<2x128xf32>
      %207 = vector.shape_cast %206 : vector<2x128xf32> to vector<1x2x128xf32>
      %c0_171 = arith.constant 0 : index
      %c0_172 = arith.constant 0 : index
      %c0_173 = arith.constant 0 : index
      %208 = vector.load %arg2[%c0_171, %c0_172, %c0_173] : memref<1x2x128xf32, #tpu.memory_space<vmem>>, vector<1x2x128xf32>
      %209 = arith.mulf %207, %208 : vector<1x2x128xf32>
      %c0_174 = arith.constant 0 : index
      %c0_175 = arith.constant 0 : index
      %c0_176 = arith.constant 0 : index
      %210 = vector.load %arg37[%c0_174, %c0_175, %c0_176] : memref<1x2x128xf32, #tpu.memory_space<vmem>>, vector<1x2x128xf32>
      tpu.vector_store %arg37[%c0_174, %c0_175, %c0_176], %209 {strides = array<i32>} : memref<1x2x128xf32, #tpu.memory_space<vmem>>, vector<1x2x128xf32>,
    } else {
    }
    %c1_i32 = arith.constant 1 : i32
    %3 = arith.cmpi eq, %arg0, %c1_i32 : i32
    %4 = arith.extui %3 : i1 to i32
    %c0_i32_1 = arith.constant 0 : i32
    %5 = arith.cmpi ne, %4, %c0_i32_1 : i32
    scf.if %5 {
      %c0 = arith.constant 0 : index
      %c0_2 = arith.constant 0 : index
      %c0_3 = arith.constant 0 : index
      %c0_4 = arith.constant 0 : index
      %6 = vector.load %arg1[%c0, %c0_2, %c0_3, %c0_4] : memref<2x16x16x128xf32, #tpu.memory_space<vmem>>, vector<2x16x16x128xf32>
      %c0_5 = arith.constant 0 : index
      %c0_6 = arith.constant 0 : index
      %7 = vector.load %arg17[%c0_5, %c0_6] : memref<16x128xf32, #tpu.memory_space<vmem>>, vector<16x128xf32>
      %c0_7 = arith.constant 0 : index
      %c0_8 = arith.constant 0 : index
      %8 = vector.load %arg18[%c0_7, %c0_8] : memref<1x128xf32, #tpu.memory_space<vmem>>, vector<1x128xf32>
      %9 = vector.shape_cast %6 : vector<2x16x16x128xf32> to vector<16x2x16x128xf32>
      %10 = vector.extract_strided_slice %9 {offsets = [0, 0, 0, 0], sizes = [16, 1, 16, 128], strides = [1, 1, 1, 1]} : vector<16x2x16x128xf32> to vector<16x1x16x128xf32>
      %11 = vector.shape_cast %10 : vector<16x1x16x128xf32> to vector<16x16x128xf32>
      %12 = vector.extract_strided_slice %9 {offsets = [0, 1, 0, 0], sizes = [16, 1, 16, 128], strides = [1, 1, 1, 1]} : vector<16x2x16x128xf32> to vector<16x1x16x128xf32>
      %13 = vector.shape_cast %12 : vector<16x1x16x128xf32> to vector<16x16x128xf32>
      %14 = vector.shape_cast %11 : vector<16x16x128xf32> to vector<2x8x8x256xf32>
      %15 = vector.extract_strided_slice %14 {offsets = [0, 0, 0, 0], sizes = [2, 8, 8, 128], strides = [1, 1, 1, 1]} : vector<2x8x8x256xf32> to vector<2x8x8x128xf32>
      %16 = vector.extract_strided_slice %14 {offsets = [0, 0, 0, 128], sizes = [2, 8, 8, 128], strides = [1, 1, 1, 1]} : vector<2x8x8x256xf32> to vector<2x8x8x128xf32>
      %17 = vector.shape_cast %13 : vector<16x16x128xf32> to vector<2x8x8x256xf32>
      %18 = vector.extract_strided_slice %17 {offsets = [0, 0, 0, 0], sizes = [2, 8, 8, 128], strides = [1, 1, 1, 1]} : vector<2x8x8x256xf32> to vector<2x8x8x128xf32>
      %19 = vector.extract_strided_slice %17 {offsets = [0, 0, 0, 128], sizes = [2, 8, 8, 128], strides = [1, 1, 1, 1]} : vector<2x8x8x256xf32> to vector<2x8x8x128xf32>
      %cst = arith.constant 0.000000e+00 : f32
      %20 = vector.broadcast %cst : f32 to vector<2x1x9x128xf32>
      %cst_9 = arith.constant 0.000000e+00 : f32
      %21 = vector.broadcast %cst_9 : f32 to vector<2x1x8x128xf32>
      %cst_10 = arith.constant 0.000000e+00 : f32
      %22 = vector.broadcast %cst_10 : f32 to vector<2x8x1x128xf32>
      %c0_11 = arith.constant 0 : index
      %c1 = arith.constant 1 : index
      %c1_12 = arith.constant 1 : index
      %c0_13 = arith.constant 0 : index
      %23 = vector.load %arg39[%c0_11, %c1, %c1_12, %c0_13] : memref<2x9x16x128xf32, #tpu.memory_space<vmem>>, vector<2x8x8x128xf32>
      tpu.vector_store %arg39[%c0_11, %c1, %c1_12, %c0_13], %19 {strides = array<i32>} : memref<2x9x16x128xf32, #tpu.memory_space<vmem>>, vector<2x8x8x128xf32>,
      %c0_14 = arith.constant 0 : index
      %c0_15 = arith.constant 0 : index
      %c0_16 = arith.constant 0 : index
      %c0_17 = arith.constant 0 : index
      %24 = vector.load %arg39[%c0_14, %c0_15, %c0_16, %c0_17] : memref<2x9x16x128xf32, #tpu.memory_space<vmem>>, vector<2x1x9x128xf32>
      tpu.vector_store %arg39[%c0_14, %c0_15, %c0_16, %c0_17], %20 {strides = array<i32>} : memref<2x9x16x128xf32, #tpu.memory_space<vmem>>, vector<2x1x9x128xf32>,
      %c0_18 = arith.constant 0 : index
      %c1_19 = arith.constant 1 : index
      %c0_20 = arith.constant 0 : index
      %c0_21 = arith.constant 0 : index
      %25 = vector.load %arg39[%c0_18, %c1_19, %c0_20, %c0_21] : memref<2x9x16x128xf32, #tpu.memory_space<vmem>>, vector<2x8x1x128xf32>
      tpu.vector_store %arg39[%c0_18, %c1_19, %c0_20, %c0_21], %22 {strides = array<i32>} : memref<2x9x16x128xf32, #tpu.memory_space<vmem>>, vector<2x8x1x128xf32>,
      %c0_22 = arith.constant 0 : index
      %c1_23 = arith.constant 1 : index
      %c0_24 = arith.constant 0 : index
      %c0_25 = arith.constant 0 : index
      %26 = vector.load %arg40[%c0_22, %c1_23, %c0_24, %c0_25] : memref<2x9x16x128xf32, #tpu.memory_space<vmem>>, vector<2x8x8x128xf32>
      tpu.vector_store %arg40[%c0_22, %c1_23, %c0_24, %c0_25], %18 {strides = array<i32>} : memref<2x9x16x128xf32, #tpu.memory_space<vmem>>, vector<2x8x8x128xf32>,
      %c0_26 = arith.constant 0 : index
      %c0_27 = arith.constant 0 : index
      %c0_28 = arith.constant 0 : index
      %c0_29 = arith.constant 0 : index
      %27 = vector.load %arg40[%c0_26, %c0_27, %c0_28, %c0_29] : memref<2x9x16x128xf32, #tpu.memory_space<vmem>>, vector<2x1x8x128xf32>
      tpu.vector_store %arg40[%c0_26, %c0_27, %c0_28, %c0_29], %21 {strides = array<i32>} : memref<2x9x16x128xf32, #tpu.memory_space<vmem>>, vector<2x1x8x128xf32>,
      %c0_30 = arith.constant 0 : index
      %c0_31 = arith.constant 0 : index
      %c1_32 = arith.constant 1 : index
      %c0_33 = arith.constant 0 : index
      %28 = vector.load %arg41[%c0_30, %c0_31, %c1_32, %c0_33] : memref<2x9x16x128xf32, #tpu.memory_space<vmem>>, vector<2x8x8x128xf32>
      tpu.vector_store %arg41[%c0_30, %c0_31, %c1_32, %c0_33], %16 {strides = array<i32>} : memref<2x9x16x128xf32, #tpu.memory_space<vmem>>, vector<2x8x8x128xf32>,
      %c0_34 = arith.constant 0 : index
      %c0_35 = arith.constant 0 : index
      %c0_36 = arith.constant 0 : index
      %c0_37 = arith.constant 0 : index
      %29 = vector.load %arg41[%c0_34, %c0_35, %c0_36, %c0_37] : memref<2x9x16x128xf32, #tpu.memory_space<vmem>>, vector<2x8x1x128xf32>
      tpu.vector_store %arg41[%c0_34, %c0_35, %c0_36, %c0_37], %22 {strides = array<i32>} : memref<2x9x16x128xf32, #tpu.memory_space<vmem>>, vector<2x8x1x128xf32>,
      %c0_38 = arith.constant 0 : index
      %c0_39 = arith.constant 0 : index
      %c0_40 = arith.constant 0 : index
      %c0_41 = arith.constant 0 : index
      %30 = vector.load %arg42[%c0_38, %c0_39, %c0_40, %c0_41] : memref<2x9x16x128xf32, #tpu.memory_space<vmem>>, vector<2x8x8x128xf32>
      tpu.vector_store %arg42[%c0_38, %c0_39, %c0_40, %c0_41], %15 {strides = array<i32>} : memref<2x9x16x128xf32, #tpu.memory_space<vmem>>, vector<2x8x8x128xf32>,
      %31 = vector.extract_strided_slice %7 {offsets = [0, 0], sizes = [1, 128], strides = [1, 1]} : vector<16x128xf32> to vector<1x128xf32>
      %32 = vector.shape_cast %31 : vector<1x128xf32> to vector<1x1x1x128xf32>
      %33 = vector.extract_strided_slice %7 {offsets = [1, 0], sizes = [1, 128], strides = [1, 1]} : vector<16x128xf32> to vector<1x128xf32>
      %34 = vector.shape_cast %33 : vector<1x128xf32> to vector<1x1x1x128xf32>
      %35 = vector.extract_strided_slice %7 {offsets = [2, 0], sizes = [1, 128], strides = [1, 1]} : vector<16x128xf32> to vector<1x128xf32>
      %36 = vector.shape_cast %35 : vector<1x128xf32> to vector<1x1x1x128xf32>
      %37 = vector.extract_strided_slice %7 {offsets = [3, 0], sizes = [1, 128], strides = [1, 1]} : vector<16x128xf32> to vector<1x128xf32>
      %38 = vector.shape_cast %37 : vector<1x128xf32> to vector<1x1x1x128xf32>
      %39 = vector.extract_strided_slice %7 {offsets = [4, 0], sizes = [1, 128], strides = [1, 1]} : vector<16x128xf32> to vector<1x128xf32>
      %40 = vector.shape_cast %39 : vector<1x128xf32> to vector<1x1x1x128xf32>
      %41 = vector.extract_strided_slice %7 {offsets = [5, 0], sizes = [1, 128], strides = [1, 1]} : vector<16x128xf32> to vector<1x128xf32>
      %42 = vector.shape_cast %41 : vector<1x128xf32> to vector<1x1x1x128xf32>
      %43 = vector.extract_strided_slice %7 {offsets = [6, 0], sizes = [1, 128], strides = [1, 1]} : vector<16x128xf32> to vector<1x128xf32>
      %44 = vector.shape_cast %43 : vector<1x128xf32> to vector<1x1x1x128xf32>
      %45 = vector.extract_strided_slice %7 {offsets = [7, 0], sizes = [1, 128], strides = [1, 1]} : vector<16x128xf32> to vector<1x128xf32>
      %46 = vector.shape_cast %45 : vector<1x128xf32> to vector<1x1x1x128xf32>
      %47 = vector.extract_strided_slice %7 {offsets = [8, 0], sizes = [1, 128], strides = [1, 1]} : vector<16x128xf32> to vector<1x128xf32>
      %48 = vector.shape_cast %47 : vector<1x128xf32> to vector<1x1x1x128xf32>
      %cst_42 = arith.constant 0.000000e+00 : f32
      %49 = vector.broadcast %cst_42 : f32 to vector<2x8x8x128xf32>
      %c0_43 = arith.constant 0 : index
      %c0_44 = arith.constant 0 : index
      %c0_45 = arith.constant 0 : index
      %c0_46 = arith.constant 0 : index
      %50 = vector.load %arg39[%c0_43, %c0_44, %c0_45, %c0_46] : memref<2x9x16x128xf32, #tpu.memory_space<vmem>>, vector<2x8x8x128xf32>
      %51 = vector.broadcast %32 : vector<1x1x1x128xf32> to vector<2x8x8x128xf32>
      %52 = arith.mulf %50, %51 : vector<2x8x8x128xf32>
      %53 = arith.addf %49, %52 : vector<2x8x8x128xf32>
      %c0_47 = arith.constant 0 : index
      %c0_48 = arith.constant 0 : index
      %c0_49 = arith.constant 0 : index
      %c0_50 = arith.constant 0 : index
      %54 = vector.load %arg40[%c0_47, %c0_48, %c0_49, %c0_50] : memref<2x9x16x128xf32, #tpu.memory_space<vmem>>, vector<2x8x8x128xf32>
      %55 = vector.broadcast %34 : vector<1x1x1x128xf32> to vector<2x8x8x128xf32>
      %56 = arith.mulf %54, %55 : vector<2x8x8x128xf32>
      %57 = arith.addf %53, %56 : vector<2x8x8x128xf32>
      %c0_51 = arith.constant 0 : index
      %c0_52 = arith.constant 0 : index
      %c1_53 = arith.constant 1 : index
      %c0_54 = arith.constant 0 : index
      %58 = vector.load %arg39[%c0_51, %c0_52, %c1_53, %c0_54] : memref<2x9x16x128xf32, #tpu.memory_space<vmem>>, vector<2x8x8x128xf32>
      %59 = vector.broadcast %36 : vector<1x1x1x128xf32> to vector<2x8x8x128xf32>
      %60 = arith.mulf %58, %59 : vector<2x8x8x128xf32>
      %61 = arith.addf %57, %60 : vector<2x8x8x128xf32>
      %c0_55 = arith.constant 0 : index
      %c0_56 = arith.constant 0 : index
      %c0_57 = arith.constant 0 : index
      %c0_58 = arith.constant 0 : index
      %62 = vector.load %arg41[%c0_55, %c0_56, %c0_57, %c0_58] : memref<2x9x16x128xf32, #tpu.memory_space<vmem>>, vector<2x8x8x128xf32>
      %63 = vector.broadcast %38 : vector<1x1x1x128xf32> to vector<2x8x8x128xf32>
      %64 = arith.mulf %62, %63 : vector<2x8x8x128xf32>
      %65 = arith.addf %61, %64 : vector<2x8x8x128xf32>
      %c0_59 = arith.constant 0 : index
      %c0_60 = arith.constant 0 : index
      %c0_61 = arith.constant 0 : index
      %c0_62 = arith.constant 0 : index
      %66 = vector.load %arg42[%c0_59, %c0_60, %c0_61, %c0_62] : memref<2x9x16x128xf32, #tpu.memory_space<vmem>>, vector<2x8x8x128xf32>
      %67 = vector.broadcast %40 : vector<1x1x1x128xf32> to vector<2x8x8x128xf32>
      %68 = arith.mulf %66, %67 : vector<2x8x8x128xf32>
      %69 = arith.addf %65, %68 : vector<2x8x8x128xf32>
      %c0_63 = arith.constant 0 : index
      %c0_64 = arith.constant 0 : index
      %c1_65 = arith.constant 1 : index
      %c0_66 = arith.constant 0 : index
      %70 = vector.load %arg41[%c0_63, %c0_64, %c1_65, %c0_66] : memref<2x9x16x128xf32, #tpu.memory_space<vmem>>, vector<2x8x8x128xf32>
      %71 = vector.broadcast %42 : vector<1x1x1x128xf32> to vector<2x8x8x128xf32>
      %72 = arith.mulf %70, %71 : vector<2x8x8x128xf32>
      %73 = arith.addf %69, %72 : vector<2x8x8x128xf32>
      %c0_67 = arith.constant 0 : index
      %c1_68 = arith.constant 1 : index
      %c0_69 = arith.constant 0 : index
      %c0_70 = arith.constant 0 : index
      %74 = vector.load %arg39[%c0_67, %c1_68, %c0_69, %c0_70] : memref<2x9x16x128xf32, #tpu.memory_space<vmem>>, vector<2x8x8x128xf32>
      %75 = vector.broadcast %44 : vector<1x1x1x128xf32> to vector<2x8x8x128xf32>
      %76 = arith.mulf %74, %75 : vector<2x8x8x128xf32>
      %77 = arith.addf %73, %76 : vector<2x8x8x128xf32>
      %c0_71 = arith.constant 0 : index
      %c1_72 = arith.constant 1 : index
      %c0_73 = arith.constant 0 : index
      %c0_74 = arith.constant 0 : index
      %78 = vector.load %arg40[%c0_71, %c1_72, %c0_73, %c0_74] : memref<2x9x16x128xf32, #tpu.memory_space<vmem>>, vector<2x8x8x128xf32>
      %79 = vector.broadcast %46 : vector<1x1x1x128xf32> to vector<2x8x8x128xf32>
      %80 = arith.mulf %78, %79 : vector<2x8x8x128xf32>
      %81 = arith.addf %77, %80 : vector<2x8x8x128xf32>
      %c0_75 = arith.constant 0 : index
      %c1_76 = arith.constant 1 : index
      %c1_77 = arith.constant 1 : index
      %c0_78 = arith.constant 0 : index
      %82 = vector.load %arg39[%c0_75, %c1_76, %c1_77, %c0_78] : memref<2x9x16x128xf32, #tpu.memory_space<vmem>>, vector<2x8x8x128xf32>
      %83 = vector.broadcast %48 : vector<1x1x1x128xf32> to vector<2x8x8x128xf32>
      %84 = arith.mulf %82, %83 : vector<2x8x8x128xf32>
      %85 = arith.addf %81, %84 : vector<2x8x8x128xf32>
      %86 = vector.shape_cast %8 : vector<1x128xf32> to vector<1x1x1x128xf32>
      %87 = vector.broadcast %86 : vector<1x1x1x128xf32> to vector<2x8x8x128xf32>
      %88 = arith.addf %85, %87 : vector<2x8x8x128xf32>
      %cst_79 = arith.constant 0.000000e+00 : f32
      %89 = vector.broadcast %cst_79 : f32 to vector<2x8x8x128xf32>
      %90 = arith.maximumf %88, %89 : vector<2x8x8x128xf32>
      %c0_80 = arith.constant 0 : index
      %c0_81 = arith.constant 0 : index
      %91 = vector.load %arg19[%c0_80, %c0_81] : memref<128x128xbf16, #tpu.memory_space<vmem>>, vector<128x128xbf16>
      %c0_82 = arith.constant 0 : index
      %c0_83 = arith.constant 0 : index
      %92 = vector.load %arg20[%c0_82, %c0_83] : memref<1x128xf32, #tpu.memory_space<vmem>>, vector<1x128xf32>
      %93 = vector.shape_cast %90 : vector<2x8x8x128xf32> to vector<128x128xf32>
      %94 = arith.truncf %93 : vector<128x128xf32> to vector<128x128xbf16>
      %cst_84 = arith.constant dense<0.000000e+00> : vector<128x128xf32>
      %95 = tpu.matmul %94, %91, %cst_84 {dimension_numbers = #tpu.dot_dimension_numbers<[1], [0], [0], [1], [0, 0, 1, 1], [], []>} : vector<128x128xbf16>, vector<128x128xbf16>, vector<128x128xf32> -> vector<128x128xf32>
      %96 = vector.broadcast %92 : vector<1x128xf32> to vector<128x128xf32>
      %97 = arith.addf %95, %96 : vector<128x128xf32>
      %cst_85 = arith.constant 0.000000e+00 : f32
      %98 = vector.broadcast %cst_85 : f32 to vector<128x128xf32>
      %99 = arith.maximumf %97, %98 : vector<128x128xf32>
      %100 = vector.shape_cast %99 : vector<128x128xf32> to vector<2x8x8x128xf32>
      %c0_86 = arith.constant 0 : index
      %c0_87 = arith.constant 0 : index
      %101 = vector.load %arg21[%c0_86, %c0_87] : memref<128x128xbf16, #tpu.memory_space<vmem>>, vector<128x128xbf16>
      %c0_88 = arith.constant 0 : index
      %c0_89 = arith.constant 0 : index
      %102 = vector.load %arg22[%c0_88, %c0_89] : memref<1x128xf32, #tpu.memory_space<vmem>>, vector<1x128xf32>
      %103 = vector.shape_cast %100 : vector<2x8x8x128xf32> to vector<128x128xf32>
      %104 = arith.truncf %103 : vector<128x128xf32> to vector<128x128xbf16>
      %cst_90 = arith.constant dense<0.000000e+00> : vector<128x128xf32>
      %105 = tpu.matmul %104, %101, %cst_90 {dimension_numbers = #tpu.dot_dimension_numbers<[1], [0], [0], [1], [0, 0, 1, 1], [], []>} : vector<128x128xbf16>, vector<128x128xbf16>, vector<128x128xf32> -> vector<128x128xf32>
      %106 = vector.broadcast %102 : vector<1x128xf32> to vector<128x128xf32>
      %107 = arith.addf %105, %106 : vector<128x128xf32>
      %cst_91 = arith.constant 0.000000e+00 : f32
      %108 = vector.broadcast %cst_91 : f32 to vector<128x128xf32>
      %109 = arith.maximumf %107, %108 : vector<128x128xf32>
      %110 = vector.shape_cast %109 : vector<128x128xf32> to vector<2x8x8x128xf32>
      %c0_92 = arith.constant 0 : index
      %c0_93 = arith.constant 0 : index
      %111 = vector.load %arg23[%c0_92, %c0_93] : memref<16x128xf32, #tpu.memory_space<vmem>>, vector<16x128xf32>
      %c0_94 = arith.constant 0 : index
      %c0_95 = arith.constant 0 : index
      %112 = vector.load %arg24[%c0_94, %c0_95] : memref<1x128xf32, #tpu.memory_space<vmem>>, vector<1x128xf32>
      %c0_96 = arith.constant 0 : index
      %c1_97 = arith.constant 1 : index
      %c1_98 = arith.constant 1 : index
      %c0_99 = arith.constant 0 : index
      %113 = vector.load %arg38[%c0_96, %c1_97, %c1_98, %c0_99] : memref<2x10x16x128xf32, #tpu.memory_space<vmem>>, vector<2x8x8x128xf32>
      tpu.vector_store %arg38[%c0_96, %c1_97, %c1_98, %c0_99], %110 {strides = array<i32>} : memref<2x10x16x128xf32, #tpu.memory_space<vmem>>, vector<2x8x8x128xf32>,
      %cst_100 = arith.constant 0.000000e+00 : f32
      %114 = vector.broadcast %cst_100 : f32 to vector<2x1x10x128xf32>
      %cst_101 = arith.constant 0.000000e+00 : f32
      %115 = vector.broadcast %cst_101 : f32 to vector<2x8x1x128xf32>
      %c0_102 = arith.constant 0 : index
      %c0_103 = arith.constant 0 : index
      %c0_104 = arith.constant 0 : index
      %c0_105 = arith.constant 0 : index
      %116 = vector.load %arg38[%c0_102, %c0_103, %c0_104, %c0_105] : memref<2x10x16x128xf32, #tpu.memory_space<vmem>>, vector<2x1x10x128xf32>
      tpu.vector_store %arg38[%c0_102, %c0_103, %c0_104, %c0_105], %114 {strides = array<i32>} : memref<2x10x16x128xf32, #tpu.memory_space<vmem>>, vector<2x1x10x128xf32>,
      %c0_106 = arith.constant 0 : index
      %c9 = arith.constant 9 : index
      %c0_107 = arith.constant 0 : index
      %c0_108 = arith.constant 0 : index
      %117 = vector.load %arg38[%c0_106, %c9, %c0_107, %c0_108] : memref<2x10x16x128xf32, #tpu.memory_space<vmem>>, vector<2x1x10x128xf32>
      tpu.vector_store %arg38[%c0_106, %c9, %c0_107, %c0_108], %114 {strides = array<i32>} : memref<2x10x16x128xf32, #tpu.memory_space<vmem>>, vector<2x1x10x128xf32>,
      %c0_109 = arith.constant 0 : index
      %c1_110 = arith.constant 1 : index
      %c0_111 = arith.constant 0 : index
      %c0_112 = arith.constant 0 : index
      %118 = vector.load %arg38[%c0_109, %c1_110, %c0_111, %c0_112] : memref<2x10x16x128xf32, #tpu.memory_space<vmem>>, vector<2x8x1x128xf32>
      tpu.vector_store %arg38[%c0_109, %c1_110, %c0_111, %c0_112], %115 {strides = array<i32>} : memref<2x10x16x128xf32, #tpu.memory_space<vmem>>, vector<2x8x1x128xf32>,
      %c0_113 = arith.constant 0 : index
      %c1_114 = arith.constant 1 : index
      %c9_115 = arith.constant 9 : index
      %c0_116 = arith.constant 0 : index
      %119 = vector.load %arg38[%c0_113, %c1_114, %c9_115, %c0_116] : memref<2x10x16x128xf32, #tpu.memory_space<vmem>>, vector<2x8x1x128xf32>
      tpu.vector_store %arg38[%c0_113, %c1_114, %c9_115, %c0_116], %115 {strides = array<i32>} : memref<2x10x16x128xf32, #tpu.memory_space<vmem>>, vector<2x8x1x128xf32>,
      %120 = vector.extract_strided_slice %111 {offsets = [0, 0], sizes = [1, 128], strides = [1, 1]} : vector<16x128xf32> to vector<1x128xf32>
      %121 = vector.shape_cast %120 : vector<1x128xf32> to vector<1x1x1x128xf32>
      %122 = vector.extract_strided_slice %111 {offsets = [1, 0], sizes = [1, 128], strides = [1, 1]} : vector<16x128xf32> to vector<1x128xf32>
      %123 = vector.shape_cast %122 : vector<1x128xf32> to vector<1x1x1x128xf32>
      %124 = vector.extract_strided_slice %111 {offsets = [2, 0], sizes = [1, 128], strides = [1, 1]} : vector<16x128xf32> to vector<1x128xf32>
      %125 = vector.shape_cast %124 : vector<1x128xf32> to vector<1x1x1x128xf32>
      %126 = vector.extract_strided_slice %111 {offsets = [3, 0], sizes = [1, 128], strides = [1, 1]} : vector<16x128xf32> to vector<1x128xf32>
      %127 = vector.shape_cast %126 : vector<1x128xf32> to vector<1x1x1x128xf32>
      %128 = vector.extract_strided_slice %111 {offsets = [4, 0], sizes = [1, 128], strides = [1, 1]} : vector<16x128xf32> to vector<1x128xf32>
      %129 = vector.shape_cast %128 : vector<1x128xf32> to vector<1x1x1x128xf32>
      %130 = vector.extract_strided_slice %111 {offsets = [5, 0], sizes = [1, 128], strides = [1, 1]} : vector<16x128xf32> to vector<1x128xf32>
      %131 = vector.shape_cast %130 : vector<1x128xf32> to vector<1x1x1x128xf32>
      %132 = vector.extract_strided_slice %111 {offsets = [6, 0], sizes = [1, 128], strides = [1, 1]} : vector<16x128xf32> to vector<1x128xf32>
      %133 = vector.shape_cast %132 : vector<1x128xf32> to vector<1x1x1x128xf32>
      %134 = vector.extract_strided_slice %111 {offsets = [7, 0], sizes = [1, 128], strides = [1, 1]} : vector<16x128xf32> to vector<1x128xf32>
      %135 = vector.shape_cast %134 : vector<1x128xf32> to vector<1x1x1x128xf32>
      %136 = vector.extract_strided_slice %111 {offsets = [8, 0], sizes = [1, 128], strides = [1, 1]} : vector<16x128xf32> to vector<1x128xf32>
      %137 = vector.shape_cast %136 : vector<1x128xf32> to vector<1x1x1x128xf32>
      %cst_117 = arith.constant 0.000000e+00 : f32
      %138 = vector.broadcast %cst_117 : f32 to vector<2x8x8x128xf32>
      %c0_118 = arith.constant 0 : index
      %c0_119 = arith.constant 0 : index
      %c0_120 = arith.constant 0 : index
      %c0_121 = arith.constant 0 : index
      %139 = vector.load %arg38[%c0_118, %c0_119, %c0_120, %c0_121] : memref<2x10x16x128xf32, #tpu.memory_space<vmem>>, vector<2x8x8x128xf32>
      %140 = vector.broadcast %121 : vector<1x1x1x128xf32> to vector<2x8x8x128xf32>
      %141 = arith.mulf %139, %140 : vector<2x8x8x128xf32>
      %142 = arith.addf %138, %141 : vector<2x8x8x128xf32>
      %c0_122 = arith.constant 0 : index
      %c0_123 = arith.constant 0 : index
      %c1_124 = arith.constant 1 : index
      %c0_125 = arith.constant 0 : index
      %143 = vector.load %arg38[%c0_122, %c0_123, %c1_124, %c0_125] : memref<2x10x16x128xf32, #tpu.memory_space<vmem>>, vector<2x8x8x128xf32>
      %144 = vector.broadcast %123 : vector<1x1x1x128xf32> to vector<2x8x8x128xf32>
      %145 = arith.mulf %143, %144 : vector<2x8x8x128xf32>
      %146 = arith.addf %142, %145 : vector<2x8x8x128xf32>
      %c0_126 = arith.constant 0 : index
      %c0_127 = arith.constant 0 : index
      %c2 = arith.constant 2 : index
      %c0_128 = arith.constant 0 : index
      %147 = vector.load %arg38[%c0_126, %c0_127, %c2, %c0_128] : memref<2x10x16x128xf32, #tpu.memory_space<vmem>>, vector<2x8x8x128xf32>
      %148 = vector.broadcast %125 : vector<1x1x1x128xf32> to vector<2x8x8x128xf32>
      %149 = arith.mulf %147, %148 : vector<2x8x8x128xf32>
      %150 = arith.addf %146, %149 : vector<2x8x8x128xf32>
      %c0_129 = arith.constant 0 : index
      %c1_130 = arith.constant 1 : index
      %c0_131 = arith.constant 0 : index
      %c0_132 = arith.constant 0 : index
      %151 = vector.load %arg38[%c0_129, %c1_130, %c0_131, %c0_132] : memref<2x10x16x128xf32, #tpu.memory_space<vmem>>, vector<2x8x8x128xf32>
      %152 = vector.broadcast %127 : vector<1x1x1x128xf32> to vector<2x8x8x128xf32>
      %153 = arith.mulf %151, %152 : vector<2x8x8x128xf32>
      %154 = arith.addf %150, %153 : vector<2x8x8x128xf32>
      %c0_133 = arith.constant 0 : index
      %c1_134 = arith.constant 1 : index
      %c1_135 = arith.constant 1 : index
      %c0_136 = arith.constant 0 : index
      %155 = vector.load %arg38[%c0_133, %c1_134, %c1_135, %c0_136] : memref<2x10x16x128xf32, #tpu.memory_space<vmem>>, vector<2x8x8x128xf32>
      %156 = vector.broadcast %129 : vector<1x1x1x128xf32> to vector<2x8x8x128xf32>
      %157 = arith.mulf %155, %156 : vector<2x8x8x128xf32>
      %158 = arith.addf %154, %157 : vector<2x8x8x128xf32>
      %c0_137 = arith.constant 0 : index
      %c1_138 = arith.constant 1 : index
      %c2_139 = arith.constant 2 : index
      %c0_140 = arith.constant 0 : index
      %159 = vector.load %arg38[%c0_137, %c1_138, %c2_139, %c0_140] : memref<2x10x16x128xf32, #tpu.memory_space<vmem>>, vector<2x8x8x128xf32>
      %160 = vector.broadcast %131 : vector<1x1x1x128xf32> to vector<2x8x8x128xf32>
      %161 = arith.mulf %159, %160 : vector<2x8x8x128xf32>
      %162 = arith.addf %158, %161 : vector<2x8x8x128xf32>
      %c0_141 = arith.constant 0 : index
      %c2_142 = arith.constant 2 : index
      %c0_143 = arith.constant 0 : index
      %c0_144 = arith.constant 0 : index
      %163 = vector.load %arg38[%c0_141, %c2_142, %c0_143, %c0_144] : memref<2x10x16x128xf32, #tpu.memory_space<vmem>>, vector<2x8x8x128xf32>
      %164 = vector.broadcast %133 : vector<1x1x1x128xf32> to vector<2x8x8x128xf32>
      %165 = arith.mulf %163, %164 : vector<2x8x8x128xf32>
      %166 = arith.addf %162, %165 : vector<2x8x8x128xf32>
      %c0_145 = arith.constant 0 : index
      %c2_146 = arith.constant 2 : index
      %c1_147 = arith.constant 1 : index
      %c0_148 = arith.constant 0 : index
      %167 = vector.load %arg38[%c0_145, %c2_146, %c1_147, %c0_148] : memref<2x10x16x128xf32, #tpu.memory_space<vmem>>, vector<2x8x8x128xf32>
      %168 = vector.broadcast %135 : vector<1x1x1x128xf32> to vector<2x8x8x128xf32>
      %169 = arith.mulf %167, %168 : vector<2x8x8x128xf32>
      %170 = arith.addf %166, %169 : vector<2x8x8x128xf32>
      %c0_149 = arith.constant 0 : index
      %c2_150 = arith.constant 2 : index
      %c2_151 = arith.constant 2 : index
      %c0_152 = arith.constant 0 : index
      %171 = vector.load %arg38[%c0_149, %c2_150, %c2_151, %c0_152] : memref<2x10x16x128xf32, #tpu.memory_space<vmem>>, vector<2x8x8x128xf32>
      %172 = vector.broadcast %137 : vector<1x1x1x128xf32> to vector<2x8x8x128xf32>
      %173 = arith.mulf %171, %172 : vector<2x8x8x128xf32>
      %174 = arith.addf %170, %173 : vector<2x8x8x128xf32>
      %175 = vector.shape_cast %112 : vector<1x128xf32> to vector<1x1x1x128xf32>
      %176 = vector.broadcast %175 : vector<1x1x1x128xf32> to vector<2x8x8x128xf32>
      %177 = arith.addf %174, %176 : vector<2x8x8x128xf32>
      %cst_153 = arith.constant 0.000000e+00 : f32
      %178 = vector.broadcast %cst_153 : f32 to vector<2x8x8x128xf32>
      %179 = arith.maximumf %177, %178 : vector<2x8x8x128xf32>
      %c0_154 = arith.constant 0 : index
      %c0_155 = arith.constant 0 : index
      %180 = vector.load %arg25[%c0_154, %c0_155] : memref<128x128xbf16, #tpu.memory_space<vmem>>, vector<128x128xbf16>
      %c0_156 = arith.constant 0 : index
      %c0_157 = arith.constant 0 : index
      %181 = vector.load %arg26[%c0_156, %c0_157] : memref<1x128xf32, #tpu.memory_space<vmem>>, vector<1x128xf32>
      %182 = vector.shape_cast %179 : vector<2x8x8x128xf32> to vector<128x128xf32>
      %183 = arith.truncf %182 : vector<128x128xf32> to vector<128x128xbf16>
      %cst_158 = arith.constant dense<0.000000e+00> : vector<128x128xf32>
      %184 = tpu.matmul %183, %180, %cst_158 {dimension_numbers = #tpu.dot_dimension_numbers<[1], [0], [0], [1], [0, 0, 1, 1], [], []>} : vector<128x128xbf16>, vector<128x128xbf16>, vector<128x128xf32> -> vector<128x128xf32>
      %185 = vector.broadcast %181 : vector<1x128xf32> to vector<128x128xf32>
      %186 = arith.addf %184, %185 : vector<128x128xf32>
      %187 = vector.shape_cast %186 : vector<128x128xf32> to vector<2x8x8x128xf32>
      %188 = arith.addf %187, %100 : vector<2x8x8x128xf32>
      %c0_159 = arith.constant 0 : index
      %c0_160 = arith.constant 0 : index
      %189 = vector.load %arg27[%c0_159, %c0_160] : memref<128x128xbf16, #tpu.memory_space<vmem>>, vector<128x128xbf16>
      %c0_161 = arith.constant 0 : index
      %c0_162 = arith.constant 0 : index
      %190 = vector.load %arg28[%c0_161, %c0_162] : memref<1x128xf32, #tpu.memory_space<vmem>>, vector<1x128xf32>
      %191 = vector.shape_cast %188 : vector<2x8x8x128xf32> to vector<128x128xf32>
      %192 = arith.truncf %191 : vector<128x128xf32> to vector<128x128xbf16>
      %cst_163 = arith.constant dense<0.000000e+00> : vector<128x128xf32>
      %193 = tpu.matmul %192, %189, %cst_163 {dimension_numbers = #tpu.dot_dimension_numbers<[1], [0], [0], [1], [0, 0, 1, 1], [], []>} : vector<128x128xbf16>, vector<128x128xbf16>, vector<128x128xf32> -> vector<128x128xf32>
      %194 = vector.broadcast %190 : vector<1x128xf32> to vector<128x128xf32>
      %195 = arith.addf %193, %194 : vector<128x128xf32>
      %cst_164 = arith.constant 0.000000e+00 : f32
      %196 = vector.broadcast %cst_164 : f32 to vector<128x128xf32>
      %197 = arith.maximumf %195, %196 : vector<128x128xf32>
      %198 = vector.shape_cast %197 : vector<128x128xf32> to vector<2x8x8x128xf32>
      %c0_165 = arith.constant 0 : index
      %c0_166 = arith.constant 0 : index
      %199 = vector.load %arg29[%c0_165, %c0_166] : memref<16x128xf32, #tpu.memory_space<vmem>>, vector<16x128xf32>
      %c0_167 = arith.constant 0 : index
      %c0_168 = arith.constant 0 : index
      %200 = vector.load %arg30[%c0_167, %c0_168] : memref<1x128xf32, #tpu.memory_space<vmem>>, vector<1x128xf32>
      %201 = vector.shape_cast %198 : vector<2x8x8x128xf32> to vector<8x2x8x128xf32>
      %202 = vector.extract_strided_slice %201 {offsets = [0, 0, 0, 0], sizes = [8, 1, 8, 128], strides = [1, 1, 1, 1]} : vector<8x2x8x128xf32> to vector<8x1x8x128xf32>
      %203 = vector.shape_cast %202 : vector<8x1x8x128xf32> to vector<8x8x128xf32>
      %204 = vector.extract_strided_slice %201 {offsets = [0, 1, 0, 0], sizes = [8, 1, 8, 128], strides = [1, 1, 1, 1]} : vector<8x2x8x128xf32> to vector<8x1x8x128xf32>
      %205 = vector.shape_cast %204 : vector<8x1x8x128xf32> to vector<8x8x128xf32>
      %206 = vector.shape_cast %203 : vector<8x8x128xf32> to vector<2x4x4x256xf32>
      %207 = vector.extract_strided_slice %206 {offsets = [0, 0, 0, 0], sizes = [2, 4, 4, 128], strides = [1, 1, 1, 1]} : vector<2x4x4x256xf32> to vector<2x4x4x128xf32>
      %208 = vector.extract_strided_slice %206 {offsets = [0, 0, 0, 128], sizes = [2, 4, 4, 128], strides = [1, 1, 1, 1]} : vector<2x4x4x256xf32> to vector<2x4x4x128xf32>
      %209 = vector.shape_cast %205 : vector<8x8x128xf32> to vector<2x4x4x256xf32>
      %210 = vector.extract_strided_slice %209 {offsets = [0, 0, 0, 0], sizes = [2, 4, 4, 128], strides = [1, 1, 1, 1]} : vector<2x4x4x256xf32> to vector<2x4x4x128xf32>
      %211 = vector.extract_strided_slice %209 {offsets = [0, 0, 0, 128], sizes = [2, 4, 4, 128], strides = [1, 1, 1, 1]} : vector<2x4x4x256xf32> to vector<2x4x4x128xf32>
      %cst_169 = arith.constant 0.000000e+00 : f32
      %212 = vector.broadcast %cst_169 : f32 to vector<2x1x5x128xf32>
      %cst_170 = arith.constant 0.000000e+00 : f32
      %213 = vector.broadcast %cst_170 : f32 to vector<2x1x4x128xf32>
      %cst_171 = arith.constant 0.000000e+00 : f32
      %214 = vector.broadcast %cst_171 : f32 to vector<2x4x1x128xf32>
      %c0_172 = arith.constant 0 : index
      %c1_173 = arith.constant 1 : index
      %c1_174 = arith.constant 1 : index
      %c0_175 = arith.constant 0 : index
      %215 = vector.load %arg39[%c0_172, %c1_173, %c1_174, %c0_175] : memref<2x9x16x128xf32, #tpu.memory_space<vmem>>, vector<2x4x4x128xf32>
      tpu.vector_store %arg39[%c0_172, %c1_173, %c1_174, %c0_175], %211 {strides = array<i32>} : memref<2x9x16x128xf32, #tpu.memory_space<vmem>>, vector<2x4x4x128xf32>,
      %c0_176 = arith.constant 0 : index
      %c0_177 = arith.constant 0 : index
      %c0_178 = arith.constant 0 : index
      %c0_179 = arith.constant 0 : index
      %216 = vector.load %arg39[%c0_176, %c0_177, %c0_178, %c0_179] : memref<2x9x16x128xf32, #tpu.memory_space<vmem>>, vector<2x1x5x128xf32>
      tpu.vector_store %arg39[%c0_176, %c0_177, %c0_178, %c0_179], %212 {strides = array<i32>} : memref<2x9x16x128xf32, #tpu.memory_space<vmem>>, vector<2x1x5x128xf32>,
      %c0_180 = arith.constant 0 : index
      %c1_181 = arith.constant 1 : index
      %c0_182 = arith.constant 0 : index
      %c0_183 = arith.constant 0 : index
      %217 = vector.load %arg39[%c0_180, %c1_181, %c0_182, %c0_183] : memref<2x9x16x128xf32, #tpu.memory_space<vmem>>, vector<2x4x1x128xf32>
      tpu.vector_store %arg39[%c0_180, %c1_181, %c0_182, %c0_183], %214 {strides = array<i32>} : memref<2x9x16x128xf32, #tpu.memory_space<vmem>>, vector<2x4x1x128xf32>,
      %c0_184 = arith.constant 0 : index
      %c1_185 = arith.constant 1 : index
      %c0_186 = arith.constant 0 : index
      %c0_187 = arith.constant 0 : index
      %218 = vector.load %arg40[%c0_184, %c1_185, %c0_186, %c0_187] : memref<2x9x16x128xf32, #tpu.memory_space<vmem>>, vector<2x4x4x128xf32>
      tpu.vector_store %arg40[%c0_184, %c1_185, %c0_186, %c0_187], %210 {strides = array<i32>} : memref<2x9x16x128xf32, #tpu.memory_space<vmem>>, vector<2x4x4x128xf32>,
      %c0_188 = arith.constant 0 : index
      %c0_189 = arith.constant 0 : index
      %c0_190 = arith.constant 0 : index
      %c0_191 = arith.constant 0 : index
      %219 = vector.load %arg40[%c0_188, %c0_189, %c0_190, %c0_191] : memref<2x9x16x128xf32, #tpu.memory_space<vmem>>, vector<2x1x4x128xf32>
      tpu.vector_store %arg40[%c0_188, %c0_189, %c0_190, %c0_191], %213 {strides = array<i32>} : memref<2x9x16x128xf32, #tpu.memory_space<vmem>>, vector<2x1x4x128xf32>,
      %c0_192 = arith.constant 0 : index
      %c0_193 = arith.constant 0 : index
      %c1_194 = arith.constant 1 : index
      %c0_195 = arith.constant 0 : index
      %220 = vector.load %arg41[%c0_192, %c0_193, %c1_194, %c0_195] : memref<2x9x16x128xf32, #tpu.memory_space<vmem>>, vector<2x4x4x128xf32>
      tpu.vector_store %arg41[%c0_192, %c0_193, %c1_194, %c0_195], %208 {strides = array<i32>} : memref<2x9x16x128xf32, #tpu.memory_space<vmem>>, vector<2x4x4x128xf32>,
      %c0_196 = arith.constant 0 : index
      %c0_197 = arith.constant 0 : index
      %c0_198 = arith.constant 0 : index
      %c0_199 = arith.constant 0 : index
      %221 = vector.load %arg41[%c0_196, %c0_197, %c0_198, %c0_199] : memref<2x9x16x128xf32, #tpu.memory_space<vmem>>, vector<2x4x1x128xf32>
      tpu.vector_store %arg41[%c0_196, %c0_197, %c0_198, %c0_199], %214 {strides = array<i32>} : memref<2x9x16x128xf32, #tpu.memory_space<vmem>>, vector<2x4x1x128xf32>,
      %c0_200 = arith.constant 0 : index
      %c0_201 = arith.constant 0 : index
      %c0_202 = arith.constant 0 : index
      %c0_203 = arith.constant 0 : index
      %222 = vector.load %arg42[%c0_200, %c0_201, %c0_202, %c0_203] : memref<2x9x16x128xf32, #tpu.memory_space<vmem>>, vector<2x4x4x128xf32>
      tpu.vector_store %arg42[%c0_200, %c0_201, %c0_202, %c0_203], %207 {strides = array<i32>} : memref<2x9x16x128xf32, #tpu.memory_space<vmem>>, vector<2x4x4x128xf32>,
      %223 = vector.extract_strided_slice %199 {offsets = [0, 0], sizes = [1, 128], strides = [1, 1]} : vector<16x128xf32> to vector<1x128xf32>
      %224 = vector.shape_cast %223 : vector<1x128xf32> to vector<1x1x1x128xf32>
      %225 = vector.extract_strided_slice %199 {offsets = [1, 0], sizes = [1, 128], strides = [1, 1]} : vector<16x128xf32> to vector<1x128xf32>
      %226 = vector.shape_cast %225 : vector<1x128xf32> to vector<1x1x1x128xf32>
      %227 = vector.extract_strided_slice %199 {offsets = [2, 0], sizes = [1, 128], strides = [1, 1]} : vector<16x128xf32> to vector<1x128xf32>
      %228 = vector.shape_cast %227 : vector<1x128xf32> to vector<1x1x1x128xf32>
      %229 = vector.extract_strided_slice %199 {offsets = [3, 0], sizes = [1, 128], strides = [1, 1]} : vector<16x128xf32> to vector<1x128xf32>
      %230 = vector.shape_cast %229 : vector<1x128xf32> to vector<1x1x1x128xf32>
      %231 = vector.extract_strided_slice %199 {offsets = [4, 0], sizes = [1, 128], strides = [1, 1]} : vector<16x128xf32> to vector<1x128xf32>
      %232 = vector.shape_cast %231 : vector<1x128xf32> to vector<1x1x1x128xf32>
      %233 = vector.extract_strided_slice %199 {offsets = [5, 0], sizes = [1, 128], strides = [1, 1]} : vector<16x128xf32> to vector<1x128xf32>
      %234 = vector.shape_cast %233 : vector<1x128xf32> to vector<1x1x1x128xf32>
      %235 = vector.extract_strided_slice %199 {offsets = [6, 0], sizes = [1, 128], strides = [1, 1]} : vector<16x128xf32> to vector<1x128xf32>
      %236 = vector.shape_cast %235 : vector<1x128xf32> to vector<1x1x1x128xf32>
      %237 = vector.extract_strided_slice %199 {offsets = [7, 0], sizes = [1, 128], strides = [1, 1]} : vector<16x128xf32> to vector<1x128xf32>
      %238 = vector.shape_cast %237 : vector<1x128xf32> to vector<1x1x1x128xf32>
      %239 = vector.extract_strided_slice %199 {offsets = [8, 0], sizes = [1, 128], strides = [1, 1]} : vector<16x128xf32> to vector<1x128xf32>
      %240 = vector.shape_cast %239 : vector<1x128xf32> to vector<1x1x1x128xf32>
      %cst_204 = arith.constant 0.000000e+00 : f32
      %241 = vector.broadcast %cst_204 : f32 to vector<2x4x4x128xf32>
      %c0_205 = arith.constant 0 : index
      %c0_206 = arith.constant 0 : index
      %c0_207 = arith.constant 0 : index
      %c0_208 = arith.constant 0 : index
      %242 = vector.load %arg39[%c0_205, %c0_206, %c0_207, %c0_208] : memref<2x9x16x128xf32, #tpu.memory_space<vmem>>, vector<2x4x4x128xf32>
      %243 = vector.broadcast %224 : vector<1x1x1x128xf32> to vector<2x4x4x128xf32>
      %244 = arith.mulf %242, %243 : vector<2x4x4x128xf32>
      %245 = arith.addf %241, %244 : vector<2x4x4x128xf32>
      %c0_209 = arith.constant 0 : index
      %c0_210 = arith.constant 0 : index
      %c0_211 = arith.constant 0 : index
      %c0_212 = arith.constant 0 : index
      %246 = vector.load %arg40[%c0_209, %c0_210, %c0_211, %c0_212] : memref<2x9x16x128xf32, #tpu.memory_space<vmem>>, vector<2x4x4x128xf32>
      %247 = vector.broadcast %226 : vector<1x1x1x128xf32> to vector<2x4x4x128xf32>
      %248 = arith.mulf %246, %247 : vector<2x4x4x128xf32>
      %249 = arith.addf %245, %248 : vector<2x4x4x128xf32>
      %c0_213 = arith.constant 0 : index
      %c0_214 = arith.constant 0 : index
      %c1_215 = arith.constant 1 : index
      %c0_216 = arith.constant 0 : index
      %250 = vector.load %arg39[%c0_213, %c0_214, %c1_215, %c0_216] : memref<2x9x16x128xf32, #tpu.memory_space<vmem>>, vector<2x4x4x128xf32>
      %251 = vector.broadcast %228 : vector<1x1x1x128xf32> to vector<2x4x4x128xf32>
      %252 = arith.mulf %250, %251 : vector<2x4x4x128xf32>
      %253 = arith.addf %249, %252 : vector<2x4x4x128xf32>
      %c0_217 = arith.constant 0 : index
      %c0_218 = arith.constant 0 : index
      %c0_219 = arith.constant 0 : index
      %c0_220 = arith.constant 0 : index
      %254 = vector.load %arg41[%c0_217, %c0_218, %c0_219, %c0_220] : memref<2x9x16x128xf32, #tpu.memory_space<vmem>>, vector<2x4x4x128xf32>
      %255 = vector.broadcast %230 : vector<1x1x1x128xf32> to vector<2x4x4x128xf32>
      %256 = arith.mulf %254, %255 : vector<2x4x4x128xf32>
      %257 = arith.addf %253, %256 : vector<2x4x4x128xf32>
      %c0_221 = arith.constant 0 : index
      %c0_222 = arith.constant 0 : index
      %c0_223 = arith.constant 0 : index
      %c0_224 = arith.constant 0 : index
      %258 = vector.load %arg42[%c0_221, %c0_222, %c0_223, %c0_224] : memref<2x9x16x128xf32, #tpu.memory_space<vmem>>, vector<2x4x4x128xf32>
      %259 = vector.broadcast %232 : vector<1x1x1x128xf32> to vector<2x4x4x128xf32>
      %260 = arith.mulf %258, %259 : vector<2x4x4x128xf32>
      %261 = arith.addf %257, %260 : vector<2x4x4x128xf32>
      %c0_225 = arith.constant 0 : index
      %c0_226 = arith.constant 0 : index
      %c1_227 = arith.constant 1 : index
      %c0_228 = arith.constant 0 : index
      %262 = vector.load %arg41[%c0_225, %c0_226, %c1_227, %c0_228] : memref<2x9x16x128xf32, #tpu.memory_space<vmem>>, vector<2x4x4x128xf32>
      %263 = vector.broadcast %234 : vector<1x1x1x128xf32> to vector<2x4x4x128xf32>
      %264 = arith.mulf %262, %263 : vector<2x4x4x128xf32>
      %265 = arith.addf %261, %264 : vector<2x4x4x128xf32>
      %c0_229 = arith.constant 0 : index
      %c1_230 = arith.constant 1 : index
      %c0_231 = arith.constant 0 : index
      %c0_232 = arith.constant 0 : index
      %266 = vector.load %arg39[%c0_229, %c1_230, %c0_231, %c0_232] : memref<2x9x16x128xf32, #tpu.memory_space<vmem>>, vector<2x4x4x128xf32>
      %267 = vector.broadcast %236 : vector<1x1x1x128xf32> to vector<2x4x4x128xf32>
      %268 = arith.mulf %266, %267 : vector<2x4x4x128xf32>
      %269 = arith.addf %265, %268 : vector<2x4x4x128xf32>
      %c0_233 = arith.constant 0 : index
      %c1_234 = arith.constant 1 : index
      %c0_235 = arith.constant 0 : index
      %c0_236 = arith.constant 0 : index
      %270 = vector.load %arg40[%c0_233, %c1_234, %c0_235, %c0_236] : memref<2x9x16x128xf32, #tpu.memory_space<vmem>>, vector<2x4x4x128xf32>
      %271 = vector.broadcast %238 : vector<1x1x1x128xf32> to vector<2x4x4x128xf32>
      %272 = arith.mulf %270, %271 : vector<2x4x4x128xf32>
      %273 = arith.addf %269, %272 : vector<2x4x4x128xf32>
      %c0_237 = arith.constant 0 : index
      %c1_238 = arith.constant 1 : index
      %c1_239 = arith.constant 1 : index
      %c0_240 = arith.constant 0 : index
      %274 = vector.load %arg39[%c0_237, %c1_238, %c1_239, %c0_240] : memref<2x9x16x128xf32, #tpu.memory_space<vmem>>, vector<2x4x4x128xf32>
      %275 = vector.broadcast %240 : vector<1x1x1x128xf32> to vector<2x4x4x128xf32>
      %276 = arith.mulf %274, %275 : vector<2x4x4x128xf32>
      %277 = arith.addf %273, %276 : vector<2x4x4x128xf32>
      %278 = vector.shape_cast %200 : vector<1x128xf32> to vector<1x1x1x128xf32>
      %279 = vector.broadcast %278 : vector<1x1x1x128xf32> to vector<2x4x4x128xf32>
      %280 = arith.addf %277, %279 : vector<2x4x4x128xf32>
      %cst_241 = arith.constant 0.000000e+00 : f32
      %281 = vector.broadcast %cst_241 : f32 to vector<2x4x4x128xf32>
      %282 = arith.maximumf %280, %281 : vector<2x4x4x128xf32>
      %c0_242 = arith.constant 0 : index
      %c0_243 = arith.constant 0 : index
      %283 = vector.load %arg31[%c0_242, %c0_243] : memref<128x128xbf16, #tpu.memory_space<vmem>>, vector<128x128xbf16>
      %c0_244 = arith.constant 0 : index
      %c0_245 = arith.constant 0 : index
      %284 = vector.load %arg32[%c0_244, %c0_245] : memref<1x128xf32, #tpu.memory_space<vmem>>, vector<1x128xf32>
      %285 = vector.shape_cast %282 : vector<2x4x4x128xf32> to vector<32x128xf32>
      %286 = arith.truncf %285 : vector<32x128xf32> to vector<32x128xbf16>
      %cst_246 = arith.constant dense<0.000000e+00> : vector<32x128xf32>
      %287 = tpu.matmul %286, %283, %cst_246 {dimension_numbers = #tpu.dot_dimension_numbers<[1], [0], [0], [1], [0, 0, 1, 1], [], []>} : vector<32x128xbf16>, vector<128x128xbf16>, vector<32x128xf32> -> vector<32x128xf32>
      %288 = vector.broadcast %284 : vector<1x128xf32> to vector<32x128xf32>
      %289 = arith.addf %287, %288 : vector<32x128xf32>
      %290 = vector.shape_cast %289 : vector<32x128xf32> to vector<2x4x4x128xf32>
      %c0_247 = arith.constant 0 : index
      %c0_248 = arith.constant 0 : index
      %291 = vector.load %arg33[%c0_247, %c0_248] : memref<128x512xbf16, #tpu.memory_space<vmem>>, vector<128x512xbf16>
      %c0_249 = arith.constant 0 : index
      %c0_250 = arith.constant 0 : index
      %292 = vector.load %arg34[%c0_249, %c0_250] : memref<1x512xf32, #tpu.memory_space<vmem>>, vector<1x512xf32>
      %293 = vector.shape_cast %290 : vector<2x4x4x128xf32> to vector<32x128xf32>
      %294 = arith.truncf %293 : vector<32x128xf32> to vector<32x128xbf16>
      %cst_251 = arith.constant dense<0.000000e+00> : vector<32x512xf32>
      %295 = tpu.matmul %294, %291, %cst_251 {dimension_numbers = #tpu.dot_dimension_numbers<[1], [0], [0], [1], [0, 0, 1, 1], [], []>} : vector<32x128xbf16>, vector<128x512xbf16>, vector<32x512xf32> -> vector<32x512xf32>
      %296 = vector.broadcast %292 : vector<1x512xf32> to vector<32x512xf32>
      %297 = arith.addf %295, %296 : vector<32x512xf32>
      %cst_252 = arith.constant 0.000000e+00 : f32
      %298 = vector.broadcast %cst_252 : f32 to vector<32x512xf32>
      %299 = arith.maximumf %297, %298 : vector<32x512xf32>
      %300 = vector.shape_cast %299 : vector<32x512xf32> to vector<2x4x4x512xf32>
      %301 = vector.shape_cast %300 : vector<2x4x4x512xf32> to vector<2x16x512xf32>
      %cst_253 = arith.constant dense<0.000000e+00> : vector<2x512xf32>
      %302 = vector.multi_reduction <add>, %301, %cst_253 [1] : vector<2x16x512xf32> to vector<2x512xf32>
      %c0_254 = arith.constant 0 : index
      %c0_255 = arith.constant 0 : index
      %303 = vector.load %arg35[%c0_254, %c0_255] : memref<512x128xbf16, #tpu.memory_space<vmem>>, vector<512x128xbf16>
      %c0_256 = arith.constant 0 : index
      %c0_257 = arith.constant 0 : index
      %304 = vector.load %arg36[%c0_256, %c0_257] : memref<1x128xf32, #tpu.memory_space<vmem>>, vector<1x128xf32>
      %305 = arith.truncf %302 : vector<2x512xf32> to vector<2x512xbf16>
      %cst_258 = arith.constant dense<0.000000e+00> : vector<2x128xf32>
      %306 = tpu.matmul %305, %303, %cst_258 {dimension_numbers = #tpu.dot_dimension_numbers<[1], [0], [0], [1], [0, 0, 1, 1], [], []>} : vector<2x512xbf16>, vector<512x128xbf16>, vector<2x128xf32> -> vector<2x128xf32>
      %307 = vector.broadcast %304 : vector<1x128xf32> to vector<2x128xf32>
      %308 = arith.addf %306, %307 : vector<2x128xf32>
      %309 = vector.shape_cast %308 : vector<2x128xf32> to vector<1x2x128xf32>
      %c0_259 = arith.constant 0 : index
      %c0_260 = arith.constant 0 : index
      %c0_261 = arith.constant 0 : index
      %310 = vector.load %arg2[%c0_259, %c0_260, %c0_261] : memref<1x2x128xf32, #tpu.memory_space<vmem>>, vector<1x2x128xf32>
      %311 = arith.mulf %309, %310 : vector<1x2x128xf32>
      %c0_262 = arith.constant 0 : index
      %c0_263 = arith.constant 0 : index
      %c0_264 = arith.constant 0 : index
      %312 = vector.load %arg37[%c0_262, %c0_263, %c0_264] : memref<1x2x128xf32, #tpu.memory_space<vmem>>, vector<1x2x128xf32>
      tpu.vector_store %arg37[%c0_262, %c0_263, %c0_264], %311 {strides = array<i32>} : memref<1x2x128xf32, #tpu.memory_space<vmem>>, vector<1x2x128xf32>,
    } else {
    }
    return
  }
  func.func @transform_0(%arg0: i32) -> (i32, i32, i32, i32) {
    %c0_i32 = arith.constant 0 : i32
    %c0_i32_0 = arith.constant 0 : i32
    %c0_i32_1 = arith.constant 0 : i32
    %c0_i32_2 = arith.constant 0 : i32
    %c0_i32_3 = arith.constant 0 : i32
    return %c0_i32, %c0_i32_0, %c0_i32_1, %c0_i32_2 : i32, i32, i32, i32
  }
  func.func @transform_1(%arg0: i32) -> (i32, i32, i32) {
    %c0_i32 = arith.constant 0 : i32
    %c0_i32_0 = arith.constant 0 : i32
    %c0_i32_1 = arith.constant 0 : i32
    return %arg0, %c0_i32, %c0_i32_0 : i32, i32, i32
  }
  func.func @transform_2(%arg0: i32) -> (i32, i32) {
    %c0_i32 = arith.constant 0 : i32
    %c0_i32_0 = arith.constant 0 : i32
    %c0_i32_1 = arith.constant 0 : i32
    return %c0_i32, %c0_i32_0 : i32, i32
  }
  func.func @transform_3(%arg0: i32) -> (i32, i32) {
    %c0_i32 = arith.constant 0 : i32
    %c0_i32_0 = arith.constant 0 : i32
    %c0_i32_1 = arith.constant 0 : i32
    return %c0_i32, %c0_i32_0 : i32, i32
  }
  func.func @transform_4(%arg0: i32) -> (i32, i32) {
    %c0_i32 = arith.constant 0 : i32
    %c0_i32_0 = arith.constant 0 : i32
    %c0_i32_1 = arith.constant 0 : i32
    return %c0_i32, %c0_i32_0 : i32, i32
  }
  func.func @transform_5(%arg0: i32) -> (i32, i32) {
    %c0_i32 = arith.constant 0 : i32
    %c0_i32_0 = arith.constant 0 : i32
    %c0_i32_1 = arith.constant 0 : i32
    return %c0_i32, %c0_i32_0 : i32, i32
  }
  func.func @transform_6(%arg0: i32) -> (i32, i32) {
    %c0_i32 = arith.constant 0 : i32
    %c0_i32_0 = arith.constant 0 : i32
    %c0_i32_1 = arith.constant 0 : i32
    return %c0_i32, %c0_i32_0 : i32, i32
  }
  func.func @transform_7(%arg0: i32) -> (i32, i32) {
    %c0_i32 = arith.constant 0 : i32
    %c0_i32_0 = arith.constant 0 : i32
    %c0_i32_1 = arith.constant 0 : i32
    return %c0_i32, %c0_i32_0 : i32, i32
  }
  func.func @transform_8(%arg0: i32) -> (i32, i32) {
    %c0_i32 = arith.constant 0 : i32
    %c0_i32_0 = arith.constant 0 : i32
    %c0_i32_1 = arith.constant 0 : i32
    return %c0_i32, %c0_i32_0 : i32, i32
  }
  func.func @transform_9(%arg0: i32) -> (i32, i32) {
    %c0_i32 = arith.constant 0 : i32
    %c0_i32_0 = arith.constant 0 : i32
    %c0_i32_1 = arith.constant 0 : i32
    return %c0_i32, %c0_i32_0 : i32, i32
  }
  func.func @transform_10(%arg0: i32) -> (i32, i32) {
    %c0_i32 = arith.constant 0 : i32
    %c0_i32_0 = arith.constant 0 : i32
    %c0_i32_1 = arith.constant 0 : i32
    return %c0_i32, %c0_i32_0 : i32, i32
  }
  func.func @transform_11(%arg0: i32) -> (i32, i32) {
    %c0_i32 = arith.constant 0 : i32
    %c0_i32_0 = arith.constant 0 : i32
    %c0_i32_1 = arith.constant 0 : i32
    return %c0_i32, %c0_i32_0 : i32, i32
  }
  func.func @transform_12(%arg0: i32) -> (i32, i32) {
    %c0_i32 = arith.constant 0 : i32
    %c0_i32_0 = arith.constant 0 : i32
    %c0_i32_1 = arith.constant 0 : i32
    return %c0_i32, %c0_i32_0 : i32, i32
  }
  func.func @transform_13(%arg0: i32) -> (i32, i32) {
    %c0_i32 = arith.constant 0 : i32
    %c0_i32_0 = arith.constant 0 : i32
    %c0_i32_1 = arith.constant 0 : i32
    return %c0_i32, %c0_i32_0 : i32, i32
  }
  func.func @transform_14(%arg0: i32) -> (i32, i32) {
    %c0_i32 = arith.constant 0 : i32
    %c0_i32_0 = arith.constant 0 : i32
    %c0_i32_1 = arith.constant 0 : i32
    return %c0_i32, %c0_i32_0 : i32, i32
  }
  func.func @transform_15(%arg0: i32) -> (i32, i32) {
    %c0_i32 = arith.constant 0 : i32
    %c0_i32_0 = arith.constant 0 : i32
    %c0_i32_1 = arith.constant 0 : i32
    return %c0_i32, %c0_i32_0 : i32, i32
  }
  func.func @transform_16(%arg0: i32) -> (i32, i32) {
    %c0_i32 = arith.constant 0 : i32
    %c0_i32_0 = arith.constant 0 : i32
    %c0_i32_1 = arith.constant 0 : i32
    return %c0_i32, %c0_i32_0 : i32, i32
  }
  func.func @transform_17(%arg0: i32) -> (i32, i32) {
    %c0_i32 = arith.constant 0 : i32
    %c0_i32_0 = arith.constant 0 : i32
    %c0_i32_1 = arith.constant 0 : i32
    return %c0_i32, %c0_i32_0 : i32, i32
  }
  func.func @transform_18(%arg0: i32) -> (i32, i32) {
    %c0_i32 = arith.constant 0 : i32
    %c0_i32_0 = arith.constant 0 : i32
    %c0_i32_1 = arith.constant 0 : i32
    return %c0_i32, %c0_i32_0 : i32, i32
  }
  func.func @transform_19(%arg0: i32) -> (i32, i32) {
    %c0_i32 = arith.constant 0 : i32
    %c0_i32_0 = arith.constant 0 : i32
    %c0_i32_1 = arith.constant 0 : i32
    return %c0_i32, %c0_i32_0 : i32, i32
  }
  func.func @transform_20(%arg0: i32) -> (i32, i32) {
    %c0_i32 = arith.constant 0 : i32
    %c0_i32_0 = arith.constant 0 : i32
    %c0_i32_1 = arith.constant 0 : i32
    return %c0_i32, %c0_i32_0 : i32, i32
  }
  func.func @transform_21(%arg0: i32) -> (i32, i32) {
    %c0_i32 = arith.constant 0 : i32
    %c0_i32_0 = arith.constant 0 : i32
    %c0_i32_1 = arith.constant 0 : i32
    return %c0_i32, %c0_i32_0 : i32, i32
  }
  func.func @transform_22(%arg0: i32) -> (i32, i32) {
    %c0_i32 = arith.constant 0 : i32
    %c0_i32_0 = arith.constant 0 : i32
    %c0_i32_1 = arith.constant 0 : i32
    return %c0_i32, %c0_i32_0 : i32, i32
  }
  func.func @transform_23(%arg0: i32) -> (i32, i32) {
    %c0_i32 = arith.constant 0 : i32
    %c0_i32_0 = arith.constant 0 : i32
    %c0_i32_1 = arith.constant 0 : i32
    return %c0_i32, %c0_i32_0 : i32, i32
  }
  func.func @transform_24(%arg0: i32) -> (i32, i32) {
    %c0_i32 = arith.constant 0 : i32
    %c0_i32_0 = arith.constant 0 : i32
    %c0_i32_1 = arith.constant 0 : i32
    return %c0_i32, %c0_i32_0 : i32, i32
  }
  func.func @transform_25(%arg0: i32) -> (i32, i32) {
    %c0_i32 = arith.constant 0 : i32
    %c0_i32_0 = arith.constant 0 : i32
    %c0_i32_1 = arith.constant 0 : i32
    return %c0_i32, %c0_i32_0 : i32, i32
  }
  func.func @transform_26(%arg0: i32) -> (i32, i32) {
    %c0_i32 = arith.constant 0 : i32
    %c0_i32_0 = arith.constant 0 : i32
    %c0_i32_1 = arith.constant 0 : i32
    return %c0_i32, %c0_i32_0 : i32, i32
  }
  func.func @transform_27(%arg0: i32) -> (i32, i32) {
    %c0_i32 = arith.constant 0 : i32
    %c0_i32_0 = arith.constant 0 : i32
    %c0_i32_1 = arith.constant 0 : i32
    return %c0_i32, %c0_i32_0 : i32, i32
  }
  func.func @transform_28(%arg0: i32) -> (i32, i32) {
    %c0_i32 = arith.constant 0 : i32
    %c0_i32_0 = arith.constant 0 : i32
    %c0_i32_1 = arith.constant 0 : i32
    return %c0_i32, %c0_i32_0 : i32, i32
  }
  func.func @transform_29(%arg0: i32) -> (i32, i32) {
    %c0_i32 = arith.constant 0 : i32
    %c0_i32_0 = arith.constant 0 : i32
    %c0_i32_1 = arith.constant 0 : i32
    return %c0_i32, %c0_i32_0 : i32, i32
  }
  func.func @transform_30(%arg0: i32) -> (i32, i32) {
    %c0_i32 = arith.constant 0 : i32
    %c0_i32_0 = arith.constant 0 : i32
    %c0_i32_1 = arith.constant 0 : i32
    return %c0_i32, %c0_i32_0 : i32, i32
  }
  func.func @transform_31(%arg0: i32) -> (i32, i32) {
    %c0_i32 = arith.constant 0 : i32
    %c0_i32_0 = arith.constant 0 : i32
    %c0_i32_1 = arith.constant 0 : i32
    return %c0_i32, %c0_i32_0 : i32, i32
  }
  func.func @transform_32(%arg0: i32) -> (i32, i32) {
    %c0_i32 = arith.constant 0 : i32
    %c0_i32_0 = arith.constant 0 : i32
    %c0_i32_1 = arith.constant 0 : i32
    return %c0_i32, %c0_i32_0 : i32, i32
  }
  func.func @transform_33(%arg0: i32) -> (i32, i32) {
    %c0_i32 = arith.constant 0 : i32
    %c0_i32_0 = arith.constant 0 : i32
    %c0_i32_1 = arith.constant 0 : i32
    return %c0_i32, %c0_i32_0 : i32, i32
  }
  func.func @transform_34(%arg0: i32) -> (i32, i32) {
    %c0_i32 = arith.constant 0 : i32
    %c0_i32_0 = arith.constant 0 : i32
    %c0_i32_1 = arith.constant 0 : i32
    return %c0_i32, %c0_i32_0 : i32, i32
  }
  func.func @transform_35(%arg0: i32) -> (i32, i32) {
    %c0_i32 = arith.constant 0 : i32
    %c0_i32_0 = arith.constant 0 : i32
    %c0_i32_1 = arith.constant 0 : i32
    return %c0_i32, %c0_i32_0 : i32, i32
  }
  func.func @transform_36(%arg0: i32) -> (i32, i32, i32) {
    %c0_i32 = arith.constant 0 : i32
    %c0_i32_0 = arith.constant 0 : i32
    %c0_i32_1 = arith.constant 0 : i32
    return %arg0, %c0_i32, %c0_i32_0 : i32, i32, i32
  }
}

</mosaic_0001>

<bundles_post_ra>
// kernel: tpu_custom_call.1
= control target key start
LH: loop header
LB: loop body
LE: loop exit
PB: predicated region body
PF: predicated region fallthrough
CT: control target
= control target key end

     0   :  { %s11767_s6 = smov 1   ;;  %s11768_s10 = smov 2   ;;  %s14635_s0 = inlined_call_operand.smem [shape: u32[37], index: -1, kind: input, shape index: {}] }
   0x1   :  { %s11852_s5 = sld [smem:[%s14635_s0]]   ;;  %s11769_s14 = smov 3  }
   0x2   :  { %s11857_s9 = sld [smem:[%s14635_s0 + %s11767_s6]]   ;;  %s11770_s18 = smov 4  }
   0x3   :  { %s11862_s13 = sld [smem:[%s14635_s0 + %s11768_s10]]   ;;  %s11771_s22 = smov 5  }
   0x4   :  { %s11867_s17 = sld [smem:[%s14635_s0 + %s11769_s14]]   ;;  %s11772_s26 = smov 6  }
   0x5   :  { %s11872_s21 = sld [smem:[%s14635_s0 + %s11770_s18]]   ;;  %s11773_s30 = smov 7  }
   0x6   :  { %s11877_s25 = sld [smem:[%s14635_s0 + %s11771_s22]]   ;;  %s11774_s4 = smov 8  }
   0x7   :  { %14722 = sst [smem:[#allocation70_spill]] %s11852_s5  ;;  %s11775_s10 = smov 9  }
   0x8   :  { %14723 = sst [smem:[#allocation71_spill]] %s11857_s9  ;;  %s11776_s15 = smov 10  }
   0x9   :  { %14724 = sst [smem:[#allocation72_spill]] %s11862_s13  ;;  %s11777_s20 = smov 11  }
   0xa   :  { %s11882_s29 = sld [smem:[%s14635_s0 + %s11772_s26]]   ;;  %s11778_s26 = smov 12  }
   0xb   :  { %14725 = sst [smem:[#allocation73_spill]] %s11872_s21  ;;  %s11779_s1 = smov 13  }
   0xc   :  { %s11887_s3 = sld [smem:[%s14635_s0 + %s11773_s30]]   ;;  %s11780_s7 = smov 14  }
   0xd   :  { %s11892_s8 = sld [smem:[%s14635_s0 + %s11774_s4]]   ;;  %s11782_s22 = smov 16  }
   0xe   :  { %s11897_s14 = sld [smem:[%s14635_s0 + %s11775_s10]]   ;;  %s11783_s28 = smov 17  }
   0xf   :  { %s11902_s19 = sld [smem:[%s14635_s0 + %s11776_s15]]   ;;  %s11781_s15 = smov 15  }
  0x10   :  { %14726 = sst [smem:[#allocation74_spill]] %s11882_s29 }
  0x11   :  { %s11907_s24 = sld [smem:[%s14635_s0 + %s11777_s20]]  }
  0x12   :  { %14727 = sst [smem:[#allocation75_spill]] %s11887_s3 }
  0x13   :  { %14728 = sst [smem:[#allocation76_spill]] %s11892_s8 }
  0x14   :  { %14729 = sst [smem:[#allocation77_spill]] %s11897_s14 }
  0x15   :  { %14730 = sst [smem:[#allocation78_spill]] %s11902_s19 }
  0x16   :  { %s11912_s30 = sld [smem:[%s14635_s0 + %s11778_s26]]  }
  0x17   :  { %s11917_s6 = sld [smem:[%s14635_s0 + %s11779_s1]]  }
  0x18   :  { %s11922_s12 = sld [smem:[%s14635_s0 + %s11780_s7]]   ;;  %s11784_s7 = smov 18  }
  0x19   :  { %s11927_s20 = sld [smem:[%s14635_s0 + %s11781_s15]]   ;;  %s11785_s15 = smov 19  }
  0x1a   :  { %s11932_s27 = sld [smem:[%s14635_s0 + %s11782_s22]]   ;;  %s11786_s22 = smov 20  }
  0x1b   :  { %s11937_s4 = sld [smem:[%s14635_s0 + %s11783_s28]]   ;;  %s11787_s28 = smov 21  }
  0x1c   :  { %14731 = sst [smem:[#allocation79_spill]] %s11912_s30 }
  0x1d   :  { %14732 = sst [smem:[#allocation80_spill]] %s11917_s6 }
  0x1e   :  { %14733 = sst [smem:[#allocation81_spill]] %s11922_s12 }
  0x1f   :  { %s11942_s9 = sld [smem:[%s14635_s0 + %s11784_s7]]   ;;  %s11788_s7 = smov 22  }
  0x20   :  { %14734 = sst [smem:[#allocation82_spill]] %s11932_s27 }
  0x21   :  { %14735 = sst [smem:[#allocation83_spill]] %s11937_s4 }
  0x22   :  { %s11947_s12 = sld [smem:[%s14635_s0 + %s11785_s15]]   ;;  %s11789_s15 = smov 23  }
  0x23   :  { %s11952_s27 = sld [smem:[%s14635_s0 + %s11786_s22]]   ;;  %s11790_s22 = smov 24  }
  0x24   :  { %s11957_s4 = sld [smem:[%s14635_s0 + %s11787_s28]]   ;;  %s11791_s28 = smov 25  }
  0x25   :  { %14736 = sst [smem:[#allocation84_spill]] %s11942_s9 }
  0x26   :  { %s11962_s30 = sld [smem:[%s14635_s0 + %s11788_s7]]   ;;  %s11792_s7 = smov 26  }
  0x27   :  { %s11977_s19 = sld [smem:[%s14635_s0 + %s11791_s28]]   ;;  %s11795_s28 = smov 29  }
  0x28   :  { %14737 = sst [smem:[#allocation85_spill]] %s11947_s12 }
  0x29   :  { %14738 = sst [smem:[#allocation86_spill]] %s11952_s27 }
  0x2a   :  { %14739 = sst [smem:[#allocation87_spill]] %s11957_s4 }
  0x2b   :  { %s11967_s12 = sld [smem:[%s14635_s0 + %s11789_s15]]   ;;  %s11793_s15 = smov 27  }
  0x2c   :  { %14740 = sst [smem:[#allocation88_spill]] %s11962_s30 }
  0x2d   :  { %s11972_s27 = sld [smem:[%s14635_s0 + %s11790_s22]]   ;;  %s11794_s22 = smov 28  }
  0x2e   :  { %14742 = sst [smem:[#allocation90_spill]] %s11977_s19 }
  0x2f   :  { %s11982_s30 = sld [smem:[%s14635_s0 + %s11792_s7]]   ;;  %s11796_s7 = smov 30  }
  0x30   :  { %s11992_s8 = sld [smem:[%s14635_s0 + %s11794_s22]]   ;;  %s11798_s22 = smov 32  }
  0x31   :  { %14741 = sst [smem:[#allocation89_spill]] %s11967_s12 }
  0x32   :  { %s11987_s12 = sld [smem:[%s14635_s0 + %s11793_s15]]   ;;  %s11797_s15 = smov 31  }
  0x33   :  { %s11997_s19 = sld [smem:[%s14635_s0 + %s11795_s28]]   ;;  %s11799_s28 = smov 33  }
  0x34   :  { %s12002_s29 = sld [smem:[%s14635_s0 + %s11796_s7]]   ;;  %s11800_s7 = smov 34  }
  0x35   :  { %s12017_s21 = sld [smem:[%s14635_s0 + %s11799_s28]]  }
  0x36   :  { %14744 = sst [smem:[#allocation92_spill]] %s11992_s8 }
  0x37   :  { %s12012_s8 = sld [smem:[%s14635_s0 + %s11798_s22]]   ;;  %s11802_s22 = smov 36  }
  0x38   :  { %14743 = sst [smem:[#allocation91_spill]] %s11987_s12 }
  0x39   :  { %s12007_s12 = sld [smem:[%s14635_s0 + %s11797_s15]]   ;;  %s11801_s15 = smov 35  }
  0x3a   :  { %14745 = sst [smem:[#allocation93_spill]] %s12002_s29 }
  0x3b   :  { %14748 = sst [smem:[#allocation96_spill]] %s12017_s21 }
  0x3c   :  { %s12022_s29 = sld [smem:[%s14635_s0 + %s11800_s7]]  }
  0x3d   :  { %14747 = sst [smem:[#allocation95_spill]] %s12012_s8 }
  0x3e   :  { %s12032_s5 = sld [smem:[%s14635_s0 + %s11802_s22]]  }
  0x3f   :  { %14746 = sst [smem:[#allocation94_spill]] %s12007_s12 }
  0x40   :  { %s12027_s12 = sld [smem:[%s14635_s0 + %s11801_s15]]  }
  0x44   :  { %14750 = sst [smem:[#allocation98_spill]] %s12032_s5 }
  0x46   :  { %14749 = sst [smem:[#allocation97_spill]] %s12027_s12 }
  0x47   :  { %78 = vsyncpa [#allocation8], 0 }
  0x48   :  { %79 = vsyncpa [#allocation11], 0 }
  0x49   :  { %81 = vsyncpa [#allocation11 + $0x1], 0 }
  0x4a   :  { %82 = vsyncpa [#allocation14], 0 }
  0x4b   :  { %83 = vsyncpa [#allocation17], 0 }
  0x4c   :  { %84 = vsyncpa [#allocation20], 0 }
  0x4d   :  { %85 = vsyncpa [#allocation23], 0 }
  0x4e   :  { %86 = vsyncpa [#allocation26], 0 }
  0x4f   :  { %87 = vsyncpa [#allocation29], 0 }
  0x50   :  { %88 = vsyncpa [#allocation32], 0 }
  0x51   :  { %89 = vsyncpa [#allocation35], 0 }
  0x52   :  { %90 = vsyncpa [#allocation38], 0 }
  0x53   :  { %91 = vsyncpa [#allocation41], 0 }
  0x54   :  { %92 = vsyncpa [#allocation44], 0 }
  0x55   :  { %93 = vsyncpa [#allocation47], 0 }
  0x56   :  { %94 = vsyncpa [#allocation50], 0 }
  0x57   :  { %95 = vsyncpa [#allocation9], 0 }
  0x58   :  { %97 = vsyncpa [#allocation9 + $0x1], 0  ;;  %s12034_s0 = smov 0   ;;  %s12036_s28 = smov 0  }
  0x59   :  { %s12038_s1 = smov 0   ;;  %s12040_s2 = smov 0  }
  0x5a LB: > { %s12055_s7 = sadd.s32 4294967295, %s11765_s2   ;;  %p9409_p0 = scmp.ge.s32.totalorder %s11765_s2, 1  ;;  %s11765_s2 = sphi %s12040_s2, %s14924_s2   ;;  %s11761_s1 = sphi %s12038_s1, %s14923_s1   ;;  %s11757_s28 = sphi %s12036_s28, %s14922_s28   ;;  %s11753_s0 = sphi %s12034_s0, %s14921_s0  }
  0x5b   : > { %p14645_p1 = scmp.eq.s32.totalorder %s12055_s7, 0  ;;  %p895_p2 = scmp.lt.s32.totalorder %s11765_s2, 3 }
  0x5c   : > { %s11803_s11 = smov [#allocation12]   ;;  %s11804_s16 = smov [#allocation13]  }
  0x5d   : > { %p12061_p4 = pnand %p9409_p0, %p895_p2  ;;  %s920_s15 = sshll.u32 %s11803_s11, 4  ;;  %s921_s15 = int_to_ptr.vmem [resolvable:$true] %s920_s15 }
  0x5e   : > { %s934_s18 = sshll.u32 %s11804_s16, 4  ;;  %s11805_s23 = smov [#allocation16]   ;;  %s935_s18 = int_to_ptr.vmem [resolvable:$true] %s934_s18 }
  0x5f   : > { %s14751_s10 = scalar_select %p12061_p4, 1, 0 }
  0x60   : > { %p10399_p6 = pneg %p12061_p4  ;;  %s958_s26 = sshll.u32 %s11805_s23, 4  ;;  %s12074_s26 = int_to_ptr.vmem [resolvable:$true] %s958_s26 }
  0x61   : > { %s10896_s5 = scalar_lea.vmem %s921_s15, 256  ;;  %p10904_p12 = scmp.lt.s32.totalorder %s921_s15, %s921_s15 }
  0x62   : > { %p12070_p7 = pnand %p10399_p6, %p14645_p1  ;;  %p10897_p9 = scmp.ne.s32.totalorder %s921_s15, %s10896_s5 }
  0x63   : > { %p10905_p13 = scmp.lt.s32.totalorder %s10896_s5, %s10896_s5 }
  0x64   : > { %p12078_p8 = pneg %p12070_p7 }
  0x65   : > { %p10906_p0 = por %p10905_p13, %p10904_p12 }
  0x66   : > { %p10899_p10 = pnand %p10897_p9, %p12078_p8 }
  0x68   : > { %p10900_p11 = pneg %p10899_p10 }
  0x6a   : > { %p10907_p2 = pnand %p10906_p0, %p10900_p11 }
  0x6c   : > { %10910 = shalt.err (!%p10907_p2)
}
  0x6d   : > { %s14641_s16 = smov 128   ;;  %s14754_s13 = sld [smem:[#allocation72_spill]] }
  0x6e   : > { %s14643_s23 = smov 8   ;;  %s10922_s12 = scalar_lea.vmem %s935_s18, 16 }
  0x6f   : > { %p10923_p6 = scmp.ne.s32.totalorder %s935_s18, %s10922_s12  ;;  %s10929_s21 = scalar_lea.vmem %s935_s18, 32 }
  0x70   : > { %p10930_p5 = scmp.lt.s32.totalorder %s935_s18, %s935_s18  ;;  %p10931_p12 = scmp.lt.s32.totalorder %s10929_s21, %s10922_s12 }
  0x71   : > { %p10925_p9 = pnand %p10923_p6, %p12078_p8 }
  0x72   : > { %p10932_p11 = por %p10931_p12, %p10930_p5 }
  0x73   : > { %10405 = dma.hbm_to_vmem [thread:$0]  (!%p12070_p7), %s14754_s13, 256, %s921_s15, [#allocation11], %s14641_s16, %s14641_s16, %s14643_s23  }
  0x74   : > { %p10926_p10 = pneg %p10925_p9 }
  0x76   : > { %p10933_p13 = pnand %p10932_p11, %p10926_p10 }
  0x78   : > { %10936 = shalt.err (!%p10933_p13)
}
  0x79   : > { %10408 = dma.hbm_to_vmem [thread:$0]  (!%p12070_p7), %s11867_s17, 16, %s935_s18, [#allocation14]  }
  0x7a   : > { %s10948_s5 = scalar_lea.vmem %s12074_s26, 16  ;;  %s10955_s15 = scalar_lea.vmem %s12074_s26, 32 }
  0x7b   : > { %p10949_p0 = scmp.ne.s32.totalorder %s12074_s26, %s10948_s5  ;;  %p10956_p9 = scmp.lt.s32.totalorder %s12074_s26, %s12074_s26 }
  0x7c   : > { %p10957_p5 = scmp.lt.s32.totalorder %s10955_s15, %s10948_s5 }
  0x7d   : > { %p10951_p2 = pnand %p10949_p0, %p12078_p8 }
  0x7e   : > { %p10958_p10 = por %p10957_p5, %p10956_p9 }
  0x7f   : > { %p10952_p6 = pneg %p10951_p2 }
  0x81   : > { %p10959_p12 = pnand %p10958_p10, %p10952_p6 }
  0x83   : > { %10962 = shalt.err (!%p10959_p12)
}
  0x84   : > { %10414 = dma.hbm_to_vmem [thread:$0]  (!%p12070_p7), %s11877_s25, 16, %s12074_s26, [#allocation17]  }
  0x85   : > { %s11808_s21 = smov [#allocation19]   ;;  %s11809_s18 = smov [#allocation22]  }
  0x86   : > { %s982_s12 = sshll.u32 %s11808_s21, 4  ;;  %s1006_s16 = sshll.u32 %s11809_s18, 4  ;;  %s983_s12 = int_to_ptr.vmem [resolvable:$true] %s982_s12  ;;  %s1007_s16 = int_to_ptr.vmem [resolvable:$true] %s1006_s16 }
  0x87   : > { %s10974_s23 = scalar_lea.vmem %s983_s12, 16  ;;  %s10981_s5 = scalar_lea.vmem %s983_s12, 32 }
  0x88   : > { %p10975_p11 = scmp.ne.s32.totalorder %s983_s12, %s10974_s23  ;;  %p10982_p2 = scmp.lt.s32.totalorder %s983_s12, %s983_s12 }
  0x89   : > { %p10983_p6 = scmp.lt.s32.totalorder %s10981_s5, %s10974_s23 }
  0x8a   : > { %p10977_p13 = pnand %p10975_p11, %p12078_p8 }
  0x8b   : > { %p10984_p9 = por %p10983_p6, %p10982_p2 }
  0x8c   : > { %p10978_p0 = pneg %p10977_p13 }
  0x8e   : > { %p10985_p5 = pnand %p10984_p9, %p10978_p0 }
  0x90   : > { %10988 = shalt.err (!%p10985_p5)
}
  0x91   : > { %s14755_s3 = sld [smem:[#allocation75_spill]]  ;;  %s11000_s26 = scalar_lea.vmem %s1007_s16, 16 }
  0x92   : > { %p11001_p10 = scmp.ne.s32.totalorder %s1007_s16, %s11000_s26  ;;  %s11007_s15 = scalar_lea.vmem %s1007_s16, 32 }
  0x93   : > { %p11008_p11 = scmp.lt.s32.totalorder %s1007_s16, %s1007_s16  ;;  %p11009_p13 = scmp.lt.s32.totalorder %s11007_s15, %s11000_s26 }
  0x94   : > { %p11003_p12 = pnand %p11001_p10, %p12078_p8 }
  0x95   : > { %p11010_p1 = por %p11009_p13, %p11008_p11 }
  0x96   : > { %p11004_p3 = pneg %p11003_p12 }
  0x97   : > { %10420 = dma.hbm_to_vmem [thread:$0]  (!%p12070_p7), %s14755_s3, 16, %s983_s12, [#allocation20]  }
  0x98   : > { %p11011_p4 = pnand %p11010_p1, %p11004_p3 }
  0x9a   : > { %11014 = shalt.err (!%p11011_p4)
}
  0x9b   : > { %s14756_s14 = sld [smem:[#allocation77_spill]]  ;;  %s11810_s23 = smov [#allocation25]  }
  0x9c   : > { %s1030_s21 = sshll.u32 %s11810_s23, 4  ;;  %s11811_s12 = smov [#allocation28]   ;;  %s1031_s21 = int_to_ptr.vmem [resolvable:$true] %s1030_s21 }
  0x9d   : > { %s1054_s18 = sshll.u32 %s11811_s12, 4  ;;  %s11026_s5 = scalar_lea.vmem %s1031_s21, 16  ;;  %s1055_s18 = int_to_ptr.vmem [resolvable:$true] %s1054_s18 }
  0x9e   : > { %p11027_p0 = scmp.ne.s32.totalorder %s1031_s21, %s11026_s5  ;;  %s11033_s3 = scalar_lea.vmem %s1031_s21, 32 }
  0x9f   : > { %p11034_p9 = scmp.lt.s32.totalorder %s1031_s21, %s1031_s21  ;;  %p11035_p5 = scmp.lt.s32.totalorder %s11033_s3, %s11026_s5 }
  0xa0   : > { %p11029_p2 = pnand %p11027_p0, %p12078_p8 }
  0xa1   : > { %10426 = dma.hbm_to_vmem [thread:$0]  (!%p12070_p7), %s14756_s14, 16, %s1007_s16, [#allocation23]  }
  0xa2   : > { %p11030_p6 = pneg %p11029_p2  ;;  %p11036_p1 = por %p11035_p5, %p11034_p9 }
  0xa4   : > { %p11037_p3 = pnand %p11036_p1, %p11030_p6 }
  0xa6   : > { %11040 = shalt.err (!%p11037_p3)
}
  0xa7   : > { %10432 = dma.hbm_to_vmem [thread:$0]  (!%p12070_p7), %s11907_s24, 16, %s1031_s21, [#allocation26]  }
  0xa8   : > { %s11052_s16 = scalar_lea.vmem %s1055_s18, 64  ;;  %p11060_p11 = scmp.lt.s32.totalorder %s1055_s18, %s1055_s18 }
  0xa9   : > { %p11053_p4 = scmp.ne.s32.totalorder %s1055_s18, %s11052_s16  ;;  %p11061_p13 = scmp.lt.s32.totalorder %s11052_s16, %s11052_s16 }
  0xab   : > { %p11055_p10 = pnand %p11053_p4, %p12078_p8  ;;  %p11062_p0 = por %p11061_p13, %p11060_p11 }
  0xad   : > { %p11056_p12 = pneg %p11055_p10 }
  0xaf   : > { %p11063_p2 = pnand %p11062_p0, %p11056_p12 }
  0xb1   : > { %11066 = shalt.err (!%p11063_p2)
}
  0xb2   : > { %s14757_s6 = sld [smem:[#allocation80_spill]]  ;;  %s11812_s3 = smov [#allocation31]  }
  0xb3   : > { %s1078_s26 = sshll.u32 %s11812_s3, 4  ;;  %s1079_s26 = int_to_ptr.vmem [resolvable:$true] %s1078_s26 }
  0xb4   : > { %s11078_s15 = scalar_lea.vmem %s1079_s26, 16  ;;  %s11085_s23 = scalar_lea.vmem %s1079_s26, 32 }
  0xb5   : > { %p11079_p6 = scmp.ne.s32.totalorder %s1079_s26, %s11078_s15  ;;  %p11086_p1 = scmp.lt.s32.totalorder %s1079_s26, %s1079_s26 }
  0xb6   : > { %p11087_p3 = scmp.lt.s32.totalorder %s11085_s23, %s11078_s15 }
  0xb7   : > { %p11081_p9 = pnand %p11079_p6, %p12078_p8 }
  0xb8   : > { %10438 = dma.hbm_to_vmem [thread:$0]  (!%p12070_p7), %s14757_s6, 64, %s1055_s18, [#allocation29]  }
  0xb9   : > { %p11082_p5 = pneg %p11081_p9  ;;  %p11088_p4 = por %p11087_p3, %p11086_p1 }
  0xbb   : > { %p11089_p10 = pnand %p11088_p4, %p11082_p5 }
  0xbd   : > { %11092 = shalt.err (!%p11089_p10)
}
  0xbe   : > { %10444 = dma.hbm_to_vmem [thread:$0]  (!%p12070_p7), %s11927_s20, 16, %s1079_s26, [#allocation32]  }
  0xbf   : > { %s11813_s21 = smov [#allocation34]   ;;  %s11814_s18 = smov [#allocation37]  }
  0xc0   : > { %s1102_s12 = sshll.u32 %s11813_s21, 4  ;;  %s1132_s5 = sshll.u32 %s11814_s18, 4  ;;  %s1103_s12 = int_to_ptr.vmem [resolvable:$true] %s1102_s12  ;;  %s1133_s5 = int_to_ptr.vmem [resolvable:$true] %s1132_s5 }
  0xc1   : > { %s11104_s16 = scalar_lea.vmem %s1103_s12, 1024  ;;  %p11112_p0 = scmp.lt.s32.totalorder %s1103_s12, %s1103_s12 }
  0xc2   : > { %p11105_p12 = scmp.ne.s32.totalorder %s1103_s12, %s11104_s16  ;;  %p11113_p2 = scmp.lt.s32.totalorder %s11104_s16, %s11104_s16 }
  0xc4   : > { %p11107_p11 = pnand %p11105_p12, %p12078_p8  ;;  %p11114_p6 = por %p11113_p2, %p11112_p0 }
  0xc6   : > { %p11108_p13 = pneg %p11107_p11 }
  0xc8   : > { %p11115_p9 = pnand %p11114_p6, %p11108_p13 }
  0xca   : > { %11118 = shalt.err (!%p11115_p9)
}
  0xcb   : > { %s14647_s3 = smov 64   ;;  %s14758_s9 = sld [smem:[#allocation84_spill]] }
  0xcc   : > { %s14649_s26 = smov 4   ;;  %s11130_s15 = scalar_lea.vmem %s1133_s5, 16 }
  0xcd   : > { %p11131_p5 = scmp.ne.s32.totalorder %s1133_s5, %s11130_s15  ;;  %s11137_s23 = scalar_lea.vmem %s1133_s5, 32 }
  0xce   : > { %p11138_p4 = scmp.lt.s32.totalorder %s1133_s5, %s1133_s5  ;;  %p11139_p10 = scmp.lt.s32.totalorder %s11137_s23, %s11130_s15 }
  0xcf   : > { %p11133_p1 = pnand %p11131_p5, %p12078_p8 }
  0xd0   : > { %p11140_p12 = por %p11139_p10, %p11138_p4 }
  0xd1   : > { %10450 = dma.hbm_to_vmem [thread:$0]  (!%p12070_p7), %s14758_s9, 1024, %s1103_s12, [#allocation35], %s14647_s3, %s14647_s3, %s14649_s26  }
  0xd2   : > { %p11134_p3 = pneg %p11133_p1 }
  0xd4   : > { %p11141_p11 = pnand %p11140_p12, %p11134_p3 }
  0xd6   : > { %11144 = shalt.err (!%p11141_p11)
}
  0xd7   : > { %s14759_s4 = sld [smem:[#allocation87_spill]]  ;;  %s11817_s21 = smov [#allocation40]  }
  0xd8   : > { %s1156_s18 = sshll.u32 %s11817_s21, 4  ;;  %s11818_s16 = smov [#allocation43]   ;;  %s1157_s18 = int_to_ptr.vmem [resolvable:$true] %s1156_s18 }
  0xd9   : > { %s1180_s12 = sshll.u32 %s11818_s16, 4  ;;  %s11156_s3 = scalar_lea.vmem %s1157_s18, 1024  ;;  %s1181_s12 = int_to_ptr.vmem [resolvable:$true] %s1180_s12 }
  0xda   : > { %p11157_p13 = scmp.ne.s32.totalorder %s1157_s18, %s11156_s3  ;;  %p11164_p6 = scmp.lt.s32.totalorder %s1157_s18, %s1157_s18 }
  0xdb   : > { %p11165_p9 = scmp.lt.s32.totalorder %s11156_s3, %s11156_s3 }
  0xdc   : > { %p11159_p0 = pnand %p11157_p13, %p12078_p8 }
  0xdd   : > { %10456 = dma.hbm_to_vmem [thread:$0]  (!%p12070_p7), %s14759_s4, 16, %s1133_s5, [#allocation38]  }
  0xde   : > { %p11160_p2 = pneg %p11159_p0  ;;  %p11166_p5 = por %p11165_p9, %p11164_p6 }
  0xe0   : > { %p11167_p1 = pnand %p11166_p5, %p11160_p2 }
  0xe2   : > { %11170 = shalt.err (!%p11167_p1)
}
  0xe3   : > { %s14760_s5 = smov 64   ;;  %s11182_s15 = scalar_lea.vmem %s1181_s12, 1024 }
  0xe4   : > { %10462 = dma.hbm_to_vmem [thread:$0]  (!%p12070_p7), %s11972_s27, 1024, %s1157_s18, [#allocation41], %s14760_s5, %s14760_s5, %s14649_s26  }
  0xe5   : > { %p11183_p3 = scmp.ne.s32.totalorder %s1181_s12, %s11182_s15  ;;  %p11190_p12 = scmp.lt.s32.totalorder %s1181_s12, %s1181_s12 }
  0xe6   : > { %p11191_p11 = scmp.lt.s32.totalorder %s11182_s15, %s11182_s15 }
  0xe7   : > { %p11185_p4 = pnand %p11183_p3, %p12078_p8 }
  0xe8   : > { %p11192_p13 = por %p11191_p11, %p11190_p12 }
  0xe9   : > { %p11186_p10 = pneg %p11185_p4 }
  0xeb   : > { %p11193_p0 = pnand %p11192_p13, %p11186_p10 }
  0xed   : > { %11196 = shalt.err (!%p11193_p0)
}
  0xee   : > { %10468 = dma.hbm_to_vmem [thread:$0]  (!%p12070_p7), %s11982_s30, 1024, %s1181_s12, [#allocation44], %s14760_s5, %s14760_s5, %s14649_s26  }
  0xef   : > { %s11819_s3 = smov [#allocation46]  }
  0xf0   : > { %s1208_s23 = sshll.u32 %s11819_s3, 4  ;;  %s1209_s23 = int_to_ptr.vmem [resolvable:$true] %s1208_s23 }
  0xf1   : > { %s11208_s21 = scalar_lea.vmem %s1209_s23, 16  ;;  %s11215_s18 = scalar_lea.vmem %s1209_s23, 32 }
  0xf2   : > { %p11209_p2 = scmp.ne.s32.totalorder %s1209_s23, %s11208_s21  ;;  %p11216_p5 = scmp.lt.s32.totalorder %s1209_s23, %s1209_s23 }
  0xf3   : > { %p11217_p1 = scmp.lt.s32.totalorder %s11215_s18, %s11208_s21 }
  0xf4   : > { %p11211_p6 = pnand %p11209_p2, %p12078_p8 }
  0xf5   : > { %p11218_p3 = por %p11217_p1, %p11216_p5 }
  0xf6   : > { %p11212_p9 = pneg %p11211_p6 }
  0xf8   : > { %p11219_p4 = pnand %p11218_p3, %p11212_p9 }
  0xfa   : > { %11222 = shalt.err (!%p11219_p4)
}
  0xfb   : > { %10474 = dma.hbm_to_vmem [thread:$0]  (!%p12070_p7), %s11997_s19, 16, %s1209_s23, [#allocation47]  }
  0xfc   : > { %s11820_s16 = smov [#allocation49]   ;;  %s11821_s15 = smov [#allocation7]  }
  0xfd   : > { %s1234_s12 = sshll.u32 %s11820_s16, 4  ;;  %s907_s3 = sshll.u32 %s11821_s15, 4  ;;  %s1235_s12 = int_to_ptr.vmem [resolvable:$true] %s1234_s12  ;;  %s908_s3 = int_to_ptr.vmem [resolvable:$true] %s907_s3 }
  0xfe   : > { %s11234_s26 = scalar_lea.vmem %s1235_s12, 4096  ;;  %p11242_p13 = scmp.lt.s32.totalorder %s1235_s12, %s1235_s12 }
  0xff   : > { %p11235_p10 = scmp.ne.s32.totalorder %s1235_s12, %s11234_s26  ;;  %p11243_p0 = scmp.lt.s32.totalorder %s11234_s26, %s11234_s26 }
 0x101   : > { %p11237_p12 = pnand %p11235_p10, %p12078_p8  ;;  %p11244_p2 = por %p11243_p0, %p11242_p13 }
 0x103   : > { %p11238_p11 = pneg %p11237_p12 }
 0x105   : > { %p11245_p6 = pnand %p11244_p2, %p11238_p11 }
 0x107   : > { %11248 = shalt.err (!%p11245_p6)
}
 0x108   : > { %s14651_s21 = smov 256   ;;  %s14761_s8 = sld [smem:[#allocation95_spill]] }
 0x109   : > { %s14652_s23 = smov 16   ;;  %s11260_s18 = scalar_lea.vmem %s908_s3, 8192 }
 0x10a   : > { %p11261_p9 = scmp.ne.s32.totalorder %s908_s3, %s11260_s18  ;;  %p11268_p3 = scmp.lt.s32.totalorder %s908_s3, %s908_s3 }
 0x10b   : > { %p11269_p4 = scmp.lt.s32.totalorder %s11260_s18, %s11260_s18 }
 0x10c   : > { %p11263_p5 = pnand %p11261_p9, %p12078_p8 }
 0x10d   : > { %p11270_p10 = por %p11269_p4, %p11268_p3 }
 0x10e   : > { %10480 = dma.hbm_to_vmem [thread:$0]  (!%p12070_p7), %s14761_s8, 4096, %s1235_s12, [#allocation50], %s14651_s21, %s14651_s21, %s14652_s23  }
 0x10f   : > { %p11264_p1 = pneg %p11263_p5 }
 0x111   : > { %p11271_p12 = pnand %p11270_p10, %p11264_p1 }
 0x113   : > { %11274 = shalt.err (!%p11271_p12)
}
 0x114   : > { %s14762_s26 = smov 8   ;;  %s14763_s16 = smov 128  }
 0x115   : > { %s14764_s15 = sld [smem:[#allocation70_spill]]  ;;  %s11824_s12 = smov [#allocation15]  }
 0x116   : > { %s944_s21 = sshll.u32 %s11824_s12, 4  ;;  %s11825_s23 = smov [#allocation18]   ;;  %s945_s21 = int_to_ptr.vmem [resolvable:$true] %s944_s21 }
 0x117   : > { %s968_s4 = sshll.u32 %s11825_s23, 4  ;;  %s11286_s6 = scalar_lea.vmem %s945_s21, 1024  ;;  %s969_s4 = int_to_ptr.vmem [resolvable:$true] %s968_s4 }
 0x118   : > { %p11287_p11 = scmp.ne.s32.totalorder %s945_s21, %s11286_s6  ;;  %p11294_p2 = scmp.lt.s32.totalorder %s945_s21, %s945_s21 }
 0x119   : > { %p11295_p6 = scmp.lt.s32.totalorder %s11286_s6, %s11286_s6 }
 0x11a   : > { %p11289_p13 = pnand %p11287_p11, %p12078_p8 }
 0x11b   : > { %10402 = dma.hbm_to_vmem [thread:$0]  (!%p12070_p7), %s14764_s15, 8192, %s908_s3, [#allocation8], %s14763_s16, %s14763_s16, %s14762_s26  }
 0x11c   : > { %p11290_p0 = pneg %p11289_p13  ;;  %p11296_p9 = por %p11295_p6, %p11294_p2 }
 0x11e   : > { %p11297_p5 = pnand %p11296_p9, %p11290_p0 }
 0x120   : > { %11300 = shalt.err (!%p11297_p5)
}
 0x121   : > { %s14765_s18 = smov 4   ;;  %s14766_s3 = sld [smem:[#allocation73_spill]] }
 0x122   : > { %s11312_s23 = scalar_lea.vmem %s969_s4, 1024  ;;  %p11320_p10 = scmp.lt.s32.totalorder %s969_s4, %s969_s4 }
 0x123   : > { %p11313_p1 = scmp.ne.s32.totalorder %s969_s4, %s11312_s23  ;;  %p11321_p12 = scmp.lt.s32.totalorder %s11312_s23, %s11312_s23 }
 0x125   : > { %p11315_p3 = pnand %p11313_p1, %p12078_p8  ;;  %p11322_p11 = por %p11321_p12, %p11320_p10 }
 0x127   : > { %10411 = dma.hbm_to_vmem [thread:$0]  (!%p12070_p7), %s14766_s3, 1024, %s945_s21, [#allocation14], %s14760_s5, %s14760_s5, %s14765_s18  }
 0x128   : > { %p11316_p4 = pneg %p11315_p3 }
 0x12a   : > { %p11323_p13 = pnand %p11322_p11, %p11316_p4 }
 0x12c   : > { %11326 = shalt.err (!%p11323_p13)
}
 0x12d   : > { %s14767_s6 = sld [smem:[#allocation74_spill]]  ;;  %s11826_s21 = smov [#allocation21]  }
 0x12e   : > { %s992_s15 = sshll.u32 %s11826_s21, 4  ;;  %s11827_s12 = smov [#allocation24]   ;;  %s993_s15 = int_to_ptr.vmem [resolvable:$true] %s992_s15 }
 0x12f   : > { %s1016_s3 = sshll.u32 %s11827_s12, 4  ;;  %s11338_s8 = scalar_lea.vmem %s993_s15, 256  ;;  %s1017_s3 = int_to_ptr.vmem [resolvable:$true] %s1016_s3 }
 0x130   : > { %p11339_p0 = scmp.ne.s32.totalorder %s993_s15, %s11338_s8  ;;  %p11346_p9 = scmp.lt.s32.totalorder %s993_s15, %s993_s15 }
 0x131   : > { %p11347_p5 = scmp.lt.s32.totalorder %s11338_s8, %s11338_s8 }
 0x132   : > { %p11341_p2 = pnand %p11339_p0, %p12078_p8 }
 0x133   : > { %10417 = dma.hbm_to_vmem [thread:$0]  (!%p12070_p7), %s14767_s6, 1024, %s969_s4, [#allocation17], %s14760_s5, %s14760_s5, %s14765_s18  }
 0x134   : > { %p11342_p6 = pneg %p11341_p2  ;;  %p11348_p1 = por %p11347_p5, %p11346_p9 }
 0x136   : > { %p11349_p3 = pnand %p11348_p1, %p11342_p6 }
 0x138   : > { %11352 = shalt.err (!%p11349_p3)
}
 0x139   : > { %s14768_s4 = sld [smem:[#allocation76_spill]]  ;;  %s11364_s23 = scalar_lea.vmem %s1017_s3, 1024 }
 0x13a   : > { %p11365_p4 = scmp.ne.s32.totalorder %s1017_s3, %s11364_s23  ;;  %p11372_p11 = scmp.lt.s32.totalorder %s1017_s3, %s1017_s3 }
 0x13b   : > { %p11373_p13 = scmp.lt.s32.totalorder %s11364_s23, %s11364_s23 }
 0x13c   : > { %p11367_p10 = pnand %p11365_p4, %p12078_p8 }
 0x13d   : > { %p11374_p0 = por %p11373_p13, %p11372_p11 }
 0x13e   : > { %p11368_p12 = pneg %p11367_p10 }
 0x13f   : > { %10423 = dma.hbm_to_vmem [thread:$0]  (!%p12070_p7), %s14768_s4, 256, %s993_s15, [#allocation20], %s14763_s16, %s14763_s16, %s14762_s26  }
 0x140   : > { %p11375_p2 = pnand %p11374_p0, %p11368_p12 }
 0x142   : > { %11378 = shalt.err (!%p11375_p2)
}
 0x143   : > { %s14769_s8 = sld [smem:[#allocation78_spill]]  ;;  %s11828_s26 = smov [#allocation27]  }
 0x144   : > { %s1040_s16 = sshll.u32 %s11828_s26, 4  ;;  %s11829_s6 = smov [#allocation30]   ;;  %s1041_s16 = int_to_ptr.vmem [resolvable:$true] %s1040_s16 }
 0x145   : > { %s1064_s21 = sshll.u32 %s11829_s6, 4  ;;  %s11390_s15 = scalar_lea.vmem %s1041_s16, 4096  ;;  %s1065_s21 = int_to_ptr.vmem [resolvable:$true] %s1064_s21 }
 0x146   : > { %p11391_p6 = scmp.ne.s32.totalorder %s1041_s16, %s11390_s15  ;;  %p11398_p1 = scmp.lt.s32.totalorder %s1041_s16, %s1041_s16 }
 0x147   : > { %p11399_p3 = scmp.lt.s32.totalorder %s11390_s15, %s11390_s15 }
 0x148   : > { %p11393_p9 = pnand %p11391_p6, %p12078_p8 }
 0x149   : > { %10429 = dma.hbm_to_vmem [thread:$0]  (!%p12070_p7), %s14769_s8, 1024, %s1017_s3, [#allocation23], %s14760_s5, %s14760_s5, %s14765_s18  }
 0x14a   : > { %p11394_p5 = pneg %p11393_p9  ;;  %p11400_p4 = por %p11399_p3, %p11398_p1 }
 0x14c   : > { %p11401_p10 = pnand %p11400_p4, %p11394_p5 }
 0x14e   : > { %11404 = shalt.err (!%p11401_p10)
}
 0x14f   : > { %s14770_s12 = smov 16   ;;  %s14771_s4 = smov 256  }
 0x150   : > { %s14772_s3 = sld [smem:[#allocation79_spill]]  ;;  %s11416_s23 = scalar_lea.vmem %s1065_s21, 4096 }
 0x151   : > { %p11417_p12 = scmp.ne.s32.totalorder %s1065_s21, %s11416_s23  ;;  %p11424_p0 = scmp.lt.s32.totalorder %s1065_s21, %s1065_s21 }
 0x152   : > { %p11425_p2 = scmp.lt.s32.totalorder %s11416_s23, %s11416_s23 }
 0x153   : > { %p11419_p11 = pnand %p11417_p12, %p12078_p8 }
 0x154   : > { %p11426_p6 = por %p11425_p2, %p11424_p0 }
 0x155   : > { %p11420_p13 = pneg %p11419_p11 }
 0x156   : > { %10435 = dma.hbm_to_vmem [thread:$0]  (!%p12070_p7), %s14772_s3, 4096, %s1041_s16, [#allocation26], %s14771_s4, %s14771_s4, %s14770_s12  }
 0x157   : > { %p11427_p9 = pnand %p11426_p6, %p11420_p13 }
 0x159   : > { %11430 = shalt.err (!%p11427_p9)
}
 0x15a   : > { %s14773_s8 = sld [smem:[#allocation81_spill]]  ;;  %s11830_s26 = smov [#allocation33]  }
 0x15b   : > { %s1092_s16 = sshll.u32 %s11830_s26, 4  ;;  %s11831_s6 = smov [#allocation36]   ;;  %s1093_s16 = int_to_ptr.vmem [resolvable:$true] %s1092_s16 }
 0x15c   : > { %s1118_s15 = sshll.u32 %s11831_s6, 4  ;;  %s11442_s12 = scalar_lea.vmem %s1093_s16, 16  ;;  %s1119_s15 = int_to_ptr.vmem [resolvable:$true] %s1118_s15 }
 0x15d   : > { %p11443_p5 = scmp.ne.s32.totalorder %s1093_s16, %s11442_s12  ;;  %s11449_s4 = scalar_lea.vmem %s1093_s16, 32 }
 0x15e   : > { %p11450_p4 = scmp.lt.s32.totalorder %s1093_s16, %s1093_s16  ;;  %p11451_p10 = scmp.lt.s32.totalorder %s11449_s4, %s11442_s12 }
 0x15f   : > { %p11445_p1 = pnand %p11443_p5, %p12078_p8 }
 0x160   : > { %10441 = dma.hbm_to_vmem [thread:$0]  (!%p12070_p7), %s14773_s8, 4096, %s1065_s21, [#allocation29], %s14760_s5, %s14760_s5, %s14765_s18  }
 0x161   : > { %p11446_p3 = pneg %p11445_p1  ;;  %p11452_p12 = por %p11451_p10, %p11450_p4 }
 0x163   : > { %p11453_p11 = pnand %p11452_p12, %p11446_p3 }
 0x165   : > { %11456 = shalt.err (!%p11453_p11)
}
 0x166   : > { %s14774_s3 = sld [smem:[#allocation83_spill]]  ;;  %s11468_s21 = scalar_lea.vmem %s1119_s15, 1024 }
 0x167   : > { %p11469_p13 = scmp.ne.s32.totalorder %s1119_s15, %s11468_s21  ;;  %p11476_p6 = scmp.lt.s32.totalorder %s1119_s15, %s1119_s15 }
 0x168   : > { %p11477_p9 = scmp.lt.s32.totalorder %s11468_s21, %s11468_s21 }
 0x169   : > { %p11471_p0 = pnand %p11469_p13, %p12078_p8 }
 0x16a   : > { %p11478_p5 = por %p11477_p9, %p11476_p6 }
 0x16b   : > { %p11472_p2 = pneg %p11471_p0 }
 0x16c   : > { %10447 = dma.hbm_to_vmem [thread:$0]  (!%p12070_p7), %s14774_s3, 16, %s1093_s16, [#allocation32]  }
 0x16d   : > { %p11479_p1 = pnand %p11478_p5, %p11472_p2 }
 0x16f   : > { %11482 = shalt.err (!%p11479_p1)
}
 0x170   : > { %s14775_s23 = sld [smem:[#allocation86_spill]]  ;;  %s11832_s8 = smov [#allocation39]  }
 0x171   : > { %s1146_s26 = sshll.u32 %s11832_s8, 4  ;;  %s11833_s16 = smov [#allocation42]   ;;  %s1147_s26 = int_to_ptr.vmem [resolvable:$true] %s1146_s26 }
 0x172   : > { %s1170_s6 = sshll.u32 %s11833_s16, 4  ;;  %s11494_s12 = scalar_lea.vmem %s1147_s26, 16  ;;  %s1171_s6 = int_to_ptr.vmem [resolvable:$true] %s1170_s6 }
 0x173   : > { %p11495_p3 = scmp.ne.s32.totalorder %s1147_s26, %s11494_s12  ;;  %s11501_s4 = scalar_lea.vmem %s1147_s26, 32 }
 0x174   : > { %p11502_p12 = scmp.lt.s32.totalorder %s1147_s26, %s1147_s26  ;;  %p11503_p11 = scmp.lt.s32.totalorder %s11501_s4, %s11494_s12 }
 0x175   : > { %p11497_p4 = pnand %p11495_p3, %p12078_p8 }
 0x176   : > { %10453 = dma.hbm_to_vmem [thread:$0]  (!%p12070_p7), %s14775_s23, 1024, %s1119_s15, [#allocation35], %s14760_s5, %s14760_s5, %s14765_s18  }
 0x177   : > { %p11498_p10 = pneg %p11497_p4  ;;  %p11504_p13 = por %p11503_p11, %p11502_p12 }
 0x179   : > { %p11505_p0 = pnand %p11504_p13, %p11498_p10 }
 0x17b   : > { %11508 = shalt.err (!%p11505_p0)
}
 0x17c   : > { %s14776_s3 = sld [smem:[#allocation89_spill]]  ;;  %s11520_s15 = scalar_lea.vmem %s1171_s6, 16 }
 0x17d   : > { %p11521_p2 = scmp.ne.s32.totalorder %s1171_s6, %s11520_s15  ;;  %s11527_s21 = scalar_lea.vmem %s1171_s6, 32 }
 0x17e   : > { %p11528_p5 = scmp.lt.s32.totalorder %s1171_s6, %s1171_s6  ;;  %p11529_p1 = scmp.lt.s32.totalorder %s11527_s21, %s11520_s15 }
 0x17f   : > { %p11523_p6 = pnand %p11521_p2, %p12078_p8 }
 0x180   : > { %p11530_p3 = por %p11529_p1, %p11528_p5 }
 0x181   : > { %p11524_p9 = pneg %p11523_p6 }
 0x182   : > { %10459 = dma.hbm_to_vmem [thread:$0]  (!%p12070_p7), %s14776_s3, 16, %s1147_s26, [#allocation38]  }
 0x183   : > { %p11531_p4 = pnand %p11530_p3, %p11524_p9 }
 0x185   : > { %11534 = shalt.err (!%p11531_p4)
}
 0x186   : > { %s14777_s23 = sld [smem:[#allocation90_spill]]  ;;  %s11834_s8 = smov [#allocation45]  }
 0x187   : > { %s1194_s16 = sshll.u32 %s11834_s8, 4  ;;  %s11835_s26 = smov [#allocation48]   ;;  %s1195_s16 = int_to_ptr.vmem [resolvable:$true] %s1194_s16 }
 0x188   : > { %s1218_s12 = sshll.u32 %s11835_s26, 4  ;;  %s11546_s4 = scalar_lea.vmem %s1195_s16, 16  ;;  %s1219_s12 = int_to_ptr.vmem [resolvable:$true] %s1218_s12 }
 0x189   : > { %p11547_p10 = scmp.ne.s32.totalorder %s1195_s16, %s11546_s4  ;;  %s11553_s3 = scalar_lea.vmem %s1195_s16, 32 }
 0x18a   : > { %p11554_p13 = scmp.lt.s32.totalorder %s1195_s16, %s1195_s16  ;;  %p11555_p0 = scmp.lt.s32.totalorder %s11553_s3, %s11546_s4 }
 0x18b   : > { %p11549_p12 = pnand %p11547_p10, %p12078_p8 }
 0x18c   : > { %10465 = dma.hbm_to_vmem [thread:$0]  (!%p12070_p7), %s14777_s23, 16, %s1171_s6, [#allocation41]  }
 0x18d   : > { %p11550_p11 = pneg %p11549_p12  ;;  %p11556_p2 = por %p11555_p0, %p11554_p13 }
 0x18f   : > { %p11557_p6 = pnand %p11556_p2, %p11550_p11 }
 0x191   : > { %11560 = shalt.err (!%p11557_p6)
}
 0x192   : > { %s14778_s15 = sld [smem:[#allocation91_spill]]  ;;  %s11572_s6 = scalar_lea.vmem %s1219_s12, 1024 }
 0x193   : > { %p11573_p9 = scmp.ne.s32.totalorder %s1219_s12, %s11572_s6  ;;  %p11580_p3 = scmp.lt.s32.totalorder %s1219_s12, %s1219_s12 }
 0x194   : > { %p11581_p4 = scmp.lt.s32.totalorder %s11572_s6, %s11572_s6 }
 0x195   : > { %p11575_p5 = pnand %p11573_p9, %p12078_p8 }
 0x196   : > { %p11582_p10 = por %p11581_p4, %p11580_p3 }
 0x197   : > { %p11576_p1 = pneg %p11575_p5 }
 0x198   : > { %10471 = dma.hbm_to_vmem [thread:$0]  (!%p12070_p7), %s14778_s15, 16, %s1195_s16, [#allocation44]  }
 0x199   : > { %p11583_p12 = pnand %p11582_p10, %p11576_p1 }
 0x19b   : > { %11586 = shalt.err (!%p11583_p12)
}
 0x19c   : > { %s14779_s21 = sld [smem:[#allocation93_spill]]  ;;  %s11836_s23 = smov [#allocation51]  }
 0x19d   : > { %s1250_s8 = sshll.u32 %s11836_s23, 4  ;;  %s1251_s8 = int_to_ptr.vmem [resolvable:$true] %s1250_s8 }
 0x19e   : > { %s11598_s16 = scalar_lea.vmem %s1251_s8, 4096  ;;  %p11606_p2 = scmp.lt.s32.totalorder %s1251_s8, %s1251_s8 }
 0x19f   : > { %p11599_p11 = scmp.ne.s32.totalorder %s1251_s8, %s11598_s16  ;;  %p11607_p6 = scmp.lt.s32.totalorder %s11598_s16, %s11598_s16 }
 0x1a1   : > { %p11601_p13 = pnand %p11599_p11, %p12078_p8  ;;  %p11608_p9 = por %p11607_p6, %p11606_p2 }
 0x1a2   : > { %10477 = dma.hbm_to_vmem [thread:$0]  (!%p12070_p7), %s14779_s21, 1024, %s1219_s12, [#allocation47], %s14760_s5, %s14760_s5, %s14765_s18  }
 0x1a3   : > { %p11602_p0 = pneg %p11601_p13 }
 0x1a5   : > { %p11609_p5 = pnand %p11608_p9, %p11602_p0 }
 0x1a7   : > { %11612 = shalt.err (!%p11609_p5)
}
 0x1a8   : > { %10483 = dma.hbm_to_vmem [thread:$0]  (!%p12070_p7), %s12022_s29, 4096, %s1251_s8, [#allocation50], %s14760_s5, %s14760_s5, %s14765_s18  }
 0x1a9   : > { %s9408_s22 = sadd.s32 4294967294, %s11765_s2   ;;  %s12275_s11 = sadd.s32 1, %s11765_s2  }
 0x1aa   : > { %s128_s26 = ssub.s32 %s11765_s2, %s12275_s11  ;;  %s131_s12 = sadd.s32 1, %s11761_s1 }
 0x1ab   : > { %p129_p8 = scmp.eq.s32.totalorder %s128_s26, 0  ;;  %s14780_s4 = sld [smem:[#allocation71_spill]] }
 0x1ac   : > { %p138_p1 = scmp.ne.s32.totalorder %s11761_s1, %s11757_s28  ;;  %p139_p3 = scmp.eq.s32.totalorder %s11765_s2, 0 }
 0x1ad   : > { %p144_p4 = scmp.ne.s32.totalorder %s11757_s28, %s11753_s0  ;;  %p14782_p7 = scmp.eq.s32.totalorder %s12055_s7, 0 }
 0x1ae   : > { %s12286_s3 = scalar_select %p129_p8, %s11761_s1, %s131_s12  }
 0x1af   : > { %p12288_p10 = por %p139_p3, %p138_p1  ;;  %p12294_p12 = por %p14782_p7, %p144_p4 }
 0x1b0   : > { %p882_p11 = scmp.eq.s32.totalorder %s12055_s7, 1  ;;  %p888_p13 = scmp.eq.s32.totalorder %s9408_s22, 1 }
 0x1b1   : > { %s14783_s5 = scalar_select %p12294_p12, 1, 0 }
 0x1b2   : > { %p10520_p0 = scmp.lt.s32.totalorder %s11765_s2, 2  ;;  %s1267_s18 = sand.u32 1, %s11765_s2  }
 0x1b3   : > { %p12301_p2 = por %p882_p11, %p138_p1  ;;  %p12305_p6 = por %p888_p13, %p144_p4 }
 0x1b4   : > { %s1269_s23 = sand.u32 1, %s11761_s1   ;;  %s9440_s16 = sshll.u32 %s11765_s2, 5 }
 0x1b5   : > { %s14784_s6 = scalar_select %p12301_p2, 1, 0 }
 0x1b6   : > { %s14785_s21 = scalar_select %p12305_p6, 1, 0 }
 0x1b7   : > { %s9439_s8 = sshll.u32 %s1269_s23, 1  ;;  %s12312_s26 = scalar_lea.hbm %s14780_s4, %s9440_s16 }
 0x1b8   : > { %s1271_s22 = scalar_lea.vmem [#allocation10], %s9439_s8  ;;  %p12316_p9 = pnand %p10520_p0, %p12288_p10 }
 0x1b9   : > { %s1278_s12 = sshll.u32 %s1271_s22, 4  ;;  %s1268_s13 = scalar_lea.sflag [#allocation11], %s1267_s18  ;;  %s1279_s12 = int_to_ptr.vmem [resolvable:$true] %s1278_s12 }
 0x1ba   : > { %s14786_s9 = scalar_select %p12316_p9, 1, 0 }
 0x1bb   : > { %s11613_s14 = scalar_lea.hbm %s12312_s26, 32  ;;  %p11615_p8 = pneg %p12316_p9 }
 0x1bc   : > { %p11614_p5 = scmp.ne.s32.totalorder %s12312_s26, %s11613_s14  ;;  %s11618_s23 = scalar_lea.hbm %s14780_s4, 64 }
 0x1bd   : > { %p11619_p4 = scmp.lt.s32.totalorder %s12312_s26, %s14780_s4  ;;  %p11620_p7 = scmp.lt.s32.totalorder %s11618_s23, %s11613_s14 }
 0x1be   : > { %p11616_p1 = pnand %p11615_p8, %p11614_p5 }
 0x1bf   : > { %p11621_p11 = por %p11620_p7, %p11619_p4 }
 0x1c0   : > { %p11617_p3 = pneg %p11616_p1 }
 0x1c2   : > { %p11622_p13 = pnand %p11621_p11, %p11617_p3 }
 0x1c4   : > { %11625 = shalt.err (!%p11622_p13)
}
 0x1c5   : > { %s11626_s15 = scalar_lea.vmem %s1279_s12, 32  ;;  %s11837_s8 = smov [#allocation10]  }
 0x1c6   : > { %p11627_p10 = scmp.ne.s32.totalorder %s1279_s12, %s11626_s15  ;;  %s11631_s16 = sshll.u32 %s11837_s8, 4  ;;  %s11632_s16 = int_to_ptr.vmem [resolvable:$false] %s11631_s16 }
 0x1c7   : > { %s11633_s18 = scalar_lea.vmem %s11632_s16, 64  ;;  %p11634_p2 = scmp.lt.s32.totalorder %s1279_s12, %s11632_s16 }
 0x1c8   : > { %p11629_p0 = pnand %p11627_p10, %p11615_p8  ;;  %p11635_p12 = scmp.lt.s32.totalorder %s11633_s18, %s11626_s15 }
 0x1ca   : > { %p11630_p6 = pneg %p11629_p0  ;;  %p11636_p9 = por %p11635_p12, %p11634_p2 }
 0x1cc   : > { %p11637_p5 = pnand %p11636_p9, %p11630_p6 }
 0x1ce   : > { %11640 = shalt.err (!%p11637_p5)
}
 0x1cf   : > { %p14787_p1 = scmp.ne.s32.totalorder %s14786_s9, 0  ;;  %p14788_p3 = scmp.ne.s32.totalorder %s14751_s10, 0 }
 0x1d0   : > { %p14789_p4 = scmp.eq.s32.totalorder (!%p14788_p3), %s12055_s7, 0 }
 0x1d1   : > { %10487 = dma.hbm_to_vmem [thread:$0]  (!%p14787_p1), %s12312_s26, 32, %s1279_s12, %s1268_s13  }
 0x1d2   : > { %1287 = sbr.rel (%p14788_p3) target bundleno = 3481 (0xd99), region = 164 }
 0x1d7   : > { %11684 = dma.done.wait (%p14789_p4), [#allocation8], 8192   ;;  %p14790_p8 = pmov %p14789_p4 }
 0x1d8   : > { %s1293_s14 = sand.u32 1, %s12055_s7   ;;  %s1295_s22 = sand.u32 1, %s11757_s28  }
 0x1d9   : > { %11686 = vsyncadd (%p14790_p8), [#allocation8], 4294959104  ;;  %s12340_s23 = sshll.u32 %s1295_s22, 1  ;;  %s1294_s9 = scalar_lea.sflag [#allocation11], %s1293_s14 }
 0x1da   : > { %s1297_s13 = scalar_lea.vmem [#allocation10], %s12340_s23  ;;  %p14791_p12 = scmp.ne.s32.totalorder %s14783_s5, 0 }
 0x1dc   : > { %11688 = dma.done.wait (%p14791_p12), %s1294_s9, 32  }
 0x1dd   : > { %11690 = vsyncadd (%p14791_p12), %s1294_s9, 4294967264  ;;  %p14792_p2 = pmov %p14789_p4 }
 0x1df   : > { %11692 = dma.done.wait (%p14792_p2), [#allocation11], 256   ;;  %p14793_p6 = pmov %p14792_p2 }
 0x1e0   : > { %p14794_p9 = pmov %p14792_p2 }
 0x1e1   : > { %11694 = vsyncadd (%p14793_p6), [#allocation11], 4294967040 }
 0x1e2   : > { %11696 = dma.done.wait (%p14794_p9), [#allocation14], 1040   ;;  %p14795_p7 = pmov %p14792_p2 }
 0x1e3   : > { %p14796_p11 = pmov %p14792_p2 }
 0x1e4   : > { %11698 = vsyncadd (%p14795_p7), [#allocation14], 4294966256 }
 0x1e5   : > { %11700 = dma.done.wait (%p14796_p11), [#allocation17], 1040   ;;  %p14797_p13 = pmov %p14792_p2 }
 0x1e6   : > { %p14798_p10 = pmov %p14792_p2 }
 0x1e7   : > { %11702 = vsyncadd (%p14797_p13), [#allocation17], 4294966256 }
 0x1e8   : > { %11704 = dma.done.wait (%p14798_p10), [#allocation20], 272   ;;  %p14799_p0 = pmov %p14792_p2 }
 0x1ea   : > { %11706 = vsyncadd (%p14799_p0), [#allocation20], 4294967024  ;;  %p14800_p5 = pmov %p14799_p0 }
 0x1eb   : > { %p14801_p1 = pmov %p14799_p0 }
 0x1ec   : > { %11708 = dma.done.wait (%p14800_p5), [#allocation23], 1040  }
 0x1ed   : > { %11710 = vsyncadd (%p14801_p1), [#allocation23], 4294966256  ;;  %p14802_p3 = pmov %p14799_p0 }
 0x1ee   : > { %p14803_p4 = pmov %p14799_p0 }
 0x1ef   : > { %11712 = dma.done.wait (%p14802_p3), [#allocation26], 4112  }
 0x1f0   : > { %11714 = vsyncadd (%p14803_p4), [#allocation26], 4294963184  ;;  %p14804_p8 = pmov %p14799_p0 }
 0x1f1   : > { %p14805_p12 = pmov %p14799_p0 }
 0x1f2   : > { %11716 = dma.done.wait (%p14804_p8), [#allocation29], 4160  }
 0x1f3   : > { %11718 = vsyncadd (%p14805_p12), [#allocation29], 4294963136  ;;  %p14806_p2 = pmov %p14799_p0 }
 0x1f4   : > { %p14807_p6 = pmov %p14799_p0 }
 0x1f5   : > { %11720 = dma.done.wait (%p14806_p2), [#allocation32], 32  }
 0x1f6   : > { %11722 = vsyncadd (%p14807_p6), [#allocation32], 4294967264  ;;  %p14808_p9 = pmov %p14799_p0 }
 0x1f7   : > { %p14809_p7 = pmov %p14799_p0 }
 0x1f8   : > { %11724 = dma.done.wait (%p14808_p9), [#allocation35], 2048  }
 0x1f9   : > { %11726 = vsyncadd (%p14809_p7), [#allocation35], 4294965248  ;;  %p14810_p11 = pmov %p14799_p0 }
 0x1fa   : > { %p14811_p13 = pmov %p14799_p0 }
 0x1fb   : > { %11728 = dma.done.wait (%p14810_p11), [#allocation38], 32  }
 0x1fc   : > { %11730 = vsyncadd (%p14811_p13), [#allocation38], 4294967264  ;;  %p14812_p10 = pmov %p14799_p0 }
 0x1fe   : > { %11732 = dma.done.wait (%p14812_p10), [#allocation41], 1040  }
 0x1ff   : > { %11734 = vsyncadd (%p14799_p0), [#allocation41], 4294966256  ;;  %p14813_p5 = pmov %p14799_p0 }
 0x200   : > { %p14814_p1 = pmov %p14799_p0 }
 0x201   : > { %11736 = dma.done.wait (%p14813_p5), [#allocation44], 1040  }
 0x202   : > { %11738 = vsyncadd (%p14814_p1), [#allocation44], 4294966256  ;;  %p14815_p3 = pmov %p14799_p0 }
 0x203   : > { %p14816_p4 = pmov %p14799_p0 }
 0x204   : > { %11740 = dma.done.wait (%p14815_p3), [#allocation47], 1040  }
 0x205   : > { %11742 = vsyncadd (%p14816_p4), [#allocation47], 4294966256  ;;  %p14817_p8 = pmov %p14799_p0 }
 0x206   : > { %p14818_p12 = pmov %p14799_p0 }
 0x207   : > { %11744 = dma.done.wait (%p14817_p8), [#allocation50], 8192  }
 0x208   : > { %11746 = vsyncadd (%p14818_p12), [#allocation50], 4294959104  ;;  %s12404_s10 = scalar_lea.vmem [#allocation52], %s12340_s23  ;;  %p14819_p2 = scmp.ne.s32.totalorder %s12055_s7, 0 }
 0x20a   : > { %1498 = sbr.rel (%p14819_p2) target bundleno = 1764 (0x6e4), region = 284 }
 0x20f   : > { %v12408_v0 = vld [vmem:[#allocation15 + $0x38] sm:$0xff]   ;;  %v2326_v1 = vlaneseq  ;;  %v12410_v2 = vld [vmem:[#allocation15 + $0x30] sm:$0xff]   ;;  %v11838_v3 = vmov 0.0   ;;  %v10659_v5 = vld [vmem:[#allocation15 + $0x28] sm:$0xff]   ;;  %vm4671_vm0 = vcmask 1041409  }
 0x210   : > { %2095 = vst [vmem:[#allocation3] sm:$0xff] %v11838_v3  ;;  %2096 = vst [vmem:[#allocation3 + $0x8] sm:$0x1] %v11838_v3  ;;  %10039 = vmatprep.subr.bf16.mxu0 %v12408_v0  ;;  %v10660_v6 = vld [vmem:[#allocation15 + $0x20] sm:$0xff]   ;;  %v10661_v25 = vld [vmem:[#allocation15 + $0x18] sm:$0xff]  }
 0x211   : > { %2099 = vst [vmem:[#allocation3 + $0x10] sm:$0x1] %v11838_v3  ;;  %2100 = vst [vmem:[#allocation3 + $0x20] sm:$0x1] %v11838_v3  ;;  %v12492_v4 = vshrl.u32 %v2326_v1, 7  ;;  %10040 = vmatpush3.bf16.msra.mxu0 %v12408_v0  ;;  %v1563_v26 = vld [vmem:[#allocation12] sm:$0xff] }
 0x212   : > { %2164 = vst [vmem:[#allocation4] sm:$0xff] %v11838_v3  ;;  %2246 = vst [vmem:[#allocation5] sm:$0x1] %v11838_v3  ;;  %10041 = vmatprep.subr.bf16.mxu0 %v12410_v2  ;;  %v9473_v11 = vld.sshfl [vmem:[#allocation7] sm:$0xff pattern:$0x75316420] }
 0x213   : > { %2247 = vst [vmem:[#allocation5 + $0x10] sm:$0x1] %v11838_v3  ;;  %2097 = vst [vmem:[#allocation3 + $0x90] sm:$0xff] %v11838_v3  ;;  %v12497_v7 = vsub.s32 0, %v12492_v4  ;;  %v12500_v8 = vsub.s32 1, %v12492_v4  ;;  %v12504_v9 = vsub.s32 2, %v12492_v4 }
 0x214   : > { %2098 = vst [vmem:[#allocation3 + $0x98] sm:$0x1] %v11838_v3  ;;  %2101 = vst [vmem:[#allocation3 + $0x30] sm:$0x1] %v11838_v3  ;;  %v12507_v10 = vsub.s32 3, %v12492_v4  ;;  %v2536_v29 = vsub.s32 4, %v12492_v4 }
 0x215   : > { %2102 = vst [vmem:[#allocation3 + $0x40] sm:$0x1] %v11838_v3  ;;  %2103 = vst [vmem:[#allocation3 + $0x50] sm:$0x1] %v11838_v3  ;;  %10042 = vmatpush3.bf16.msra.mxu0 %v12410_v2  ;;  %v2588_v30 = vsub.s32 5, %v12492_v4  ;;  %v12525_v31 = vrot.slane %v1563_v26, %v12497_v7  ;;  %v12528_v32 = vrot.slane %v1563_v26, %v12500_v8  ;;  %v10662_v35 = vld [vmem:[#allocation15 + $0x10] sm:$0xff]  }
 0x216   : > { %2104 = vst [vmem:[#allocation3 + $0x60] sm:$0x1] %v11838_v3  ;;  %2105 = vst [vmem:[#allocation3 + $0x70] sm:$0x1] %v11838_v3  ;;  %10043 = vmatprep.subr.bf16.mxu0 %v10659_v5  ;;  %v12531_v34 = vrot.slane %v1563_v26, %v12504_v9  ;;  %v12536_v36 = vrot.slane %v1563_v26, %v12507_v10  ;;  %v12540_v37 = vrot.slane %v1563_v26, %v2536_v29  ;;  %v10665_v40 = vld [vmem:[#allocation18 + $0x38] sm:$0xff]  }
 0x217   : > { %2106 = vst [vmem:[#allocation3 + $0x80] sm:$0x1] %v11838_v3  ;;  %2107 = vst [vmem:[#allocation3 + $0xa0] sm:$0x1] %v11838_v3  ;;  %v2414_v33 = vld [vmem:[#allocation3 + $0x1] sm:$0xff]  ;;  %v2640_v38 = vsub.s32 6, %v12492_v4  ;;  %v12549_v45 = vrot.slane %v1563_v26, %v2588_v30  ;;  %10071 = vmatprep.subr.bf16.mxu1 %v10665_v40 }
 0x218   : > { %2108 = vst [vmem:[#allocation3 + $0xb0] sm:$0x1] %v11838_v3  ;;  %2109 = vst [vmem:[#allocation3 + $0xc0] sm:$0x1] %v11838_v3  ;;  %v2692_v39 = vsub.s32 7, %v12492_v4  ;;  %v1564_v41 = vld [vmem:[#allocation12 + $0x8] sm:$0xff]  ;;  %v2434_v44 = vmul.f32 %v12531_v34, %v2414_v33  ;;  %10072 = vmatpush3.bf16.msra.mxu1 %v10665_v40 }
 0x219   : > { %2110 = vst [vmem:[#allocation3 + $0xd0] sm:$0x1] %v11838_v3  ;;  %2111 = vst [vmem:[#allocation3 + $0xe0] sm:$0x1] %v11838_v3  ;;  %10044 = vmatpush3.bf16.msra.mxu0 %v10659_v5  ;;  %v2330_v42 = vmul.f32 0.0, %v12525_v31  ;;  %v2382_v43 = vmul.f32 0.0, %v12528_v32  ;;  %v12560_v54 = vrot.slane %v1563_v26, %v2640_v38 }
 0x21a   : > { %2112 = vst [vmem:[#allocation3 + $0xf0] sm:$0x1] %v11838_v3  ;;  %2113 = vst [vmem:[#allocation3 + $0x100] sm:$0x1] %v11838_v3  ;;  %10045 = vmatprep.subr.bf16.mxu0 %v10660_v6  ;;  %v12564_v55 = vrot.slane %v1563_v26, %v2692_v39 }
 0x21b   : > { %2114 = vst [vmem:[#allocation3 + $0x110] sm:$0x1] %v11838_v3  ;;  %2165 = vst [vmem:[#allocation4 + $0x90] sm:$0xff] %v11838_v3  ;;  %v9474_v12 = vld.sshfl [vmem:[#allocation7 + $0x8] sm:$0xff pattern:$0x75316420]  ;;  %v12555_v52 = vadd.f32 %v2382_v43, %v2330_v42 }
 0x21c   : > { %2248 = vst [vmem:[#allocation5 + $0x20] sm:$0x1] %v11838_v3  ;;  %2249 = vst [vmem:[#allocation5 + $0x30] sm:$0x1] %v11838_v3  ;;  %v12509_v15 = vcombine.high %v9473_v11, %v9474_v12  ;;  %v2262_v16 = vcombine.low %v9473_v11, %v9474_v12  ;;  %v10663_v11 = vld [vmem:[#allocation15 + $0x8] sm:$0xff]   ;;  %v10664_v43 = vld [vmem:[#allocation15] sm:$0xff]  }
 0x21d   : > { %2250 = vst [vmem:[#allocation5 + $0x40] sm:$0x1] %v11838_v3  ;;  %2251 = vst [vmem:[#allocation5 + $0x50] sm:$0x1] %v11838_v3  ;;  %10046 = vmatpush3.bf16.msra.mxu0 %v10660_v6  ;;  %v2450_v1 = vadd.f32 %v2434_v44, %v12555_v52 }
 0x21e   : > { %2252 = vst [vmem:[#allocation5 + $0x60] sm:$0x1] %v11838_v3  ;;  %2253 = vst [vmem:[#allocation5 + $0x70] sm:$0x1] %v11838_v3  ;;  %10047 = vmatprep.subr.bf16.mxu0 %v10661_v25  ;;  %v2538_v53 = vmul.f32 %v12540_v37, %v2262_v16 }
 0x21f   : > { %2254 = vst [vmem:[#allocation5 + $0x90] sm:$0x1] %v11838_v3  ;;  %2255 = vst [vmem:[#allocation5 + $0xa0] sm:$0x1] %v11838_v3 }
 0x220   : > { %2256 = vst [vmem:[#allocation5 + $0xb0] sm:$0x1] %v11838_v3  ;;  %2257 = vst [vmem:[#allocation5 + $0xc0] sm:$0x1] %v11838_v3 }
 0x221   : > { %2258 = vst [vmem:[#allocation5 + $0xd0] sm:$0x1] %v11838_v3  ;;  %2259 = vst [vmem:[#allocation5 + $0xe0] sm:$0x1] %v11838_v3  ;;  %10048 = vmatpush3.bf16.msra.mxu0 %v10661_v25 }
 0x222   : > { %2260 = vst [vmem:[#allocation5 + $0xf0] sm:$0x1] %v11838_v3  ;;  %2261 = vst [vmem:[#allocation5 + $0x100] sm:$0x1] %v11838_v3  ;;  %10049 = vmatprep.subr.bf16.mxu0 %v10662_v35 }
 0x223   : > { %3220 = vst [vmem:[#allocation2] sm:$0xff] %v11838_v3  ;;  %3221 = vst [vmem:[#allocation2 + $0x8] sm:$0x3] %v11838_v3  ;;  %v9505_v13 = vld.sshfl [vmem:[#allocation7 + $0x10] sm:$0xff pattern:$0x75316420] }
 0x224   : > { %3222 = vst [vmem:[#allocation2 + $0xa0] sm:$0xff] %v11838_v3  ;;  %3223 = vst [vmem:[#allocation2 + $0xa8] sm:$0x3] %v11838_v3  ;;  %v9506_v14 = vld.sshfl [vmem:[#allocation7 + $0x18] sm:$0xff pattern:$0x75316420] }
 0x225   : > { %3225 = vst [vmem:[#allocation2 + $0x90] sm:$0xff] %v11838_v3  ;;  %3226 = vst [vmem:[#allocation2 + $0x98] sm:$0x3] %v11838_v3  ;;  %v9475_v17 = vld.sshfl [vmem:[#allocation7 + $0x20] sm:$0xff pattern:$0x75316420]  ;;  %v12511_v19 = vcombine.high %v9505_v13, %v9506_v14  ;;  %v12513_v20 = vcombine.low %v9505_v13, %v9506_v14  ;;  %10050 = vmatpush3.bf16.msra.mxu0 %v10662_v35 }
 0x226   : > { %3227 = vst [vmem:[#allocation2 + $0x130] sm:$0xff] %v11838_v3  ;;  %3228 = vst [vmem:[#allocation2 + $0x138] sm:$0x3] %v11838_v3  ;;  %v9476_v18 = vld.sshfl [vmem:[#allocation7 + $0x28] sm:$0xff pattern:$0x75316420]  ;;  %10051 = vmatprep.subr.bf16.mxu0 %v10663_v11 }
 0x227   : > { %3229 = vst [vmem:[#allocation2 + $0x10] sm:$0x1] %v11838_v3  ;;  %3230 = vst [vmem:[#allocation2 + $0x20] sm:$0x1] %v11838_v3  ;;  %v2199_v23 = vcombine.high %v9475_v17, %v9476_v18  ;;  %v2263_v24 = vcombine.low %v9475_v17, %v9476_v18  ;;  %v2383_v48 = vmul.f32 %v12528_v32, %v12513_v20 }
 0x228   : > { %3231 = vst [vmem:[#allocation2 + $0x30] sm:$0x1] %v11838_v3  ;;  %3232 = vst [vmem:[#allocation2 + $0x40] sm:$0x1] %v11838_v3  ;;  %v2435_v49 = vmul.f32 %v12531_v34, %v12511_v19  ;;  %v2694_v14 = vmul.f32 %v12564_v55, %v12513_v20  ;;  %v12588_v17 = vrot.slane %v1564_v41, %v12497_v7 }
 0x229   : > { %3233 = vst [vmem:[#allocation2 + $0x50] sm:$0x1] %v11838_v3  ;;  %3234 = vst [vmem:[#allocation2 + $0x60] sm:$0x1] %v11838_v3  ;;  %v12567_v59 = vmul.f32 %v12540_v37, %v2263_v24  ;;  %v12578_v5 = vmul.f32 %v12549_v45, %v2199_v23  ;;  %10052 = vmatpush3.bf16.msra.mxu0 %v10663_v11 }
 0x22a   : > { %3235 = vst [vmem:[#allocation2 + $0x70] sm:$0x1] %v11838_v3  ;;  %3236 = vst [vmem:[#allocation2 + $0x80] sm:$0x1] %v11838_v3  ;;  %10053 = vmatprep.subr.bf16.mxu0 %v10664_v43 }
 0x22b   : > { %3237 = vst [vmem:[#allocation2 + $0xb0] sm:$0x1] %v11838_v3  ;;  %3238 = vst [vmem:[#allocation2 + $0xc0] sm:$0x1] %v11838_v3 }
 0x22c   : > { %3239 = vst [vmem:[#allocation2 + $0xd0] sm:$0x1] %v11838_v3  ;;  %3240 = vst [vmem:[#allocation2 + $0xe0] sm:$0x1] %v11838_v3 }
 0x22d   : > { %3241 = vst [vmem:[#allocation2 + $0xf0] sm:$0x1] %v11838_v3  ;;  %3242 = vst [vmem:[#allocation2 + $0x100] sm:$0x1] %v11838_v3  ;;  %10054 = vmatpush3.bf16.msra.mxu0 %v10664_v43 }
 0x22e   : > { %3243 = vst [vmem:[#allocation2 + $0x110] sm:$0x1] %v11838_v3  ;;  %3244 = vst [vmem:[#allocation2 + $0x120] sm:$0x1] %v11838_v3 }
 0x22f   : > { %3245 = vst [vmem:[#allocation2 + $0x19] sm:$0x1] %v11838_v3  ;;  %3246 = vst [vmem:[#allocation2 + $0x29] sm:$0x1] %v11838_v3 }
 0x230   : > { %3247 = vst [vmem:[#allocation2 + $0x39] sm:$0x1] %v11838_v3  ;;  %3248 = vst [vmem:[#allocation2 + $0x49] sm:$0x1] %v11838_v3 }
 0x231   : > { %3249 = vst [vmem:[#allocation2 + $0x59] sm:$0x1] %v11838_v3  ;;  %3250 = vst [vmem:[#allocation2 + $0x69] sm:$0x1] %v11838_v3 }
 0x232   : > { %3251 = vst [vmem:[#allocation2 + $0x79] sm:$0x1] %v11838_v3  ;;  %3252 = vst [vmem:[#allocation2 + $0x89] sm:$0x1] %v11838_v3 }
 0x233   : > { %3253 = vst [vmem:[#allocation2 + $0xb9] sm:$0x1] %v11838_v3  ;;  %3254 = vst [vmem:[#allocation2 + $0xc9] sm:$0x1] %v11838_v3 }
 0x234   : > { %3255 = vst [vmem:[#allocation2 + $0xd9] sm:$0x1] %v11838_v3  ;;  %3256 = vst [vmem:[#allocation2 + $0xe9] sm:$0x1] %v11838_v3 }
 0x235   : > { %3257 = vst [vmem:[#allocation2 + $0xf9] sm:$0x1] %v11838_v3  ;;  %3258 = vst [vmem:[#allocation2 + $0x109] sm:$0x1] %v11838_v3 }
 0x236   : > { %3259 = vst [vmem:[#allocation2 + $0x119] sm:$0x1] %v11838_v3  ;;  %3260 = vst [vmem:[#allocation2 + $0x129] sm:$0x1] %v11838_v3  ;;  %v2590_v3 = vmul.f32 %v12549_v45, %v12509_v15 }
 0x237   : > { %14820 = vst [vmem:[#allocation99_spill] sm:$0xff] %v12497_v7  ;;  %14821 = vst [vmem:[#allocation100_spill] sm:$0xff] %v12500_v8  ;;  %v9507_v21 = vld.sshfl [vmem:[#allocation7 + $0x30] sm:$0xff pattern:$0x75316420] }
 0x238   : > { %14822 = vst [vmem:[#allocation101_spill] sm:$0xff] %v12504_v9  ;;  %14823 = vst [vmem:[#allocation102_spill] sm:$0xff] %v12507_v10  ;;  %v9508_v22 = vld.sshfl [vmem:[#allocation7 + $0x38] sm:$0xff pattern:$0x75316420] }
 0x239   : > { %2230 = vst [vmem:[#allocation5 + $0x1] sm:$0xff] %v12509_v15  ;;  %2294 = vst [vmem:[#allocation6] sm:$0xff] %v2262_v16  ;;  %v12516_v27 = vcombine.high %v9507_v21, %v9508_v22  ;;  %v12519_v28 = vcombine.low %v9507_v21, %v9508_v22  ;;  %v9509_v46 = vld.sshfl [vmem:[#allocation7 + $0x50] sm:$0xff pattern:$0x75316420] }
 0x23a   : > { %2079 = vst [vmem:[#allocation3 + $0x11] sm:$0xff] %v12511_v19  ;;  %2148 = vst [vmem:[#allocation4 + $0x10] sm:$0xff] %v12513_v20  ;;  %v9510_v47 = vld.sshfl [vmem:[#allocation7 + $0x58] sm:$0xff pattern:$0x75316420] }
 0x23b   : > { %2231 = vst [vmem:[#allocation5 + $0x11] sm:$0xff] %v2199_v23  ;;  %2295 = vst [vmem:[#allocation6 + $0x10] sm:$0xff] %v2263_v24  ;;  %v9477_v50 = vld.sshfl [vmem:[#allocation7 + $0x40] sm:$0xff pattern:$0x75316420]  ;;  %v12569_v61 = vcombine.high %v9509_v46, %v9510_v47  ;;  %v2117_v63 = vcombine.low %v9509_v46, %v9510_v47  ;;  %v12585_v16 = vmul.f32 %v12564_v55, %v12519_v28 }
 0x23c   : > { %2080 = vst [vmem:[#allocation3 + $0x21] sm:$0xff] %v12516_v27  ;;  %2149 = vst [vmem:[#allocation4 + $0x20] sm:$0xff] %v12519_v28  ;;  %v9478_v51 = vld.sshfl [vmem:[#allocation7 + $0x48] sm:$0xff pattern:$0x75316420]  ;;  %v2384_v42 = vmul.f32 %v12528_v32, %v12519_v28  ;;  %v2746_v46 = vmul.f32 %v12588_v17, %v12511_v19  ;;  %v12604_v47 = vmul.f32 %v12588_v17, %v12516_v27 }
 0x23d   : > { %v9511_v56 = vld.sshfl [vmem:[#allocation7 + $0x70] sm:$0xff pattern:$0x75316420]  ;;  %v9512_v57 = vld.sshfl [vmem:[#allocation7 + $0x78] sm:$0xff pattern:$0x75316420]  ;;  %v2200_v23 = vcombine.high %v9477_v50, %v9478_v51  ;;  %v2264_v26 = vcombine.low %v9477_v50, %v9478_v51  ;;  %v2436_v35 = vmul.f32 %v12531_v34, %v12516_v27  ;;  %v2385_v28 = vmul.f32 %v12528_v32, %v2117_v63 }
 0x23e   : > { %v9479_v60 = vld.sshfl [vmem:[#allocation7 + $0x60] sm:$0xff pattern:$0x75316420]  ;;  %v12571_v62 = vcombine.high %v9511_v56, %v9512_v57  ;;  %v9480_v6 = vld.sshfl [vmem:[#allocation7 + $0x68] sm:$0xff pattern:$0x75316420]  ;;  %v12593_v22 = vcombine.low %v9511_v56, %v9512_v57  ;;  %v2437_v19 = vmul.f32 %v12531_v34, %v12569_v61 }
 0x23f   : > { %2081 = vst [vmem:[#allocation3 + $0x31] sm:$0xff] %v12569_v61  ;;  %2150 = vst [vmem:[#allocation4 + $0x30] sm:$0xff] %v2117_v63  ;;  %v2201_v25 = vcombine.high %v9479_v60, %v9480_v6  ;;  %v2265_v40 = vcombine.low %v9479_v60, %v9480_v6  ;;  %v2540_v57 = vmul.f32 %v12540_v37, %v2264_v26  ;;  %v12614_v60 = vld.sshfl [vmem:[#allocation7 + $0x80] sm:$0xff pattern:$0x75316420] }
 0x240   : > { %v2466_v58 = vld [vmem:[#allocation5] sm:$0xff]  ;;  %2082 = vst [vmem:[#allocation3 + $0x41] sm:$0xff] %v12571_v62  ;;  %2151 = vst [vmem:[#allocation4 + $0x40] sm:$0xff] %v12593_v22  ;;  %v9515_v27 = vld.sshfl [vmem:[#allocation7 + $0xb0] sm:$0xff pattern:$0x75316420] }
 0x241   : > { %v2311_v0 = vld [vmem:[#allocation3 + $0x10] sm:$0xff]  ;;  %v2486_v2 = vmul.f32 %v12536_v36, %v2466_v58  ;;  %2232 = vst [vmem:[#allocation5 + $0x21] sm:$0xff] %v2200_v23  ;;  %2233 = vst [vmem:[#allocation5 + $0x31] sm:$0xff] %v2201_v25  ;;  %v2541_v58 = vmul.f32 %v12540_v37, %v2265_v40  ;;  %v2593_v6 = vmul.f32 %v12549_v45, %v2201_v25  ;;  %v9483_v11 = vld.sshfl [vmem:[#allocation7 + $0xa0] sm:$0xff pattern:$0x75316420] }
 0x242   : > { %v2331_v12 = vmul.f32 %v12525_v31, %v2311_v0  ;;  %v2467_v13 = vld [vmem:[#allocation5 + $0x10] sm:$0xff]  ;;  %v2642_v21 = vmul.f32 %v12560_v54, %v2311_v0  ;;  %2296 = vst [vmem:[#allocation6 + $0x20] sm:$0xff] %v2264_v26  ;;  %2297 = vst [vmem:[#allocation6 + $0x30] sm:$0xff] %v2265_v40  ;;  %v9516_v0 = vld.sshfl [vmem:[#allocation7 + $0xb8] sm:$0xff pattern:$0x75316420] }
 0x243   : > { %v2502_v15 = vadd.f32 %v2486_v2, %v2450_v1  ;;  %v2623_v18 = vld [vmem:[#allocation3 + $0x20] sm:$0xff]  ;;  %v2487_v24 = vmul.f32 %v12536_v36, %v2467_v13  ;;  %v9482_v13 = vld.sshfl [vmem:[#allocation7 + $0x88] sm:$0xff pattern:$0x75316420]  ;;  %v12627_v26 = vld [vmem:[#allocation13] ss:$0 sm:$0xff] }
 0x244   : > { %v2399_v20 = vadd.f32 %v2383_v48, %v2331_v12  ;;  %v2332_v41 = vmul.f32 %v2623_v18, %v12525_v31  ;;  %v2643_v50 = vmul.f32 %v12560_v54, %v2623_v18  ;;  %v12619_v12 = vmul.f32 %v12564_v55, %v2117_v63 }
 0x245   : > { %v2554_v33 = vadd.f32 %v2538_v53, %v2502_v15  ;;  %v9514_v53 = vld.sshfl [vmem:[#allocation7 + $0x98] sm:$0xff pattern:$0x75316420]  ;;  %v12631_v63 = vmul.f32 %v12588_v17, %v12569_v61  ;;  %v2202_v61 = vcombine.high %v12614_v60, %v9482_v13 }
 0x246   : > { %v2451_v44 = vadd.f32 %v2435_v49, %v2399_v20  ;;  %v2400_v51 = vadd.f32 %v2384_v42, %v2332_v41  ;;  %v9513_v49 = vld.sshfl [vmem:[#allocation7 + $0x90] sm:$0xff pattern:$0x75316420] }
 0x247   : > { %v2606_v48 = vadd.f32 %v2590_v3, %v2554_v33  ;;  %v2313_v2 = vld [vmem:[#allocation3 + $0x30] sm:$0xff]  ;;  %v2592_v3 = vmul.f32 %v12549_v45, %v2200_v23  ;;  %v12633_v25 = vcombine.high %v9513_v49, %v9514_v53  ;;  %v12635_v33 = vcombine.high %v9515_v27, %v9516_v0  ;;  %v2625_v42 = vld [vmem:[#allocation3 + $0x40] sm:$0xff]  ;;  %2234 = vst [vmem:[#allocation5 + $0x41] sm:$0xff] %v2202_v61 }
 0x248   : > { %v2503_v56 = vadd.f32 %v2487_v24, %v2451_v44  ;;  %v2333_v18 = vmul.f32 %v12525_v31, %v2313_v2  ;;  %v2452_v20 = vadd.f32 %v2436_v35, %v2400_v51  ;;  %v12625_v24 = vmul.f32 %v12564_v55, %v12593_v22  ;;  %v2468_v41 = vld [vmem:[#allocation5 + $0x20] sm:$0xff] }
 0x249   : > { %v2658_v1 = vadd.f32 %v2642_v21, %v2606_v48  ;;  %v9484_v21 = vld.sshfl [vmem:[#allocation7 + $0xa8] sm:$0xff pattern:$0x75316420]  ;;  %v2119_v44 = vcombine.low %v9513_v49, %v9514_v53  ;;  %v12638_v35 = vcombine.low %v9515_v27, %v9516_v0  ;;  %2083 = vst [vmem:[#allocation3 + $0x51] sm:$0xff] %v12633_v25  ;;  %2084 = vst [vmem:[#allocation3 + $0x61] sm:$0xff] %v12635_v33 }
 0x24a   : > { %v2555_v15 = vadd.f32 %v12567_v59, %v2503_v56  ;;  %v2401_v40 = vadd.f32 %v2385_v28, %v2333_v18  ;;  %v10666_v48 = vld [vmem:[#allocation18 + $0x30] sm:$0xff]   ;;  %v2488_v56 = vmul.f32 %v12536_v36, %v2468_v41  ;;  %v2266_v49 = vcombine.low %v12614_v60, %v9482_v13 }
 0x24b   : > { %v2710_v23 = vadd.f32 %v2694_v14, %v2658_v1  ;;  %v2469_v14 = vld [vmem:[#allocation5 + $0x30] sm:$0xff]  ;;  %v2203_v1 = vcombine.high %v9483_v11, %v9484_v21  ;;  %10073 = vmatprep.subr.bf16.mxu1 %v10666_v48  ;;  %v2267_v53 = vcombine.low %v9483_v11, %v9484_v21  ;;  %v2334_v27 = vmul.f32 %v2625_v42, %v12525_v31 }
 0x24c   : > { %v2607_v59 = vadd.f32 %v12578_v5, %v2555_v15  ;;  %v2453_v28 = vadd.f32 %v2437_v19, %v2401_v40  ;;  %v2489_v15 = vmul.f32 %v12536_v36, %v2469_v14  ;;  %10074 = vmatpush3.bf16.msra.mxu1 %v10666_v48  ;;  %v2386_v19 = vmul.f32 %v12528_v32, %v12593_v22 }
 0x24d   : > { %v2762_v51 = vadd.f32 %v2746_v46, %v2710_v23  ;;  %v2504_v46 = vadd.f32 %v2488_v56, %v2452_v20  ;;  %2235 = vst [vmem:[#allocation5 + $0x51] sm:$0xff] %v2203_v1  ;;  %v2645_v60 = vmul.f32 %v12560_v54, %v2625_v42  ;;  %v2749_v13 = vmul.f32 %v12588_v17, %v12571_v62 }
 0x24e   : > { %v2659_v5 = vadd.f32 %v2643_v50, %v2607_v59  ;;  %v2505_v18 = vadd.f32 %v2489_v15, %v2453_v28  ;;  %v2644_v50 = vmul.f32 %v12560_v54, %v2313_v2  ;;  %v2438_v20 = vmul.f32 %v12531_v34, %v12571_v62  ;;  %v9518_v28 = vld.sshfl [vmem:[#allocation7 + $0xd8] sm:$0xff pattern:$0x75316420]  ;;  %v12669_v15 = vld.sshfl [vmem:[#allocation7 + $0xf0] sm:$0xff pattern:$0x75316420] }
 0x24f   : > { %v2784_v43 = vadd.f32 %v12627_v26, %v2762_v51  ;;  %v2556_v23 = vadd.f32 %v2540_v57, %v2504_v46  ;;  %v2402_v59 = vadd.f32 %v2386_v19, %v2334_v27  ;;  %v2439_v22 = vmul.f32 %v12531_v34, %v12633_v25  ;;  %v12673_v27 = vld.sshfl [vmem:[#allocation7 + $0xf8] sm:$0xff pattern:$0x75316420] }
 0x250   : > { %v2711_v0 = vadd.f32 %v12585_v16, %v2659_v5  ;;  %v2557_v21 = vadd.f32 %v2541_v58, %v2505_v18  ;;  %v2387_v16 = vmul.f32 %v12528_v32, %v2119_v44  ;;  %v2542_v57 = vmul.f32 %v12540_v37, %v2266_v49  ;;  %v2315_v48 = vld [vmem:[#allocation3 + $0x50] sm:$0xff]  ;;  %v12667_v5 = vld.sshfl [vmem:[#allocation7 + $0xc0] sm:$0xff pattern:$0x75316420] }
 0x251   : > { %v2800_v40 = vmax.f32 %v2784_v43, 0.0  ;;  %v2608_v2 = vadd.f32 %v2592_v3, %v2556_v23  ;;  %v2543_v51 = vmul.f32 %v12540_v37, %v2267_v53  ;;  %v2594_v62 = vmul.f32 %v12549_v45, %v2202_v61  ;;  %v2627_v19 = vld [vmem:[#allocation3 + $0x60] sm:$0xff]  ;;  %v9486_v23 = vld.sshfl [vmem:[#allocation7 + $0xc8] sm:$0xff pattern:$0x75316420] }
 0x252   : > { %v2763_v11 = vadd.f32 %v12604_v47, %v2711_v0  ;;  %v2609_v42 = vadd.f32 %v2593_v6, %v2557_v21  ;;  %v9517_v47 = vld.sshfl [vmem:[#allocation7 + $0xd0] sm:$0xff pattern:$0x75316420]  ;;  %v2335_v14 = vmul.f32 %v12525_v31, %v2315_v48  ;;  %v2454_v56 = vadd.f32 %v2438_v20, %v2402_v59  ;;  %v2470_v6 = vld [vmem:[#allocation5 + $0x40] sm:$0xff] }
 0x253   : > { %v2660_v58 = vadd.f32 %v2644_v50, %v2608_v2  ;;  %v2595_v3 = vmul.f32 %v12549_v45, %v2203_v1  ;;  %v2646_v53 = vmul.f32 %v12560_v54, %v2315_v48  ;;  %v2698_v61 = vmul.f32 %v12564_v55, %v2119_v44  ;;  %v9487_v21 = vld.sshfl [vmem:[#allocation7 + $0xe0] sm:$0xff pattern:$0x75316420]  ;;  %v9488_v59 = vld.sshfl [vmem:[#allocation7 + $0xe8] sm:$0xff pattern:$0x75316420] }
 0x254   : > { %v2785_v41 = vadd.f32 %v12627_v26, %v2763_v11  ;;  %v2661_v43 = vadd.f32 %v2645_v60, %v2609_v42  ;;  %v2471_v46 = vld [vmem:[#allocation5 + $0x50] sm:$0xff]  ;;  %v2403_v18 = vadd.f32 %v2387_v16, %v2335_v14  ;;  %v2490_v1 = vmul.f32 %v12536_v36, %v2470_v6 }
 0x255   : > { %v2712_v0 = vadd.f32 %v12619_v12, %v2660_v58  ;;  %v2491_v50 = vmul.f32 %v12536_v36, %v2471_v46  ;;  %v2647_v11 = vmul.f32 %v12560_v54, %v2627_v19  ;;  %v12680_v2 = vcombine.high %v9517_v47, %v9518_v28  ;;  %v10667_v46 = vld [vmem:[#allocation18 + $0x28] sm:$0xff]  }
 0x256   : > { %v2801_v49 = vmax.f32 %v2785_v41, 0.0  ;;  %v2713_v60 = vadd.f32 %v12625_v24, %v2661_v43  ;;  %v2455_v41 = vadd.f32 %v2439_v22, %v2403_v18  ;;  %v2506_v12 = vadd.f32 %v2490_v1, %v2454_v56  ;;  %v10668_v18 = vld [vmem:[#allocation18 + $0x20] sm:$0xff]   ;;  %10075 = vmatprep.subr.bf16.mxu1 %v10667_v46 }
 0x257   : > { %v2764_v44 = vadd.f32 %v12631_v63, %v2712_v0  ;;  %v12685_v16 = vcombine.high %v12669_v15, %v12673_v27  ;;  %2085 = vst [vmem:[#allocation3 + $0x71] sm:$0xff] %v12680_v2  ;;  %v2122_v24 = vcombine.low %v12669_v15, %v12673_v27  ;;  %v2204_v48 = vcombine.high %v12667_v5, %v9486_v23 }
 0x258   : > { %v2833_v20 = vpack.c.bf16 %v2801_v49, %v2800_v40  ;;  %v2765_v42 = vadd.f32 %v2749_v13, %v2713_v60  ;;  %v2121_v40 = vcombine.low %v9517_v47, %v9518_v28  ;;  %v2507_v14 = vadd.f32 %v2491_v50, %v2455_v41  ;;  %v9524_v60 = vld.sshfl [vmem:[#allocation7 + $0x138] sm:$0xff pattern:$0x75316420]  ;;  %10076 = vmatpush3.bf16.msra.mxu1 %v10667_v46 }
 0x259   : > { %v2786_v58 = vadd.f32 %v12627_v26, %v2764_v44  ;;  %v2558_v63 = vadd.f32 %v2542_v57, %v2506_v12  ;;  %2086 = vst [vmem:[#allocation3 + $0x81] sm:$0xff] %v12685_v16  ;;  %v2205_v22 = vcombine.high %v9487_v21, %v9488_v59  ;;  %2236 = vst [vmem:[#allocation5 + $0x61] sm:$0xff] %v2204_v48  ;;  %10077 = vmatprep.subr.bf16.mxu1 %v10668_v18 }
 0x25a   : > { %10055 = vmatprep.mubr.bf16.mxu0 %v2833_v20  ;;  %v2787_v56 = vadd.f32 %v12627_v26, %v2765_v42  ;;  %v2268_v13 = vcombine.low %v12667_v5, %v9486_v23  ;;  %v2269_v49 = vcombine.low %v9487_v21, %v9488_v59  ;;  %v2336_v47 = vmul.f32 %v2627_v19, %v12525_v31  ;;  %v9521_v19 = vld.sshfl [vmem:[#allocation7 + $0x110] sm:$0xff pattern:$0x75316420]  ;;  %v9522_v23 = vld.sshfl [vmem:[#allocation7 + $0x118] sm:$0xff pattern:$0x75316420] }
 0x25b   : > { %v2802_v28 = vmax.f32 %v2786_v58, 0.0  ;;  %v2559_v43 = vadd.f32 %v2543_v51, %v2507_v14  ;;  %v2610_v15 = vadd.f32 %v2594_v62, %v2558_v63  ;;  %2237 = vst [vmem:[#allocation5 + $0x71] sm:$0xff] %v2205_v22  ;;  %v2388_v6 = vmul.f32 %v12528_v32, %v12638_v35  ;;  %v9523_v20 = vld.sshfl [vmem:[#allocation7 + $0x130] sm:$0xff pattern:$0x75316420] }
 0x25c   : > { %v2803_v57 = vmax.f32 %v2787_v56, 0.0  ;;  %v2699_v27 = vmul.f32 %v12564_v55, %v12638_v35  ;;  %v2750_v0 = vmul.f32 %v12588_v17, %v12633_v25  ;;  %v2440_v5 = vmul.f32 %v12531_v34, %v12635_v33  ;;  %v10669_v21 = vld [vmem:[#allocation18 + $0x18] sm:$0xff]   ;;  %v9489_v42 = vld.sshfl [vmem:[#allocation7 + $0x100] sm:$0xff pattern:$0x75316420]  ;;  %10078 = vmatpush3.bf16.msra.mxu1 %v10668_v18 }
 0x25d   : > { %v2611_v1 = vadd.f32 %v2595_v3, %v2559_v43  ;;  %v2662_v50 = vadd.f32 %v2646_v53, %v2610_v15  ;;  %v2751_v51 = vmul.f32 %v12588_v17, %v12635_v33  ;;  %v2404_v62 = vadd.f32 %v2388_v6, %v2336_v47  ;;  %v9490_v58 = vld.sshfl [vmem:[#allocation7 + $0x108] sm:$0xff pattern:$0x75316420]  ;;  %10079 = vmatprep.subr.bf16.mxu1 %v10669_v21 }
 0x25e   : > { %v2834_v35 = vpack.c.bf16 %v2803_v57, %v2802_v28  ;;  %v2389_v59 = vmul.f32 %v12528_v32, %v2121_v40  ;;  %v2441_v25 = vmul.f32 %v12531_v34, %v12680_v2  ;;  %v2544_v44 = vmul.f32 %v12540_v37, %v2268_v13  ;;  %v2317_v41 = vld [vmem:[#allocation3 + $0x70] sm:$0xff] }
 0x25f   : > { %v2663_v3 = vadd.f32 %v2647_v11, %v2611_v1  ;;  %v2714_v53 = vadd.f32 %v2698_v61, %v2662_v50  ;;  %v2545_v33 = vmul.f32 %v12540_v37, %v2269_v49  ;;  %v2596_v12 = vmul.f32 %v12549_v45, %v2204_v48  ;;  %v9491_v11 = vld.sshfl [vmem:[#allocation7 + $0x120] sm:$0xff pattern:$0x75316420]  ;;  %v9492_v61 = vld.sshfl [vmem:[#allocation7 + $0x128] sm:$0xff pattern:$0x75316420] }
 0x260   : > { %10056 = vmatmul.mubr.bf16.vlgmr.msra.gmra.mxu0 %v2834_v35  ;;  %v2337_v14 = vmul.f32 %v12525_v31, %v2317_v41  ;;  %v2456_v63 = vadd.f32 %v2440_v5, %v2404_v62  ;;  %v12714_v56 = vmul.f32 %v12549_v45, %v2205_v22  ;;  %v12717_v13 = vmul.f32 %v12564_v55, %v2121_v40  ;;  %v2472_v49 = vld [vmem:[#allocation5 + $0x60] sm:$0xff]  ;;  %v2422_v40 = vld [vmem:[#allocation3 + $0x91] sm:$0xff] }
 0x261   : > { %v2715_v47 = vadd.f32 %v2699_v27, %v2663_v3  ;;  %v2766_v28 = vadd.f32 %v2750_v0, %v2714_v53  ;;  %v2648_v48 = vmul.f32 %v12560_v54, %v2317_v41  ;;  %v12721_v43 = vmul.f32 %v12564_v55, %v2122_v24  ;;  %v2629_v57 = vld [vmem:[#allocation3 + $0x80] sm:$0xff]  ;;  %10080 = vmatpush3.bf16.msra.mxu1 %v10669_v21  ;;  %v9494_v21 = vld.sshfl [vmem:[#allocation7 + $0x148] sm:$0xff pattern:$0x75316420] }
 0x262   : > { %v2405_v15 = vadd.f32 %v2389_v59, %v2337_v14  ;;  %v2473_v6 = vld [vmem:[#allocation5 + $0x70] sm:$0xff]  ;;  %v2492_v46 = vmul.f32 %v12536_v36, %v2472_v49  ;;  %v12724_v22 = vcombine.high %v9521_v19, %v9522_v23  ;;  %v12726_v5 = vcombine.high %v9523_v20, %v9524_v60  ;;  %v9493_v49 = vld.sshfl [vmem:[#allocation7 + $0x140] sm:$0xff pattern:$0x75316420] }
 0x263   : > { %v2767_v1 = vadd.f32 %v2751_v51, %v2715_v47  ;;  %v2788_v27 = vadd.f32 %v12627_v26, %v2766_v28  ;;  %v2493_v0 = vmul.f32 %v12536_v36, %v2473_v6  ;;  %v2123_v50 = vcombine.low %v9521_v19, %v9522_v23  ;;  %v9496_v6 = vld.sshfl [vmem:[#allocation7 + $0x168] sm:$0xff pattern:$0x75316420] }
 0x264   : > { %v2457_v24 = vadd.f32 %v2441_v25, %v2405_v15  ;;  %v2508_v62 = vadd.f32 %v2492_v46, %v2456_v63  ;;  %2087 = vst [vmem:[#allocation3 + $0xa1] sm:$0xff] %v12724_v22  ;;  %2088 = vst [vmem:[#allocation3 + $0xb1] sm:$0xff] %v12726_v5  ;;  %v12732_v35 = vcombine.low %v9523_v20, %v9524_v60  ;;  %v9525_v25 = vld.sshfl [vmem:[#allocation7 + $0x150] sm:$0xff pattern:$0x75316420] }
 0x265   : > { %v2206_v59 = vcombine.high %v9489_v42, %v9490_v58  ;;  %v2789_v3 = vadd.f32 %v12627_v26, %v2767_v1  ;;  %v2804_v53 = vmax.f32 %v2788_v27, 0.0  ;;  %2156 = vst [vmem:[#allocation4 + $0xa0] sm:$0xff] %v2123_v50  ;;  %v2207_v18 = vcombine.high %v9491_v11, %v9492_v61  ;;  %v9526_v63 = vld.sshfl [vmem:[#allocation7 + $0x158] sm:$0xff pattern:$0x75316420] }
 0x266   : > { %v2270_v51 = vcombine.low %v9489_v42, %v9490_v58  ;;  %v2509_v41 = vadd.f32 %v2493_v0, %v2457_v24  ;;  %v2560_v14 = vadd.f32 %v2544_v44, %v2508_v62  ;;  %v2752_v19 = vmul.f32 %v12588_v17, %v12680_v2  ;;  %2157 = vst [vmem:[#allocation4 + $0xb0] sm:$0xff] %v12732_v35  ;;  %v9527_v20 = vld.sshfl [vmem:[#allocation7 + $0x170] sm:$0xff pattern:$0x75316420] }
 0x267   : > { %2238 = vst [vmem:[#allocation5 + $0x91] sm:$0xff] %v2206_v59  ;;  %v2271_v23 = vcombine.low %v9491_v11, %v9492_v61  ;;  %v9528_v60 = vld.sshfl [vmem:[#allocation7 + $0x178] sm:$0xff pattern:$0x75316420]  ;;  %v2805_v47 = vmax.f32 %v2789_v3, 0.0  ;;  %v2649_v28 = vmul.f32 %v12560_v54, %v2629_v57  ;;  %v2753_v42 = vmul.f32 %v12588_v17, %v12685_v16  ;;  %2239 = vst [vmem:[#allocation5 + $0xa1] sm:$0xff] %v2207_v18 }
 0x268   : > { %2302 = vst [vmem:[#allocation6 + $0x90] sm:$0xff] %v2270_v51  ;;  %v2442_v44 = vmul.f32 %v12531_v34, %v2422_v40  ;;  %v2561_v2 = vadd.f32 %v2545_v33, %v2509_v41  ;;  %v2612_v58 = vadd.f32 %v2596_v12, %v2560_v14  ;;  %v2391_v11 = vmul.f32 %v12528_v32, %v2123_v50  ;;  %v9495_v15 = vld.sshfl [vmem:[#allocation7 + $0x160] sm:$0xff pattern:$0x75316420] }
 0x269   : > { %2303 = vst [vmem:[#allocation6 + $0xa0] sm:$0xff] %v2271_v23  ;;  %v2443_v61 = vmul.f32 %v12531_v34, %v12724_v22  ;;  %v2835_v46 = vpack.c.bf16 %v2805_v47, %v2804_v53  ;;  %v2546_v57 = vmul.f32 %v12540_v37, %v2270_v51  ;;  %v2547_v16 = vmul.f32 %v12540_v37, %v2271_v23 }
 0x26a   : > { %v2598_v1 = vmul.f32 %v12549_v45, %v2206_v59  ;;  %v2613_v33 = vadd.f32 %v12714_v56, %v2561_v2  ;;  %v2664_v12 = vadd.f32 %v2648_v48, %v2612_v58  ;;  %v2458_v40 = vadd.f32 %v2442_v44, %v12555_v52 }
 0x26b   : > { %v12751_v27 = vmul.f32 %v12549_v45, %v2207_v18  ;;  %10059 = vmatprep.mubr.bf16.mxu0 %v2835_v46  ;;  %v2319_v0 = vld [vmem:[#allocation3 + $0xa0] sm:$0xff]  ;;  %v2631_v24 = vld [vmem:[#allocation3 + $0xb0] sm:$0xff]  ;;  %v12754_v62 = vmul.f32 %v12564_v55, %v2123_v50  ;;  %v12756_v3 = vcombine.high %v9525_v25, %v9526_v63  ;;  %v12758_v53 = vcombine.high %v9527_v20, %v9528_v60 }
 0x26c   : > { %v12760_v51 = vcombine.low %v9525_v25, %v9526_v63  ;;  %v2665_v59 = vadd.f32 %v2649_v28, %v2613_v33  ;;  %v2716_v56 = vadd.f32 %v12717_v13, %v2664_v12  ;;  %v2339_v52 = vmul.f32 %v12525_v31, %v2319_v0 }
 0x26d   : > { %v12766_v48 = vmul.f32 %v12564_v55, %v12732_v35  ;;  %v12770_v50 = vmul.f32 %v12588_v17, %v12724_v22  ;;  %2089 = vst [vmem:[#allocation3 + $0xc1] sm:$0xff] %v12756_v3  ;;  %2090 = vst [vmem:[#allocation3 + $0xd1] sm:$0xff] %v12758_v53  ;;  %v12774_v41 = vcombine.low %v9527_v20, %v9528_v60 }
 0x26e   : > { %v2474_v18 = vld [vmem:[#allocation5 + $0x90] sm:$0xff]  ;;  %2158 = vst [vmem:[#allocation4 + $0xc0] sm:$0xff] %v12760_v51  ;;  %v2208_v13 = vcombine.high %v9493_v49, %v9494_v21  ;;  %v2209_v14 = vcombine.high %v9495_v15, %v9496_v6  ;;  %v2717_v23 = vadd.f32 %v12721_v43, %v2665_v59  ;;  %v2768_v25 = vadd.f32 %v2752_v19, %v2716_v56  ;;  %v2475_v47 = vld [vmem:[#allocation5 + $0xa0] sm:$0xff] }
 0x26f   : > { %v2407_v63 = vadd.f32 %v2391_v11, %v2339_v52  ;;  %v2494_v28 = vmul.f32 %v12536_v36, %v2474_v18  ;;  %v2495_v22 = vmul.f32 %v12536_v36, %v2475_v47  ;;  %2159 = vst [vmem:[#allocation4 + $0xd0] sm:$0xff] %v12774_v41  ;;  %v2272_v44 = vcombine.low %v9493_v49, %v9494_v21  ;;  %v9529_v18 = vld.sshfl [vmem:[#allocation7 + $0x190] sm:$0xff pattern:$0x75316420] }
 0x270   : > { %2240 = vst [vmem:[#allocation5 + $0xb1] sm:$0xff] %v2208_v13  ;;  %2241 = vst [vmem:[#allocation5 + $0xc1] sm:$0xff] %v2209_v14  ;;  %v2273_v20 = vcombine.low %v9495_v15, %v9496_v6  ;;  %v2340_v60 = vmul.f32 %v2631_v24, %v12525_v31  ;;  %v2769_v2 = vadd.f32 %v2753_v42, %v2717_v23  ;;  %v9530_v23 = vld.sshfl [vmem:[#allocation7 + $0x198] sm:$0xff pattern:$0x75316420] }
 0x271   : > { %v2790_v58 = vadd.f32 %v12627_v26, %v2768_v25  ;;  %v2459_v46 = vadd.f32 %v2443_v61, %v2407_v63  ;;  %v2510_v43 = vadd.f32 %v2494_v28, %v2458_v40  ;;  %v2650_v19 = vmul.f32 %v12560_v54, %v2319_v0  ;;  %2304 = vst [vmem:[#allocation6 + $0xb0] sm:$0xff] %v2272_v44  ;;  %v9531_v25 = vld.sshfl [vmem:[#allocation7 + $0x1b0] sm:$0xff pattern:$0x75316420] }
 0x272   : > { %v2755_v11 = vmul.f32 %v12588_v17, %v12726_v5  ;;  %2305 = vst [vmem:[#allocation6 + $0xc0] sm:$0xff] %v2273_v20  ;;  %v2392_v33 = vmul.f32 %v12528_v32, %v12732_v35  ;;  %v2444_v49 = vmul.f32 %v12531_v34, %v12726_v5  ;;  %v2791_v21 = vadd.f32 %v12627_v26, %v2769_v2  ;;  %v9532_v63 = vld.sshfl [vmem:[#allocation7 + $0x1b8] sm:$0xff pattern:$0x75316420] }
 0x273   : > { %v2806_v42 = vmax.f32 %v2790_v58, 0.0  ;;  %v2511_v15 = vadd.f32 %v2495_v22, %v2459_v46  ;;  %v2562_v6 = vadd.f32 %v2546_v57, %v2510_v43  ;;  %v2651_v61 = vmul.f32 %v12560_v54, %v2631_v24  ;;  %v9497_v46 = vld.sshfl [vmem:[#allocation7 + $0x180] sm:$0xff pattern:$0x75316420] }
 0x274   : > { %v2393_v12 = vmul.f32 %v12528_v32, %v12760_v51  ;;  %v2408_v40 = vadd.f32 %v2392_v33, %v2340_v60  ;;  %v2445_v0 = vmul.f32 %v12531_v34, %v12756_v3  ;;  %v2807_v59 = vmax.f32 %v2791_v21, 0.0  ;;  %v2321_v52 = vld [vmem:[#allocation3 + $0xc0] sm:$0xff]  ;;  %v2633_v22 = vld [vmem:[#allocation3 + $0xd0] sm:$0xff]  ;;  %v9498_v43 = vld.sshfl [vmem:[#allocation7 + $0x188] sm:$0xff pattern:$0x75316420] }
 0x275   : > { %v2563_v56 = vadd.f32 %v2547_v16, %v2511_v15  ;;  %v2614_v35 = vadd.f32 %v2598_v1, %v2562_v6  ;;  %v2548_v5 = vmul.f32 %v12540_v37, %v2272_v44  ;;  %v2341_v57 = vmul.f32 %v12525_v31, %v2321_v52  ;;  %v9499_v33 = vld.sshfl [vmem:[#allocation7 + $0x1a0] sm:$0xff pattern:$0x75316420]  ;;  %v9500_v21 = vld.sshfl [vmem:[#allocation7 + $0x1a8] sm:$0xff pattern:$0x75316420] }
 0x276   : > { %v2460_v24 = vadd.f32 %v2444_v49, %v2408_v40  ;;  %v2549_v47 = vmul.f32 %v12540_v37, %v2273_v20  ;;  %v2600_v28 = vmul.f32 %v12549_v45, %v2208_v13  ;;  %v2836_v60 = vpack.c.bf16 %v2807_v59, %v2806_v42 }
 0x277   : > { %v2615_v2 = vadd.f32 %v12751_v27, %v2563_v56  ;;  %v2666_v16 = vadd.f32 %v2650_v19, %v2614_v35  ;;  %v2476_v1 = vld [vmem:[#allocation5 + $0xb0] sm:$0xff]  ;;  %v2477_v58 = vld [vmem:[#allocation5 + $0xc0] sm:$0xff]  ;;  %v2601_v44 = vmul.f32 %v12549_v45, %v2209_v14  ;;  %v2409_v15 = vadd.f32 %v2393_v12, %v2341_v57 }
 0x278   : > { %v2496_v49 = vmul.f32 %v12536_v36, %v2476_v1  ;;  %v2497_v20 = vmul.f32 %v12536_v36, %v2477_v58  ;;  %v2652_v13 = vmul.f32 %v12560_v54, %v2321_v52  ;;  %10060 = vmatmul.mubr.bf16.gmra.mxu0 %v2836_v60  ;;  %v2653_v19 = vmul.f32 %v12560_v54, %v2633_v22 }
 0x279   : > { %v2667_v42 = vadd.f32 %v2651_v61, %v2615_v2  ;;  %v2718_v27 = vadd.f32 %v12754_v62, %v2666_v16  ;;  %v2704_v14 = vmul.f32 %v12564_v55, %v12760_v51  ;;  %v2461_v6 = vadd.f32 %v2445_v0, %v2409_v15 }
 0x27a   : > { %v2512_v40 = vadd.f32 %v2496_v49, %v2460_v24  ;;  %v12809_v59 = vcombine.high %v9529_v18, %v9530_v23  ;;  %v12811_v12 = vcombine.high %v9531_v25, %v9532_v63  ;;  %v12815_v52 = vcombine.low %v9529_v18, %v9530_v23 }
 0x27b   : > { %v2719_v56 = vadd.f32 %v12766_v48, %v2667_v42  ;;  %v2770_v35 = vadd.f32 %v12770_v50, %v2718_v27  ;;  %v12817_v61 = vcombine.low %v9531_v25, %v9532_v63  ;;  %v2513_v62 = vadd.f32 %v2497_v20, %v2461_v6  ;;  %v12842_v20 = vld.sshfl [vmem:[#allocation7 + $0x1c0] sm:$0xff pattern:$0x75316420] }
 0x27c   : > { %v2564_v57 = vadd.f32 %v2548_v5, %v2512_v40  ;;  %2091 = vst [vmem:[#allocation3 + $0xe1] sm:$0xff] %v12809_v59  ;;  %2092 = vst [vmem:[#allocation3 + $0xf1] sm:$0xff] %v12811_v12  ;;  %v2210_v51 = vcombine.high %v9497_v46, %v9498_v43  ;;  %v2211_v0 = vcombine.high %v9499_v33, %v9500_v21 }
 0x27d   : > { %v2771_v24 = vadd.f32 %v2755_v11, %v2719_v56  ;;  %v2792_v60 = vadd.f32 %v12627_v26, %v2770_v35  ;;  %v2274_v2 = vcombine.low %v9497_v46, %v9498_v43  ;;  %v2275_v16 = vcombine.low %v9499_v33, %v9500_v21  ;;  %v9533_v46 = vld.sshfl [vmem:[#allocation7 + $0x1d0] sm:$0xff pattern:$0x75316420]  ;;  %v12834_v33 = vld.sshfl [vmem:[#allocation7 + $0x1f8] sm:$0xff pattern:$0x75316420] }
 0x27e   : > { %v2565_v48 = vadd.f32 %v2549_v47, %v2513_v62  ;;  %v2616_v1 = vadd.f32 %v2600_v28, %v2564_v57  ;;  %2242 = vst [vmem:[#allocation5 + $0xd1] sm:$0xff] %v2210_v51  ;;  %2243 = vst [vmem:[#allocation5 + $0xe1] sm:$0xff] %v2211_v0  ;;  %v2342_v50 = vmul.f32 %v2633_v22, %v12525_v31  ;;  %v9534_v22 = vld.sshfl [vmem:[#allocation7 + $0x1d8] sm:$0xff pattern:$0x75316420] }
 0x27f   : > { %v2394_v5 = vmul.f32 %v12528_v32, %v12774_v41  ;;  %v2793_v18 = vadd.f32 %v12627_v26, %v2771_v24  ;;  %v2808_v23 = vmax.f32 %v2792_v60, 0.0  ;;  %v2705_v25 = vmul.f32 %v12564_v55, %v12774_v41  ;;  %v12832_v43 = vld.sshfl [vmem:[#allocation7 + $0x1f0] sm:$0xff pattern:$0x75316420] }
 0x280   : > { %v2756_v11 = vmul.f32 %v12588_v17, %v12756_v3  ;;  %v2617_v63 = vadd.f32 %v2601_v44, %v2565_v48  ;;  %v2668_v58 = vadd.f32 %v2652_v13, %v2616_v1  ;;  %v2446_v28 = vmul.f32 %v12531_v34, %v12758_v53  ;;  %v12847_v56 = vld.sshfl [vmem:[#allocation7 + $0x1c8] sm:$0xff pattern:$0x75316420]  ;;  %v9503_v57 = vld.sshfl [vmem:[#allocation7 + $0x1e0] sm:$0xff pattern:$0x75316420] }
 0x281   : > { %v2410_v47 = vadd.f32 %v2394_v5, %v2342_v50  ;;  %v2809_v21 = vmax.f32 %v2793_v18, 0.0  ;;  %v2757_v15 = vmul.f32 %v12588_v17, %v12758_v53  ;;  %v2395_v3 = vmul.f32 %v12528_v32, %v12815_v52  ;;  %v9504_v24 = vld.sshfl [vmem:[#allocation7 + $0x1e8] sm:$0xff pattern:$0x75316420] }
 0x282   : > { %v2669_v41 = vadd.f32 %v2653_v19, %v2617_v63  ;;  %v2720_v49 = vadd.f32 %v2704_v14, %v2668_v58  ;;  %v2447_v44 = vmul.f32 %v12531_v34, %v12809_v59  ;;  %v2550_v27 = vmul.f32 %v12540_v37, %v2274_v2 }
 0x283   : > { %v2837_v13 = vpack.c.bf16 %v2809_v21, %v2808_v23  ;;  %v2323_v42 = vld [vmem:[#allocation3 + $0xe0] sm:$0xff]  ;;  %v2551_v6 = vmul.f32 %v12540_v37, %v2275_v16  ;;  %v2602_v40 = vmul.f32 %v12549_v45, %v2210_v51  ;;  %v2462_v35 = vadd.f32 %v2446_v28, %v2410_v47  ;;  %v2635_v62 = vld [vmem:[#allocation3 + $0xf0] sm:$0xff] }
 0x284   : > { %v2721_v53 = vadd.f32 %v2705_v25, %v2669_v41  ;;  %v2772_v19 = vadd.f32 %v2756_v11, %v2720_v49  ;;  %v2343_v14 = vmul.f32 %v12525_v31, %v2323_v42  ;;  %v2603_v1 = vmul.f32 %v12549_v45, %v2211_v0 }
 0x285   : > { %10063 = vmatprep.mubr.bf16.mxu0 %v2837_v13  ;;  %v2478_v60 = vld [vmem:[#allocation5 + $0xd0] sm:$0xff]  ;;  %v2479_v48 = vld [vmem:[#allocation5 + $0xe0] sm:$0xff]  ;;  %v2654_v2 = vmul.f32 %v12560_v54, %v2323_v42  ;;  %v12852_v16 = vcombine.high %v9533_v46, %v9534_v22  ;;  %v12856_v51 = vcombine.high %v12832_v43, %v12834_v33  ;;  %v2129_v0 = vcombine.low %v9533_v46, %v9534_v22 }
 0x286   : > { %v2773_v50 = vadd.f32 %v2757_v15, %v2721_v53  ;;  %v2794_v5 = vadd.f32 %v12627_v26, %v2772_v19  ;;  %v2411_v18 = vadd.f32 %v2395_v3, %v2343_v14  ;;  %v2498_v23 = vmul.f32 %v12536_v36, %v2478_v60 }
 0x287   : > { %v2499_v25 = vmul.f32 %v12536_v36, %v2479_v48  ;;  %2093 = vst [vmem:[#allocation3 + $0x101] sm:$0xff] %v12852_v16  ;;  %2094 = vst [vmem:[#allocation3 + $0x111] sm:$0xff] %v12856_v51  ;;  %v2130_v11 = vcombine.low %v12832_v43, %v12834_v33  ;;  %v2212_v63 = vcombine.high %v12842_v20, %v12847_v56  ;;  %v10670_v33 = vld [vmem:[#allocation18 + $0x10] sm:$0xff]  }
 0x288   : > { %v2795_v58 = vadd.f32 %v12627_v26, %v2773_v50  ;;  %v2810_v47 = vmax.f32 %v2794_v5, 0.0  ;;  %v2463_v28 = vadd.f32 %v2447_v44, %v2411_v18  ;;  %v2514_v21 = vadd.f32 %v2498_v23, %v2462_v35  ;;  %10081 = vmatprep.subr.bf16.mxu1 %v10670_v33 }
 0x289   : > { %v2213_v15 = vcombine.high %v9503_v57, %v9504_v24  ;;  %2244 = vst [vmem:[#allocation5 + $0xf1] sm:$0xff] %v2212_v63  ;;  %v2276_v41 = vcombine.low %v12842_v20, %v12847_v56  ;;  %v2277_v49 = vcombine.low %v9503_v57, %v9504_v24  ;;  %v2344_v3 = vmul.f32 %v2635_v62, %v12525_v31 }
 0x28a   : > { %v2811_v46 = vmax.f32 %v2795_v58, 0.0  ;;  %v2515_v22 = vadd.f32 %v2499_v25, %v2463_v28  ;;  %v2566_v13 = vadd.f32 %v2550_v27, %v2514_v21  ;;  %v2396_v42 = vmul.f32 %v12528_v32, %v12817_v61  ;;  %v10761_v21 = vld [vmem:[#allocation13] ss:$0 sm:$0xff]  ;;  %10082 = vmatpush3.bf16.msra.mxu1 %v10670_v33 }
 0x28b   : > { %v2655_v53 = vmul.f32 %v12560_v54, %v2635_v62  ;;  %v2706_v26 = vmul.f32 %v12564_v55, %v12815_v52  ;;  %2245 = vst [vmem:[#allocation5 + $0x101] sm:$0xff] %v2213_v15  ;;  %v2448_v44 = vmul.f32 %v12531_v34, %v12811_v12  ;;  %v2397_v35 = vmul.f32 %v12528_v32, %v2129_v0 }
 0x28c   : > { %v2838_v19 = vpack.c.bf16 %v2811_v46, %v2810_v47  ;;  %v2567_v20 = vadd.f32 %v2551_v6, %v2515_v22  ;;  %v2618_v56 = vadd.f32 %v2602_v40, %v2566_v13  ;;  %v2412_v14 = vadd.f32 %v2396_v42, %v2344_v3 }
 0x28d   : > { %v2707_v24 = vmul.f32 %v12564_v55, %v12817_v61  ;;  %v2758_v62 = vmul.f32 %v12588_v17, %v12809_v59  ;;  %v2449_v48 = vmul.f32 %v12531_v34, %v12852_v16  ;;  %v2759_v32 = vmul.f32 %v12588_v17, %v12811_v12 }
 0x28e   : > { %10064 = vmatmul.mubr.bf16.gmra.mxu0 %v2838_v19  ;;  %v2619_v27 = vadd.f32 %v2603_v1, %v2567_v20  ;;  %v2670_v57 = vadd.f32 %v2654_v2, %v2618_v56  ;;  %v2325_v52 = vld [vmem:[#allocation3 + $0x100] sm:$0xff]  ;;  %v2464_v6 = vadd.f32 %v2448_v44, %v2412_v14  ;;  %v2552_v61 = vmul.f32 %v12540_v37, %v2276_v41  ;;  %v2637_v3 = vld [vmem:[#allocation3 + $0x110] sm:$0xff] }
 0x28f   : > { %v2345_v60 = vmul.f32 %v12525_v31, %v2325_v52  ;;  %v2553_v31 = vmul.f32 %v12540_v37, %v2277_v49  ;;  %v2604_v47 = vmul.f32 %v12549_v45, %v2212_v63  ;;  %v2605_v13 = vmul.f32 %v12549_v45, %v2213_v15 }
 0x290   : > { %v2671_v40 = vadd.f32 %v2655_v53, %v2619_v27  ;;  %v2722_v50 = vadd.f32 %v2706_v26, %v2670_v57  ;;  %v2480_v1 = vld [vmem:[#allocation5 + $0xf0] sm:$0xff]  ;;  %v2656_v41 = vmul.f32 %v12560_v54, %v2325_v52  ;;  %v2657_v49 = vmul.f32 %v12560_v54, %v2637_v3 }
 0x291   : > { %v2413_v2 = vadd.f32 %v2397_v35, %v2345_v60  ;;  %v2500_v5 = vmul.f32 %v12536_v36, %v2480_v1  ;;  %v2709_v20 = vmul.f32 %v12564_v55, %v2130_v11  ;;  %v2760_v45 = vmul.f32 %v12588_v17, %v12852_v16  ;;  %v10672_v16 = vld [vmem:[#allocation18] sm:$0xff]   ;;  %v9538_v11 = vld [vmem:[#allocation16] ss:$0 sm:$0xff] }
 0x292   : > { %v2723_v18 = vadd.f32 %v2707_v24, %v2671_v40  ;;  %v2774_v59 = vadd.f32 %v2758_v62, %v2722_v50  ;;  %v2481_v23 = vld [vmem:[#allocation5 + $0x100] sm:$0xff]  ;;  %v2761_v35 = vmul.f32 %v12588_v17, %v12856_v51 }
 0x293   : > { %v2465_v25 = vadd.f32 %v2449_v48, %v2413_v2  ;;  %v2501_v34 = vmul.f32 %v12536_v36, %v2481_v23  ;;  %v2516_v58 = vadd.f32 %v2500_v5, %v2464_v6  ;;  %v2708_v36 = vmul.f32 %v12564_v55, %v2129_v0  ;;  %v10671_v55 = vld [vmem:[#allocation18 + $0x8] sm:$0xff]  }
 0x294   : > { %v2775_v28 = vadd.f32 %v2759_v32, %v2723_v18  ;;  %v2796_v12 = vadd.f32 %v10761_v21, %v2774_v59  ;;  %10083 = vmatprep.subr.bf16.mxu1 %v10671_v55 }
 0x295   : > { %v2517_v46 = vadd.f32 %v2501_v34, %v2465_v25  ;;  %v2568_v22 = vadd.f32 %v2552_v61, %v2516_v58  ;;  %10084 = vmatpush3.bf16.msra.mxu1 %v10671_v55 }
 0x296   : > { %v2797_v42 = vadd.f32 %v10761_v21, %v2775_v28  ;;  %v2812_v53 = vmax.f32 %v2796_v12, 0.0  ;;  %10085 = vmatprep.subr.bf16.mxu1 %v10672_v16 }
 0x297   : > { %v2569_v26 = vadd.f32 %v2553_v31, %v2517_v46  ;;  %v2620_v37 = vadd.f32 %v2604_v47, %v2568_v22 }
 0x298   : > { %v2813_v44 = vmax.f32 %v2797_v42, 0.0 }
 0x299   : > { %v2621_v63 = vadd.f32 %v2605_v13, %v2569_v26  ;;  %v2672_v19 = vadd.f32 %v2656_v41, %v2620_v37  ;;  %10086 = vmatpush3.bf16.msra.mxu1 %v10672_v16 }
 0x29a   : > { %v2839_v15 = vpack.c.bf16 %v2813_v44, %v2812_v53 }
 0x29b   : > { %v2673_v56 = vadd.f32 %v2657_v49, %v2621_v63  ;;  %v2724_v14 = vadd.f32 %v2708_v36, %v2672_v19 }
 0x29c   : > { %10067 = vmatprep.mubr.bf16.mxu0 %v2839_v15 }
 0x29d   : > { %v2725_v54 = vadd.f32 %v2709_v20, %v2673_v56  ;;  %v2776_v0 = vadd.f32 %v2760_v45, %v2724_v14 }
 0x29f   : > { %v2777_v27 = vadd.f32 %v2761_v35, %v2725_v54  ;;  %v2798_v57 = vadd.f32 %v10761_v21, %v2776_v0 }
 0x2a1   : > { %v2799_v24 = vadd.f32 %v10761_v21, %v2777_v27  ;;  %v2814_v62 = vmax.f32 %v2798_v57, 0.0 }
 0x2a3   : > { %v2815_v52 = vmax.f32 %v2799_v24, 0.0 }
 0x2a5   : > { %v2840_v43 = vpack.c.bf16 %v2815_v52, %v2814_v62 }
 0x2a7   : > { %10068 = vmatmul.mubr.bf16.gmra.mxu0 %v2840_v43 }
 0x320   : > { %v10057_v17 = vpop.f32.mrf.mxu0 }
 0x321   : > { %v12909_v40 = vadd.f32 %v10057_v17, %v9538_v11 }
 0x322   : > { %v2929_v51 = vpop.f32.mrf.mxu0 }
 0x323   : > { %v12905_v48 = vadd.f32 %v9538_v11, %v2929_v51  ;;  %v14668_v61 = vmax.f32 %v12909_v40, 0.0 }
 0x324   : > { %v10058_v60 = vpop.f32.mrf.mxu0 }
 0x325   : > { %v12907_v6 = vadd.f32 %v10058_v60, %v9538_v11  ;;  %v14671_v2 = vmax.f32 %v12905_v48, 0.0  ;;  %v10673_v60 = vld [vmem:[#allocation24 + $0x38] sm:$0xff]  }
 0x326   : > { %v2932_v50 = vpop.f32.mrf.mxu0  ;;  %10103 = vmatprep.subr.bf16.mxu0 %v10673_v60 }
 0x327   : > { %v12911_v32 = vadd.f32 %v9538_v11, %v2932_v50  ;;  %v14669_v1 = vmax.f32 %v12907_v6, 0.0  ;;  %10104 = vmatpush3.bf16.msra.mxu0 %v10673_v60  ;;  %v10674_v50 = vld [vmem:[#allocation24 + $0x30] sm:$0xff]  }
 0x328   : > { %10105 = vmatprep.subr.bf16.mxu0 %v10674_v50  ;;  %v10705_v60 = vld [vmem:[#allocation27 + $0x60] ss:$16 sps:$4 sm:$0xff]  }
 0x329   : > { %v14670_v5 = vmax.f32 %v12911_v32, 0.0  ;;  %v3026_v59 = vpack.c.bf16 %v14669_v1, %v14668_v61 }
 0x32b   : > { %v3025_v18 = vpack.c.bf16 %v14670_v5, %v14671_v2  ;;  %10106 = vmatpush3.bf16.msra.mxu0 %v10674_v50  ;;  %v13066_v5 = vld [vmem:[#allocation22] ss:$0 sm:$0xff] }
 0x32d   : > { %10087 = vmatprep.mubr.bf16.mxu1 %v3025_v18  ;;  %v10676_v18 = vld [vmem:[#allocation24 + $0x20] sm:$0xff]  }
 0x32e   : > { %10088 = vmatmul.mubr.bf16.vlgmr.msra.gmra.mxu1 %v3026_v59  ;;  %v10677_v59 = vld [vmem:[#allocation24 + $0x18] sm:$0xff]  }
 0x338   : > { %v10061_v23 = vpop.f32.mrf.mxu0 }
 0x339   : > { %v12925_v31 = vadd.f32 %v10061_v23, %v9538_v11  ;;  %v10678_v23 = vld [vmem:[#allocation24 + $0x10] sm:$0xff]  }
 0x33a   : > { %v2945_v25 = vpop.f32.mrf.mxu0 }
 0x33b   : > { %v12927_v34 = vadd.f32 %v9538_v11, %v2945_v25  ;;  %v14664_v28 = vmax.f32 %v12925_v31, 0.0  ;;  %v10679_v25 = vld [vmem:[#allocation24 + $0x8] sm:$0xff]  }
 0x33c   : > { %v10062_v58 = vpop.f32.mrf.mxu0 }
 0x33d   : > { %v12929_v47 = vadd.f32 %v10062_v58, %v9538_v11  ;;  %v14666_v12 = vmax.f32 %v12927_v34, 0.0  ;;  %v10680_v58 = vld [vmem:[#allocation24] sm:$0xff]  }
 0x33e   : > { %v2948_v21 = vpop.f32.mrf.mxu0 }
 0x33f   : > { %v14665_v3 = vmax.f32 %v12929_v47, 0.0  ;;  %v12934_v46 = vadd.f32 %v9538_v11, %v2948_v21  ;;  %v10681_v21 = vld [vmem:[#allocation27 + $0xe0] ss:$16 sps:$4 sm:$0xff]  }
 0x341   : > { %v14667_v22 = vmax.f32 %v12934_v46, 0.0  ;;  %v3028_v13 = vpack.c.bf16 %v14665_v3, %v14664_v28 }
 0x343   : > { %v3027_v41 = vpack.c.bf16 %v14667_v22, %v14666_v12 }
 0x345   : > { %10091 = vmatprep.mubr.bf16.mxu1 %v3027_v41  ;;  %v10686_v41 = vld [vmem:[#allocation27 + $0xec] ss:$16 sps:$4 sm:$0xff]  }
 0x346   : > { %10092 = vmatmul.mubr.bf16.gmra.mxu1 %v3028_v13  ;;  %v10683_v13 = vld [vmem:[#allocation27 + $0xe4] ss:$16 sps:$4 sm:$0xff]  }
 0x347   : > { %4182 = vmatprep.subr.bf16.mxu1 %v10683_v13 }
 0x348   : > { %4183 = vmatpush1.bf16.msra.mxu1 %v10681_v21 }
 0x34e   : > { %v10065_v42 = vpop.f32.mrf.mxu0 }
 0x34f   : > { %v12945_v53 = vadd.f32 %v10065_v42, %v9538_v11  ;;  %v10689_v42 = vld [vmem:[#allocation27 + $0xc4] ss:$16 sps:$4 sm:$0xff]  }
 0x350   : > { %v2961_v26 = vpop.f32.mrf.mxu0  ;;  %4184 = vmatprep.subr.bf16.mxu1 %v10689_v42 }
 0x351   : > { %14824 = vst [vmem:[#allocation103_spill] sm:$0xff] %v12945_v53  ;;  %v12947_v37 = vadd.f32 %v9538_v11, %v2961_v26  ;;  %v14660_v44 = vmax.f32 %v12945_v53, 0.0  ;;  %v10687_v26 = vld [vmem:[#allocation27 + $0xc0] ss:$16 sps:$4 sm:$0xff]  }
 0x352   : > { %v10066_v49 = vpop.f32.mrf.mxu0  ;;  %4185 = vmatpush1.bf16.msra.mxu1 %v10687_v26 }
 0x353   : > { %14825 = vst [vmem:[#allocation104_spill] sm:$0xff] %v12947_v37  ;;  %v12949_v36 = vadd.f32 %v10066_v49, %v9538_v11  ;;  %v14663_v19 = vmax.f32 %v12947_v37, 0.0  ;;  %v10695_v49 = vld [vmem:[#allocation27 + $0xa4] ss:$16 sps:$4 sm:$0xff]  }
 0x354   : > { %v2964_v63 = vpop.f32.mrf.mxu0  ;;  %4186 = vmatprep.subr.bf16.mxu1 %v10695_v49 }
 0x355   : > { %14826 = vst [vmem:[#allocation105_spill] sm:$0xff] %v12949_v36  ;;  %v14661_v20 = vmax.f32 %v12949_v36, 0.0  ;;  %v12954_v45 = vadd.f32 %v9538_v11, %v2964_v63  ;;  %v10693_v63 = vld [vmem:[#allocation27 + $0xa0] ss:$16 sps:$4 sm:$0xff]  }
 0x356   : > { %4187 = vmatpush1.bf16.msra.mxu1 %v10693_v63  ;;  %v3365_v63 = vld [vmem:[#allocation2 + $0x2] sm:$0xff] }
 0x357   : > { %14827 = vst [vmem:[#allocation106_spill] sm:$0xff] %v12954_v45  ;;  %v14662_v15 = vmax.f32 %v12954_v45, 0.0  ;;  %v3030_v56 = vpack.c.bf16 %v14661_v20, %v14660_v44 }
 0x359   : > { %v3029_v14 = vpack.c.bf16 %v14662_v15, %v14663_v19 }
 0x35b   : > { %10095 = vmatprep.mubr.bf16.mxu1 %v3029_v14  ;;  %v10699_v14 = vld [vmem:[#allocation27 + $0x80] ss:$16 sps:$4 sm:$0xff]  }
 0x35c   : > { %10096 = vmatmul.mubr.bf16.gmra.mxu1 %v3030_v56  ;;  %v10701_v56 = vld [vmem:[#allocation27 + $0x84] ss:$16 sps:$4 sm:$0xff]  }
 0x35d   : > { %4188 = vmatprep.subr.bf16.mxu1 %v10701_v56 }
 0x35e   : > { %4189 = vmatpush1.bf16.msra.mxu1 %v10699_v14 }
 0x367   : > { %v10069_v35 = vpop.f32.mrf.mxu0 }
 0x368   : > { %v12965_v54 = vadd.f32 %v10069_v35, %v9538_v11  ;;  %v12985_v35 = vld [vmem:[#allocation19] ss:$0 sm:$0xff] }
 0x369   : > { %v2977_v0 = vpop.f32.mrf.mxu0 }
 0x36a   : > { %14828 = vst [vmem:[#allocation107_spill] sm:$0xff] %v12965_v54  ;;  %v12967_v27 = vadd.f32 %v9538_v11, %v2977_v0  ;;  %v14656_v62 = vmax.f32 %v12965_v54, 0.0  ;;  %v10707_v0 = vld [vmem:[#allocation27 + $0x64] ss:$16 sps:$4 sm:$0xff]  }
 0x36b   : > { %v10070_v57 = vpop.f32.mrf.mxu0  ;;  %4190 = vmatprep.subr.bf16.mxu1 %v10707_v0 }
 0x36c   : > { %14829 = vst [vmem:[#allocation108_spill] sm:$0xff] %v12967_v27  ;;  %v12969_v24 = vadd.f32 %v10070_v57, %v9538_v11  ;;  %v14658_v43 = vmax.f32 %v12967_v27, 0.0  ;;  %v3200_v57 = vld [vmem:[#allocation21] sm:$0xff]  ;;  %4191 = vmatpush1.bf16.msra.mxu1 %v10705_v60 }
 0x36d   : > { %v2980_v52 = vpop.f32.mrf.mxu0  ;;  %v13007_v26 = vrot.slane %v3200_v57, %v12504_v9 }
 0x36e   : > { %14830 = vst [vmem:[#allocation109_spill] sm:$0xff] %v12969_v24  ;;  %v14657_v33 = vmax.f32 %v12969_v24, 0.0  ;;  %v12974_v55 = vadd.f32 %v9538_v11, %v2980_v52  ;;  %v10675_v11 = vld [vmem:[#allocation24 + $0x28] sm:$0xff]  }
 0x36f   : > { %10107 = vmatprep.subr.bf16.mxu0 %v10675_v11 }
 0x370   : > { %14831 = vst [vmem:[#allocation110_spill] sm:$0xff] %v12974_v55  ;;  %v14659_v16 = vmax.f32 %v12974_v55, 0.0  ;;  %v3032_v17 = vpack.c.bf16 %v14657_v33, %v14656_v62  ;;  %10108 = vmatpush3.bf16.msra.mxu0 %v10675_v11  ;;  %v3313_v11 = vld [vmem:[#allocation2 + $0x1] sm:$0xff] }
 0x371   : > { %10109 = vmatprep.subr.bf16.mxu0 %v10676_v18 }
 0x372   : > { %v3031_v51 = vpack.c.bf16 %v14659_v16, %v14658_v43 }
 0x374   : > { %10099 = vmatprep.mubr.bf16.mxu1 %v3031_v51  ;;  %10110 = vmatpush3.bf16.msra.mxu0 %v10676_v18 }
 0x375   : > { %10100 = vmatmul.mubr.bf16.gmra.mxu1 %v3032_v17  ;;  %10111 = vmatprep.subr.bf16.mxu0 %v10677_v59  ;;  %v12988_v17 = vrot.slane %v3200_v57, %v12497_v7 }
 0x378   : > { %10112 = vmatpush3.bf16.msra.mxu0 %v10677_v59 }
 0x379   : > { %10113 = vmatprep.subr.bf16.mxu0 %v10678_v23 }
 0x37c   : > { %10114 = vmatpush3.bf16.msra.mxu0 %v10678_v23  ;;  %v12995_v23 = vrot.slane %v3200_v57, %v12500_v8 }
 0x37d   : > { %10115 = vmatprep.subr.bf16.mxu0 %v10679_v25 }
 0x37e   : > { %v3333_v42 = vmul.f32 %v12995_v23, %v3313_v11 }
 0x380   : > { %10116 = vmatpush3.bf16.msra.mxu0 %v10679_v25 }
 0x381   : > { %10117 = vmatprep.subr.bf16.mxu0 %v10680_v58 }
 0x384   : > { %10118 = vmatpush3.bf16.msra.mxu0 %v10680_v58  ;;  %v12997_v58 = vld [vmem:[#allocation3] sm:$0xff] }
 0x385   : > { %4295 = vmatprep.subr.bf16.mxu0 %v10686_v41  ;;  %v13001_v21 = vmul.f32 %v12997_v58, %v12988_v17 }
 0x3ee   : > { %v10089_v52 = vpop.f32.mrf.mxu1 }
 0x3ef   : > { %v3130_v51 = vadd.f32 %v10089_v52, %v12985_v35  ;;  %v3349_v52 = vadd.f32 %v3333_v42, %v13001_v21  ;;  %v13024_v42 = vrot.slane %v3200_v57, %v2536_v29  ;;  %v13036_v29 = vrot.slane %v3200_v57, %v2640_v38 }
 0x3f0   : > { %v3121_v50 = vpop.f32.mrf.mxu1 }
 0x3f1   : > { %v12991_v18 = vmax.f32 %v3130_v51, 0.0  ;;  %v3122_v59 = vadd.f32 %v12985_v35, %v3121_v50  ;;  %v3385_v51 = vmul.f32 %v13007_v26, %v3365_v63  ;;  %v13028_v63 = vrot.slane %v3200_v57, %v2588_v30 }
 0x3f2   : > { %v10090_v25 = vpop.f32.mrf.mxu1  ;;  %v13040_v30 = vrot.slane %v3200_v57, %v2692_v39 }
 0x3f3   : > { %3206 = vst [vmem:[#allocation2 + $0x31] sm:$0xff] %v12991_v18  ;;  %v3184_v13 = vmax.f32 %v3122_v59, 0.0  ;;  %v3133_v41 = vadd.f32 %v10090_v25, %v12985_v35  ;;  %v3401_v11 = vadd.f32 %v3385_v51, %v3349_v52  ;;  %v13016_v59 = vrot.slane %v3200_v57, %v12507_v10  ;;  %v3201_v51 = vld [vmem:[#allocation21 + $0x8] sm:$0xff] }
 0x3f4   : > { %v3124_v49 = vpop.f32.mrf.mxu1  ;;  %v3336_v52 = vmul.f32 %v12995_v23, %v12991_v18 }
 0x3f5   : > { %3204 = vst [vmem:[#allocation2 + $0x11] sm:$0xff] %v3184_v13  ;;  %v13009_v56 = vmax.f32 %v3133_v41, 0.0  ;;  %v3125_v14 = vadd.f32 %v12985_v35, %v3124_v49  ;;  %v3334_v49 = vmul.f32 %v12995_v23, %v3184_v13  ;;  %v3489_v44 = vmul.f32 %v13024_v42, %v3184_v13 }
 0x3f6   : > { %v13045_v13 = vrot.slane %v3201_v51, %v12497_v7 }
 0x3f7   : > { %3207 = vst [vmem:[#allocation2 + $0x41] sm:$0xff] %v13009_v56  ;;  %v3185_v0 = vmax.f32 %v3125_v14, 0.0 }
 0x3f9   : > { %3205 = vst [vmem:[#allocation2 + $0x21] sm:$0xff] %v3185_v0  ;;  %v3335_v38 = vmul.f32 %v12995_v23, %v3185_v0  ;;  %v3490_v57 = vmul.f32 %v13024_v42, %v3185_v0  ;;  %v3646_v22 = vmul.f32 %v13040_v30, %v3185_v0  ;;  %v3491_v0 = vmul.f32 %v13024_v42, %v12991_v18 }
 0x3fa   : > { %v3575_v50 = vld [vmem:[#allocation2 + $0x30] sm:$0xff] }
 0x3fb   : > { %v3284_v41 = vmul.f32 %v3575_v50, %v12988_v17  ;;  %v3679_v20 = vld [vmem:[#allocation2 + $0x32] sm:$0xff] }
 0x3fc   : > { %v3262_v60 = vld [vmem:[#allocation2 + $0x10] sm:$0xff]  ;;  %v3388_v4 = vmul.f32 %v3679_v20, %v13007_v26 }
 0x3fd   : > { %v3366_v25 = vld [vmem:[#allocation2 + $0x12] sm:$0xff]  ;;  %v3282_v62 = vmul.f32 %v12988_v17, %v3262_v60  ;;  %v3437_v14 = vmul.f32 %v13016_v59, %v3262_v60  ;;  %v3352_v15 = vadd.f32 %v3336_v52, %v3284_v41 }
 0x3fe   : > { %v3386_v43 = vmul.f32 %v13007_v26, %v3366_v25 }
 0x3ff   : > { %v3350_v33 = vadd.f32 %v3334_v49, %v3282_v62  ;;  %v3453_v16 = vadd.f32 %v3437_v14, %v3401_v11  ;;  %v3541_v11 = vmul.f32 %v13028_v63, %v3366_v25  ;;  %v3420_v14 = vld [vmem:[#allocation2 + $0x40] sm:$0xff]  ;;  %v3404_v25 = vadd.f32 %v3388_v4, %v3352_v15 }
 0x400   : > { %v3418_v60 = vld [vmem:[#allocation2 + $0x20] sm:$0xff]  ;;  %v3440_v41 = vmul.f32 %v13016_v59, %v3420_v14 }
 0x401   : > { %v3402_v19 = vadd.f32 %v3386_v43, %v3350_v33  ;;  %v3438_v28 = vmul.f32 %v13016_v59, %v3418_v60  ;;  %v3505_v62 = vadd.f32 %v3489_v44, %v3453_v16  ;;  %v3522_v49 = vld [vmem:[#allocation2 + $0x22] sm:$0xff]  ;;  %v3283_v3 = vmul.f32 %v3418_v60, %v12988_v17 }
 0x402   : > { %v3594_v33 = vmul.f32 %v13036_v29, %v3418_v60  ;;  %v3387_v16 = vmul.f32 %v3522_v49, %v13007_v26  ;;  %v3542_v51 = vmul.f32 %v13028_v63, %v3522_v49 }
 0x403   : > { %v3454_v39 = vadd.f32 %v3438_v28, %v3402_v19  ;;  %v3557_v43 = vadd.f32 %v3541_v11, %v3505_v62  ;;  %v3351_v44 = vadd.f32 %v3335_v38, %v3283_v3  ;;  %v3595_v28 = vmul.f32 %v13036_v29, %v3575_v50 }
 0x404   : > { %v3647_v19 = vmul.f32 %v13040_v30, %v12991_v18  ;;  %v3439_v3 = vmul.f32 %v3575_v50, %v13016_v59  ;;  %v3698_v38 = vmul.f32 %v13045_v13, %v3522_v49  ;;  %v3337_v49 = vmul.f32 %v12995_v23, %v13009_v56 }
 0x405   : > { %v3506_v52 = vadd.f32 %v3490_v57, %v3454_v39  ;;  %v3610_v12 = vadd.f32 %v3594_v33, %v3557_v43  ;;  %v3403_v62 = vadd.f32 %v3387_v16, %v3351_v44  ;;  %v3456_v57 = vadd.f32 %v3440_v41, %v3404_v25 }
 0x406   : > { %v10093_v61 = vpop.f32.mrf.mxu1  ;;  %v3285_v43 = vmul.f32 %v3420_v14, %v12988_v17 }
 0x407   : > { %v3146_v60 = vadd.f32 %v10093_v61, %v12985_v35  ;;  %v3558_v15 = vadd.f32 %v3542_v51, %v3506_v52  ;;  %v3662_v11 = vadd.f32 %v3646_v22, %v3610_v12  ;;  %v3455_v39 = vadd.f32 %v3439_v3, %v3403_v62  ;;  %v3321_v51 = vld [vmem:[#allocation2 + $0xa1] sm:$0xff] }
 0x408   : > { %v3137_v4 = vpop.f32.mrf.mxu1  ;;  %v3492_v61 = vmul.f32 %v13024_v42, %v13009_v56  ;;  %v3543_v22 = vmul.f32 %v3679_v20, %v13028_v63  ;;  %v3699_v52 = vmul.f32 %v13045_v13, %v3679_v20  ;;  %v3524_v3 = vld [vmem:[#allocation2 + $0x42] sm:$0xff]  ;;  %v3648_v20 = vmul.f32 %v13040_v30, %v13009_v56 }
 0x409   : > { %v3190_v33 = vmax.f32 %v3146_v60, 0.0  ;;  %v3138_v1 = vadd.f32 %v12985_v35, %v3137_v4  ;;  %v3611_v44 = vadd.f32 %v3595_v28, %v3558_v15  ;;  %v3714_v16 = vadd.f32 %v3698_v38, %v3662_v11 }
 0x40a   : > { %v10094_v50 = vpop.f32.mrf.mxu1  ;;  %v3507_v12 = vadd.f32 %v3491_v0, %v3455_v39  ;;  %v3508_v62 = vadd.f32 %v3492_v61, %v3456_v57  ;;  %v3596_v15 = vmul.f32 %v13036_v29, %v3420_v14  ;;  %v3353_v11 = vadd.f32 %v3337_v49, %v3285_v43  ;;  %v3633_v0 = vld [vmem:[#allocation2 + $0x91] sm:$0xff] }
 0x40b   : > { %3210 = vst [vmem:[#allocation2 + $0x71] sm:$0xff] %v3190_v33  ;;  %v3188_v18 = vmax.f32 %v3138_v1, 0.0  ;;  %v3149_v25 = vadd.f32 %v10094_v50, %v12985_v35  ;;  %v3663_v41 = vadd.f32 %v3647_v19, %v3611_v44  ;;  %v3736_v1 = vadd.f32 %v13066_v5, %v3714_v16  ;;  %v3685_v19 = vld [vmem:[#allocation2 + $0x92] sm:$0xff] }
 0x40c   : > { %v3140_v28 = vpop.f32.mrf.mxu1  ;;  %v3559_v60 = vadd.f32 %v3543_v22, %v3507_v12  ;;  %v13084_v57 = vmul.f32 %v12997_v58, %v13036_v29  ;;  %v13087_v14 = vmul.f32 %v12995_v23, %v3321_v51  ;;  %v3544_v16 = vmul.f32 %v13028_v63, %v3524_v3 }
 0x40d   : > { %3208 = vst [vmem:[#allocation2 + $0x51] sm:$0xff] %v3188_v18  ;;  %v13076_v38 = vmax.f32 %v3149_v25, 0.0  ;;  %v3141_v4 = vadd.f32 %v12985_v35, %v3140_v28  ;;  %v3715_v39 = vadd.f32 %v3699_v52, %v3663_v41  ;;  %v3389_v61 = vmul.f32 %v3524_v3, %v13007_v26 }
 0x40e   : > { %v3612_v44 = vadd.f32 %v3596_v15, %v3559_v60  ;;  %v3700_v22 = vmul.f32 %v13045_v13, %v3524_v3  ;;  %v13095_v56 = vmul.f32 %v13040_v30, %v3633_v0  ;;  %v13098_v58 = vmul.f32 %v13045_v13, %v3685_v19 }
 0x40f   : > { %3211 = vst [vmem:[#allocation2 + $0x81] sm:$0xff] %v13076_v38  ;;  %v3189_v43 = vmax.f32 %v3141_v4, 0.0  ;;  %v3737_v50 = vadd.f32 %v13066_v5, %v3715_v39  ;;  %v3752_v49 = vmax.f32 %v3736_v1, 0.0  ;;  %v3560_v41 = vadd.f32 %v3544_v16, %v3508_v62 }
 0x410   : > { %v3664_v12 = vadd.f32 %v3648_v20, %v3612_v44  ;;  %v3405_v52 = vadd.f32 %v3389_v61, %v3353_v11  ;;  %v13101_v60 = vmul.f32 %v13040_v30, %v3190_v33  ;;  %v3340_v15 = vmul.f32 %v12995_v23, %v3190_v33 }
 0x411   : > { %3209 = vst [vmem:[#allocation2 + $0x61] sm:$0xff] %v3189_v43  ;;  %v3753_v25 = vmax.f32 %v3737_v50, 0.0  ;;  %v13105_v3 = vmul.f32 %v13024_v42, %v3190_v33  ;;  %v3649_v39 = vmul.f32 %v13040_v30, %v3188_v18  ;;  %v3338_v0 = vmul.f32 %v12995_v23, %v3188_v18 }
 0x412   : > { %v3716_v51 = vadd.f32 %v3700_v22, %v3664_v12  ;;  %v3579_v28 = vld [vmem:[#allocation2 + $0x70] sm:$0xff]  ;;  %v3493_v44 = vmul.f32 %v13024_v42, %v3188_v18  ;;  %v3494_v20 = vmul.f32 %v13024_v42, %v3189_v43  ;;  %v3650_v50 = vmul.f32 %v13040_v30, %v3189_v43 }
 0x413   : > { %v3785_v4 = vpack.c.bf16 %v3753_v25, %v3752_v49  ;;  %v13109_v19 = vld [vmem:[#allocation2 + $0x72] sm:$0xff]  ;;  %v3288_v62 = vmul.f32 %v3579_v28, %v12988_v17  ;;  %v3496_v33 = vmul.f32 %v13024_v42, %v13076_v38  ;;  %v3339_v22 = vmul.f32 %v12995_v23, %v3189_v43 }
 0x414   : > { %v3577_v11 = vld [vmem:[#allocation2 + $0x50] sm:$0xff]  ;;  %v3738_v61 = vadd.f32 %v13066_v5, %v3716_v51  ;;  %v3599_v18 = vmul.f32 %v13036_v29, %v3579_v28  ;;  %v3392_v2 = vmul.f32 %v13109_v19, %v13007_v26 }
 0x415   : > { %v3681_v1 = vld [vmem:[#allocation2 + $0x52] sm:$0xff]  ;;  %10119 = vmatprep.mubr.bf16.mxu0 %v3785_v4  ;;  %v3597_v16 = vmul.f32 %v13036_v29, %v3577_v11  ;;  %v3286_v12 = vmul.f32 %v3577_v11, %v12988_v17  ;;  %v3441_v49 = vmul.f32 %v3577_v11, %v13016_v59  ;;  %v3356_v25 = vadd.f32 %v3340_v15, %v3288_v62 }
 0x416   : > { %v13125_v10 = vld [vmem:[#allocation2 + $0x80] sm:$0xff]  ;;  %v3390_v9 = vmul.f32 %v3681_v1, %v13007_v26  ;;  %v3701_v43 = vmul.f32 %v13045_v13, %v3681_v1  ;;  %v3443_v15 = vmul.f32 %v3579_v28, %v13016_v59  ;;  %v3754_v27 = vmax.f32 %v3738_v61, 0.0 }
 0x417   : > { %v3613_v8 = vadd.f32 %v3597_v16, %v3560_v41  ;;  %v3354_v4 = vadd.f32 %v3338_v0, %v3286_v12  ;;  %v3444_v51 = vmul.f32 %v13016_v59, %v13125_v10  ;;  %v13130_v7 = vld [vmem:[#allocation2 + $0x82] sm:$0xff]  ;;  %v3457_v54 = vadd.f32 %v3441_v49, %v3405_v52 }
 0x418   : > { %v3422_v11 = vld [vmem:[#allocation2 + $0x60] sm:$0xff]  ;;  %v3408_v24 = vadd.f32 %v3392_v2, %v3356_v25  ;;  %v3545_v12 = vmul.f32 %v3681_v1, %v13028_v63  ;;  %v3548_v36 = vmul.f32 %v13028_v63, %v13130_v7 }
 0x419   : > { %v3665_v62 = vadd.f32 %v3649_v39, %v3613_v8  ;;  %v3406_v55 = vadd.f32 %v3390_v9, %v3354_v4  ;;  %v3442_v41 = vmul.f32 %v13016_v59, %v3422_v11  ;;  %v3526_v0 = vld [vmem:[#allocation2 + $0x62] sm:$0xff]  ;;  %v3509_v16 = vadd.f32 %v3493_v44, %v3457_v54 }
 0x41a   : > { %v3287_v53 = vmul.f32 %v3422_v11, %v12988_v17  ;;  %v3598_v2 = vmul.f32 %v13036_v29, %v3422_v11  ;;  %v3460_v28 = vadd.f32 %v3444_v51, %v3408_v24  ;;  %v3391_v61 = vmul.f32 %v3526_v0, %v13007_v26 }
 0x41b   : > { %v3717_v37 = vadd.f32 %v3701_v43, %v3665_v62  ;;  %v3458_v52 = vadd.f32 %v3442_v41, %v3406_v55  ;;  %v3561_v9 = vadd.f32 %v3545_v12, %v3509_v16  ;;  %v3546_v49 = vmul.f32 %v13028_v63, %v3526_v0 }
 0x41c   : > { %v10097_v45 = vpop.f32.mrf.mxu1  ;;  %v3355_v39 = vadd.f32 %v3339_v22, %v3287_v53  ;;  %v3512_v25 = vadd.f32 %v3496_v33, %v3460_v28  ;;  %v3702_v53 = vmul.f32 %v13045_v13, %v3526_v0  ;;  %v10684_v33 = vld [vmem:[#allocation27 + $0xe8] ss:$16 sps:$4 sm:$0xff]  }
 0x41d   : > { %v3162_v8 = vadd.f32 %v10097_v45, %v12985_v35  ;;  %v3739_v1 = vadd.f32 %v13066_v5, %v3717_v37  ;;  %v3510_v44 = vadd.f32 %v3494_v20, %v3458_v52  ;;  %v3614_v43 = vadd.f32 %v3598_v2, %v3561_v9  ;;  %v10692_v9 = vld [vmem:[#allocation27 + $0xcc] ss:$16 sps:$4 sm:$0xff]  }
 0x41e   : > { %v3153_v54 = vpop.f32.mrf.mxu1  ;;  %v3407_v11 = vadd.f32 %v3391_v61, %v3355_v39  ;;  %v3564_v22 = vadd.f32 %v3548_v36, %v3512_v25  ;;  %v3547_v2 = vmul.f32 %v13109_v19, %v13028_v63  ;;  %v3357_v61 = vadd.f32 %v13087_v14, %v13001_v21  ;;  %v10698_v25 = vld [vmem:[#allocation27 + $0xac] ss:$16 sps:$4 sm:$0xff]  }
 0x41f   : > { %v13144_v4 = vmax.f32 %v3162_v8, 0.0  ;;  %v3154_v55 = vadd.f32 %v12985_v35, %v3153_v54  ;;  %v3755_v51 = vmax.f32 %v3739_v1, 0.0  ;;  %v3562_v45 = vadd.f32 %v3546_v49, %v3510_v44  ;;  %v3373_v8 = vld [vmem:[#allocation2 + $0xa2] sm:$0xff] }
 0x420   : > { %v10098_v24 = vpop.f32.mrf.mxu1  ;;  %v3666_v20 = vadd.f32 %v3650_v50, %v3614_v43  ;;  %v3459_v41 = vadd.f32 %v3443_v15, %v3407_v11  ;;  %v3617_v28 = vadd.f32 %v13084_v57, %v3564_v22  ;;  %v3600_v44 = vmul.f32 %v13036_v29, %v13125_v10 }
 0x421   : > { %3214 = vst [vmem:[#allocation2 + $0xd1] sm:$0xff] %v13144_v4  ;;  %v3192_v62 = vmax.f32 %v3154_v55, 0.0  ;;  %v3165_v37 = vadd.f32 %v10098_v24, %v12985_v35  ;;  %v3786_v12 = vpack.c.bf16 %v3755_v51, %v3754_v27  ;;  %v3615_v52 = vadd.f32 %v3599_v18, %v3562_v45 }
 0x422   : > { %v3156_v16 = vpop.f32.mrf.mxu1  ;;  %v3718_v39 = vadd.f32 %v3702_v53, %v3666_v20  ;;  %v3511_v50 = vadd.f32 %v13105_v3, %v3459_v41  ;;  %v3703_v27 = vmul.f32 %v13045_v13, %v13109_v19  ;;  %v3669_v18 = vadd.f32 %v13095_v56, %v3617_v28 }
 0x423   : > { %3212 = vst [vmem:[#allocation2 + $0xb1] sm:$0xff] %v3192_v62  ;;  %v13153_v36 = vmax.f32 %v3165_v37, 0.0  ;;  %v3157_v0 = vadd.f32 %v12985_v35, %v3156_v16  ;;  %10120 = vmatmul.mubr.bf16.vlgmr.msra.gmra.mxu0 %v3786_v12  ;;  %v3667_v15 = vadd.f32 %v13101_v60, %v3615_v52  ;;  %v3393_v3 = vmul.f32 %v13007_v26, %v3373_v8  ;;  %v10690_v60 = vld [vmem:[#allocation27 + $0xc8] ss:$16 sps:$4 sm:$0xff]   ;;  %v10704_v12 = vld [vmem:[#allocation27 + $0x8c] ss:$16 sps:$4 sm:$0xff]  }
 0x424   : > { %v3563_v1 = vadd.f32 %v3547_v2, %v3511_v50  ;;  %4296 = vmatpush1.bf16.msra.mxu0 %v10684_v33  ;;  %v3740_v19 = vadd.f32 %v13066_v5, %v3718_v39  ;;  %v3721_v56 = vadd.f32 %v13098_v58, %v3669_v18  ;;  %v3652_v14 = vmul.f32 %v13040_v30, %v13076_v38  ;;  %v10696_v58 = vld [vmem:[#allocation27 + $0xa8] ss:$16 sps:$4 sm:$0xff]  }
 0x425   : > { %3215 = vst [vmem:[#allocation2 + $0xe1] sm:$0xff] %v13153_v36  ;;  %v13164_v54 = vmax.f32 %v3157_v0, 0.0  ;;  %v3719_v49 = vadd.f32 %v3703_v27, %v3667_v15  ;;  %4297 = vmatprep.subr.bf16.mxu0 %v10692_v9  ;;  %v3704_v43 = vmul.f32 %v13045_v13, %v13130_v7  ;;  %v3342_v11 = vmul.f32 %v12995_v23, %v3192_v62  ;;  %v10702_v15 = vld [vmem:[#allocation27 + $0x88] ss:$16 sps:$4 sm:$0xff]  }
 0x426   : > { %v3616_v21 = vadd.f32 %v3600_v44, %v3563_v1  ;;  %v3409_v24 = vadd.f32 %v3393_v3, %v3357_v61  ;;  %v3756_v45 = vmax.f32 %v3740_v19, 0.0  ;;  %v3743_v22 = vadd.f32 %v13066_v5, %v3721_v56  ;;  %v10710_v3 = vld [vmem:[#allocation27 + $0x6c] ss:$16 sps:$4 sm:$0xff]  }
 0x427   : > { %3213 = vst [vmem:[#allocation2 + $0xc1] sm:$0xff] %v13164_v54  ;;  %v3741_v55 = vadd.f32 %v13066_v5, %v3719_v49  ;;  %v3497_v2 = vmul.f32 %v13024_v42, %v3192_v62  ;;  %v3344_v8 = vmul.f32 %v12995_v23, %v13144_v4  ;;  %v3498_v61 = vmul.f32 %v13024_v42, %v13164_v54 }
 0x428   : > { %v3668_v10 = vadd.f32 %v3652_v14, %v3616_v21  ;;  %v3583_v51 = vld [vmem:[#allocation2 + $0xd0] sm:$0xff]  ;;  %4298 = vmatpush1.bf16.msra.mxu0 %v10690_v60  ;;  %v3759_v27 = vmax.f32 %v3743_v22, 0.0  ;;  %v3343_v1 = vmul.f32 %v12995_v23, %v13164_v54 }
 0x429   : > { %v3757_v53 = vmax.f32 %v3741_v55, 0.0  ;;  %4299 = vmatprep.subr.bf16.mxu0 %v10698_v25  ;;  %v13182_v16 = vld [vmem:[#allocation2 + $0xd2] sm:$0xff]  ;;  %v3292_v28 = vmul.f32 %v3583_v51, %v12988_v17  ;;  %v3447_v22 = vmul.f32 %v3583_v51, %v13016_v59 }
 0x42a   : > { %v3270_v37 = vld [vmem:[#allocation2 + $0xb0] sm:$0xff]  ;;  %v3720_v38 = vadd.f32 %v3704_v43, %v3668_v10  ;;  %v3396_v44 = vmul.f32 %v13182_v16, %v13007_v26 }
 0x42b   : > { %v3374_v20 = vld [vmem:[#allocation2 + $0xb2] sm:$0xff]  ;;  %v3290_v41 = vmul.f32 %v12988_v17, %v3270_v37  ;;  %v3445_v7 = vmul.f32 %v13016_v59, %v3270_v37  ;;  %v3787_v52 = vpack.c.bf16 %v3757_v53, %v3756_v45  ;;  %v3360_v55 = vadd.f32 %v3344_v8, %v3292_v28 }
 0x42c   : > { %v3394_v33 = vmul.f32 %v13007_v26, %v3374_v20  ;;  %v3742_v9 = vadd.f32 %v13066_v5, %v3720_v38  ;;  %v3549_v50 = vmul.f32 %v13028_v63, %v3374_v20  ;;  %4300 = vmatpush1.bf16.msra.mxu0 %v10696_v58  ;;  %v3428_v58 = vld [vmem:[#allocation2 + $0xe0] sm:$0xff]  ;;  %v3654_v38 = vmul.f32 %v13040_v30, %v13164_v54 }
 0x42d   : > { %v3358_v0 = vadd.f32 %v3342_v11, %v3290_v41  ;;  %v3461_v39 = vadd.f32 %v3445_v7, %v3409_v24  ;;  %10123 = vmatprep.mubr.bf16.mxu0 %v3787_v52  ;;  %4301 = vmatprep.subr.bf16.mxu0 %v10704_v12  ;;  %v10708_v45 = vld [vmem:[#allocation27 + $0x68] ss:$16 sps:$4 sm:$0xff]   ;;  %v3603_v41 = vmul.f32 %v13036_v29, %v3583_v51 }
 0x42e   : > { %v3426_v18 = vld [vmem:[#allocation2 + $0xc0] sm:$0xff]  ;;  %v3758_v60 = vmax.f32 %v3742_v9, 0.0  ;;  %v3448_v7 = vmul.f32 %v13016_v59, %v3428_v58  ;;  %v3412_v8 = vadd.f32 %v3396_v44, %v3360_v55  ;;  %v3655_v51 = vmul.f32 %v13040_v30, %v13144_v4 }
 0x42f   : > { %v3530_v62 = vld [vmem:[#allocation2 + $0xc2] sm:$0xff]  ;;  %v3410_v49 = vadd.f32 %v3394_v33, %v3358_v0  ;;  %v3446_v19 = vmul.f32 %v13016_v59, %v3426_v18  ;;  %v3513_v56 = vadd.f32 %v3497_v2, %v3461_v39  ;;  %v3602_v21 = vmul.f32 %v13036_v29, %v3426_v18 }
 0x430   : > { %v3550_v25 = vmul.f32 %v13028_v63, %v3530_v62  ;;  %v3291_v14 = vmul.f32 %v3426_v18, %v12988_v17  ;;  %v3788_v10 = vpack.c.bf16 %v3759_v27, %v3758_v60  ;;  %v3395_v24 = vmul.f32 %v3530_v62, %v13007_v26  ;;  %4302 = vmatpush1.bf16.msra.mxu0 %v10702_v15 }
 0x431   : > { %v3462_v43 = vadd.f32 %v3446_v19, %v3410_v49  ;;  %v3565_v11 = vadd.f32 %v3549_v50, %v3513_v56  ;;  %4303 = vmatprep.subr.bf16.mxu0 %v10710_v3  ;;  %v3706_v28 = vmul.f32 %v13045_v13, %v3530_v62  ;;  %v3499_v39 = vmul.f32 %v13024_v42, %v13144_v4 }
 0x432   : > { %v3359_v53 = vadd.f32 %v3343_v1, %v3291_v14  ;;  %10124 = vmatmul.mubr.bf16.gmra.mxu0 %v3788_v10  ;;  %v3551_v62 = vmul.f32 %v13182_v16, %v13028_v63  ;;  %v3707_v3 = vmul.f32 %v13045_v13, %v13182_v16  ;;  %v3464_v60 = vadd.f32 %v3448_v7, %v3412_v8 }
 0x433   : > { %v3514_v37 = vadd.f32 %v3498_v61, %v3462_v43  ;;  %v3618_v20 = vadd.f32 %v3602_v21, %v3565_v11  ;;  %v3604_v49 = vmul.f32 %v13036_v29, %v3428_v58  ;;  %v3500_v10 = vmul.f32 %v13024_v42, %v13153_v36  ;;  %v3532_v43 = vld [vmem:[#allocation2 + $0xe2] sm:$0xff] }
 0x434   : > { %v3411_v33 = vadd.f32 %v3395_v24, %v3359_v53  ;;  %4304 = vmatpush1.bf16.msra.mxu0 %v10708_v45  ;;  %v3345_v45 = vmul.f32 %v12995_v23, %v13153_v36 }
 0x435   : > { %v10101_v12 = vpop.f32.mrf.mxu1  ;;  %v3566_v52 = vadd.f32 %v3550_v25, %v3514_v37  ;;  %v3670_v2 = vadd.f32 %v3654_v38, %v3618_v20  ;;  %v3293_v25 = vmul.f32 %v3428_v58, %v12988_v17  ;;  %v3552_v58 = vmul.f32 %v13028_v63, %v3532_v43 }
 0x436   : > { %v3178_v9 = vadd.f32 %v10101_v12, %v12985_v35  ;;  %v3463_v0 = vadd.f32 %v3447_v22, %v3411_v33  ;;  %v3656_v22 = vmul.f32 %v13040_v30, %v13153_v36  ;;  %v3516_v20 = vadd.f32 %v3500_v10, %v3464_v60 }
 0x437   : > { %v3169_v50 = vpop.f32.mrf.mxu1  ;;  %v3619_v54 = vadd.f32 %v3603_v41, %v3566_v52  ;;  %v3722_v15 = vadd.f32 %v3706_v28, %v3670_v2  ;;  %v3361_v38 = vadd.f32 %v3345_v45, %v3293_v25  ;;  %v3397_v41 = vmul.f32 %v3532_v43, %v13007_v26 }
 0x438   : > { %v13212_v27 = vmax.f32 %v3178_v9, 0.0  ;;  %v3170_v18 = vadd.f32 %v12985_v35, %v3169_v50  ;;  %v3515_v61 = vadd.f32 %v3499_v39, %v3463_v0  ;;  %v3708_v2 = vmul.f32 %v13045_v13, %v3532_v43 }
 0x439   : > { %v10102_v1 = vpop.f32.mrf.mxu1  ;;  %v3671_v44 = vadd.f32 %v3655_v51, %v3619_v54  ;;  %v3744_v55 = vadd.f32 %v13066_v5, %v3722_v15  ;;  %v3568_v0 = vadd.f32 %v3552_v58, %v3516_v20  ;;  %v3413_v50 = vadd.f32 %v3397_v41, %v3361_v38 }
 0x43a   : > { %3218 = vst [vmem:[#allocation2 + $0x111] sm:$0xff] %v13212_v27  ;;  %v3196_v4 = vmax.f32 %v3170_v18, 0.0  ;;  %v3181_v19 = vadd.f32 %v10102_v1, %v12985_v35  ;;  %v3567_v56 = vadd.f32 %v3551_v62, %v3515_v61  ;;  %v3348_v36 = vmul.f32 %v12995_v23, %v13212_v27 }
 0x43b   : > { %v3172_v21 = vpop.f32.mrf.mxu1  ;;  %v3723_v14 = vadd.f32 %v3707_v3, %v3671_v44  ;;  %v3760_v33 = vmax.f32 %v3744_v55, 0.0 }
 0x43c   : > { %3216 = vst [vmem:[#allocation2 + $0xf1] sm:$0xff] %v3196_v4  ;;  %v13226_v16 = vmax.f32 %v3181_v19, 0.0  ;;  %v3173_v11 = vadd.f32 %v12985_v35, %v3172_v21  ;;  %v3620_v24 = vadd.f32 %v3604_v49, %v3567_v56  ;;  %v3641_v35 = vld [vmem:[#allocation2 + $0x131] sm:$0xff]  ;;  %v3346_v39 = vmul.f32 %v12995_v23, %v3196_v4 }
 0x43d   : > { %v3745_v53 = vadd.f32 %v13066_v5, %v3723_v14  ;;  %v13246_v9 = vmul.f32 %v13040_v30, %v3641_v35  ;;  %v3657_v15 = vmul.f32 %v13040_v30, %v3196_v4  ;;  %v3501_v62 = vmul.f32 %v13024_v42, %v3196_v4 }
 0x43e   : > { %3219 = vst [vmem:[#allocation2 + $0x121] sm:$0xff] %v13226_v16  ;;  %v13236_v37 = vmax.f32 %v3173_v11, 0.0  ;;  %v3672_v12 = vadd.f32 %v3656_v22, %v3620_v24  ;;  %v3504_v49 = vmul.f32 %v13024_v42, %v13226_v16 }
 0x43f   : > { %v3761_v7 = vmax.f32 %v3745_v53, 0.0 }
 0x440   : > { %3217 = vst [vmem:[#allocation2 + $0x101] sm:$0xff] %v13236_v37  ;;  %v3724_v61 = vadd.f32 %v3708_v2, %v3672_v12  ;;  %v3502_v60 = vmul.f32 %v13024_v42, %v13236_v37  ;;  %v3347_v4 = vmul.f32 %v12995_v23, %v13236_v37 }
 0x441   : > { %v3789_v52 = vpack.c.bf16 %v3761_v7, %v3760_v33  ;;  %v3587_v28 = vld [vmem:[#allocation2 + $0x110] sm:$0xff] }
 0x442   : > { %v13241_v8 = vld [vmem:[#allocation2 + $0x112] sm:$0xff]  ;;  %v3296_v54 = vmul.f32 %v3587_v28, %v12988_v17  ;;  %v3746_v24 = vadd.f32 %v13066_v5, %v3724_v61 }
 0x443   : > { %10127 = vmatprep.mubr.bf16.mxu0 %v3789_v52  ;;  %v3585_v51 = vld [vmem:[#allocation2 + $0xf0] sm:$0xff]  ;;  %v3400_v1 = vmul.f32 %v13241_v8, %v13007_v26 }
 0x444   : > { %v3689_v18 = vld [vmem:[#allocation2 + $0xf2] sm:$0xff]  ;;  %v3605_v44 = vmul.f32 %v13036_v29, %v3585_v51  ;;  %v3294_v3 = vmul.f32 %v3585_v51, %v12988_v17  ;;  %v3449_v56 = vmul.f32 %v3585_v51, %v13016_v59  ;;  %v3364_v25 = vadd.f32 %v3348_v36, %v3296_v54 }
 0x445   : > { %v3398_v19 = vmul.f32 %v3689_v18, %v13007_v26  ;;  %v3432_v21 = vld [vmem:[#allocation2 + $0x120] sm:$0xff]  ;;  %v3709_v10 = vmul.f32 %v13045_v13, %v3689_v18  ;;  %v3553_v22 = vmul.f32 %v3689_v18, %v13028_v63  ;;  %v3607_v54 = vmul.f32 %v13036_v29, %v3587_v28 }
 0x446   : > { %v13264_v14 = vld [vmem:[#allocation2 + $0x122] sm:$0xff]  ;;  %v3621_v55 = vadd.f32 %v3605_v44, %v3568_v0  ;;  %v3362_v43 = vadd.f32 %v3346_v39, %v3294_v3  ;;  %v3452_v11 = vmul.f32 %v13016_v59, %v3432_v21  ;;  %v3465_v53 = vadd.f32 %v3449_v56, %v3413_v50 }
 0x447   : > { %v3430_v45 = vld [vmem:[#allocation2 + $0x100] sm:$0xff]  ;;  %v3416_v20 = vadd.f32 %v3400_v1, %v3364_v25  ;;  %v3556_v35 = vmul.f32 %v13028_v63, %v13264_v14  ;;  %v3762_v61 = vmax.f32 %v3746_v24, 0.0  ;;  %v3659_v25 = vmul.f32 %v13040_v30, %v13212_v27 }
 0x448   : > { %v3534_v58 = vld [vmem:[#allocation2 + $0x102] sm:$0xff]  ;;  %v3673_v38 = vadd.f32 %v3657_v15, %v3621_v55  ;;  %v3414_v23 = vadd.f32 %v3398_v19, %v3362_v43  ;;  %v3450_v41 = vmul.f32 %v13016_v59, %v3430_v45  ;;  %v3517_v33 = vadd.f32 %v3501_v62, %v3465_v53  ;;  %v3693_v55 = vld [vmem:[#allocation2 + $0x132] sm:$0xff] }
 0x449   : > { %v3554_v7 = vmul.f32 %v13028_v63, %v3534_v58  ;;  %v3606_v12 = vmul.f32 %v13036_v29, %v3430_v45  ;;  %v3295_v52 = vmul.f32 %v3430_v45, %v12988_v17  ;;  %v3399_v0 = vmul.f32 %v3534_v58, %v13007_v26 }
 0x44a   : > { %v3725_v2 = vadd.f32 %v3709_v10, %v3673_v38  ;;  %v3466_v36 = vadd.f32 %v3450_v41, %v3414_v23  ;;  %v3468_v39 = vadd.f32 %v3452_v11, %v3416_v20  ;;  %v3569_v50 = vadd.f32 %v3553_v22, %v3517_v33 }
 0x44b   : > { %v3363_v51 = vadd.f32 %v3347_v4, %v3295_v52  ;;  %v3451_v15 = vmul.f32 %v3587_v28, %v13016_v59  ;;  %v3658_v17 = vmul.f32 %v13040_v30, %v13236_v37  ;;  %v3710_v3 = vmul.f32 %v13045_v13, %v3534_v58 }
 0x44c   : > { %v3747_v18 = vadd.f32 %v13066_v5, %v3725_v2  ;;  %v3518_v62 = vadd.f32 %v3502_v60, %v3466_v36  ;;  %v3520_v1 = vadd.f32 %v3504_v49, %v3468_v39  ;;  %v3622_v44 = vadd.f32 %v3606_v12, %v3569_v50  ;;  %v10716_v39 = vld [vmem:[#allocation27 + $0x4c] ss:$16 sps:$4 sm:$0xff]   ;;  %v10720_v50 = vld [vmem:[#allocation27 + $0x28] ss:$16 sps:$4 sm:$0xff]  }
 0x44d   : > { %v3415_v19 = vadd.f32 %v3399_v0, %v3363_v51  ;;  %v3503_v60 = vmul.f32 %v13024_v42, %v13212_v27  ;;  %v3555_v49 = vmul.f32 %v13241_v8, %v13028_v63  ;;  %v3711_v43 = vmul.f32 %v13045_v13, %v13241_v8  ;;  %v10714_v0 = vld [vmem:[#allocation27 + $0x48] ss:$16 sps:$4 sm:$0xff]   ;;  %4305 = vmatprep.subr.bf16.mxu0 %v10716_v39  ;;  %v10725_v51 = vld [vmem:[#allocation27 + $0x4] ss:$16 sps:$4 sm:$0xff]  }
 0x44e   : > { %v3763_v26 = vmax.f32 %v3747_v18, 0.0  ;;  %v3570_v56 = vadd.f32 %v3554_v7, %v3518_v62  ;;  %v3572_v4 = vadd.f32 %v3556_v35, %v3520_v1  ;;  %v3674_v59 = vadd.f32 %v3658_v17, %v3622_v44  ;;  %4306 = vmatpush1.bf16.msra.mxu0 %v10714_v0  ;;  %v10728_v18 = vld [vmem:[#allocation27 + $0xc] ss:$16 sps:$4 sm:$0xff]  }
 0x44f   : > { %v3467_v28 = vadd.f32 %v3451_v15, %v3415_v19  ;;  %v3608_v53 = vmul.f32 %v13036_v29, %v3432_v21  ;;  %v3713_v58 = vmul.f32 %v13045_v13, %v3693_v55  ;;  %v3660_v8 = vmul.f32 %v13040_v30, %v13226_v16  ;;  %v10711_v30 = vld [vmem:[#allocation27 + $0x40] ss:$16 sps:$4 sm:$0xff]   ;;  %v10713_v16 = vld [vmem:[#allocation27 + $0x44] ss:$16 sps:$4 sm:$0xff]   ;;  %v10726_v15 = vld [vmem:[#allocation27 + $0x8] ss:$16 sps:$4 sm:$0xff]  }
 0x450   : > { %v3790_v10 = vpack.c.bf16 %v3763_v26, %v3762_v61  ;;  %v3623_v37 = vadd.f32 %v3607_v54, %v3570_v56  ;;  %v3625_v11 = vadd.f32 %v13084_v57, %v3572_v4  ;;  %v3726_v24 = vadd.f32 %v3710_v3, %v3674_v59  ;;  %4192 = vmatprep.subr.bf16.mxu1 %v10713_v16  ;;  %v10722_v54 = vld [vmem:[#allocation27 + $0x2c] ss:$16 sps:$4 sm:$0xff]  }
 0x451   : > { %v3519_v45 = vadd.f32 %v3503_v60, %v3467_v28  ;;  %v3712_v29 = vmul.f32 %v13045_v13, %v13264_v14  ;;  %4193 = vmatpush1.bf16.msra.mxu1 %v10711_v30  ;;  %v10717_v13 = vld [vmem:[#allocation27 + $0x20] ss:$16 sps:$4 sm:$0xff]   ;;  %v10719_v14 = vld [vmem:[#allocation27 + $0x24] ss:$16 sps:$4 sm:$0xff]   ;;  %4307 = vmatprep.subr.bf16.mxu0 %v10722_v54  ;;  %v11839_v61 = vmov 0   ;;  %v14832_v56 = vmax.f32 %v12905_v48, 0.0 }
 0x452   : > { %10128 = vmatmul.mubr.bf16.gmra.mxu0 %v3790_v10  ;;  %v3675_v22 = vadd.f32 %v3659_v25, %v3623_v37  ;;  %v3677_v42 = vadd.f32 %v13246_v9, %v3625_v11  ;;  %v3748_v63 = vadd.f32 %v13066_v5, %v3726_v24  ;;  %4194 = vmatprep.subr.bf16.mxu1 %v10719_v14  ;;  %v13305_v44 = vld [vmem:[#allocation25] ss:$0 sm:$0xff]  ;;  %v14833_v4 = vmax.f32 %v12911_v32, 0.0  ;;  %v14844_v16 = vld [vmem:[#allocation105_spill] sm:$0xff]  ;;  %v14846_v14 = vld [vmem:[#allocation103_spill] sm:$0xff] }
 0x453   : > { %v3571_v27 = vadd.f32 %v3555_v49, %v3519_v45  ;;  %4308 = vmatpush1.bf16.msra.mxu0 %v10720_v50  ;;  %4214 = vmatprep.mubr.bf16.mxu1 %v11839_v61  ;;  %v14834_v49 = vmax.f32 %v12907_v6, 0.0  ;;  %v14835_v48 = vmax.f32 %v12909_v40, 0.0  ;;  %v14836_v6 = vmax.f32 %v12934_v46, 0.0 }
 0x454   : > { %v3727_v20 = vadd.f32 %v3711_v43, %v3675_v22  ;;  %v3729_v23 = vadd.f32 %v3713_v58, %v3677_v42  ;;  %v3764_v21 = vmax.f32 %v3748_v63, 0.0  ;;  %4309 = vmatprep.subr.bf16.mxu0 %v10728_v18  ;;  %v14837_v40 = vmax.f32 %v12927_v34, 0.0 }
 0x455   : > { %v3624_v38 = vadd.f32 %v3608_v53, %v3571_v27  ;;  %4195 = vmatpush1.bf16.msra.mxu1 %v10717_v13  ;;  %v14839_v46 = vmax.f32 %v12925_v31, 0.0  ;;  %v14842_v31 = vld [vmem:[#allocation106_spill] sm:$0xff]  ;;  %v14845_v0 = vmax.f32 %v14844_v16, 0.0  ;;  %v14847_v50 = vmax.f32 %v14846_v14, 0.0 }
 0x456   : > { %v3749_v57 = vadd.f32 %v13066_v5, %v3727_v20  ;;  %v3751_v9 = vadd.f32 %v13066_v5, %v3729_v23  ;;  %4196 = vmatprep.subr.bf16.mxu1 %v10725_v51 }
 0x457   : > { %v3676_v41 = vadd.f32 %v3660_v8, %v3624_v38  ;;  %4310 = vmatpush1.bf16.msra.mxu0 %v10726_v15  ;;  %v14838_v38 = vmax.f32 %v12929_v47, 0.0  ;;  %v14840_v47 = vld [vmem:[#allocation104_spill] sm:$0xff] }
 0x458   : > { %v3765_v35 = vmax.f32 %v3749_v57, 0.0  ;;  %v3767_v2 = vmax.f32 %v3751_v9, 0.0  ;;  %v14841_v9 = vmax.f32 %v14840_v47, 0.0  ;;  %v10754_v47 = vld [vmem:[#allocation30 + $0x8] sm:$0xff]  }
 0x459   : > { %v3728_v33 = vadd.f32 %v3712_v29, %v3676_v41 }
 0x45a   : > { %v3791_v7 = vpack.c.bf16 %v3765_v35, %v3764_v21 }
 0x45b   : > { %v3750_v12 = vadd.f32 %v13066_v5, %v3728_v33  ;;  %v10723_v5 = vld [vmem:[#allocation27] ss:$16 sps:$4 sm:$0xff]  }
 0x45c   : > { %10131 = vmatprep.mubr.bf16.mxu0 %v3791_v7  ;;  %4197 = vmatpush1.bf16.msra.mxu1 %v10723_v5 }
 0x45d   : > { %v3766_v52 = vmax.f32 %v3750_v12, 0.0  ;;  %v14843_v12 = vmax.f32 %v14842_v31, 0.0  ;;  %v10759_v31 = vld [vmem:[#allocation30 + $0xc0] sm:$0xff]  }
 0x45f   : > { %v3792_v36 = vpack.c.bf16 %v3767_v2, %v3766_v52 }
 0x461   : > { %10132 = vmatmul.mubr.bf16.gmra.mxu0 %v3792_v36 }
 0x462   : > { %4327 = vmatprep.mubr.bf16.mxu0 %v11839_v61 }
 0x4e3   : > { %v10121_v62 = vpop.f32.mrf.mxu0 }
 0x4e4   : > { %v3890_v60 = vadd.f32 %v10121_v62, %v13305_v44 }
 0x4e5   : > { %v3881_v1 = vpop.f32.mrf.mxu0 }
 0x4e6   : > { %v3882_v3 = vadd.f32 %v13305_v44, %v3881_v1  ;;  %v3946_v43 = vadd.f32 %v3890_v60, %v14835_v48 }
 0x4e7   : > { %v10122_v17 = vpop.f32.mrf.mxu0 }
 0x4e8   : > { %v3944_v25 = vadd.f32 %v3882_v3, %v14832_v56  ;;  %v3893_v59 = vadd.f32 %v10122_v17, %v13305_v44  ;;  %v14848_v17 = vld [vmem:[#allocation110_spill] sm:$0xff] }
 0x4e9   : > { %v3884_v19 = vpop.f32.mrf.mxu0  ;;  %v14849_v3 = vmax.f32 %v14848_v17, 0.0 }
 0x4ea   : > { %v3885_v26 = vadd.f32 %v13305_v44, %v3884_v19  ;;  %v3947_v10 = vadd.f32 %v3893_v59, %v14834_v49 }
 0x4ec   : > { %v3945_v55 = vadd.f32 %v3885_v26, %v14833_v4  ;;  %v3994_v24 = vpack.c.bf16 %v3947_v10, %v3946_v43  ;;  %v14850_v26 = vld [vmem:[#allocation108_spill] sm:$0xff]  ;;  %v14854_v10 = vld [vmem:[#allocation107_spill] sm:$0xff] }
 0x4ed   : > { %v14851_v56 = vmax.f32 %v14850_v26, 0.0 }
 0x4ee   : > { %v3993_v28 = vpack.c.bf16 %v3945_v55, %v3944_v25 }
 0x4f0   : > { %4215 = vmatmul.mubr.bf16.vlgmr.msra.gmra.mxu1 %v3993_v28  ;;  %4328 = vmatmul.mubr.bf16.vlgmr.msra.gmra.mxu0 %v3993_v28  ;;  %v14852_v28 = vld [vmem:[#allocation109_spill] sm:$0xff] }
 0x4f1   : > { %4224 = vmatprep.mubr.bf16.mxu1 %v11839_v61  ;;  %4337 = vmatprep.mubr.bf16.mxu0 %v11839_v61  ;;  %v14853_v60 = vmax.f32 %v14852_v28, 0.0 }
 0x4f2   : > { %v10125_v37 = vpop.f32.mrf.mxu0 }
 0x4f3   : > { %v3906_v63 = vadd.f32 %v10125_v37, %v13305_v44  ;;  %v14855_v37 = vmax.f32 %v14854_v10, 0.0 }
 0x4f4   : > { %v3897_v32 = vpop.f32.mrf.mxu0 }
 0x4f5   : > { %v3898_v45 = vadd.f32 %v13305_v44, %v3897_v32  ;;  %v3950_v23 = vadd.f32 %v3906_v63, %v14839_v46  ;;  %v10729_v32 = vld [vmem:[#allocation30 + $0x78] sm:$0xff]   ;;  %v10743_v63 = vld [vmem:[#allocation30 + $0xe0] sm:$0xff]  }
 0x4f6   : > { %v10126_v11 = vpop.f32.mrf.mxu0  ;;  %9877 = vmatprep.subr.bf16.mxu1 %v10729_v32  ;;  %v10746_v46 = vld [vmem:[#allocation30 + $0x18] sm:$0xff]  }
 0x4f7   : > { %v3948_v42 = vadd.f32 %v3898_v45, %v14837_v40  ;;  %v3909_v27 = vadd.f32 %v10126_v11, %v13305_v44  ;;  %v10730_v11 = vld [vmem:[#allocation30 + $0x38] sm:$0xff]   ;;  %v10733_v45 = vld [vmem:[#allocation30 + $0x70] sm:$0xff]   ;;  %v10739_v40 = vld [vmem:[#allocation30 + $0xe8] sm:$0xff]  }
 0x4f8   : > { %v3900_v53 = vpop.f32.mrf.mxu0  ;;  %4225 = vmatmul.mubr.bf16.gmra.mxu1 %v3994_v24  ;;  %4338 = vmatmul.mubr.bf16.gmra.mxu0 %v3994_v24  ;;  %v10732_v24 = vld [vmem:[#allocation30 + $0xb8] sm:$0xff]  }
 0x4f9   : > { %v3901_v58 = vadd.f32 %v13305_v44, %v3900_v53  ;;  %4234 = vmatprep.mubr.bf16.mxu1 %v11839_v61  ;;  %4347 = vmatprep.mubr.bf16.mxu0 %v11839_v61  ;;  %v3951_v8 = vadd.f32 %v3909_v27, %v14838_v38  ;;  %v10734_v53 = vld [vmem:[#allocation30 + $0x30] sm:$0xff]   ;;  %v10741_v27 = vld [vmem:[#allocation30 + $0x60] sm:$0xff]  }
 0x4fa   : > { %9878 = vmatpush3.bf16.msra.mxu1 %v10730_v11  ;;  %v10744_v38 = vld [vmem:[#allocation30 + $0xa0] sm:$0xff]  }
 0x4fb   : > { %v3949_v22 = vadd.f32 %v3901_v58, %v14836_v6  ;;  %v3996_v57 = vpack.c.bf16 %v3951_v8, %v3950_v23  ;;  %v10736_v58 = vld [vmem:[#allocation30 + $0xb0] sm:$0xff]   ;;  %9879 = vmatprep.subr.bf16.mxu1 %v10733_v45  ;;  %v10737_v6 = vld [vmem:[#allocation30 + $0x68] sm:$0xff]   ;;  %v10745_v8 = vld [vmem:[#allocation30 + $0x58] sm:$0xff]  }
 0x4fc   : > { %v10747_v23 = vld [vmem:[#allocation30 + $0xd8] sm:$0xff]  }
 0x4fd   : > { %v3995_v20 = vpack.c.bf16 %v3949_v22, %v3948_v42  ;;  %v10738_v22 = vld [vmem:[#allocation30 + $0x28] sm:$0xff]  }
 0x4fe   : > { %9880 = vmatpush3.bf16.msra.mxu1 %v10734_v53  ;;  %v10740_v42 = vld [vmem:[#allocation30 + $0xa8] sm:$0xff]  }
 0x4ff   : > { %9881 = vmatprep.subr.bf16.mxu1 %v10737_v6 }
 0x500   : > { %4235 = vmatmul.mubr.bf16.gmra.mxu1 %v3995_v20  ;;  %4348 = vmatmul.mubr.bf16.gmra.mxu0 %v3995_v20  ;;  %v10742_v20 = vld [vmem:[#allocation30 + $0x20] sm:$0xff]  }
 0x501   : > { %4244 = vmatprep.mubr.bf16.mxu1 %v11839_v61  ;;  %4357 = vmatprep.mubr.bf16.mxu0 %v11839_v61 }
 0x502   : > { %9882 = vmatpush3.bf16.msra.mxu1 %v10738_v22 }
 0x503   : > { %9883 = vmatprep.subr.bf16.mxu1 %v10741_v27 }
 0x506   : > { %9884 = vmatpush3.bf16.msra.mxu1 %v10742_v20 }
 0x507   : > { %9885 = vmatprep.subr.bf16.mxu1 %v10745_v8 }
 0x508   : > { %4245 = vmatmul.mubr.bf16.gmra.mxu1 %v3996_v57  ;;  %4358 = vmatmul.mubr.bf16.gmra.mxu0 %v3996_v57  ;;  %v10748_v57 = vld [vmem:[#allocation30 + $0x98] sm:$0xff]  }
 0x509   : > { %4254 = vmatprep.mubr.bf16.mxu1 %v11839_v61  ;;  %4367 = vmatprep.mubr.bf16.mxu0 %v11839_v61 }
 0x50a   : > { %9886 = vmatpush3.bf16.msra.mxu1 %v10746_v46 }
 0x512   : > { %v10129_v34 = vpop.f32.mrf.mxu0 }
 0x513   : > { %v3922_v30 = vadd.f32 %v10129_v34, %v13305_v44  ;;  %v10749_v34 = vld [vmem:[#allocation30 + $0x50] sm:$0xff]  }
 0x514   : > { %v3913_v41 = vpop.f32.mrf.mxu0  ;;  %9887 = vmatprep.subr.bf16.mxu1 %v10749_v34 }
 0x515   : > { %v3914_v21 = vadd.f32 %v13305_v44, %v3913_v41  ;;  %v3954_v54 = vadd.f32 %v3922_v30, %v14847_v50  ;;  %v10750_v41 = vld [vmem:[#allocation30 + $0x10] sm:$0xff]  }
 0x516   : > { %v10130_v29 = vpop.f32.mrf.mxu0  ;;  %9888 = vmatpush3.bf16.msra.mxu1 %v10750_v41 }
 0x517   : > { %v3952_v7 = vadd.f32 %v3914_v21, %v14841_v9  ;;  %v3925_v2 = vadd.f32 %v10130_v29, %v13305_v44  ;;  %v10751_v29 = vld [vmem:[#allocation30 + $0xd0] sm:$0xff]   ;;  %v10756_v9 = vld [vmem:[#allocation30 + $0x88] sm:$0xff]  }
 0x518   : > { %v3916_v35 = vpop.f32.mrf.mxu0  ;;  %v10752_v21 = vld [vmem:[#allocation30 + $0x90] sm:$0xff]  }
 0x519   : > { %v3917_v33 = vadd.f32 %v13305_v44, %v3916_v35  ;;  %v3955_v39 = vadd.f32 %v3925_v2, %v14845_v0  ;;  %v10753_v35 = vld [vmem:[#allocation30 + $0x48] sm:$0xff]  }
 0x51a   : > { %9889 = vmatprep.subr.bf16.mxu1 %v10753_v35 }
 0x51b   : > { %v3953_v52 = vadd.f32 %v3917_v33, %v14843_v12  ;;  %v3998_v15 = vpack.c.bf16 %v3955_v39, %v3954_v54  ;;  %v10755_v33 = vld [vmem:[#allocation30 + $0xc8] sm:$0xff]   ;;  %9890 = vmatpush3.bf16.msra.mxu1 %v10754_v47  ;;  %v10758_v12 = vld [vmem:[#allocation30] sm:$0xff]  }
 0x51d   : > { %v3997_v36 = vpack.c.bf16 %v3953_v52, %v3952_v7  ;;  %v10757_v7 = vld [vmem:[#allocation30 + $0x40] sm:$0xff]  }
 0x51e   : > { %v10760_v52 = vld [vmem:[#allocation30 + $0x80] sm:$0xff]   ;;  %9891 = vmatprep.subr.bf16.mxu1 %v10757_v7 }
 0x51f   : > { %4255 = vmatmul.mubr.bf16.gmra.mxu1 %v3997_v36  ;;  %4368 = vmatmul.mubr.bf16.gmra.mxu0 %v3997_v36 }
 0x520   : > { %4264 = vmatprep.mubr.bf16.mxu1 %v11839_v61  ;;  %4377 = vmatprep.mubr.bf16.mxu0 %v11839_v61 }
 0x521   : > { %v10133_v13 = vpop.f32.mrf.mxu0  ;;  %9892 = vmatpush3.bf16.msra.mxu1 %v10758_v12 }
 0x522   : > { %v3938_v59 = vadd.f32 %v10133_v13, %v13305_v44 }
 0x523   : > { %v3929_v5 = vpop.f32.mrf.mxu0 }
 0x524   : > { %v3930_v18 = vadd.f32 %v13305_v44, %v3929_v5  ;;  %v3958_v48 = vadd.f32 %v3938_v59, %v14855_v37  ;;  %v14859_v37 = vld [vmem:[#allocation102_spill] sm:$0xff] }
 0x525   : > { %v10134_v51 = vpop.f32.mrf.mxu0 }
 0x526   : > { %v3956_v25 = vadd.f32 %v3930_v18, %v14851_v56  ;;  %v3941_v4 = vadd.f32 %v10134_v51, %v13305_v44 }
 0x527   : > { %v3932_v62 = vpop.f32.mrf.mxu0  ;;  %4265 = vmatmul.mubr.bf16.gmra.mxu1 %v3998_v15  ;;  %4378 = vmatmul.mubr.bf16.gmra.mxu0 %v3998_v15 }
 0x528   : > { %v3933_v1 = vadd.f32 %v13305_v44, %v3932_v62  ;;  %4274 = vmatprep.mubr.bf16.mxu1 %v11839_v61  ;;  %4387 = vmatprep.mubr.bf16.mxu0 %v11839_v61  ;;  %v3959_v49 = vadd.f32 %v3941_v4, %v14853_v60  ;;  %v10731_v44 = vld [vmem:[#allocation30 + $0xf8] sm:$0xff]  }
 0x529   : > { %9899 = vmatprep.subr.bf16.mxu0 %v10731_v44 }
 0x52a   : > { %v3957_v19 = vadd.f32 %v3933_v1, %v14849_v3  ;;  %v4000_v43 = vpack.c.bf16 %v3959_v49, %v3958_v48  ;;  %9900 = vmatpush3.bf16.msra.mxu0 %v10732_v24  ;;  %v14858_v49 = vld [vmem:[#allocation100_spill] sm:$0xff] }
 0x52c   : > { %v3999_v55 = vpack.c.bf16 %v3957_v19, %v3956_v25  ;;  %v3992_v19 = vld [vmem:[#allocation28] sm:$0xf]  ;;  %v14856_v25 = vld [vmem:[#allocation99_spill] sm:$0xff] }
 0x52d   : > { %v13374_v4 = vrot.slane %v3992_v19, %v14856_v25  ;;  %v13380_v10 = vrot.slane %v3992_v19, %v14858_v49  ;;  %v13383_v48 = vrot.slane %v3992_v19, %v14859_v37 }
 0x52f   : > { %4275 = vmatmul.mubr.bf16.gmra.mxu1 %v3999_v55  ;;  %4388 = vmatmul.mubr.bf16.gmra.mxu0 %v3999_v55  ;;  %v14857_v55 = vld [vmem:[#allocation101_spill] sm:$0xff] }
 0x530   : > { %4284 = vmatprep.mubr.bf16.mxu1 %v11839_v61  ;;  %4397 = vmatprep.mubr.bf16.mxu0 %v11839_v61  ;;  %v10735_v61 = vld [vmem:[#allocation30 + $0xf0] sm:$0xff]   ;;  %v13377_v59 = vrot.slane %v3992_v19, %v14857_v55 }
 0x531   : > { %9901 = vmatprep.subr.bf16.mxu0 %v10735_v61 }
 0x532   : > { %9902 = vmatpush3.bf16.msra.mxu0 %v10736_v58 }
 0x533   : > { %9903 = vmatprep.subr.bf16.mxu0 %v10739_v40 }
 0x536   : > { %9904 = vmatpush3.bf16.msra.mxu0 %v10740_v42 }
 0x537   : > { %4285 = vmatmul.mubr.bf16.gmra.mxu1 %v4000_v43  ;;  %4398 = vmatmul.mubr.bf16.gmra.mxu0 %v4000_v43 }
 0x538   : > { %9905 = vmatprep.subr.bf16.mxu0 %v10743_v63 }
 0x53a   : > { %9906 = vmatpush3.bf16.msra.mxu0 %v10744_v38 }
 0x53b   : > { %9907 = vmatprep.subr.bf16.mxu0 %v10747_v23 }
 0x53e   : > { %9908 = vmatpush3.bf16.msra.mxu0 %v10748_v57 }
 0x53f   : > { %9909 = vmatprep.subr.bf16.mxu0 %v10751_v29 }
 0x542   : > { %9910 = vmatpush3.bf16.msra.mxu0 %v10752_v21 }
 0x543   : > { %9911 = vmatprep.subr.bf16.mxu0 %v10755_v33 }
 0x546   : > { %9912 = vmatpush3.bf16.msra.mxu0 %v10756_v9 }
 0x547   : > { %9913 = vmatprep.subr.bf16.mxu0 %v10759_v31 }
 0x54a   : > { %9914 = vmatpush3.bf16.msra.mxu0 %v10760_v52 }
 0x5b0   : > { %v4216_v2 = vpop.f32.mrf.mxu1  ;;  %v4329_v36 = vpop.f32.mrf.mxu0 }
 0x5b1   : > { %v4217_v11 = vadd.f32 %v4216_v2, %v13374_v4  ;;  %v4330_v44 = vadd.f32 %v4329_v36, %v13377_v59 }
 0x5b2   : > { %v4218_v30 = vpop.f32.mrf.mxu1  ;;  %v4331_v16 = vpop.f32.mrf.mxu0 }
 0x5b3   : > { %v4219_v58 = vadd.f32 %v4218_v30, %v13380_v10  ;;  %v4332_v6 = vadd.f32 %v4331_v16, %v13383_v48  ;;  %v4408_v38 = vmax.f32 %v4217_v11, 0.0  ;;  %v4410_v8 = vmax.f32 %v4330_v44, 0.0 }
 0x5b4   : > { %v4220_v0 = vpop.f32.mrf.mxu1  ;;  %v4333_v39 = vpop.f32.mrf.mxu0 }
 0x5b5   : > { %v4221_v24 = vadd.f32 %v4220_v0, %v13374_v4  ;;  %v4334_v45 = vadd.f32 %v4333_v39, %v13377_v59  ;;  %v4409_v21 = vmax.f32 %v4219_v58, 0.0  ;;  %v4411_v35 = vmax.f32 %v4332_v6, 0.0 }
 0x5b6   : > { %v4222_v13 = vpop.f32.mrf.mxu1  ;;  %v4335_v14 = vpop.f32.mrf.mxu0 }
 0x5b7   : > { %v4223_v53 = vadd.f32 %v4222_v13, %v13380_v10  ;;  %v4336_v61 = vadd.f32 %v4335_v14, %v13383_v48  ;;  %v4412_v46 = vmax.f32 %v4221_v24, 0.0  ;;  %v4414_v23 = vmax.f32 %v4334_v45, 0.0 }
 0x5b8   : > { %v4226_v50 = vpop.f32.mrf.mxu1  ;;  %v4339_v54 = vpop.f32.mrf.mxu0 }
 0x5b9   : > { %v4227_v22 = vadd.f32 %v4226_v50, %v13374_v4  ;;  %v4340_v40 = vadd.f32 %v4339_v54, %v13377_v59  ;;  %v4413_v57 = vmax.f32 %v4223_v53, 0.0  ;;  %v4415_v34 = vmax.f32 %v4336_v61, 0.0 }
 0x5ba   : > { %v4228_v5 = vpop.f32.mrf.mxu1  ;;  %v4341_v51 = vpop.f32.mrf.mxu0  ;;  %v4472_v36 = vadd.f32 %v4412_v46, %v4408_v38  ;;  %v4498_v30 = vadd.f32 %v4414_v23, %v4410_v8 }
 0x5bb   : > { %v4229_v42 = vadd.f32 %v4228_v5, %v13380_v10  ;;  %v4342_v27 = vadd.f32 %v4341_v51, %v13383_v48  ;;  %v4416_v33 = vmax.f32 %v4227_v22, 0.0  ;;  %v4418_v47 = vmax.f32 %v4340_v40, 0.0 }
 0x5bc   : > { %v4230_v15 = vpop.f32.mrf.mxu1  ;;  %v4343_v18 = vpop.f32.mrf.mxu0  ;;  %v4485_v39 = vadd.f32 %v4413_v57, %v4409_v21  ;;  %v4511_v13 = vadd.f32 %v4415_v34, %v4411_v35 }
 0x5bd   : > { %v4231_v41 = vadd.f32 %v4230_v15, %v13374_v4  ;;  %v4344_v29 = vadd.f32 %v4343_v18, %v13377_v59  ;;  %v4417_v9 = vmax.f32 %v4229_v42, 0.0  ;;  %v4419_v7 = vmax.f32 %v4342_v27, 0.0 }
 0x5be   : > { %v4232_v62 = vpop.f32.mrf.mxu1  ;;  %v4345_v1 = vpop.f32.mrf.mxu0  ;;  %v4473_v54 = vadd.f32 %v4472_v36, %v4416_v33  ;;  %v4499_v5 = vadd.f32 %v4498_v30, %v4418_v47 }
 0x5bf   : > { %v4233_v31 = vadd.f32 %v4232_v62, %v13380_v10  ;;  %v4346_v12 = vadd.f32 %v4345_v1, %v13383_v48  ;;  %v4420_v14 = vmax.f32 %v4231_v41, 0.0  ;;  %v4422_v50 = vmax.f32 %v4344_v29, 0.0 }
 0x5c0   : > { %v4236_v17 = vpop.f32.mrf.mxu1  ;;  %v4349_v3 = vpop.f32.mrf.mxu0  ;;  %v4486_v18 = vadd.f32 %v4485_v39, %v4417_v9  ;;  %v4512_v62 = vadd.f32 %v4511_v13, %v4419_v7 }
 0x5c1   : > { %v4237_v16 = vadd.f32 %v4236_v17, %v13374_v4  ;;  %v4350_v0 = vadd.f32 %v4349_v3, %v13377_v59  ;;  %v4421_v1 = vmax.f32 %v4233_v31, 0.0  ;;  %v4423_v19 = vmax.f32 %v4346_v12, 0.0 }
 0x5c2   : > { %v13369_v26 = vpop.f32.mrf.mxu1  ;;  %v13371_v56 = vpop.f32.mrf.mxu0  ;;  %v4474_v11 = vadd.f32 %v4473_v54, %v4420_v14  ;;  %v4500_v44 = vadd.f32 %v4499_v5, %v4422_v50 }
 0x5c3   : > { %v4424_v49 = vmax.f32 %v4237_v16, 0.0  ;;  %v4426_v17 = vmax.f32 %v4350_v0, 0.0  ;;  %v4239_v24 = vadd.f32 %v13369_v26, %v13380_v10  ;;  %v4487_v58 = vadd.f32 %v4486_v18, %v4421_v1 }
 0x5c4   : > { %v4240_v28 = vpop.f32.mrf.mxu1  ;;  %v4353_v60 = vpop.f32.mrf.mxu0  ;;  %v4513_v6 = vadd.f32 %v4512_v62, %v4423_v19 }
 0x5c5   : > { %v4241_v51 = vadd.f32 %v4240_v28, %v13374_v4  ;;  %v4354_v15 = vadd.f32 %v4353_v60, %v13377_v59  ;;  %v4352_v28 = vadd.f32 %v13371_v56, %v13383_v48  ;;  %v4475_v42 = vadd.f32 %v4474_v11, %v4424_v49 }
 0x5c6   : > { %v13385_v43 = vpop.f32.mrf.mxu1  ;;  %v13387_v32 = vpop.f32.mrf.mxu0  ;;  %v4501_v27 = vadd.f32 %v4500_v44, %v4426_v17  ;;  %v4425_v38 = vmax.f32 %v4239_v24, 0.0 }
 0x5c7   : > { %v4428_v60 = vmax.f32 %v4241_v51, 0.0  ;;  %v4430_v45 = vmax.f32 %v4354_v15, 0.0  ;;  %v4243_v22 = vadd.f32 %v13385_v43, %v13380_v10  ;;  %v4356_v40 = vadd.f32 %v13387_v32, %v13383_v48 }
 0x5c8   : > { %v4246_v20 = vpop.f32.mrf.mxu1  ;;  %v4359_v63 = vpop.f32.mrf.mxu0  ;;  %v4427_v8 = vmax.f32 %v4352_v28, 0.0  ;;  %v4488_v9 = vadd.f32 %v4487_v58, %v4425_v38 }
 0x5c9   : > { %v4247_v3 = vadd.f32 %v4246_v20, %v13374_v4  ;;  %v4360_v37 = vadd.f32 %v4359_v63, %v13377_v59  ;;  %v4476_v57 = vadd.f32 %v4475_v42, %v4428_v60  ;;  %v4502_v34 = vadd.f32 %v4501_v27, %v4430_v45 }
 0x5ca   : > { %v4248_v52 = vpop.f32.mrf.mxu1  ;;  %v4361_v2 = vpop.f32.mrf.mxu0  ;;  %v4429_v43 = vmax.f32 %v4243_v22, 0.0  ;;  %v4431_v21 = vmax.f32 %v4356_v40, 0.0  ;;  %v4514_v7 = vadd.f32 %v4513_v6, %v4427_v8 }
 0x5cb   : > { %v4432_v26 = vmax.f32 %v4247_v3, 0.0  ;;  %v4434_v20 = vmax.f32 %v4360_v37, 0.0  ;;  %v4249_v46 = vadd.f32 %v4248_v52, %v13380_v10  ;;  %v4362_v23 = vadd.f32 %v4361_v2, %v13383_v48 }
 0x5cc   : > { %v4250_v25 = vpop.f32.mrf.mxu1  ;;  %v4363_v55 = vpop.f32.mrf.mxu0  ;;  %v4489_v16 = vadd.f32 %v4488_v9, %v4429_v43  ;;  %v4515_v0 = vadd.f32 %v4514_v7, %v4431_v21 }
 0x5cd   : > { %v4251_v53 = vadd.f32 %v4250_v25, %v13374_v4  ;;  %v4364_v61 = vadd.f32 %v4363_v55, %v13377_v59  ;;  %v4477_v33 = vadd.f32 %v4476_v57, %v4432_v26  ;;  %v4503_v47 = vadd.f32 %v4502_v34, %v4434_v20 }
 0x5ce   : > { %v4252_v63 = vpop.f32.mrf.mxu1  ;;  %v4365_v56 = vpop.f32.mrf.mxu0  ;;  %v4433_v31 = vmax.f32 %v4249_v46, 0.0  ;;  %v4435_v12 = vmax.f32 %v4362_v23, 0.0 }
 0x5cf   : > { %v4436_v41 = vmax.f32 %v4251_v53, 0.0  ;;  %v4438_v29 = vmax.f32 %v4364_v61, 0.0  ;;  %v4253_v32 = vadd.f32 %v4252_v63, %v13380_v10  ;;  %v4366_v35 = vadd.f32 %v4365_v56, %v13383_v48 }
 0x5d0   : > { %v4490_v54 = vadd.f32 %v4489_v16, %v4433_v31  ;;  %v4516_v5 = vadd.f32 %v4515_v0, %v4435_v12 }
 0x5d1   : > { %v4478_v36 = vadd.f32 %v4477_v33, %v4436_v41  ;;  %v4504_v52 = vadd.f32 %v4503_v47, %v4438_v29  ;;  %v4437_v39 = vmax.f32 %v4253_v32, 0.0  ;;  %v4439_v13 = vmax.f32 %v4366_v35, 0.0 }
 0x5d3   : > { %v4479_v51 = vrot.slane %v4478_v36, 4  ;;  %v4505_v15 = vrot.slane %v4504_v52, 4  ;;  %v4491_v1 = vadd.f32 %v4490_v54, %v4437_v39  ;;  %v4517_v19 = vadd.f32 %v4516_v5, %v4439_v13 }
 0x5d5   : > { %v13425_v49 = vadd.f32 %v4479_v51, %v4478_v36  ;;  %v13427_v17 = vadd.f32 %v4505_v15, %v4504_v52  ;;  %v4492_v24 = vrot.slane %v4491_v1, 4  ;;  %v4518_v28 = vrot.slane %v4517_v19, 4 }
 0x5d7   : > { %v4481_v26 = vrot.slane %v13425_v49, 2  ;;  %v4507_v20 = vrot.slane %v13427_v17, 2 }
 0x5df   : > { %v4256_v30 = vpop.f32.mrf.mxu1  ;;  %v4369_v2 = vpop.f32.mrf.mxu0 }
 0x5e0   : > { %v4257_v60 = vadd.f32 %v4256_v30, %v13374_v4  ;;  %v4370_v45 = vadd.f32 %v4369_v2, %v13377_v59 }
 0x5e1   : > { %v4258_v14 = vpop.f32.mrf.mxu1  ;;  %v4371_v50 = vpop.f32.mrf.mxu0 }
 0x5e2   : > { %v4259_v22 = vadd.f32 %v4258_v14, %v13380_v10  ;;  %v4372_v40 = vadd.f32 %v4371_v50, %v13383_v48  ;;  %v4440_v41 = vmax.f32 %v4257_v60, 0.0  ;;  %v4442_v29 = vmax.f32 %v4370_v45, 0.0 }
 0x5e3   : > { %v4260_v18 = vpop.f32.mrf.mxu1  ;;  %v4373_v62 = vpop.f32.mrf.mxu0 }
 0x5e4   : > { %v4261_v3 = vadd.f32 %v4260_v18, %v13374_v4  ;;  %v4374_v37 = vadd.f32 %v4373_v62, %v13377_v59  ;;  %v4441_v33 = vmax.f32 %v4259_v22, 0.0  ;;  %v4443_v47 = vmax.f32 %v4372_v40, 0.0 }
 0x5e5   : > { %v4262_v25 = vpop.f32.mrf.mxu1  ;;  %v4375_v55 = vpop.f32.mrf.mxu0 }
 0x5e6   : > { %v4263_v53 = vadd.f32 %v4262_v25, %v13380_v10  ;;  %v4376_v61 = vadd.f32 %v4375_v55, %v13383_v48  ;;  %v4444_v63 = vmax.f32 %v4261_v3, 0.0  ;;  %v4446_v56 = vmax.f32 %v4374_v37, 0.0 }
 0x5e7   : > { %v4266_v11 = vpop.f32.mrf.mxu1  ;;  %v4379_v44 = vpop.f32.mrf.mxu0  ;;  %v13451_v3 = vadd.f32 %v4492_v24, %v4491_v1  ;;  %v13453_v37 = vadd.f32 %v4518_v28, %v4517_v19 }
 0x5e8   : > { %v4267_v42 = vadd.f32 %v4266_v11, %v13374_v4  ;;  %v4380_v27 = vadd.f32 %v4379_v44, %v13377_v59  ;;  %v4445_v43 = vmax.f32 %v4263_v53, 0.0  ;;  %v4447_v21 = vmax.f32 %v4376_v61, 0.0 }
 0x5e9   : > { %v4268_v58 = vpop.f32.mrf.mxu1  ;;  %v4381_v6 = vpop.f32.mrf.mxu0  ;;  %v4524_v31 = vadd.f32 %v4444_v63, %v4440_v41  ;;  %v4550_v12 = vadd.f32 %v4446_v56, %v4442_v29 }
 0x5ea   : > { %v4269_v46 = vadd.f32 %v4268_v58, %v13380_v10  ;;  %v4382_v23 = vadd.f32 %v4381_v6, %v13383_v48  ;;  %v4448_v9 = vmax.f32 %v4267_v42, 0.0  ;;  %v4450_v7 = vmax.f32 %v4380_v27, 0.0 }
 0x5eb   : > { %v4270_v38 = vpop.f32.mrf.mxu1  ;;  %v4383_v8 = vpop.f32.mrf.mxu0  ;;  %v4537_v14 = vadd.f32 %v4445_v43, %v4441_v33  ;;  %v4563_v50 = vadd.f32 %v4447_v21, %v4443_v47 }
 0x5ec   : > { %v4271_v57 = vadd.f32 %v4270_v38, %v13374_v4  ;;  %v4384_v34 = vadd.f32 %v4383_v8, %v13377_v59  ;;  %v4449_v16 = vmax.f32 %v4269_v46, 0.0  ;;  %v4451_v0 = vmax.f32 %v4382_v23, 0.0 }
 0x5ed   : > { %v4272_v32 = vpop.f32.mrf.mxu1  ;;  %v4385_v35 = vpop.f32.mrf.mxu0  ;;  %v4525_v18 = vadd.f32 %v4524_v31, %v4448_v9  ;;  %v4551_v62 = vadd.f32 %v4550_v12, %v4450_v7 }
 0x5ee   : > { %v4273_v36 = vadd.f32 %v4272_v32, %v13380_v10  ;;  %v4386_v52 = vadd.f32 %v4385_v35, %v13383_v48  ;;  %v4452_v39 = vmax.f32 %v4271_v57, 0.0  ;;  %v4454_v13 = vmax.f32 %v4384_v34, 0.0 }
 0x5ef   : > { %v4276_v30 = vpop.f32.mrf.mxu1  ;;  %v4389_v2 = vpop.f32.mrf.mxu0  ;;  %v4538_v53 = vadd.f32 %v4537_v14, %v4449_v16  ;;  %v4564_v61 = vadd.f32 %v4563_v50, %v4451_v0  ;;  %v4494_v32 = vrot.slane %v13451_v3, 2  ;;  %v4520_v35 = vrot.slane %v13453_v37, 2 }
 0x5f0   : > { %v4277_v54 = vadd.f32 %v4276_v30, %v13374_v4  ;;  %v4390_v5 = vadd.f32 %v4389_v2, %v13377_v59  ;;  %v4453_v11 = vmax.f32 %v4273_v36, 0.0  ;;  %v4455_v44 = vmax.f32 %v4386_v52, 0.0 }
 0x5f1   : > { %v4278_v51 = vpop.f32.mrf.mxu1  ;;  %v4391_v15 = vpop.f32.mrf.mxu0  ;;  %v4526_v58 = vadd.f32 %v4525_v18, %v4452_v39  ;;  %v4552_v6 = vadd.f32 %v4551_v62, %v4454_v13 }
 0x5f2   : > { %v4279_v25 = vadd.f32 %v4278_v51, %v13380_v10  ;;  %v4392_v55 = vadd.f32 %v4391_v15, %v13383_v48  ;;  %v4456_v22 = vmax.f32 %v4277_v54, 0.0  ;;  %v4458_v40 = vmax.f32 %v4390_v5, 0.0 }
 0x5f3   : > { %v4280_v60 = vpop.f32.mrf.mxu1  ;;  %v4393_v45 = vpop.f32.mrf.mxu0  ;;  %v4539_v38 = vadd.f32 %v4538_v53, %v4453_v11  ;;  %v4565_v8 = vadd.f32 %v4564_v61, %v4455_v44 }
 0x5f4   : > { %v4281_v42 = vadd.f32 %v4280_v60, %v13374_v4  ;;  %v4394_v27 = vadd.f32 %v4393_v45, %v13377_v59  ;;  %v4457_v1 = vmax.f32 %v4279_v25, 0.0  ;;  %v4459_v24 = vmax.f32 %v4392_v55, 0.0 }
 0x5f5   : > { %v4282_v63 = vpop.f32.mrf.mxu1  ;;  %v4395_v56 = vpop.f32.mrf.mxu0  ;;  %v4527_v33 = vadd.f32 %v4526_v58, %v4456_v22  ;;  %v4553_v47 = vadd.f32 %v4552_v6, %v4458_v40  ;;  %v4508_v40 = vadd.f32 %v4507_v20, %v13427_v17 }
 0x5f6   : > { %v4283_v19 = vadd.f32 %v4282_v63, %v13380_v10  ;;  %v4396_v28 = vadd.f32 %v4395_v56, %v13383_v48  ;;  %v4460_v46 = vmax.f32 %v4281_v42, 0.0  ;;  %v4462_v23 = vmax.f32 %v4394_v27, 0.0 }
 0x5f7   : > { %v4286_v57 = vpop.f32.mrf.mxu1  ;;  %v4399_v34 = vpop.f32.mrf.mxu0  ;;  %v4540_v31 = vadd.f32 %v4539_v38, %v4457_v1  ;;  %v4566_v12 = vadd.f32 %v4565_v8, %v4459_v24  ;;  %v4495_v42 = vadd.f32 %v4494_v32, %v13451_v3  ;;  %v4509_v8 = vrot.slane %v4508_v40, 1 }
 0x5f8   : > { %v4461_v41 = vmax.f32 %v4283_v19, 0.0  ;;  %v4463_v29 = vmax.f32 %v4396_v28, 0.0  ;;  %v4287_v43 = vadd.f32 %v4286_v57, %v13374_v4  ;;  %v4400_v21 = vadd.f32 %v4399_v34, %v13377_v59 }
 0x5f9   : > { %v4288_v9 = vpop.f32.mrf.mxu1  ;;  %v4401_v7 = vpop.f32.mrf.mxu0  ;;  %v4528_v30 = vadd.f32 %v4527_v33, %v4460_v46  ;;  %v4554_v2 = vadd.f32 %v4553_v47, %v4462_v23  ;;  %v4496_v46 = vrot.slane %v4495_v42, 1 }
 0x5fa   : > { %v4464_v36 = vmax.f32 %v4287_v43, 0.0  ;;  %v4466_v52 = vmax.f32 %v4400_v21, 0.0  ;;  %v4289_v16 = vadd.f32 %v4288_v9, %v13380_v10  ;;  %v4402_v0 = vadd.f32 %v4401_v7, %v13383_v48 }
 0x5fb   : > { %v4290_v39 = vpop.f32.mrf.mxu1  ;;  %v4403_v13 = vpop.f32.mrf.mxu0  ;;  %v4541_v14 = vadd.f32 %v4540_v31, %v4461_v41  ;;  %v4567_v50 = vadd.f32 %v4566_v12, %v4463_v29  ;;  %v4510_v29 = vadd.f32 %v4509_v8, %v4508_v40  ;;  %v4497_v43 = vadd.f32 %v4496_v46, %v4495_v42 }
 0x5fc   : > { %v4291_v54 = vadd.f32 %v4290_v39, %v13374_v4  ;;  %v4404_v5 = vadd.f32 %v4403_v13, %v13377_v59  ;;  %v4529_v51 = vadd.f32 %v4528_v30, %v4464_v36  ;;  %v4555_v15 = vadd.f32 %v4554_v2, %v4466_v52 }
 0x5fd   : > { %v4465_v18 = vmax.f32 %v4289_v16, 0.0  ;;  %v4467_v62 = vmax.f32 %v4402_v0, 0.0  ;;  %v4292_v25 = vpop.f32.mrf.mxu1  ;;  %v4405_v55 = vpop.f32.mrf.mxu0  ;;  %v4482_v59 = vadd.f32 %v4481_v26, %v13425_v49  ;;  %v4643_v52 = vpack.c.bf16 %v4510_v29, %v4510_v29 }
 0x5fe   : > { %v4468_v11 = vmax.f32 %v4291_v54, 0.0  ;;  %v4470_v44 = vmax.f32 %v4404_v5, 0.0  ;;  %v4293_v60 = vadd.f32 %v4292_v25, %v13380_v10  ;;  %v4406_v45 = vadd.f32 %v4405_v55, %v13383_v48 }
 0x5ff   : > { %v4542_v53 = vadd.f32 %v4541_v14, %v4465_v18  ;;  %v4568_v61 = vadd.f32 %v4567_v50, %v4467_v62  ;;  %v4521_v10 = vadd.f32 %v4520_v35, %v13453_v37  ;;  %v4483_v38 = vrot.slane %v4482_v59, 1 }
 0x600   : > { %v4530_v58 = vadd.f32 %v4529_v51, %v4468_v11  ;;  %v4556_v6 = vadd.f32 %v4555_v15, %v4470_v44  ;;  %v4469_v22 = vmax.f32 %v4293_v60, 0.0  ;;  %v4471_v4 = vmax.f32 %v4406_v45, 0.0 }
 0x601   : > { %v4522_v49 = vrot.slane %v4521_v10, 1  ;;  %v4484_v41 = vadd.f32 %v4483_v38, %v4482_v59  ;;  %v4642_v30 = vpack.c.bf16 %v4497_v43, %v4497_v43  ;;  %v4665_v15 = vunpack.c.l.b16 %v4643_v52  ;;  %v9598_v59 = vld [vmem:[#allocation31] ss:$0 sm:$0xff] }
 0x602   : > { %v4531_v27 = vrot.slane %v4530_v58, 4  ;;  %v4557_v48 = vrot.slane %v4556_v6, 4  ;;  %v4543_v63 = vadd.f32 %v4542_v53, %v4469_v22  ;;  %v4569_v56 = vadd.f32 %v4568_v61, %v4471_v4 }
 0x603   : > { %v4523_v21 = vadd.f32 %v4522_v49, %v4521_v10  ;;  %v4641_v36 = vpack.c.bf16 %v4484_v41, %v4484_v41  ;;  %v4664_v18 = vunpack.c.l.b16 %v4642_v30 }
 0x604   : > { %v4532_v1 = vadd.f32 %v4531_v27, %v4530_v58  ;;  %v4558_v24 = vadd.f32 %v4557_v48, %v4556_v6  ;;  %v4544_v19 = vrot.slane %v4543_v63, 4  ;;  %v4570_v28 = vrot.slane %v4569_v56, 4 }
 0x605   : > { %v4644_v2 = vpack.c.bf16 %v4523_v21, %v4523_v21  ;;  %v4663_v51 = vunpack.c.l.b16 %v4641_v36 }
 0x606   : > { %v4533_v26 = vrot.slane %v4532_v1, 2  ;;  %v4559_v23 = vrot.slane %v4558_v24, 2  ;;  %v4545_v57 = vadd.f32 %v4544_v19, %v4543_v63  ;;  %v4571_v17 = vadd.f32 %v4570_v28, %v4569_v56 }
 0x607   : > { %v4666_v25 = vunpack.c.l.b16 %v4644_v2 }
 0x608   : > { %v4534_v20 = vadd.f32 %v4533_v26, %v4532_v1  ;;  %v4560_v3 = vadd.f32 %v4559_v23, %v4558_v24  ;;  %v4546_v34 = vrot.slane %v4545_v57, 2  ;;  %v4572_v37 = vrot.slane %v4571_v17, 2  ;;  %v4956_v1 = vld [vmem:[%s1297_s13] sm:$0x3] }
 0x60a   : > { %v4535_v32 = vrot.slane %v4534_v20, 1  ;;  %v4561_v35 = vrot.slane %v4560_v3, 1  ;;  %v4547_v33 = vadd.f32 %v4546_v34, %v4545_v57  ;;  %v4573_v47 = vadd.f32 %v4572_v37, %v4571_v17 }
 0x60c   : > { %v4536_v9 = vadd.f32 %v4535_v32, %v4534_v20  ;;  %v4562_v7 = vadd.f32 %v4561_v35, %v4560_v3  ;;  %v4548_v31 = vrot.slane %v4547_v33, 1  ;;  %v4574_v12 = vrot.slane %v4573_v47, 1 }
 0x60e   : > { %v4645_v16 = vpack.c.bf16 %v4536_v9, %v4536_v9  ;;  %v4647_v0 = vpack.c.bf16 %v4562_v7, %v4562_v7  ;;  %v4549_v39 = vadd.f32 %v4548_v31, %v4547_v33  ;;  %v4575_v13 = vadd.f32 %v4574_v12, %v4573_v47 }
 0x610   : > { %v4667_v14 = vunpack.c.l.b16 %v4645_v16  ;;  %v4669_v50 = vunpack.c.l.b16 %v4647_v0  ;;  %v4646_v54 = vpack.c.bf16 %v4549_v39, %v4549_v39  ;;  %v4648_v5 = vpack.c.bf16 %v4575_v13, %v4575_v13 }
 0x612   : > { %v4668_v62 = vunpack.c.l.b16 %v4646_v54  ;;  %v4670_v55 = vunpack.c.l.b16 %v4648_v5  ;;  %v4672_v11 = vsel %vm4671_vm0, %v4667_v14, %v4663_v51  ;;  %v4674_v44 = vsel %vm4671_vm0, %v4669_v50, %v4665_v15 }
 0x613   : > { %v4676_v58 = vpack.c.b16 %v4672_v11, %v4672_v11  ;;  %v4678_v6 = vpack.c.b16 %v4674_v44, %v4674_v44 }
 0x614   : > { %v4673_v60 = vsel %vm4671_vm0, %v4668_v62, %v4664_v18  ;;  %v4675_v45 = vsel %vm4671_vm0, %v4670_v55, %v4666_v25 }
 0x615   : > { %v4677_v53 = vpack.c.b16 %v4673_v60, %v4673_v60  ;;  %v4679_v61 = vpack.c.b16 %v4675_v45, %v4675_v45 }
 0x617   : > { %4908 = vmatprep.mubr.bf16.mxu1 %v4677_v53  ;;  %4948 = vmatprep.mubr.bf16.mxu0 %v4679_v61 }
 0x618   : > { %4909 = vmatmul.mubr.bf16.vlgmr.msra.gmra.mxu1 %v4676_v58  ;;  %4949 = vmatmul.mubr.bf16.vlgmr.msra.gmra.mxu0 %v4678_v6 }
 0x6d8   : > { %v9893_v22 = vpop.f32.mrf.mxu1  ;;  %v9915_v4 = vpop.f32.mrf.mxu0 }
 0x6da   : > { %v9894_v40 = vpop.f32.mrf.mxu1  ;;  %v9916_v42 = vpop.f32.mrf.mxu0 }
 0x6db   : > { %v9895_v10 = vadd.f32 %v9894_v40, %v9893_v22  ;;  %v9917_v56 = vadd.f32 %v9916_v42, %v9915_v4 }
 0x6dc   : > { %v9896_v27 = vpop.f32.mrf.mxu1  ;;  %v9918_v48 = vpop.f32.mrf.mxu0 }
 0x6dd   : > { %v4911_v63 = vadd.f32 %v9895_v10, %v9598_v59 }
 0x6de   : > { %v9897_v24 = vpop.f32.mrf.mxu1  ;;  %v9919_v19 = vpop.f32.mrf.mxu0 }
 0x6df   : > { %v4951_v28 = vadd.f32 %v9917_v56, %v4911_v63 }
 0x6e1   : > { %v4957_v38 = vmul.f32 %v4956_v1, %v4951_v28 }
 0x6e3   : > { %4958 = vst [vmem:[%s12404_s10] sm:$0x3] %v4957_v38 }
 0x6e4 PF: > { %p9631_p6 = scmp.ne.s32.totalorder %s12055_s7, 1 }
 0x6e6   : > { %4962 = sbr.rel (%p9631_p6) target bundleno = 3456 (0xd80), region = 288 }
 0x6eb   : > { %v13481_v8 = vld [vmem:[#allocation34 + $0x38] sm:$0xff]   ;;  %v5790_v46 = vlaneseq  ;;  %v13483_v49 = vld [vmem:[#allocation34 + $0x30] sm:$0xff]   ;;  %v11840_v26 = vmov 0.0   ;;  %v10765_v57 = vld [vmem:[#allocation34 + $0x28] sm:$0xff]   ;;  %s14865_s5 = sld [smem:[#allocation82_spill]]  ;;  %vm8732_vm1 = vcmask 1041409  }
 0x6ec   : > { %5559 = vst [vmem:[#allocation3] sm:$0xff] %v11840_v26  ;;  %5560 = vst [vmem:[#allocation3 + $0x8] sm:$0x1] %v11840_v26  ;;  %10135 = vmatprep.subr.bf16.mxu0 %v13481_v8  ;;  %v10766_v17 = vld [vmem:[#allocation34 + $0x20] sm:$0xff]   ;;  %v10767_v30 = vld [vmem:[#allocation34 + $0x18] sm:$0xff]   ;;  %s14870_s26 = sld [smem:[#allocation85_spill]] }
 0x6ed   : > { %5563 = vst [vmem:[#allocation3 + $0x10] sm:$0x1] %v11840_v26  ;;  %5564 = vst [vmem:[#allocation3 + $0x20] sm:$0x1] %v11840_v26  ;;  %v13565_v23 = vshrl.u32 %v5790_v46, 7  ;;  %10136 = vmatpush3.bf16.msra.mxu0 %v13481_v8  ;;  %v13615_v15 = vld [vmem:[#allocation34 + $0x10] sm:$0xff]  }
 0x6ee   : > { %5628 = vst [vmem:[#allocation4] sm:$0xff] %v11840_v26  ;;  %5710 = vst [vmem:[#allocation5] sm:$0x1] %v11840_v26  ;;  %10137 = vmatprep.subr.bf16.mxu0 %v13483_v49  ;;  %v9632_v41 = vld.sshfl [vmem:[#allocation7] sm:$0xff pattern:$0x75316420] }
 0x6ef   : > { %5711 = vst [vmem:[#allocation5 + $0x10] sm:$0x1] %v11840_v26  ;;  %5561 = vst [vmem:[#allocation3 + $0x90] sm:$0xff] %v11840_v26  ;;  %v13572_v20 = vsub.s32 0, %v13565_v23  ;;  %v13575_v3 = vsub.s32 1, %v13565_v23  ;;  %v13579_v34 = vsub.s32 2, %v13565_v23 }
 0x6f0   : > { %5562 = vst [vmem:[#allocation3 + $0x98] sm:$0x1] %v11840_v26  ;;  %5565 = vst [vmem:[#allocation3 + $0x30] sm:$0x1] %v11840_v26  ;;  %v13582_v37 = vsub.s32 3, %v13565_v23  ;;  %v13599_v39 = vsub.s32 4, %v13565_v23 }
 0x6f1   : > { %5566 = vst [vmem:[#allocation3 + $0x40] sm:$0x1] %v11840_v26  ;;  %5567 = vst [vmem:[#allocation3 + $0x50] sm:$0x1] %v11840_v26  ;;  %10138 = vmatpush3.bf16.msra.mxu0 %v13483_v49  ;;  %v5027_v2 = vld [vmem:[%s14865_s5] sm:$0xff]  ;;  %v13602_v13 = vsub.s32 5, %v13565_v23 }
 0x6f2   : > { %5568 = vst [vmem:[#allocation3 + $0x60] sm:$0x1] %v11840_v26  ;;  %5569 = vst [vmem:[#allocation3 + $0x70] sm:$0x1] %v11840_v26  ;;  %10139 = vmatprep.subr.bf16.mxu0 %v10765_v57  ;;  %v13605_v14 = vrot.slane %v5027_v2, %v13572_v20  ;;  %v13608_v50 = vrot.slane %v5027_v2, %v13575_v3  ;;  %v13611_v5 = vrot.slane %v5027_v2, %v13579_v34  ;;  %v10771_v11 = vld [vmem:[#allocation36 + $0x38] sm:$0xff]   ;;  %s14879_s12 = sld [smem:[#allocation88_spill]] }
 0x6f3   : > { %5570 = vst [vmem:[#allocation3 + $0x80] sm:$0x1] %v11840_v26  ;;  %5571 = vst [vmem:[#allocation3 + $0xa0] sm:$0x1] %v11840_v26  ;;  %v5878_v54 = vld [vmem:[#allocation3 + $0x1] sm:$0xff]  ;;  %v13620_v18 = vrot.slane %v5027_v2, %v13582_v37  ;;  %v13623_v62 = vrot.slane %v5027_v2, %v13599_v39  ;;  %v13626_v25 = vsub.s32 6, %v13565_v23  ;;  %v13638_v61 = vrot.slane %v5027_v2, %v13602_v13 }
 0x6f4   : > { %5572 = vst [vmem:[#allocation3 + $0xb0] sm:$0x1] %v11840_v26  ;;  %5573 = vst [vmem:[#allocation3 + $0xc0] sm:$0x1] %v11840_v26  ;;  %v13629_v55 = vsub.s32 7, %v13565_v23  ;;  %v5028_v44 = vld [vmem:[%s14865_s5 + $0x8] sm:$0xff]  ;;  %v5898_v53 = vmul.f32 %v13611_v5, %v5878_v54  ;;  %10167 = vmatprep.subr.bf16.mxu1 %v10771_v11 }
 0x6f5   : > { %5574 = vst [vmem:[#allocation3 + $0xd0] sm:$0x1] %v11840_v26  ;;  %5575 = vst [vmem:[#allocation3 + $0xe0] sm:$0x1] %v11840_v26  ;;  %10140 = vmatpush3.bf16.msra.mxu0 %v10765_v57  ;;  %v5794_v60 = vmul.f32 0.0, %v13605_v14  ;;  %v5846_v45 = vmul.f32 0.0, %v13608_v50  ;;  %v13648_v27 = vrot.slane %v5027_v2, %v13626_v25  ;;  %10168 = vmatpush3.bf16.msra.mxu1 %v10771_v11 }
 0x6f6   : > { %5576 = vst [vmem:[#allocation3 + $0xf0] sm:$0x1] %v11840_v26  ;;  %5577 = vst [vmem:[#allocation3 + $0x100] sm:$0x1] %v11840_v26  ;;  %10141 = vmatprep.subr.bf16.mxu0 %v10766_v17  ;;  %v13651_v48 = vrot.slane %v5027_v2, %v13629_v55  ;;  %s14905_s15 = sld [smem:[#allocation92_spill]] }
 0x6f7   : > { %5578 = vst [vmem:[#allocation3 + $0x110] sm:$0x1] %v11840_v26  ;;  %5629 = vst [vmem:[#allocation4 + $0x90] sm:$0xff] %v11840_v26  ;;  %v9633_v29 = vld.sshfl [vmem:[#allocation7 + $0x8] sm:$0xff pattern:$0x75316420]  ;;  %v13644_v42 = vadd.f32 %v5846_v45, %v5794_v60 }
 0x6f8   : > { %5712 = vst [vmem:[#allocation5 + $0x20] sm:$0x1] %v11840_v26  ;;  %5713 = vst [vmem:[#allocation5 + $0x30] sm:$0x1] %v11840_v26  ;;  %v13584_v32 = vcombine.high %v9632_v41, %v9633_v29  ;;  %v5726_v35 = vcombine.low %v9632_v41, %v9633_v29  ;;  %v13613_v51 = vld [vmem:[#allocation3 + $0x91] sm:$0xff]  ;;  %s14914_s8 = sld [smem:[#allocation94_spill]] }
 0x6f9   : > { %5714 = vst [vmem:[#allocation5 + $0x40] sm:$0x1] %v11840_v26  ;;  %5715 = vst [vmem:[#allocation5 + $0x50] sm:$0x1] %v11840_v26  ;;  %10142 = vmatpush3.bf16.msra.mxu0 %v10766_v17  ;;  %v5914_v49 = vadd.f32 %v5898_v53, %v13644_v42  ;;  %s14915_s16 = sld [smem:[#allocation96_spill]] }
 0x6fa   : > { %5716 = vst [vmem:[#allocation5 + $0x60] sm:$0x1] %v11840_v26  ;;  %5717 = vst [vmem:[#allocation5 + $0x70] sm:$0x1] %v11840_v26  ;;  %10143 = vmatprep.subr.bf16.mxu0 %v10767_v30  ;;  %v6002_v10 = vmul.f32 %v13623_v62, %v5726_v35  ;;  %v6054_v17 = vmul.f32 %v13638_v61, %v13584_v32  ;;  %s14916_s18 = sld [smem:[#allocation97_spill]] }
 0x6fb   : > { %5718 = vst [vmem:[#allocation5 + $0x90] sm:$0x1] %v11840_v26  ;;  %5719 = vst [vmem:[#allocation5 + $0xa0] sm:$0x1] %v11840_v26 }
 0x6fc   : > { %5720 = vst [vmem:[#allocation5 + $0xb0] sm:$0x1] %v11840_v26  ;;  %5721 = vst [vmem:[#allocation5 + $0xc0] sm:$0x1] %v11840_v26 }
 0x6fd   : > { %5722 = vst [vmem:[#allocation5 + $0xd0] sm:$0x1] %v11840_v26  ;;  %5723 = vst [vmem:[#allocation5 + $0xe0] sm:$0x1] %v11840_v26  ;;  %10144 = vmatpush3.bf16.msra.mxu0 %v10767_v30 }
 0x6fe   : > { %5724 = vst [vmem:[#allocation5 + $0xf0] sm:$0x1] %v11840_v26  ;;  %5725 = vst [vmem:[#allocation5 + $0x100] sm:$0x1] %v11840_v26  ;;  %10145 = vmatprep.subr.bf16.mxu0 %v13615_v15 }
 0x6ff   : > { %6684 = vst [vmem:[#allocation2] sm:$0xff] %v11840_v26  ;;  %6685 = vst [vmem:[#allocation2 + $0x8] sm:$0x3] %v11840_v26  ;;  %v9664_v43 = vld.sshfl [vmem:[#allocation7 + $0x10] sm:$0xff pattern:$0x75316420] }
 0x700   : > { %6686 = vst [vmem:[#allocation2 + $0xa0] sm:$0xff] %v11840_v26  ;;  %6687 = vst [vmem:[#allocation2 + $0xa8] sm:$0x3] %v11840_v26  ;;  %v9665_v21 = vld.sshfl [vmem:[#allocation7 + $0x18] sm:$0xff pattern:$0x75316420] }
 0x701   : > { %6689 = vst [vmem:[#allocation2 + $0x90] sm:$0xff] %v11840_v26  ;;  %6690 = vst [vmem:[#allocation2 + $0x98] sm:$0x3] %v11840_v26  ;;  %v9634_v33 = vld.sshfl [vmem:[#allocation7 + $0x20] sm:$0xff pattern:$0x75316420]  ;;  %v13586_v9 = vcombine.high %v9664_v43, %v9665_v21  ;;  %v13588_v7 = vcombine.low %v9664_v43, %v9665_v21  ;;  %10146 = vmatpush3.bf16.msra.mxu0 %v13615_v15 }
 0x702   : > { %6691 = vst [vmem:[#allocation2 + $0x130] sm:$0xff] %v11840_v26  ;;  %6692 = vst [vmem:[#allocation2 + $0x138] sm:$0x3] %v11840_v26  ;;  %v9635_v47 = vld.sshfl [vmem:[#allocation7 + $0x28] sm:$0xff pattern:$0x75316420] }
 0x703   : > { %6693 = vst [vmem:[#allocation2 + $0x10] sm:$0x1] %v11840_v26  ;;  %6694 = vst [vmem:[#allocation2 + $0x20] sm:$0x1] %v11840_v26  ;;  %v5663_v36 = vcombine.high %v9634_v33, %v9635_v47  ;;  %v5727_v52 = vcombine.low %v9634_v33, %v9635_v47  ;;  %v5847_v22 = vmul.f32 %v13608_v50, %v13588_v7  ;;  %v10769_v43 = vld [vmem:[#allocation34 + $0x8] sm:$0xff]  }
 0x704   : > { %6695 = vst [vmem:[#allocation2 + $0x30] sm:$0x1] %v11840_v26  ;;  %6696 = vst [vmem:[#allocation2 + $0x40] sm:$0x1] %v11840_v26  ;;  %v5899_v4 = vmul.f32 %v13611_v5, %v13586_v9  ;;  %v13674_v33 = vmul.f32 %v13651_v48, %v13588_v7  ;;  %10147 = vmatprep.subr.bf16.mxu0 %v10769_v43 }
 0x705   : > { %6697 = vst [vmem:[#allocation2 + $0x50] sm:$0x1] %v11840_v26  ;;  %6698 = vst [vmem:[#allocation2 + $0x60] sm:$0x1] %v11840_v26  ;;  %v13654_v24 = vmul.f32 %v13623_v62, %v5727_v52  ;;  %v13667_v41 = vmul.f32 %v13638_v61, %v5663_v36  ;;  %10148 = vmatpush3.bf16.msra.mxu0 %v10769_v43 }
 0x706   : > { %6699 = vst [vmem:[#allocation2 + $0x70] sm:$0x1] %v11840_v26  ;;  %6700 = vst [vmem:[#allocation2 + $0x80] sm:$0x1] %v11840_v26 }
 0x707   : > { %6701 = vst [vmem:[#allocation2 + $0xb0] sm:$0x1] %v11840_v26  ;;  %6702 = vst [vmem:[#allocation2 + $0xc0] sm:$0x1] %v11840_v26 }
 0x708   : > { %6703 = vst [vmem:[#allocation2 + $0xd0] sm:$0x1] %v11840_v26  ;;  %6704 = vst [vmem:[#allocation2 + $0xe0] sm:$0x1] %v11840_v26 }
 0x709   : > { %6705 = vst [vmem:[#allocation2 + $0xf0] sm:$0x1] %v11840_v26  ;;  %6706 = vst [vmem:[#allocation2 + $0x100] sm:$0x1] %v11840_v26 }
 0x70a   : > { %6707 = vst [vmem:[#allocation2 + $0x110] sm:$0x1] %v11840_v26  ;;  %6708 = vst [vmem:[#allocation2 + $0x120] sm:$0x1] %v11840_v26 }
 0x70b   : > { %6709 = vst [vmem:[#allocation2 + $0x19] sm:$0x1] %v11840_v26  ;;  %6710 = vst [vmem:[#allocation2 + $0x29] sm:$0x1] %v11840_v26 }
 0x70c   : > { %6711 = vst [vmem:[#allocation2 + $0x39] sm:$0x1] %v11840_v26  ;;  %6712 = vst [vmem:[#allocation2 + $0x49] sm:$0x1] %v11840_v26 }
 0x70d   : > { %6713 = vst [vmem:[#allocation2 + $0x59] sm:$0x1] %v11840_v26  ;;  %6714 = vst [vmem:[#allocation2 + $0x69] sm:$0x1] %v11840_v26 }
 0x70e   : > { %6715 = vst [vmem:[#allocation2 + $0x79] sm:$0x1] %v11840_v26  ;;  %6716 = vst [vmem:[#allocation2 + $0x89] sm:$0x1] %v11840_v26 }
 0x70f   : > { %6717 = vst [vmem:[#allocation2 + $0xb9] sm:$0x1] %v11840_v26  ;;  %6718 = vst [vmem:[#allocation2 + $0xc9] sm:$0x1] %v11840_v26 }
 0x710   : > { %6719 = vst [vmem:[#allocation2 + $0xd9] sm:$0x1] %v11840_v26  ;;  %6720 = vst [vmem:[#allocation2 + $0xe9] sm:$0x1] %v11840_v26 }
 0x711   : > { %6721 = vst [vmem:[#allocation2 + $0xf9] sm:$0x1] %v11840_v26  ;;  %6722 = vst [vmem:[#allocation2 + $0x109] sm:$0x1] %v11840_v26 }
 0x712   : > { %6723 = vst [vmem:[#allocation2 + $0x119] sm:$0x1] %v11840_v26  ;;  %6724 = vst [vmem:[#allocation2 + $0x129] sm:$0x1] %v11840_v26 }
 0x713   : > { %14860 = vst [vmem:[#allocation111_spill] sm:$0xff] %v13565_v23  ;;  %7781 = vst [vmem:[#allocation4] sm:$0xf] %v11840_v26  ;;  %v9666_v31 = vld.sshfl [vmem:[#allocation7 + $0x30] sm:$0xff pattern:$0x75316420] }
 0x714   : > { %7782 = vst [vmem:[#allocation4 + $0x90] sm:$0xf] %v11840_v26  ;;  %14861 = vst [vmem:[#allocation112_spill] sm:$0xff] %v13572_v20  ;;  %v9667_v12 = vld.sshfl [vmem:[#allocation7 + $0x38] sm:$0xff pattern:$0x75316420] }
 0x715   : > { %14862 = vst [vmem:[#allocation113_spill] sm:$0xff] %v13575_v3  ;;  %14863 = vst [vmem:[#allocation114_spill] sm:$0xff] %v13579_v34  ;;  %v13592_v16 = vcombine.high %v9666_v31, %v9667_v12  ;;  %v13595_v0 = vcombine.low %v9666_v31, %v9667_v12  ;;  %v9668_v58 = vld.sshfl [vmem:[#allocation7 + $0x50] sm:$0xff pattern:$0x75316420] }
 0x716   : > { %14864 = vst [vmem:[#allocation115_spill] sm:$0xff] %v13582_v37  ;;  %5694 = vst [vmem:[#allocation5 + $0x1] sm:$0xff] %v13584_v32  ;;  %v9669_v6 = vld.sshfl [vmem:[#allocation7 + $0x58] sm:$0xff pattern:$0x75316420]  ;;  %v13681_v32 = vrot.slane %v5028_v44, %v13572_v20 }
 0x717   : > { %5758 = vst [vmem:[#allocation6] sm:$0xff] %v5726_v35  ;;  %5543 = vst [vmem:[#allocation3 + $0x11] sm:$0xff] %v13586_v9  ;;  %v9636_v59 = vld.sshfl [vmem:[#allocation7 + $0x40] sm:$0xff pattern:$0x75316420]  ;;  %v13656_v28 = vcombine.high %v9668_v58, %v9669_v6  ;;  %v13660_v8 = vcombine.low %v9668_v58, %v9669_v6  ;;  %v13678_v47 = vmul.f32 %v13651_v48, %v13595_v0  ;;  %v10770_v58 = vld [vmem:[#allocation34] sm:$0xff]  }
 0x718   : > { %5612 = vst [vmem:[#allocation4 + $0x10] sm:$0xff] %v13588_v7  ;;  %14866 = vst [vmem:[#allocation116_spill] sm:$0xff] %v13599_v39  ;;  %v9637_v40 = vld.sshfl [vmem:[#allocation7 + $0x48] sm:$0xff pattern:$0x75316420]  ;;  %v5848_v53 = vmul.f32 %v13608_v50, %v13595_v0  ;;  %v5900_v15 = vmul.f32 %v13611_v5, %v13592_v16  ;;  %10149 = vmatprep.subr.bf16.mxu0 %v10770_v58 }
 0x719   : > { %14867 = vst [vmem:[#allocation117_spill] sm:$0xff] %v13602_v13  ;;  %5695 = vst [vmem:[#allocation5 + $0x11] sm:$0xff] %v5663_v36  ;;  %v9670_v63 = vld.sshfl [vmem:[#allocation7 + $0x70] sm:$0xff pattern:$0x75316420]  ;;  %v5728_v60 = vcombine.low %v9636_v59, %v9637_v40  ;;  %10150 = vmatpush3.bf16.msra.mxu0 %v10770_v58 }
 0x71a   : > { %5759 = vst [vmem:[#allocation6 + $0x10] sm:$0xff] %v5727_v52  ;;  %5544 = vst [vmem:[#allocation3 + $0x21] sm:$0xff] %v13592_v16  ;;  %v9671_v56 = vld.sshfl [vmem:[#allocation7 + $0x78] sm:$0xff pattern:$0x75316420]  ;;  %v5664_v52 = vcombine.high %v9636_v59, %v9637_v40 }
 0x71b   : > { %5613 = vst [vmem:[#allocation4 + $0x20] sm:$0xff] %v13595_v0  ;;  %14868 = vst [vmem:[#allocation118_spill] sm:$0xff] %v13626_v25  ;;  %v9638_v19 = vld.sshfl [vmem:[#allocation7 + $0x60] sm:$0xff pattern:$0x75316420]  ;;  %v13658_v38 = vcombine.high %v9670_v63, %v9671_v56  ;;  %v13689_v36 = vcombine.low %v9670_v63, %v9671_v56  ;;  %v13702_v63 = vmul.f32 %v13681_v32, %v13592_v16 }
 0x71c   : > { %14869 = vst [vmem:[#allocation119_spill] sm:$0xff] %v13629_v55  ;;  %7763 = vst [vmem:[#allocation3] sm:$0x1f] %v11840_v26  ;;  %v9639_v29 = vld.sshfl [vmem:[#allocation7 + $0x68] sm:$0xff pattern:$0x75316420]  ;;  %v5849_v0 = vmul.f32 %v13608_v50, %v13660_v8 }
 0x71d   : > { %7764 = vst [vmem:[#allocation3 + $0x90] sm:$0x1f] %v11840_v26  ;;  %v5930_v1 = vld [vmem:[#allocation5] sm:$0xff]  ;;  %5545 = vst [vmem:[#allocation3 + $0x31] sm:$0xff] %v13656_v28  ;;  %v5665_v11 = vcombine.high %v9638_v19, %v9639_v29  ;;  %v5729_v45 = vcombine.low %v9638_v19, %v9639_v29  ;;  %v6004_v19 = vmul.f32 %v13623_v62, %v5728_v60 }
 0x71e   : > { %v5775_v46 = vld [vmem:[#allocation3 + $0x10] sm:$0xff]  ;;  %v5950_v57 = vmul.f32 %v13620_v18, %v5930_v1  ;;  %7815 = vst [vmem:[#allocation5] sm:$0x1] %v11840_v26  ;;  %5546 = vst [vmem:[#allocation3 + $0x41] sm:$0xff] %v13658_v38  ;;  %v5901_v1 = vmul.f32 %v13611_v5, %v13656_v28  ;;  %v13727_v43 = vmul.f32 %v13651_v48, %v13689_v36 }
 0x71f   : > { %v5795_v21 = vmul.f32 %v13605_v14, %v5775_v46  ;;  %7765 = vst [vmem:[#allocation3 + $0x10] sm:$0x1] %v11840_v26  ;;  %5614 = vst [vmem:[#allocation4 + $0x30] sm:$0xff] %v13660_v8  ;;  %v6106_v7 = vmul.f32 %v13648_v27, %v5775_v46  ;;  %v9672_v40 = vld.sshfl [vmem:[#allocation7 + $0x90] sm:$0xff pattern:$0x75316420]  ;;  %v13713_v46 = vmul.f32 %v13623_v62, %v5729_v45 }
 0x720   : > { %v5931_v35 = vld [vmem:[#allocation5 + $0x10] sm:$0xff]  ;;  %v5966_v12 = vadd.f32 %v5950_v57, %v5914_v49  ;;  %5615 = vst [vmem:[#allocation4 + $0x40] sm:$0xff] %v13689_v36  ;;  %5696 = vst [vmem:[#allocation5 + $0x21] sm:$0xff] %v5664_v52  ;;  %v9673_v56 = vld.sshfl [vmem:[#allocation7 + $0x98] sm:$0xff pattern:$0x75316420] }
 0x721   : > { %v5776_v31 = vld [vmem:[#allocation3 + $0x20] sm:$0xff]  ;;  %7816 = vst [vmem:[#allocation5 + $0x10] sm:$0x1] %v11840_v26  ;;  %v5863_v2 = vadd.f32 %v5847_v22, %v5795_v21  ;;  %v5951_v54 = vmul.f32 %v13620_v18, %v5931_v35  ;;  %v6210_v22 = vmul.f32 %v13681_v32, %v13586_v9  ;;  %5697 = vst [vmem:[#allocation5 + $0x31] sm:$0xff] %v5665_v11 }
 0x722   : > { %v5796_v30 = vmul.f32 %v13605_v14, %v5776_v31  ;;  %7766 = vst [vmem:[#allocation3 + $0x20] sm:$0x1] %v11840_v26  ;;  %v6018_v44 = vadd.f32 %v6002_v10, %v5966_v12  ;;  %v6107_v59 = vmul.f32 %v13648_v27, %v5776_v31  ;;  %5760 = vst [vmem:[#allocation6 + $0x20] sm:$0xff] %v5728_v60  ;;  %v13715_v16 = vld.sshfl [vmem:[#allocation7 + $0x80] sm:$0xff pattern:$0x75316420] }
 0x723   : > { %v5915_v6 = vadd.f32 %v5899_v4, %v5863_v2  ;;  %5761 = vst [vmem:[#allocation6 + $0x30] sm:$0xff] %v5729_v45  ;;  %v9674_v49 = vld.sshfl [vmem:[#allocation7 + $0xb0] sm:$0xff pattern:$0x75316420]  ;;  %v6056_v35 = vmul.f32 %v13638_v61, %v5664_v52  ;;  %v6057_v31 = vmul.f32 %v13638_v61, %v5665_v11  ;;  %v13721_v12 = vmul.f32 %v13651_v48, %v13660_v8 }
 0x724   : > { %v6070_v10 = vadd.f32 %v6054_v17, %v6018_v44  ;;  %v5864_v4 = vadd.f32 %v5848_v53, %v5796_v30  ;;  %v9675_v57 = vld.sshfl [vmem:[#allocation7 + $0xb8] sm:$0xff pattern:$0x75316420]  ;;  %v5777_v29 = vld [vmem:[#allocation3 + $0x30] sm:$0xff]  ;;  %v13734_v11 = vmul.f32 %v13681_v32, %v13656_v28 }
 0x725   : > { %v5967_v9 = vadd.f32 %v5951_v54, %v5915_v6  ;;  %v5778_v21 = vld [vmem:[#allocation3 + $0x40] sm:$0xff]  ;;  %v9641_v30 = vld.sshfl [vmem:[#allocation7 + $0x88] sm:$0xff pattern:$0x75316420]  ;;  %v5797_v54 = vmul.f32 %v13605_v14, %v5777_v29  ;;  %7767 = vst [vmem:[#allocation3 + $0x30] sm:$0x1] %v11840_v26  ;;  %v13738_v60 = vcombine.high %v9674_v49, %v9675_v57 }
 0x726   : > { %v6122_v17 = vadd.f32 %v6106_v7, %v6070_v10  ;;  %v5916_v44 = vadd.f32 %v5900_v15, %v5864_v4  ;;  %7768 = vst [vmem:[#allocation3 + $0x40] sm:$0x1] %v11840_v26  ;;  %v9642_v7 = vld.sshfl [vmem:[#allocation7 + $0xa0] sm:$0xff pattern:$0x75316420]  ;;  %v5583_v10 = vcombine.low %v9672_v40, %v9673_v56  ;;  %v13743_v4 = vcombine.low %v9674_v49, %v9675_v57 }
 0x727   : > { %v6019_v2 = vadd.f32 %v13654_v24, %v5967_v9  ;;  %v9643_v52 = vld.sshfl [vmem:[#allocation7 + $0xa8] sm:$0xff pattern:$0x75316420]  ;;  %v13736_v24 = vcombine.high %v9672_v40, %v9673_v56  ;;  %v13740_v45 = vld [vmem:[#allocation33] ss:$0 sm:$0xff]  ;;  %v5865_v6 = vadd.f32 %v5849_v0, %v5797_v54  ;;  %v5932_v15 = vld [vmem:[#allocation5 + $0x20] sm:$0xff]  ;;  %v5666_v23 = vcombine.high %v13715_v16, %v9641_v30 }
 0x728   : > { %v6174_v8 = vadd.f32 %v13674_v33, %v6122_v17  ;;  %v10772_v9 = vld [vmem:[#allocation36 + $0x30] sm:$0xff]   ;;  %v5933_v17 = vld [vmem:[#allocation5 + $0x30] sm:$0xff]  ;;  %v5952_v28 = vmul.f32 %v13620_v18, %v5932_v15  ;;  %7817 = vst [vmem:[#allocation5 + $0x20] sm:$0x1] %v11840_v26  ;;  %5548 = vst [vmem:[#allocation3 + $0x61] sm:$0xff] %v13738_v60  ;;  %v5730_v58 = vcombine.low %v13715_v16, %v9641_v30 }
 0x729   : > { %v6071_v53 = vadd.f32 %v13667_v41, %v6019_v2  ;;  %5547 = vst [vmem:[#allocation3 + $0x51] sm:$0xff] %v13736_v24  ;;  %v5667_v41 = vcombine.high %v9642_v7, %v9643_v52  ;;  %v5917_v2 = vadd.f32 %v5901_v1, %v5865_v6  ;;  %v5953_v40 = vmul.f32 %v13620_v18, %v5933_v17  ;;  %v9676_v17 = vld.sshfl [vmem:[#allocation7 + $0xd0] sm:$0xff pattern:$0x75316420] }
 0x72a   : > { %v6226_v33 = vadd.f32 %v6210_v22, %v6174_v8  ;;  %7818 = vst [vmem:[#allocation5 + $0x30] sm:$0x1] %v11840_v26  ;;  %10169 = vmatprep.subr.bf16.mxu1 %v10772_v9  ;;  %v5968_v56 = vadd.f32 %v5952_v28, %v5916_v44  ;;  %5698 = vst [vmem:[#allocation5 + $0x41] sm:$0xff] %v5666_v23  ;;  %v5731_v49 = vcombine.low %v9642_v7, %v9643_v52 }
 0x72b   : > { %v6123_v0 = vadd.f32 %v6107_v59, %v6071_v53  ;;  %5699 = vst [vmem:[#allocation5 + $0x51] sm:$0xff] %v5667_v41  ;;  %v5798_v57 = vmul.f32 %v13605_v14, %v5778_v21  ;;  %10170 = vmatpush3.bf16.msra.mxu1 %v10772_v9  ;;  %v5969_v59 = vadd.f32 %v5953_v40, %v5917_v2  ;;  %v13775_v2 = vld.sshfl [vmem:[#allocation7 + $0xc0] sm:$0xff pattern:$0x75316420] }
 0x72c   : > { %v6248_v22 = vadd.f32 %v13740_v45, %v6226_v33  ;;  %v6108_v1 = vmul.f32 %v13648_v27, %v5777_v29  ;;  %v5850_v8 = vmul.f32 %v13608_v50, %v13689_v36  ;;  %v6020_v53 = vadd.f32 %v6004_v19, %v5968_v56  ;;  %v9677_v40 = vld.sshfl [vmem:[#allocation7 + $0xd8] sm:$0xff pattern:$0x75316420] }
 0x72d   : > { %v6175_v54 = vadd.f32 %v13678_v47, %v6123_v0  ;;  %v6109_v16 = vmul.f32 %v13648_v27, %v5778_v21  ;;  %v6213_v30 = vmul.f32 %v13681_v32, %v13658_v38  ;;  %v5902_v44 = vmul.f32 %v13611_v5, %v13658_v38 }
 0x72e   : > { %v6021_v52 = vadd.f32 %v13713_v46, %v5969_v59  ;;  %v5851_v47 = vmul.f32 %v13608_v50, %v5583_v10  ;;  %v5866_v6 = vadd.f32 %v5850_v8, %v5798_v57  ;;  %v6264_v29 = vmax.f32 %v6248_v22, 0.0  ;;  %v13777_v22 = vld.sshfl [vmem:[#allocation7 + $0xf0] sm:$0xff pattern:$0x75316420] }
 0x72f   : > { %v6227_v7 = vadd.f32 %v13702_v63, %v6175_v54  ;;  %v6072_v15 = vadd.f32 %v6056_v35, %v6020_v53  ;;  %v5903_v36 = vmul.f32 %v13611_v5, %v13736_v24  ;;  %v6006_v19 = vmul.f32 %v13623_v62, %v5730_v58  ;;  %v13781_v54 = vld.sshfl [vmem:[#allocation7 + $0xf8] sm:$0xff pattern:$0x75316420]  ;;  %v6091_v53 = vld [vmem:[#allocation3 + $0x60] sm:$0xff] }
 0x730   : > { %v6073_v9 = vadd.f32 %v6057_v31, %v6021_v52  ;;  %v5779_v33 = vld [vmem:[#allocation3 + $0x50] sm:$0xff]  ;;  %v6007_v38 = vmul.f32 %v13623_v62, %v5731_v49  ;;  %v6058_v63 = vmul.f32 %v13638_v61, %v5666_v23  ;;  %v5918_v0 = vadd.f32 %v5902_v44, %v5866_v6  ;;  %v9645_v44 = vld.sshfl [vmem:[#allocation7 + $0xc8] sm:$0xff pattern:$0x75316420] }
 0x731   : > { %v6249_v21 = vadd.f32 %v13740_v45, %v6227_v7  ;;  %v6124_v46 = vadd.f32 %v6108_v1, %v6072_v15  ;;  %v5799_v28 = vmul.f32 %v13605_v14, %v5779_v33  ;;  %v6059_v35 = vmul.f32 %v13638_v61, %v5667_v41  ;;  %v5934_v31 = vld [vmem:[#allocation5 + $0x40] sm:$0xff]  ;;  %v9647_v15 = vld.sshfl [vmem:[#allocation7 + $0xe8] sm:$0xff pattern:$0x75316420] }
 0x732   : > { %v6125_v56 = vadd.f32 %v6109_v16, %v6073_v9  ;;  %v5935_v57 = vld [vmem:[#allocation5 + $0x50] sm:$0xff]  ;;  %v6110_v49 = vmul.f32 %v13648_v27, %v5779_v33  ;;  %v6162_v23 = vmul.f32 %v13651_v48, %v5583_v10  ;;  %v5954_v41 = vmul.f32 %v13620_v18, %v5934_v31  ;;  %v9646_v6 = vld.sshfl [vmem:[#allocation7 + $0xe0] sm:$0xff pattern:$0x75316420] }
 0x733   : > { %v6265_v58 = vmax.f32 %v6249_v21, 0.0  ;;  %v6176_v59 = vadd.f32 %v13721_v12, %v6124_v46  ;;  %v5867_v1 = vadd.f32 %v5851_v47, %v5799_v28  ;;  %v5955_v8 = vmul.f32 %v13620_v18, %v5935_v57 }
 0x734   : > { %v6177_v16 = vadd.f32 %v13727_v43, %v6125_v56  ;;  %v6111_v52 = vmul.f32 %v13648_v27, %v6091_v53  ;;  %v13788_v21 = vcombine.high %v9676_v17, %v9677_v40  ;;  %v5970_v12 = vadd.f32 %v5954_v41, %v5918_v0  ;;  %v10774_v41 = vld [vmem:[#allocation36 + $0x20] sm:$0xff]  }
 0x735   : > { %v6297_v7 = vpack.c.bf16 %v6265_v58, %v6264_v29  ;;  %v6228_v10 = vadd.f32 %v13734_v11, %v6176_v59  ;;  %v5919_v9 = vadd.f32 %v5903_v36, %v5867_v1  ;;  %v13793_v47 = vcombine.high %v13777_v22, %v13781_v54 }
 0x736   : > { %v6229_v33 = vadd.f32 %v6213_v30, %v6177_v16  ;;  %5549 = vst [vmem:[#allocation3 + $0x71] sm:$0xff] %v13788_v21  ;;  %v5585_v29 = vcombine.low %v9676_v17, %v9677_v40  ;;  %v5586_v43 = vcombine.low %v13777_v22, %v13781_v54  ;;  %v5668_v46 = vcombine.high %v13775_v2, %v9645_v44  ;;  %v10773_v54 = vld [vmem:[#allocation36 + $0x28] sm:$0xff]   ;;  %v9682_v16 = vld.sshfl [vmem:[#allocation7 + $0x130] sm:$0xff pattern:$0x75316420] }
 0x737   : > { %10151 = vmatprep.mubr.bf16.mxu0 %v6297_v7  ;;  %v6250_v28 = vadd.f32 %v13740_v45, %v6228_v10  ;;  %v5971_v58 = vadd.f32 %v5955_v8, %v5919_v9  ;;  %v6022_v11 = vadd.f32 %v6006_v19, %v5970_v12  ;;  %5550 = vst [vmem:[#allocation3 + $0x81] sm:$0xff] %v13793_v47  ;;  %v9681_v7 = vld.sshfl [vmem:[#allocation7 + $0x118] sm:$0xff pattern:$0x75316420] }
 0x738   : > { %v5669_v36 = vcombine.high %v9646_v6, %v9647_v15  ;;  %v6251_v0 = vadd.f32 %v13740_v45, %v6229_v33  ;;  %5700 = vst [vmem:[#allocation5 + $0x61] sm:$0xff] %v5668_v46  ;;  %v5732_v30 = vcombine.low %v13775_v2, %v9645_v44  ;;  %v5733_v56 = vcombine.low %v9646_v6, %v9647_v15  ;;  %v9680_v44 = vld.sshfl [vmem:[#allocation7 + $0x110] sm:$0xff pattern:$0x75316420] }
 0x739   : > { %v5800_v17 = vmul.f32 %v6091_v53, %v13605_v14  ;;  %v6266_v40 = vmax.f32 %v6250_v28, 0.0  ;;  %v6023_v31 = vadd.f32 %v6007_v38, %v5971_v58  ;;  %v6074_v22 = vadd.f32 %v6058_v63, %v6022_v11  ;;  %v9683_v6 = vld.sshfl [vmem:[#allocation7 + $0x138] sm:$0xff pattern:$0x75316420]  ;;  %10171 = vmatprep.subr.bf16.mxu1 %v10773_v54  ;;  %v10775_v15 = vld [vmem:[#allocation36 + $0x18] sm:$0xff]  }
 0x73a   : > { %5701 = vst [vmem:[#allocation5 + $0x71] sm:$0xff] %v5669_v36  ;;  %v5852_v57 = vmul.f32 %v13608_v50, %v13743_v4  ;;  %v6267_v19 = vmax.f32 %v6251_v0, 0.0  ;;  %v6163_v59 = vmul.f32 %v13651_v48, %v13743_v4  ;;  %v6214_v1 = vmul.f32 %v13681_v32, %v13736_v24  ;;  %10172 = vmatpush3.bf16.msra.mxu1 %v10773_v54  ;;  %v9648_v28 = vld.sshfl [vmem:[#allocation7 + $0x100] sm:$0xff pattern:$0x75316420] }
 0x73b   : > { %v5904_v2 = vmul.f32 %v13611_v5, %v13738_v60  ;;  %v6075_v8 = vadd.f32 %v6059_v35, %v6023_v31  ;;  %v6126_v53 = vadd.f32 %v6110_v49, %v6074_v22  ;;  %v6215_v38 = vmul.f32 %v13681_v32, %v13738_v60  ;;  %v9649_v58 = vld.sshfl [vmem:[#allocation7 + $0x108] sm:$0xff pattern:$0x75316420]  ;;  %10173 = vmatprep.subr.bf16.mxu1 %v10774_v41 }
 0x73c   : > { %v5868_v63 = vadd.f32 %v5852_v57, %v5800_v17  ;;  %v6298_v4 = vpack.c.bf16 %v6267_v19, %v6266_v40  ;;  %v5853_v10 = vmul.f32 %v13608_v50, %v5585_v29  ;;  %v5905_v24 = vmul.f32 %v13611_v5, %v13788_v21 }
 0x73d   : > { %v6008_v9 = vmul.f32 %v13623_v62, %v5732_v30  ;;  %v6127_v35 = vadd.f32 %v6111_v52, %v6075_v8  ;;  %v6178_v49 = vadd.f32 %v6162_v23, %v6126_v53  ;;  %v5781_v12 = vld [vmem:[#allocation3 + $0x70] sm:$0xff]  ;;  %v6009_v60 = vmul.f32 %v13623_v62, %v5733_v56  ;;  %v9650_v30 = vld.sshfl [vmem:[#allocation7 + $0x120] sm:$0xff pattern:$0x75316420] }
 0x73e   : > { %v6060_v33 = vmul.f32 %v13638_v61, %v5668_v46  ;;  %10152 = vmatmul.mubr.bf16.vlgmr.msra.gmra.mxu0 %v6298_v4  ;;  %v5801_v11 = vmul.f32 %v13605_v14, %v5781_v12  ;;  %v5920_v0 = vadd.f32 %v5904_v2, %v5868_v63  ;;  %v6061_v17 = vmul.f32 %v13638_v61, %v5669_v36  ;;  %v9651_v52 = vld.sshfl [vmem:[#allocation7 + $0x128] sm:$0xff pattern:$0x75316420]  ;;  %v6093_v2 = vld [vmem:[#allocation3 + $0x80] sm:$0xff] }
 0x73f   : > { %v13823_v40 = vmul.f32 %v13651_v48, %v5585_v29  ;;  %v6179_v23 = vadd.f32 %v6163_v59, %v6127_v35  ;;  %v6230_v31 = vadd.f32 %v6214_v1, %v6178_v49  ;;  %v5936_v22 = vld [vmem:[#allocation5 + $0x60] sm:$0xff]  ;;  %v6112_v56 = vmul.f32 %v13648_v27, %v5781_v12  ;;  %10174 = vmatpush3.bf16.msra.mxu1 %v10774_v41 }
 0x740   : > { %v13827_v46 = vmul.f32 %v13651_v48, %v5586_v43  ;;  %v5869_v57 = vadd.f32 %v5853_v10, %v5801_v11  ;;  %v5956_v19 = vmul.f32 %v13620_v18, %v5936_v22  ;;  %v13830_v8 = vcombine.high %v9680_v44, %v9681_v7  ;;  %10175 = vmatprep.subr.bf16.mxu1 %v10775_v15  ;;  %v9653_v22 = vld.sshfl [vmem:[#allocation7 + $0x148] sm:$0xff pattern:$0x75316420] }
 0x741   : > { %v5937_v54 = vld [vmem:[#allocation5 + $0x70] sm:$0xff]  ;;  %v13832_v36 = vcombine.high %v9682_v16, %v9683_v6  ;;  %v6231_v29 = vadd.f32 %v6215_v38, %v6179_v23  ;;  %v6252_v59 = vadd.f32 %v13740_v45, %v6230_v31  ;;  %v5587_v53 = vcombine.low %v9680_v44, %v9681_v7 }
 0x742   : > { %v5957_v1 = vmul.f32 %v13620_v18, %v5937_v54  ;;  %v5921_v63 = vadd.f32 %v5905_v24, %v5869_v57  ;;  %v5972_v43 = vadd.f32 %v5956_v19, %v5920_v0  ;;  %5551 = vst [vmem:[#allocation3 + $0xa1] sm:$0xff] %v13830_v8  ;;  %v13838_v4 = vcombine.low %v9682_v16, %v9683_v6  ;;  %v9684_v24 = vld.sshfl [vmem:[#allocation7 + $0x150] sm:$0xff pattern:$0x75316420] }
 0x743   : > { %5552 = vst [vmem:[#allocation3 + $0xb1] sm:$0xff] %v13832_v36  ;;  %v5670_v10 = vcombine.high %v9648_v28, %v9649_v58  ;;  %v6253_v35 = vadd.f32 %v13740_v45, %v6231_v29  ;;  %v6268_v49 = vmax.f32 %v6252_v59, 0.0  ;;  %5620 = vst [vmem:[#allocation4 + $0xa0] sm:$0xff] %v5587_v53  ;;  %v5671_v41 = vcombine.high %v9650_v30, %v9651_v52  ;;  %v9685_v0 = vld.sshfl [vmem:[#allocation7 + $0x158] sm:$0xff pattern:$0x75316420] }
 0x744   : > { %v5734_v38 = vcombine.low %v9648_v28, %v9649_v58  ;;  %v5973_v12 = vadd.f32 %v5957_v1, %v5921_v63  ;;  %v6024_v11 = vadd.f32 %v6008_v9, %v5972_v43  ;;  %v6216_v44 = vmul.f32 %v13681_v32, %v13788_v21  ;;  %5621 = vst [vmem:[#allocation4 + $0xb0] sm:$0xff] %v13838_v4  ;;  %v9686_v16 = vld.sshfl [vmem:[#allocation7 + $0x170] sm:$0xff pattern:$0x75316420] }
 0x745   : > { %5702 = vst [vmem:[#allocation5 + $0x91] sm:$0xff] %v5670_v10  ;;  %v5735_v7 = vcombine.low %v9650_v30, %v9651_v52  ;;  %v9687_v6 = vld.sshfl [vmem:[#allocation7 + $0x178] sm:$0xff pattern:$0x75316420]  ;;  %10176 = vmatpush3.bf16.msra.mxu1 %v10775_v15  ;;  %v6269_v23 = vmax.f32 %v6253_v35, 0.0  ;;  %v6113_v31 = vmul.f32 %v13648_v27, %v6093_v2  ;;  %v6217_v28 = vmul.f32 %v13681_v32, %v13793_v47 }
 0x746   : > { %5703 = vst [vmem:[#allocation5 + $0xa1] sm:$0xff] %v5671_v41  ;;  %5766 = vst [vmem:[#allocation6 + $0x90] sm:$0xff] %v5734_v38  ;;  %v5906_v21 = vmul.f32 %v13611_v5, %v13613_v51  ;;  %v6025_v9 = vadd.f32 %v6009_v60, %v5973_v12  ;;  %v6076_v58 = vadd.f32 %v6060_v33, %v6024_v11  ;;  %v9652_v15 = vld.sshfl [vmem:[#allocation7 + $0x140] sm:$0xff pattern:$0x75316420] }
 0x747   : > { %5767 = vst [vmem:[#allocation6 + $0xa0] sm:$0xff] %v5735_v7  ;;  %v5855_v30 = vmul.f32 %v13608_v50, %v5587_v53  ;;  %v5907_v52 = vmul.f32 %v13611_v5, %v13830_v8  ;;  %v9654_v57 = vld.sshfl [vmem:[#allocation7 + $0x160] sm:$0xff pattern:$0x75316420]  ;;  %v6299_v19 = vpack.c.bf16 %v6269_v23, %v6268_v49  ;;  %v6010_v47 = vmul.f32 %v13623_v62, %v5734_v38 }
 0x748   : > { %v9655_v54 = vld.sshfl [vmem:[#allocation7 + $0x168] sm:$0xff pattern:$0x75316420]  ;;  %v6011_v2 = vmul.f32 %v13623_v62, %v5735_v7  ;;  %v6062_v29 = vmul.f32 %v13638_v61, %v5670_v10  ;;  %v6077_v51 = vadd.f32 %v6061_v17, %v6025_v9  ;;  %v6128_v60 = vadd.f32 %v6112_v56, %v6076_v58 }
 0x749   : > { %v5922_v33 = vadd.f32 %v5906_v21, %v13644_v42  ;;  %v13857_v59 = vmul.f32 %v13638_v61, %v5671_v41  ;;  %10155 = vmatprep.mubr.bf16.mxu0 %v6299_v19  ;;  %v5783_v1 = vld [vmem:[#allocation3 + $0xa0] sm:$0xff]  ;;  %v13860_v43 = vmul.f32 %v13651_v48, %v5587_v53  ;;  %v13862_v35 = vcombine.high %v9684_v24, %v9685_v0 }
 0x74a   : > { %v5784_v63 = vld [vmem:[#allocation3 + $0xb0] sm:$0xff]  ;;  %v13864_v49 = vcombine.high %v9686_v16, %v9687_v6  ;;  %v13866_v38 = vcombine.low %v9684_v24, %v9685_v0  ;;  %v6129_v10 = vadd.f32 %v6113_v31, %v6077_v51  ;;  %v6180_v17 = vadd.f32 %v13823_v40, %v6128_v60  ;;  %7769 = vst [vmem:[#allocation3 + $0xa0] sm:$0x1] %v11840_v26 }
 0x74b   : > { %v5803_v42 = vmul.f32 %v13605_v14, %v5783_v1  ;;  %v13872_v56 = vmul.f32 %v13651_v48, %v13838_v4  ;;  %7770 = vst [vmem:[#allocation3 + $0xb0] sm:$0x1] %v11840_v26  ;;  %v13878_v41 = vmul.f32 %v13681_v32, %v13830_v8  ;;  %5553 = vst [vmem:[#allocation3 + $0xc1] sm:$0xff] %v13862_v35 }
 0x74c   : > { %v5938_v53 = vld [vmem:[#allocation5 + $0x90] sm:$0xff]  ;;  %5554 = vst [vmem:[#allocation3 + $0xd1] sm:$0xff] %v13864_v49  ;;  %v13882_v40 = vcombine.low %v9686_v16, %v9687_v6  ;;  %5622 = vst [vmem:[#allocation4 + $0xc0] sm:$0xff] %v13866_v38  ;;  %v5672_v12 = vcombine.high %v9652_v15, %v9653_v22  ;;  %v5673_v11 = vcombine.high %v9654_v57, %v9655_v54 }
 0x74d   : > { %v6181_v7 = vadd.f32 %v13827_v46, %v6129_v10  ;;  %v6232_v24 = vadd.f32 %v6216_v44, %v6180_v17  ;;  %v5871_v0 = vadd.f32 %v5855_v30, %v5803_v42  ;;  %v5939_v23 = vld [vmem:[#allocation5 + $0xa0] sm:$0xff]  ;;  %v5958_v31 = vmul.f32 %v13620_v18, %v5938_v53  ;;  %7819 = vst [vmem:[#allocation5 + $0x90] sm:$0x1] %v11840_v26  ;;  %v9688_v53 = vld.sshfl [vmem:[#allocation7 + $0x190] sm:$0xff pattern:$0x75316420] }
 0x74e   : > { %v5959_v8 = vmul.f32 %v13620_v18, %v5939_v23  ;;  %7820 = vst [vmem:[#allocation5 + $0xa0] sm:$0x1] %v11840_v26  ;;  %5623 = vst [vmem:[#allocation4 + $0xd0] sm:$0xff] %v13882_v40  ;;  %v5736_v16 = vcombine.low %v9652_v15, %v9653_v22  ;;  %v5737_v6 = vcombine.low %v9654_v57, %v9655_v54 }
 0x74f   : > { %5704 = vst [vmem:[#allocation5 + $0xb1] sm:$0xff] %v5672_v12  ;;  %5705 = vst [vmem:[#allocation5 + $0xc1] sm:$0xff] %v5673_v11  ;;  %v5804_v21 = vmul.f32 %v13605_v14, %v5784_v63  ;;  %v6233_v46 = vadd.f32 %v6217_v28, %v6181_v7  ;;  %v6254_v44 = vadd.f32 %v13740_v45, %v6232_v24  ;;  %v9689_v7 = vld.sshfl [vmem:[#allocation7 + $0x198] sm:$0xff pattern:$0x75316420] }
 0x750   : > { %v5923_v9 = vadd.f32 %v5907_v52, %v5871_v0  ;;  %v5974_v58 = vadd.f32 %v5958_v31, %v5922_v33  ;;  %v6114_v30 = vmul.f32 %v13648_v27, %v5783_v1  ;;  %v13896_v19 = vmul.f32 %v13681_v32, %v13832_v36  ;;  %5768 = vst [vmem:[#allocation6 + $0xb0] sm:$0xff] %v5736_v16  ;;  %v9690_v24 = vld.sshfl [vmem:[#allocation7 + $0x1b0] sm:$0xff pattern:$0x75316420] }
 0x751   : > { %5769 = vst [vmem:[#allocation6 + $0xc0] sm:$0xff] %v5737_v6  ;;  %v5856_v26 = vmul.f32 %v13608_v50, %v13838_v4  ;;  %v5908_v15 = vmul.f32 %v13611_v5, %v13832_v36  ;;  %v6255_v28 = vadd.f32 %v13740_v45, %v6233_v46  ;;  %v6270_v22 = vmax.f32 %v6254_v44, 0.0 }
 0x752   : > { %v5975_v57 = vadd.f32 %v5959_v8, %v5923_v9  ;;  %v6026_v52 = vadd.f32 %v6010_v47, %v5974_v58  ;;  %v6115_v54 = vmul.f32 %v13648_v27, %v5784_v63  ;;  %v5857_v51 = vmul.f32 %v13608_v50, %v13866_v38  ;;  %v5785_v17 = vld [vmem:[#allocation3 + $0xc0] sm:$0xff]  ;;  %v9691_v47 = vld.sshfl [vmem:[#allocation7 + $0x1b8] sm:$0xff pattern:$0x75316420] }
 0x753   : > { %v5872_v60 = vadd.f32 %v5856_v26, %v5804_v21  ;;  %v5909_v33 = vmul.f32 %v13611_v5, %v13862_v35  ;;  %v6271_v1 = vmax.f32 %v6255_v28, 0.0  ;;  %v5786_v42 = vld [vmem:[#allocation3 + $0xd0] sm:$0xff]  ;;  %v6012_v36 = vmul.f32 %v13623_v62, %v5736_v16  ;;  %v13912_v8 = vld [vmem:[#allocation2] sm:$0xff]  ;;  %v9657_v58 = vld.sshfl [vmem:[#allocation7 + $0x188] sm:$0xff pattern:$0x75316420] }
 0x754   : > { %v6027_v10 = vadd.f32 %v6011_v2, %v5975_v57  ;;  %v6078_v4 = vadd.f32 %v6062_v29, %v6026_v52  ;;  %v5805_v63 = vmul.f32 %v13605_v14, %v5785_v17  ;;  %v6013_v23 = vmul.f32 %v13623_v62, %v5737_v6  ;;  %7771 = vst [vmem:[#allocation3 + $0xc0] sm:$0x1] %v13912_v8  ;;  %v9656_v9 = vld.sshfl [vmem:[#allocation7 + $0x180] sm:$0xff pattern:$0x75316420] }
 0x755   : > { %v5924_v0 = vadd.f32 %v5908_v15, %v5872_v60  ;;  %v6064_v31 = vmul.f32 %v13638_v61, %v5672_v12  ;;  %7772 = vst [vmem:[#allocation3 + $0xd0] sm:$0x1] %v13912_v8  ;;  %v6300_v2 = vpack.c.bf16 %v6271_v1, %v6270_v22  ;;  %v6065_v44 = vmul.f32 %v13638_v61, %v5673_v11  ;;  %v9658_v26 = vld.sshfl [vmem:[#allocation7 + $0x1a0] sm:$0xff pattern:$0x75316420] }
 0x756   : > { %v6079_v29 = vadd.f32 %v13857_v59, %v6027_v10  ;;  %v6130_v16 = vadd.f32 %v6114_v30, %v6078_v4  ;;  %v5940_v21 = vld [vmem:[#allocation5 + $0xb0] sm:$0xff]  ;;  %v5941_v46 = vld [vmem:[#allocation5 + $0xc0] sm:$0xff]  ;;  %v9659_v6 = vld.sshfl [vmem:[#allocation7 + $0x1a8] sm:$0xff pattern:$0x75316420]  ;;  %v5873_v15 = vadd.f32 %v5857_v51, %v5805_v63  ;;  %v6116_v57 = vmul.f32 %v13648_v27, %v5785_v17 }
 0x757   : > { %v5960_v12 = vmul.f32 %v13620_v18, %v5940_v21  ;;  %v5961_v28 = vmul.f32 %v13620_v18, %v5941_v46  ;;  %7821 = vst [vmem:[#allocation5 + $0xb0] sm:$0x1] %v13912_v8  ;;  %7822 = vst [vmem:[#allocation5 + $0xc0] sm:$0x1] %v13912_v8  ;;  %10156 = vmatmul.mubr.bf16.gmra.mxu0 %v6300_v2  ;;  %v6117_v11 = vmul.f32 %v13648_v27, %v5786_v42 }
 0x758   : > { %v6131_v59 = vadd.f32 %v6115_v54, %v6079_v29  ;;  %v6182_v30 = vadd.f32 %v13860_v43, %v6130_v16  ;;  %v6168_v22 = vmul.f32 %v13651_v48, %v13866_v38  ;;  %v5925_v52 = vadd.f32 %v5909_v33, %v5873_v15 }
 0x759   : > { %v5976_v51 = vadd.f32 %v5960_v12, %v5924_v0  ;;  %v13927_v60 = vcombine.high %v9688_v53, %v9689_v7  ;;  %v13929_v1 = vcombine.high %v9690_v24, %v9691_v47  ;;  %v13933_v17 = vcombine.low %v9688_v53, %v9689_v7 }
 0x75a   : > { %v6183_v10 = vadd.f32 %v13872_v56, %v6131_v59  ;;  %v6234_v4 = vadd.f32 %v13878_v41, %v6182_v30  ;;  %v13935_v54 = vcombine.low %v9690_v24, %v9691_v47  ;;  %v5977_v43 = vadd.f32 %v5961_v28, %v5925_v52  ;;  %v13961_v28 = vld.sshfl [vmem:[#allocation7 + $0x1c0] sm:$0xff pattern:$0x75316420] }
 0x75b   : > { %v6028_v63 = vadd.f32 %v6012_v36, %v5976_v51  ;;  %5555 = vst [vmem:[#allocation3 + $0xe1] sm:$0xff] %v13927_v60  ;;  %5556 = vst [vmem:[#allocation3 + $0xf1] sm:$0xff] %v13929_v1  ;;  %v5674_v38 = vcombine.high %v9656_v9, %v9657_v58  ;;  %v5675_v33 = vcombine.high %v9658_v26, %v9659_v6 }
 0x75c   : > { %v6235_v0 = vadd.f32 %v13896_v19, %v6183_v10  ;;  %v6256_v2 = vadd.f32 %v13740_v45, %v6234_v4  ;;  %v5738_v29 = vcombine.low %v9656_v9, %v9657_v58  ;;  %v5739_v56 = vcombine.low %v9658_v26, %v9659_v6  ;;  %v9692_v9 = vld.sshfl [vmem:[#allocation7 + $0x1d0] sm:$0xff pattern:$0x75316420]  ;;  %v13953_v26 = vld.sshfl [vmem:[#allocation7 + $0x1f8] sm:$0xff pattern:$0x75316420] }
 0x75d   : > { %v6029_v16 = vadd.f32 %v6013_v23, %v5977_v43  ;;  %v6080_v41 = vadd.f32 %v6064_v31, %v6028_v63  ;;  %5706 = vst [vmem:[#allocation5 + $0xd1] sm:$0xff] %v5674_v38  ;;  %5707 = vst [vmem:[#allocation5 + $0xe1] sm:$0xff] %v5675_v33  ;;  %v5806_v53 = vmul.f32 %v13605_v14, %v5786_v42  ;;  %v9693_v42 = vld.sshfl [vmem:[#allocation7 + $0x1d8] sm:$0xff pattern:$0x75316420] }
 0x75e   : > { %v5858_v36 = vmul.f32 %v13608_v50, %v13882_v40  ;;  %v6257_v7 = vadd.f32 %v13740_v45, %v6235_v0  ;;  %v6272_v24 = vmax.f32 %v6256_v2, 0.0  ;;  %v6169_v47 = vmul.f32 %v13651_v48, %v13882_v40  ;;  %v13951_v58 = vld.sshfl [vmem:[#allocation7 + $0x1f0] sm:$0xff pattern:$0x75316420] }
 0x75f   : > { %v6220_v19 = vmul.f32 %v13681_v32, %v13862_v35  ;;  %v6081_v21 = vadd.f32 %v6065_v44, %v6029_v16  ;;  %v6132_v46 = vadd.f32 %v6116_v57, %v6080_v41  ;;  %v5910_v31 = vmul.f32 %v13611_v5, %v13864_v49  ;;  %v13966_v10 = vld.sshfl [vmem:[#allocation7 + $0x1c8] sm:$0xff pattern:$0x75316420]  ;;  %v9662_v63 = vld.sshfl [vmem:[#allocation7 + $0x1e0] sm:$0xff pattern:$0x75316420] }
 0x760   : > { %v5874_v23 = vadd.f32 %v5858_v36, %v5806_v53  ;;  %v6273_v6 = vmax.f32 %v6257_v7, 0.0  ;;  %v6221_v15 = vmul.f32 %v13681_v32, %v13864_v49  ;;  %v5859_v35 = vmul.f32 %v13608_v50, %v13933_v17  ;;  %v9663_v0 = vld.sshfl [vmem:[#allocation7 + $0x1e8] sm:$0xff pattern:$0x75316420] }
 0x761   : > { %v6133_v40 = vadd.f32 %v6117_v11, %v6081_v21  ;;  %v6184_v12 = vadd.f32 %v6168_v22, %v6132_v46  ;;  %v5911_v44 = vmul.f32 %v13611_v5, %v13927_v60  ;;  %v6014_v30 = vmul.f32 %v13623_v62, %v5738_v29 }
 0x762   : > { %v6301_v57 = vpack.c.bf16 %v6273_v6, %v6272_v24  ;;  %v5787_v59 = vld [vmem:[#allocation3 + $0xe0] sm:$0xff]  ;;  %v6015_v52 = vmul.f32 %v13623_v62, %v5739_v56  ;;  %v6066_v51 = vmul.f32 %v13638_v61, %v5674_v38  ;;  %v5926_v4 = vadd.f32 %v5910_v31, %v5874_v23  ;;  %v6099_v43 = vld [vmem:[#allocation3 + $0xf0] sm:$0xff] }
 0x763   : > { %v6185_v49 = vadd.f32 %v6169_v47, %v6133_v40  ;;  %v6236_v11 = vadd.f32 %v6220_v19, %v6184_v12  ;;  %v5807_v22 = vmul.f32 %v13605_v14, %v5787_v59  ;;  %v6067_v41 = vmul.f32 %v13638_v61, %v5675_v33 }
 0x764   : > { %10159 = vmatprep.mubr.bf16.mxu0 %v6301_v57  ;;  %v5942_v2 = vld [vmem:[#allocation5 + $0xd0] sm:$0xff]  ;;  %v5943_v16 = vld [vmem:[#allocation5 + $0xe0] sm:$0xff]  ;;  %v6118_v29 = vmul.f32 %v13648_v27, %v5787_v59  ;;  %v13971_v56 = vcombine.high %v9692_v9, %v9693_v42  ;;  %v13975_v38 = vcombine.high %v13951_v58, %v13953_v26  ;;  %v5593_v33 = vcombine.low %v9692_v9, %v9693_v42 }
 0x765   : > { %v6237_v53 = vadd.f32 %v6221_v15, %v6185_v49  ;;  %v6258_v36 = vadd.f32 %v13740_v45, %v6236_v11  ;;  %v5875_v7 = vadd.f32 %v5859_v35, %v5807_v22  ;;  %v5962_v24 = vmul.f32 %v13620_v18, %v5942_v2 }
 0x766   : > { %v5963_v47 = vmul.f32 %v13620_v18, %v5943_v16  ;;  %5557 = vst [vmem:[#allocation3 + $0x101] sm:$0xff] %v13971_v56  ;;  %5558 = vst [vmem:[#allocation3 + $0x111] sm:$0xff] %v13975_v38  ;;  %v5594_v19 = vcombine.low %v13951_v58, %v13953_v26  ;;  %v5676_v21 = vcombine.high %v13961_v28, %v13966_v10 }
 0x767   : > { %v6259_v46 = vadd.f32 %v13740_v45, %v6237_v53  ;;  %v6274_v23 = vmax.f32 %v6258_v36, 0.0  ;;  %v5927_v31 = vadd.f32 %v5911_v44, %v5875_v7  ;;  %v5978_v6 = vadd.f32 %v5962_v24, %v5926_v4 }
 0x768   : > { %v5677_v15 = vcombine.high %v9662_v63, %v9663_v0  ;;  %5708 = vst [vmem:[#allocation5 + $0xf1] sm:$0xff] %v5676_v21  ;;  %v5740_v40 = vcombine.low %v13961_v28, %v13966_v10  ;;  %v5741_v12 = vcombine.low %v9662_v63, %v9663_v0  ;;  %v5808_v35 = vmul.f32 %v6099_v43, %v13605_v14 }
 0x769   : > { %v6275_v9 = vmax.f32 %v6259_v46, 0.0  ;;  %v5979_v42 = vadd.f32 %v5963_v47, %v5927_v31  ;;  %v6030_v57 = vadd.f32 %v6014_v30, %v5978_v6  ;;  %v5860_v59 = vmul.f32 %v13608_v50, %v13935_v54 }
 0x76a   : > { %v6119_v49 = vmul.f32 %v13648_v27, %v6099_v43  ;;  %v6170_v45 = vmul.f32 %v13651_v48, %v13933_v17  ;;  %5709 = vst [vmem:[#allocation5 + $0x101] sm:$0xff] %v5677_v15  ;;  %v5912_v44 = vmul.f32 %v13611_v5, %v13929_v1  ;;  %v5861_v4 = vmul.f32 %v13608_v50, %v5593_v33 }
 0x76b   : > { %v6302_v11 = vpack.c.bf16 %v6275_v9, %v6274_v23  ;;  %v6031_v28 = vadd.f32 %v6015_v52, %v5979_v42  ;;  %v6082_v10 = vadd.f32 %v6066_v51, %v6030_v57  ;;  %v5876_v22 = vadd.f32 %v5860_v59, %v5808_v35 }
 0x76c   : > { %v6171_v0 = vmul.f32 %v13651_v48, %v13935_v54  ;;  %v6222_v43 = vmul.f32 %v13681_v32, %v13927_v60  ;;  %v5913_v16 = vmul.f32 %v13611_v5, %v13971_v56  ;;  %v6223_v50 = vmul.f32 %v13681_v32, %v13929_v1  ;;  %v10884_v1 = vld [vmem:[#allocation33] ss:$0 sm:$0xff] }
 0x76d   : > { %10160 = vmatmul.mubr.bf16.gmra.mxu0 %v6302_v11  ;;  %v6083_v30 = vadd.f32 %v6067_v41, %v6031_v28  ;;  %v6134_v63 = vadd.f32 %v6118_v29, %v6082_v10  ;;  %v5789_v17 = vld [vmem:[#allocation3 + $0x100] sm:$0xff]  ;;  %v5928_v52 = vadd.f32 %v5912_v44, %v5876_v22  ;;  %v6016_v54 = vmul.f32 %v13623_v62, %v5740_v40  ;;  %v6101_v47 = vld [vmem:[#allocation3 + $0x110] sm:$0xff] }
 0x76e   : > { %v5809_v2 = vmul.f32 %v13605_v14, %v5789_v17  ;;  %v6017_v14 = vmul.f32 %v13623_v62, %v5741_v12  ;;  %v6068_v31 = vmul.f32 %v13638_v61, %v5676_v21  ;;  %v6069_v57 = vmul.f32 %v13638_v61, %v5677_v15 }
 0x76f   : > { %v6135_v51 = vadd.f32 %v6119_v49, %v6083_v30  ;;  %v6186_v53 = vadd.f32 %v6170_v45, %v6134_v63  ;;  %v5944_v41 = vld [vmem:[#allocation5 + $0xf0] sm:$0xff]  ;;  %v6120_v40 = vmul.f32 %v13648_v27, %v5789_v17  ;;  %v6121_v12 = vmul.f32 %v13648_v27, %v6101_v47  ;;  %v9697_v17 = vld [vmem:[%s14870_s26] ss:$0 sm:$0xff] }
 0x770   : > { %v5877_v29 = vadd.f32 %v5861_v4, %v5809_v2  ;;  %v5964_v36 = vmul.f32 %v13620_v18, %v5944_v41  ;;  %v6173_v28 = vmul.f32 %v13651_v48, %v5594_v19  ;;  %v6224_v61 = vmul.f32 %v13681_v32, %v13971_v56  ;;  %v10777_v56 = vld [vmem:[#allocation36 + $0x8] sm:$0xff]   ;;  %v10778_v19 = vld [vmem:[#allocation36] sm:$0xff]  }
 0x771   : > { %v6187_v7 = vadd.f32 %v6171_v0, %v6135_v51  ;;  %v6238_v60 = vadd.f32 %v6222_v43, %v6186_v53  ;;  %v5945_v24 = vld [vmem:[#allocation5 + $0x100] sm:$0xff]  ;;  %v6225_v4 = vmul.f32 %v13681_v32, %v13975_v38 }
 0x772   : > { %v5929_v46 = vadd.f32 %v5913_v16, %v5877_v29  ;;  %v5965_v5 = vmul.f32 %v13620_v18, %v5945_v24  ;;  %v5980_v23 = vadd.f32 %v5964_v36, %v5928_v52  ;;  %v6172_v18 = vmul.f32 %v13651_v48, %v5593_v33  ;;  %v10776_v48 = vld [vmem:[#allocation36 + $0x10] sm:$0xff]  }
 0x773   : > { %v6239_v6 = vadd.f32 %v6223_v50, %v6187_v7  ;;  %v6260_v35 = vadd.f32 %v10884_v1, %v6238_v60  ;;  %10177 = vmatprep.subr.bf16.mxu1 %v10776_v48 }
 0x774   : > { %v5981_v9 = vadd.f32 %v5965_v5, %v5929_v46  ;;  %v6032_v42 = vadd.f32 %v6016_v54, %v5980_v23  ;;  %10178 = vmatpush3.bf16.msra.mxu1 %v10776_v48 }
 0x775   : > { %v6261_v59 = vadd.f32 %v10884_v1, %v6239_v6  ;;  %v6276_v49 = vmax.f32 %v6260_v35, 0.0  ;;  %10179 = vmatprep.subr.bf16.mxu1 %v10777_v56 }
 0x776   : > { %v6033_v45 = vadd.f32 %v6017_v14, %v5981_v9  ;;  %v6084_v62 = vadd.f32 %v6068_v31, %v6032_v42 }
 0x777   : > { %v6277_v44 = vmax.f32 %v6261_v59, 0.0 }
 0x778   : > { %v6085_v11 = vadd.f32 %v6069_v57, %v6033_v45  ;;  %v6136_v21 = vadd.f32 %v6120_v40, %v6084_v62  ;;  %10180 = vmatpush3.bf16.msra.mxu1 %v10777_v56 }
 0x779   : > { %v6303_v15 = vpack.c.bf16 %v6277_v44, %v6276_v49  ;;  %10181 = vmatprep.subr.bf16.mxu1 %v10778_v19 }
 0x77a   : > { %v6137_v10 = vadd.f32 %v6121_v12, %v6085_v11  ;;  %v6188_v22 = vadd.f32 %v6172_v18, %v6136_v21 }
 0x77b   : > { %10163 = vmatprep.mubr.bf16.mxu0 %v6303_v15 }
 0x77c   : > { %v6189_v27 = vadd.f32 %v6173_v28, %v6137_v10  ;;  %v6240_v33 = vadd.f32 %v6224_v61, %v6188_v22  ;;  %10182 = vmatpush3.bf16.msra.mxu1 %v10778_v19 }
 0x77e   : > { %v6241_v30 = vadd.f32 %v6225_v4, %v6189_v27  ;;  %v6262_v63 = vadd.f32 %v10884_v1, %v6240_v33 }
 0x780   : > { %v6263_v0 = vadd.f32 %v10884_v1, %v6241_v30  ;;  %v6278_v43 = vmax.f32 %v6262_v63, 0.0 }
 0x782   : > { %v6279_v58 = vmax.f32 %v6263_v0, 0.0 }
 0x784   : > { %v6304_v26 = vpack.c.bf16 %v6279_v58, %v6278_v43 }
 0x786   : > { %10164 = vmatmul.mubr.bf16.gmra.mxu0 %v6304_v26 }
 0x7fe   : > { %v10153_v32 = vpop.f32.mrf.mxu0 }
 0x7ff   : > { %v14029_v51 = vadd.f32 %v10153_v32, %v9697_v17 }
 0x800   : > { %v6393_v38 = vpop.f32.mrf.mxu0 }
 0x801   : > { %v14025_v16 = vadd.f32 %v9697_v17, %v6393_v38  ;;  %v14697_v54 = vmax.f32 %v14029_v51, 0.0 }
 0x802   : > { %v10154_v2 = vpop.f32.mrf.mxu0 }
 0x803   : > { %v14027_v52 = vadd.f32 %v10154_v2, %v9697_v17  ;;  %v14699_v29 = vmax.f32 %v14025_v16, 0.0  ;;  %v10780_v2 = vld [vmem:[#allocation40 + $0x30] sm:$0xff]  }
 0x804   : > { %v6396_v53 = vpop.f32.mrf.mxu0 }
 0x805   : > { %v14031_v50 = vadd.f32 %v9697_v17, %v6396_v53  ;;  %v14700_v41 = vmax.f32 %v14027_v52, 0.0  ;;  %v10781_v53 = vld [vmem:[#allocation40 + $0x28] sm:$0xff]  }
 0x807   : > { %v14698_v36 = vmax.f32 %v14031_v50, 0.0  ;;  %v6490_v60 = vpack.c.bf16 %v14700_v41, %v14697_v54 }
 0x809   : > { %v6489_v7 = vpack.c.bf16 %v14698_v36, %v14699_v29 }
 0x80b   : > { %10183 = vmatprep.mubr.bf16.mxu1 %v6489_v7  ;;  %v10782_v7 = vld [vmem:[#allocation40 + $0x20] sm:$0xff]  }
 0x80c   : > { %10184 = vmatmul.mubr.bf16.vlgmr.msra.gmra.mxu1 %v6490_v60  ;;  %v10783_v60 = vld [vmem:[#allocation40 + $0x18] sm:$0xff]  }
 0x817   : > { %v10157_v24 = vpop.f32.mrf.mxu0 }
 0x818   : > { %v14049_v23 = vadd.f32 %v10157_v24, %v9697_v17  ;;  %v10784_v24 = vld [vmem:[#allocation40 + $0x10] sm:$0xff]  }
 0x819   : > { %v6409_v14 = vpop.f32.mrf.mxu0 }
 0x81a   : > { %v14045_v46 = vadd.f32 %v9697_v17, %v6409_v14  ;;  %v14693_v42 = vmax.f32 %v14049_v23, 0.0  ;;  %v10785_v14 = vld [vmem:[#allocation40 + $0x8] sm:$0xff]  }
 0x81b   : > { %v10158_v47 = vpop.f32.mrf.mxu0 }
 0x81c   : > { %v14047_v5 = vadd.f32 %v10158_v47, %v9697_v17  ;;  %v14695_v35 = vmax.f32 %v14045_v46, 0.0  ;;  %v10786_v47 = vld [vmem:[#allocation40] sm:$0xff]  }
 0x81d   : > { %v6412_v31 = vpop.f32.mrf.mxu0 }
 0x81e   : > { %v14051_v6 = vadd.f32 %v9697_v17, %v6412_v31  ;;  %v14696_v1 = vmax.f32 %v14047_v5, 0.0  ;;  %v10787_v31 = vld [vmem:[#allocation43 + $0x38] sm:$0xff]  }
 0x81f   : > { %10231 = vmatprep.subr.bf16.mxu1 %v10787_v31 }
 0x820   : > { %v14694_v9 = vmax.f32 %v14051_v6, 0.0  ;;  %v6492_v40 = vpack.c.bf16 %v14696_v1, %v14693_v42  ;;  %10232 = vmatpush3.bf16.msra.mxu1 %v10787_v31 }
 0x822   : > { %v6491_v57 = vpack.c.bf16 %v14694_v9, %v14695_v35 }
 0x824   : > { %10187 = vmatprep.mubr.bf16.mxu1 %v6491_v57  ;;  %v10788_v57 = vld [vmem:[#allocation43 + $0x30] sm:$0xff]  }
 0x825   : > { %10188 = vmatmul.mubr.bf16.gmra.mxu1 %v6492_v40  ;;  %10233 = vmatprep.subr.bf16.mxu1 %v10788_v57  ;;  %v10789_v40 = vld [vmem:[#allocation43 + $0x28] sm:$0xff]  }
 0x826   : > { %10234 = vmatpush3.bf16.msra.mxu1 %v10788_v57 }
 0x827   : > { %10235 = vmatprep.subr.bf16.mxu1 %v10789_v40 }
 0x82a   : > { %10236 = vmatpush3.bf16.msra.mxu1 %v10789_v40 }
 0x82d   : > { %v10161_v59 = vpop.f32.mrf.mxu0 }
 0x82e   : > { %v14069_v18 = vadd.f32 %v10161_v59, %v9697_v17  ;;  %v10790_v59 = vld [vmem:[#allocation43 + $0x20] sm:$0xff]  }
 0x82f   : > { %v6425_v49 = vpop.f32.mrf.mxu0  ;;  %10237 = vmatprep.subr.bf16.mxu1 %v10790_v59 }
 0x830   : > { %v14065_v62 = vadd.f32 %v9697_v17, %v6425_v49  ;;  %14873 = vst [vmem:[#allocation122_spill] sm:$0xff] %v14069_v18  ;;  %v14689_v15 = vmax.f32 %v14069_v18, 0.0  ;;  %v14105_v49 = vld [vmem:[#allocation37] ss:$0 sm:$0xff]  ;;  %10238 = vmatpush3.bf16.msra.mxu1 %v10790_v59 }
 0x831   : > { %v10162_v45 = vpop.f32.mrf.mxu0 }
 0x832   : > { %14871 = vst [vmem:[#allocation120_spill] sm:$0xff] %v14065_v62  ;;  %v14067_v12 = vadd.f32 %v10162_v45, %v9697_v17  ;;  %v14691_v28 = vmax.f32 %v14065_v62, 0.0  ;;  %v10791_v45 = vld [vmem:[#allocation43 + $0x18] sm:$0xff]  }
 0x833   : > { %v6428_v44 = vpop.f32.mrf.mxu0  ;;  %10239 = vmatprep.subr.bf16.mxu1 %v10791_v45 }
 0x834   : > { %14872 = vst [vmem:[#allocation121_spill] sm:$0xff] %v14067_v12  ;;  %v14071_v11 = vadd.f32 %v9697_v17, %v6428_v44  ;;  %v14692_v21 = vmax.f32 %v14067_v12, 0.0  ;;  %v6664_v44 = vld [vmem:[%s14879_s12] sm:$0xff]  ;;  %10240 = vmatpush3.bf16.msra.mxu1 %v10791_v45 }
 0x835   : > { %v14135_v45 = vrot.slane %v6664_v44, %v13582_v37 }
 0x836   : > { %14874 = vst [vmem:[#allocation123_spill] sm:$0xff] %v14071_v11  ;;  %v14690_v61 = vmax.f32 %v14071_v11, 0.0  ;;  %v6494_v22 = vpack.c.bf16 %v14692_v21, %v14689_v15 }
 0x838   : > { %v6493_v10 = vpack.c.bf16 %v14690_v61, %v14691_v28  ;;  %v14156_v28 = vrot.slane %v6664_v44, %v13629_v55 }
 0x83a   : > { %10191 = vmatprep.mubr.bf16.mxu1 %v6493_v10 }
 0x83b   : > { %10192 = vmatmul.mubr.bf16.gmra.mxu1 %v6494_v22  ;;  %v14109_v22 = vrot.slane %v6664_v44, %v13572_v20 }
 0x846   : > { %v10165_v4 = vpop.f32.mrf.mxu0 }
 0x847   : > { %v14089_v0 = vadd.f32 %v10165_v4, %v9697_v17 }
 0x848   : > { %v6441_v27 = vpop.f32.mrf.mxu0 }
 0x849   : > { %v14085_v30 = vadd.f32 %v9697_v17, %v6441_v27  ;;  %14877 = vst [vmem:[#allocation126_spill] sm:$0xff] %v14089_v0  ;;  %v14685_v19 = vmax.f32 %v14089_v0, 0.0 }
 0x84a   : > { %v10166_v33 = vpop.f32.mrf.mxu0 }
 0x84b   : > { %14875 = vst [vmem:[#allocation124_spill] sm:$0xff] %v14085_v30  ;;  %v14087_v63 = vadd.f32 %v10166_v33, %v9697_v17  ;;  %v14687_v48 = vmax.f32 %v14085_v30, 0.0  ;;  %v6777_v33 = vld [vmem:[#allocation2 + $0x1] sm:$0xff] }
 0x84c   : > { %v6444_v43 = vpop.f32.mrf.mxu0 }
 0x84d   : > { %14876 = vst [vmem:[#allocation125_spill] sm:$0xff] %v14087_v63  ;;  %v14091_v58 = vadd.f32 %v9697_v17, %v6444_v43  ;;  %v14688_v26 = vmax.f32 %v14087_v63, 0.0  ;;  %v10779_v17 = vld [vmem:[#allocation40 + $0x38] sm:$0xff]  }
 0x84e   : > { %10199 = vmatprep.subr.bf16.mxu0 %v10779_v17 }
 0x84f   : > { %14878 = vst [vmem:[#allocation127_spill] sm:$0xff] %v14091_v58  ;;  %v14686_v56 = vmax.f32 %v14091_v58, 0.0  ;;  %v6496_v38 = vpack.c.bf16 %v14688_v26, %v14685_v19  ;;  %10200 = vmatpush3.bf16.msra.mxu0 %v10779_v17 }
 0x850   : > { %10201 = vmatprep.subr.bf16.mxu0 %v10780_v2 }
 0x851   : > { %v6495_v32 = vpack.c.bf16 %v14686_v56, %v14687_v48 }
 0x853   : > { %10195 = vmatprep.mubr.bf16.mxu1 %v6495_v32  ;;  %10202 = vmatpush3.bf16.msra.mxu0 %v10780_v2  ;;  %v14120_v2 = vmul.f32 %v13912_v8, %v14109_v22 }
 0x854   : > { %10196 = vmatmul.mubr.bf16.gmra.mxu1 %v6496_v38  ;;  %10203 = vmatprep.subr.bf16.mxu0 %v10781_v53  ;;  %v14116_v38 = vrot.slane %v6664_v44, %v13575_v3 }
 0x857   : > { %10204 = vmatpush3.bf16.msra.mxu0 %v10781_v53 }
 0x858   : > { %10205 = vmatprep.subr.bf16.mxu0 %v10782_v7 }
 0x85b   : > { %10206 = vmatpush3.bf16.msra.mxu0 %v10782_v7 }
 0x85c   : > { %10207 = vmatprep.subr.bf16.mxu0 %v10783_v60 }
 0x85f   : > { %10208 = vmatpush3.bf16.msra.mxu0 %v10783_v60  ;;  %v6797_v60 = vmul.f32 %v14116_v38, %v6777_v33 }
 0x860   : > { %10209 = vmatprep.subr.bf16.mxu0 %v10784_v24 }
 0x861   : > { %v6813_v59 = vadd.f32 %v6797_v60, %v14120_v2  ;;  %v14142_v60 = vrot.slane %v6664_v44, %v13599_v39 }
 0x863   : > { %10210 = vmatpush3.bf16.msra.mxu0 %v10784_v24  ;;  %v14126_v24 = vrot.slane %v6664_v44, %v13579_v34 }
 0x864   : > { %10211 = vmatprep.subr.bf16.mxu0 %v10785_v14 }
 0x867   : > { %10212 = vmatpush3.bf16.msra.mxu0 %v10785_v14 }
 0x868   : > { %10213 = vmatprep.subr.bf16.mxu0 %v10786_v47 }
 0x86b   : > { %10214 = vmatpush3.bf16.msra.mxu0 %v10786_v47  ;;  %v6829_v47 = vld [vmem:[#allocation2 + $0x2] sm:$0xff] }
 0x8cc   : > { %v10185_v10 = vpop.f32.mrf.mxu1 }
 0x8cd   : > { %v6594_v4 = vadd.f32 %v10185_v10, %v14105_v49  ;;  %v6849_v10 = vmul.f32 %v14126_v24, %v6829_v47  ;;  %v14145_v47 = vrot.slane %v6664_v44, %v13602_v13  ;;  %v14182_v13 = vld [vmem:[#allocation39] ss:$0 sm:$0xff] }
 0x8ce   : > { %v6585_v27 = vpop.f32.mrf.mxu1 }
 0x8cf   : > { %v14112_v43 = vmax.f32 %v6594_v4, 0.0  ;;  %v6586_v32 = vadd.f32 %v14105_v49, %v6585_v27  ;;  %v6865_v27 = vadd.f32 %v6849_v10, %v6813_v59  ;;  %v6665_v10 = vld [vmem:[%s14879_s12 + $0x8] sm:$0xff] }
 0x8d0   : > { %v10186_v17 = vpop.f32.mrf.mxu1 }
 0x8d1   : > { %6670 = vst [vmem:[#allocation2 + $0x31] sm:$0xff] %v14112_v43  ;;  %v6648_v53 = vmax.f32 %v6586_v32, 0.0  ;;  %v6597_v7 = vadd.f32 %v10186_v17, %v14105_v49  ;;  %v6800_v59 = vmul.f32 %v14116_v38, %v14112_v43 }
 0x8d2   : > { %v6588_v14 = vpop.f32.mrf.mxu1 }
 0x8d3   : > { %6668 = vst [vmem:[#allocation2 + $0x11] sm:$0xff] %v6648_v53  ;;  %v14128_v31 = vmax.f32 %v6597_v7, 0.0  ;;  %v6589_v57 = vadd.f32 %v14105_v49, %v6588_v14  ;;  %v6798_v14 = vmul.f32 %v14116_v38, %v6648_v53  ;;  %v6953_v26 = vmul.f32 %v14142_v60, %v6648_v53 }
 0x8d5   : > { %6671 = vst [vmem:[#allocation2 + $0x41] sm:$0xff] %v14128_v31  ;;  %v6649_v40 = vmax.f32 %v6589_v57, 0.0 }
 0x8d7   : > { %6669 = vst [vmem:[#allocation2 + $0x21] sm:$0xff] %v6649_v40  ;;  %v7110_v41 = vmul.f32 %v14156_v28, %v6649_v40 }
 0x8d8   : > { %v7039_v4 = vld [vmem:[#allocation2 + $0x30] sm:$0xff] }
 0x8d9   : > { %v6748_v17 = vmul.f32 %v7039_v4, %v14109_v22  ;;  %v7143_v15 = vld [vmem:[#allocation2 + $0x32] sm:$0xff] }
 0x8da   : > { %v6726_v33 = vld [vmem:[#allocation2 + $0x10] sm:$0xff]  ;;  %v6852_v54 = vmul.f32 %v7143_v15, %v14126_v24 }
 0x8db   : > { %v6830_v32 = vld [vmem:[#allocation2 + $0x12] sm:$0xff]  ;;  %v6746_v7 = vmul.f32 %v14109_v22, %v6726_v33  ;;  %v6901_v57 = vmul.f32 %v14135_v45, %v6726_v33  ;;  %v14153_v33 = vrot.slane %v6664_v44, %v13626_v25  ;;  %v6816_v21 = vadd.f32 %v6800_v59, %v6748_v17 }
 0x8dc   : > { %v6850_v56 = vmul.f32 %v14126_v24, %v6830_v32  ;;  %v6954_v17 = vmul.f32 %v14142_v60, %v6649_v40 }
 0x8dd   : > { %v6814_v19 = vadd.f32 %v6798_v14, %v6746_v7  ;;  %v6917_v48 = vadd.f32 %v6901_v57, %v6865_v27  ;;  %v7005_v7 = vmul.f32 %v14145_v47, %v6830_v32  ;;  %v6884_v14 = vld [vmem:[#allocation2 + $0x40] sm:$0xff]  ;;  %v14161_v27 = vrot.slane %v6665_v10, %v13572_v20 }
 0x8de   : > { %v6882_v61 = vld [vmem:[#allocation2 + $0x20] sm:$0xff]  ;;  %v6799_v57 = vmul.f32 %v14116_v38, %v6649_v40  ;;  %v6868_v32 = vadd.f32 %v6852_v54, %v6816_v21  ;;  %v6904_v59 = vmul.f32 %v14135_v45, %v6884_v14  ;;  %v6955_v40 = vmul.f32 %v14142_v60, %v14112_v43 }
 0x8df   : > { %v6866_v42 = vadd.f32 %v6850_v56, %v6814_v19  ;;  %v6902_v9 = vmul.f32 %v14135_v45, %v6882_v61  ;;  %v6969_v35 = vadd.f32 %v6953_v26, %v6917_v48  ;;  %v6986_v1 = vld [vmem:[#allocation2 + $0x22] sm:$0xff]  ;;  %v6747_v53 = vmul.f32 %v6882_v61, %v14109_v22 }
 0x8e0   : > { %v7058_v19 = vmul.f32 %v14153_v33, %v6882_v61  ;;  %v6851_v48 = vmul.f32 %v6986_v1, %v14126_v24  ;;  %v7006_v36 = vmul.f32 %v14145_v47, %v6986_v1  ;;  %v6903_v61 = vmul.f32 %v7039_v4, %v14135_v45 }
 0x8e1   : > { %v6918_v44 = vadd.f32 %v6902_v9, %v6866_v42  ;;  %v7021_v56 = vadd.f32 %v7005_v7, %v6969_v35  ;;  %v6815_v26 = vadd.f32 %v6799_v57, %v6747_v53  ;;  %v7059_v9 = vmul.f32 %v14153_v33, %v7039_v4 }
 0x8e2   : > { %v7111_v35 = vmul.f32 %v14156_v28, %v14112_v43  ;;  %v7162_v53 = vmul.f32 %v14161_v27, %v6986_v1 }
 0x8e3   : > { %v6970_v10 = vadd.f32 %v6954_v17, %v6918_v44  ;;  %v7074_v29 = vadd.f32 %v7058_v19, %v7021_v56  ;;  %v6867_v42 = vadd.f32 %v6851_v48, %v6815_v26  ;;  %v6920_v17 = vadd.f32 %v6904_v59, %v6868_v32 }
 0x8e4   : > { %v6749_v56 = vmul.f32 %v6884_v14, %v14109_v22  ;;  %v7163_v59 = vmul.f32 %v14161_v27, %v7143_v15 }
 0x8e5   : > { %v10189_v55 = vpop.f32.mrf.mxu1  ;;  %v7022_v54 = vadd.f32 %v7006_v36, %v6970_v10  ;;  %v7126_v21 = vadd.f32 %v7110_v41, %v7074_v29  ;;  %v6919_v44 = vadd.f32 %v6903_v61, %v6867_v42  ;;  %v7007_v29 = vmul.f32 %v7143_v15, %v14145_v47  ;;  %v6785_v10 = vld [vmem:[#allocation2 + $0xa1] sm:$0xff] }
 0x8e6   : > { %v6610_v7 = vadd.f32 %v10189_v55, %v14105_v49  ;;  %v6956_v55 = vmul.f32 %v14142_v60, %v14128_v31  ;;  %v6801_v36 = vmul.f32 %v14116_v38, %v14128_v31  ;;  %v6988_v61 = vld [vmem:[#allocation2 + $0x42] sm:$0xff]  ;;  %v7112_v15 = vmul.f32 %v14156_v28, %v14128_v31 }
 0x8e7   : > { %v6601_v57 = vpop.f32.mrf.mxu1  ;;  %v7075_v26 = vadd.f32 %v7059_v9, %v7022_v54  ;;  %v7178_v48 = vadd.f32 %v7162_v53, %v7126_v21  ;;  %v6971_v41 = vadd.f32 %v6955_v40, %v6919_v44  ;;  %v7060_v54 = vmul.f32 %v14153_v33, %v6884_v14  ;;  %v7097_v40 = vld [vmem:[#allocation2 + $0x91] sm:$0xff] }
 0x8e8   : > { %v6654_v19 = vmax.f32 %v6610_v7, 0.0  ;;  %v6602_v25 = vadd.f32 %v14105_v49, %v6601_v57  ;;  %v6972_v42 = vadd.f32 %v6956_v55, %v6920_v17  ;;  %v6817_v21 = vadd.f32 %v6801_v36, %v6749_v56 }
 0x8e9   : > { %v10190_v4 = vpop.f32.mrf.mxu1  ;;  %v7127_v32 = vadd.f32 %v7111_v35, %v7075_v26  ;;  %v7023_v7 = vadd.f32 %v7007_v29, %v6971_v41  ;;  %v7149_v35 = vld [vmem:[#allocation2 + $0x92] sm:$0xff]  ;;  %v14200_v17 = vmul.f32 %v13912_v8, %v14153_v33  ;;  %v14203_v14 = vmul.f32 %v14116_v38, %v6785_v10 }
 0x8ea   : > { %6674 = vst [vmem:[#allocation2 + $0x71] sm:$0xff] %v6654_v19  ;;  %v6652_v1 = vmax.f32 %v6602_v25, 0.0  ;;  %v6613_v43 = vadd.f32 %v10190_v4, %v14105_v49  ;;  %v7200_v25 = vadd.f32 %v14182_v13, %v7178_v48  ;;  %v7008_v48 = vmul.f32 %v14145_v47, %v6988_v61 }
 0x8eb   : > { %v6604_v9 = vpop.f32.mrf.mxu1  ;;  %v7179_v44 = vadd.f32 %v7163_v59, %v7127_v32  ;;  %v7076_v26 = vadd.f32 %v7060_v54, %v7023_v7  ;;  %v6853_v55 = vmul.f32 %v6988_v61, %v14126_v24  ;;  %v7164_v29 = vmul.f32 %v14161_v27, %v6988_v61 }
 0x8ec   : > { %6672 = vst [vmem:[#allocation2 + $0x51] sm:$0xff] %v6652_v1  ;;  %v14192_v53 = vmax.f32 %v6613_v43, 0.0  ;;  %v6605_v57 = vadd.f32 %v14105_v49, %v6604_v9  ;;  %v14211_v31 = vmul.f32 %v14156_v28, %v7097_v40  ;;  %v14214_v8 = vmul.f32 %v14161_v27, %v7149_v35 }
 0x8ed   : > { %v7201_v4 = vadd.f32 %v14182_v13, %v7179_v44  ;;  %v7128_v41 = vadd.f32 %v7112_v15, %v7076_v26  ;;  %v7216_v36 = vmax.f32 %v7200_v25, 0.0  ;;  %v7024_v32 = vadd.f32 %v7008_v48, %v6972_v42 }
 0x8ee   : > { %6675 = vst [vmem:[#allocation2 + $0x81] sm:$0xff] %v14192_v53  ;;  %v6653_v56 = vmax.f32 %v6605_v57, 0.0  ;;  %v6869_v59 = vadd.f32 %v6853_v55, %v6817_v21  ;;  %v14217_v7 = vmul.f32 %v14156_v28, %v6654_v19  ;;  %v6804_v54 = vmul.f32 %v14116_v38, %v6654_v19 }
 0x8ef   : > { %v7217_v43 = vmax.f32 %v7201_v4, 0.0  ;;  %v7180_v10 = vadd.f32 %v7164_v29, %v7128_v41  ;;  %v14221_v61 = vmul.f32 %v14142_v60, %v6654_v19  ;;  %v7113_v44 = vmul.f32 %v14156_v28, %v6652_v1 }
 0x8f0   : > { %6673 = vst [vmem:[#allocation2 + $0x61] sm:$0xff] %v6653_v56  ;;  %v6802_v40 = vmul.f32 %v14116_v38, %v6652_v1  ;;  %v6957_v26 = vmul.f32 %v14142_v60, %v6652_v1  ;;  %v6958_v15 = vmul.f32 %v14142_v60, %v6653_v56  ;;  %v7114_v4 = vmul.f32 %v14156_v28, %v6653_v56 }
 0x8f1   : > { %v7043_v9 = vld [vmem:[#allocation2 + $0x70] sm:$0xff]  ;;  %v7249_v57 = vpack.c.bf16 %v7217_v43, %v7216_v36  ;;  %v6960_v19 = vmul.f32 %v14142_v60, %v14192_v53  ;;  %v7202_v55 = vadd.f32 %v14182_v13, %v7180_v10  ;;  %v6803_v29 = vmul.f32 %v14116_v38, %v6653_v56 }
 0x8f2   : > { %v14225_v35 = vld [vmem:[#allocation2 + $0x72] sm:$0xff]  ;;  %v6752_v42 = vmul.f32 %v7043_v9, %v14109_v22  ;;  %v7063_v1 = vmul.f32 %v14153_v33, %v7043_v9 }
 0x8f3   : > { %v7041_v21 = vld [vmem:[#allocation2 + $0x50] sm:$0xff]  ;;  %10215 = vmatprep.mubr.bf16.mxu0 %v7249_v57  ;;  %v6856_v39 = vmul.f32 %v14225_v35, %v14126_v24  ;;  %v7218_v30 = vmax.f32 %v7202_v55, 0.0 }
 0x8f4   : > { %v7145_v25 = vld [vmem:[#allocation2 + $0x52] sm:$0xff]  ;;  %v7061_v48 = vmul.f32 %v14153_v33, %v7041_v21  ;;  %v6750_v41 = vmul.f32 %v7041_v21, %v14109_v22  ;;  %v6905_v36 = vmul.f32 %v7041_v21, %v14135_v45  ;;  %v6820_v43 = vadd.f32 %v6804_v54, %v6752_v42 }
 0x8f5   : > { %v14241_v37 = vld [vmem:[#allocation2 + $0x80] sm:$0xff]  ;;  %v6854_v3 = vmul.f32 %v7145_v25, %v14126_v24  ;;  %v7165_v56 = vmul.f32 %v14161_v27, %v7145_v25  ;;  %v6907_v54 = vmul.f32 %v7043_v9, %v14135_v45 }
 0x8f6   : > { %v7077_v34 = vadd.f32 %v7061_v48, %v7024_v32  ;;  %v6818_v57 = vadd.f32 %v6802_v40, %v6750_v41  ;;  %v6908_v10 = vmul.f32 %v14135_v45, %v14241_v37  ;;  %v14246_v20 = vld [vmem:[#allocation2 + $0x82] sm:$0xff]  ;;  %v6921_v0 = vadd.f32 %v6905_v36, %v6869_v59 }
 0x8f7   : > { %v6886_v21 = vld [vmem:[#allocation2 + $0x60] sm:$0xff]  ;;  %v6872_v58 = vadd.f32 %v6856_v39, %v6820_v43  ;;  %v7009_v41 = vmul.f32 %v7145_v25, %v14145_v47  ;;  %v7012_v11 = vmul.f32 %v14145_v47, %v14246_v20 }
 0x8f8   : > { %v7129_v42 = vadd.f32 %v7113_v44, %v7077_v34  ;;  %v6870_v63 = vadd.f32 %v6854_v3, %v6818_v57  ;;  %v6906_v32 = vmul.f32 %v14135_v45, %v6886_v21  ;;  %v6990_v40 = vld [vmem:[#allocation2 + $0x62] sm:$0xff]  ;;  %v6973_v48 = vadd.f32 %v6957_v26, %v6921_v0 }
 0x8f9   : > { %v6751_v18 = vmul.f32 %v6886_v21, %v14109_v22  ;;  %v7062_v39 = vmul.f32 %v14153_v33, %v6886_v21  ;;  %v6924_v9 = vadd.f32 %v6908_v10, %v6872_v58  ;;  %v6855_v55 = vmul.f32 %v6990_v40, %v14126_v24 }
 0x8fa   : > { %v7181_v12 = vadd.f32 %v7165_v56, %v7129_v42  ;;  %v6922_v59 = vadd.f32 %v6906_v32, %v6870_v63  ;;  %v7025_v3 = vadd.f32 %v7009_v41, %v6973_v48  ;;  %v7010_v36 = vmul.f32 %v14145_v47, %v6990_v40 }
 0x8fb   : > { %v10193_v62 = vpop.f32.mrf.mxu1  ;;  %v6819_v44 = vadd.f32 %v6803_v29, %v6751_v18  ;;  %v6976_v43 = vadd.f32 %v6960_v19, %v6924_v9  ;;  %v7166_v18 = vmul.f32 %v14161_v27, %v6990_v40  ;;  %v6837_v9 = vld [vmem:[#allocation2 + $0xa2] sm:$0xff] }
 0x8fc   : > { %v6626_v34 = vadd.f32 %v10193_v62, %v14105_v49  ;;  %v7203_v25 = vadd.f32 %v14182_v13, %v7181_v12  ;;  %v6974_v26 = vadd.f32 %v6958_v15, %v6922_v59  ;;  %v7078_v56 = vadd.f32 %v7062_v39, %v7025_v3 }
 0x8fd   : > { %v6617_v0 = vpop.f32.mrf.mxu1  ;;  %v6871_v21 = vadd.f32 %v6855_v55, %v6819_v44  ;;  %v7028_v29 = vadd.f32 %v7012_v11, %v6976_v43  ;;  %v7011_v59 = vmul.f32 %v14225_v35, %v14145_v47 }
 0x8fe   : > { %v14260_v57 = vmax.f32 %v6626_v34, 0.0  ;;  %v6618_v63 = vadd.f32 %v14105_v49, %v6617_v0  ;;  %v7219_v10 = vmax.f32 %v7203_v25, 0.0  ;;  %v7026_v62 = vadd.f32 %v7010_v36, %v6974_v26 }
 0x8ff   : > { %v10194_v58 = vpop.f32.mrf.mxu1  ;;  %v7130_v15 = vadd.f32 %v7114_v4, %v7078_v56  ;;  %v6923_v32 = vadd.f32 %v6907_v54, %v6871_v21  ;;  %v7081_v39 = vadd.f32 %v14200_v17, %v7028_v29  ;;  %v6821_v54 = vadd.f32 %v14203_v14, %v14120_v2 }
 0x900   : > { %6678 = vst [vmem:[#allocation2 + $0xd1] sm:$0xff] %v14260_v57  ;;  %v6656_v42 = vmax.f32 %v6618_v63, 0.0  ;;  %v6629_v12 = vadd.f32 %v10194_v58, %v14105_v49  ;;  %v7250_v48 = vpack.c.bf16 %v7219_v10, %v7218_v30  ;;  %v7079_v41 = vadd.f32 %v7063_v1, %v7026_v62 }
 0x901   : > { %v6620_v19 = vpop.f32.mrf.mxu1  ;;  %v7182_v40 = vadd.f32 %v7166_v18, %v7130_v15  ;;  %v6975_v3 = vadd.f32 %v14221_v61, %v6923_v32  ;;  %v7167_v30 = vmul.f32 %v14161_v27, %v14225_v35  ;;  %v7133_v1 = vadd.f32 %v14211_v31, %v7081_v39 }
 0x902   : > { %6676 = vst [vmem:[#allocation2 + $0xb1] sm:$0xff] %v6656_v42  ;;  %v14269_v34 = vmax.f32 %v6629_v12, 0.0  ;;  %v6621_v11 = vadd.f32 %v14105_v49, %v6620_v19  ;;  %10216 = vmatmul.mubr.bf16.vlgmr.msra.gmra.mxu0 %v7250_v48  ;;  %v7131_v4 = vadd.f32 %v14217_v7, %v7079_v41  ;;  %v7064_v0 = vmul.f32 %v14153_v33, %v14241_v37 }
 0x903   : > { %v7027_v55 = vadd.f32 %v7011_v59, %v6975_v3  ;;  %v6857_v61 = vmul.f32 %v14126_v24, %v6837_v9  ;;  %v7204_v7 = vadd.f32 %v14182_v13, %v7182_v40  ;;  %v7185_v26 = vadd.f32 %v14214_v8, %v7133_v1 }
 0x904   : > { %6679 = vst [vmem:[#allocation2 + $0xe1] sm:$0xff] %v14269_v34  ;;  %v6657_v44 = vmax.f32 %v6621_v11, 0.0  ;;  %v7183_v25 = vadd.f32 %v7167_v30, %v7131_v4  ;;  %v7116_v31 = vmul.f32 %v14156_v28, %v14192_v53  ;;  %v7168_v36 = vmul.f32 %v14161_v27, %v14246_v20 }
 0x905   : > { %v7080_v35 = vadd.f32 %v7064_v0, %v7027_v55  ;;  %v6873_v43 = vadd.f32 %v6857_v61, %v6821_v54  ;;  %v7220_v37 = vmax.f32 %v7204_v7, 0.0  ;;  %v7207_v56 = vadd.f32 %v14182_v13, %v7185_v26 }
 0x906   : > { %6677 = vst [vmem:[#allocation2 + $0xc1] sm:$0xff] %v6657_v44  ;;  %v7205_v2 = vadd.f32 %v14182_v13, %v7183_v25  ;;  %v6806_v62 = vmul.f32 %v14116_v38, %v6656_v42  ;;  %v6961_v12 = vmul.f32 %v14142_v60, %v6656_v42  ;;  %v6962_v42 = vmul.f32 %v14142_v60, %v6657_v44 }
 0x907   : > { %v7132_v14 = vadd.f32 %v7116_v31, %v7080_v35  ;;  %v7047_v18 = vld [vmem:[#allocation2 + $0xd0] sm:$0xff]  ;;  %v7223_v48 = vmax.f32 %v7207_v56, 0.0  ;;  %v6807_v1 = vmul.f32 %v14116_v38, %v6657_v44  ;;  %v6808_v54 = vmul.f32 %v14116_v38, %v14260_v57 }
 0x908   : > { %v7221_v63 = vmax.f32 %v7205_v2, 0.0  ;;  %v6756_v39 = vmul.f32 %v7047_v18, %v14109_v22  ;;  %v7151_v7 = vld [vmem:[#allocation2 + $0xd2] sm:$0xff] }
 0x909   : > { %v6734_v21 = vld [vmem:[#allocation2 + $0xb0] sm:$0xff]  ;;  %v7184_v10 = vadd.f32 %v7168_v36, %v7132_v14 }
 0x90a   : > { %v6838_v58 = vld [vmem:[#allocation2 + $0xb2] sm:$0xff]  ;;  %v6754_v8 = vmul.f32 %v14109_v22, %v6734_v21  ;;  %v6909_v53 = vmul.f32 %v14135_v45, %v6734_v21  ;;  %v7251_v29 = vpack.c.bf16 %v7221_v63, %v7220_v37  ;;  %v6824_v35 = vadd.f32 %v6808_v54, %v6756_v39 }
 0x90b   : > { %v7206_v20 = vadd.f32 %v14182_v13, %v7184_v10  ;;  %v6858_v32 = vmul.f32 %v14126_v24, %v6838_v58  ;;  %v7013_v59 = vmul.f32 %v14145_v47, %v6838_v58  ;;  %v6892_v37 = vld [vmem:[#allocation2 + $0xe0] sm:$0xff]  ;;  %v6860_v63 = vmul.f32 %v7151_v7, %v14126_v24 }
 0x90c   : > { %v6822_v15 = vadd.f32 %v6806_v62, %v6754_v8  ;;  %v6925_v19 = vadd.f32 %v6909_v53, %v6873_v43  ;;  %10219 = vmatprep.mubr.bf16.mxu0 %v7251_v29  ;;  %v7118_v43 = vmul.f32 %v14156_v28, %v6657_v44  ;;  %v6911_v21 = vmul.f32 %v7047_v18, %v14135_v45 }
 0x90d   : > { %v6890_v41 = vld [vmem:[#allocation2 + $0xc0] sm:$0xff]  ;;  %v7222_v9 = vmax.f32 %v7206_v20, 0.0  ;;  %v6963_v58 = vmul.f32 %v14142_v60, %v14260_v57  ;;  %v7067_v62 = vmul.f32 %v14153_v33, %v7047_v18  ;;  %v6876_v20 = vadd.f32 %v6860_v63, %v6824_v35 }
 0x90e   : > { %v6874_v11 = vadd.f32 %v6858_v32, %v6822_v15  ;;  %v6910_v40 = vmul.f32 %v14135_v45, %v6890_v41  ;;  %v6977_v3 = vadd.f32 %v6961_v12, %v6925_v19  ;;  %v6994_v4 = vld [vmem:[#allocation2 + $0xc2] sm:$0xff]  ;;  %v6755_v30 = vmul.f32 %v6890_v41, %v14109_v22 }
 0x90f   : > { %v7252_v55 = vpack.c.bf16 %v7223_v48, %v7222_v9  ;;  %v7066_v25 = vmul.f32 %v14153_v33, %v6890_v41  ;;  %v6859_v31 = vmul.f32 %v6994_v4, %v14126_v24  ;;  %v7014_v14 = vmul.f32 %v14145_v47, %v6994_v4  ;;  %v6996_v35 = vld [vmem:[#allocation2 + $0xe2] sm:$0xff] }
 0x910   : > { %v6926_v0 = vadd.f32 %v6910_v40, %v6874_v11  ;;  %v7029_v61 = vadd.f32 %v7013_v59, %v6977_v3  ;;  %v6823_v26 = vadd.f32 %v6807_v1, %v6755_v30  ;;  %v7170_v29 = vmul.f32 %v14161_v27, %v6994_v4 }
 0x911   : > { %10220 = vmatmul.mubr.bf16.gmra.mxu0 %v7252_v55  ;;  %v6912_v44 = vmul.f32 %v14135_v45, %v6892_v37  ;;  %v7119_v48 = vmul.f32 %v14156_v28, %v14260_v57  ;;  %v7015_v9 = vmul.f32 %v7151_v7, %v14145_v47  ;;  %v7171_v3 = vmul.f32 %v14161_v27, %v7151_v7 }
 0x912   : > { %v6978_v2 = vadd.f32 %v6962_v42, %v6926_v0  ;;  %v7082_v36 = vadd.f32 %v7066_v25, %v7029_v61  ;;  %v6875_v56 = vadd.f32 %v6859_v31, %v6823_v26  ;;  %v7068_v4 = vmul.f32 %v14153_v33, %v6892_v37 }
 0x913   : > { %v6928_v57 = vadd.f32 %v6912_v44, %v6876_v20  ;;  %v6964_v61 = vmul.f32 %v14142_v60, %v14269_v34  ;;  %v6757_v25 = vmul.f32 %v6892_v37, %v14109_v22 }
 0x914   : > { %v10197_v10 = vpop.f32.mrf.mxu1  ;;  %v7030_v8 = vadd.f32 %v7014_v14, %v6978_v2  ;;  %v7134_v53 = vadd.f32 %v7118_v43, %v7082_v36  ;;  %v6927_v15 = vadd.f32 %v6911_v21, %v6875_v56  ;;  %v7120_v2 = vmul.f32 %v14156_v28, %v14269_v34 }
 0x915   : > { %v6642_v12 = vadd.f32 %v10197_v10, %v14105_v49  ;;  %v6809_v36 = vmul.f32 %v14116_v38, %v14269_v34  ;;  %v6980_v37 = vadd.f32 %v6964_v61, %v6928_v57  ;;  %v7105_v10 = vld [vmem:[#allocation2 + $0x131] sm:$0xff]  ;;  %v6861_v34 = vmul.f32 %v6996_v35, %v14126_v24 }
 0x916   : > { %v6633_v32 = vpop.f32.mrf.mxu1  ;;  %v7083_v19 = vadd.f32 %v7067_v62, %v7030_v8  ;;  %v7186_v41 = vadd.f32 %v7170_v29, %v7134_v53  ;;  %v6979_v18 = vadd.f32 %v6963_v58, %v6927_v15  ;;  %v7016_v8 = vmul.f32 %v14145_v47, %v6996_v35 }
 0x917   : > { %v14319_v59 = vmax.f32 %v6642_v12, 0.0  ;;  %v6634_v39 = vadd.f32 %v14105_v49, %v6633_v32  ;;  %v6825_v58 = vadd.f32 %v6809_v36, %v6757_v25  ;;  %v14350_v15 = vmul.f32 %v14156_v28, %v7105_v10 }
 0x918   : > { %v10198_v11 = vpop.f32.mrf.mxu1  ;;  %v7135_v40 = vadd.f32 %v7119_v48, %v7083_v19  ;;  %v7031_v1 = vadd.f32 %v7015_v9, %v6979_v18  ;;  %v7208_v0 = vadd.f32 %v14182_v13, %v7186_v41  ;;  %v7032_v12 = vadd.f32 %v7016_v8, %v6980_v37 }
 0x919   : > { %6682 = vst [vmem:[#allocation2 + $0x111] sm:$0xff] %v14319_v59  ;;  %v6660_v42 = vmax.f32 %v6634_v39, 0.0  ;;  %v6645_v30 = vadd.f32 %v10198_v11, %v14105_v49  ;;  %v6877_v39 = vadd.f32 %v6861_v34, %v6825_v58  ;;  %v6812_v18 = vmul.f32 %v14116_v38, %v14319_v59 }
 0x91a   : > { %v6636_v54 = vpop.f32.mrf.mxu1  ;;  %v7187_v55 = vadd.f32 %v7171_v3, %v7135_v40  ;;  %v7084_v31 = vadd.f32 %v7068_v4, %v7031_v1  ;;  %v7224_v56 = vmax.f32 %v7208_v0, 0.0 }
 0x91b   : > { %6680 = vst [vmem:[#allocation2 + $0xf1] sm:$0xff] %v6660_v42  ;;  %v14331_v7 = vmax.f32 %v6645_v30, 0.0  ;;  %v6637_v26 = vadd.f32 %v14105_v49, %v6636_v54  ;;  %v7172_v49 = vmul.f32 %v14161_v27, %v6996_v35  ;;  %v7121_v19 = vmul.f32 %v14156_v28, %v6660_v42 }
 0x91c   : > { %v7209_v14 = vadd.f32 %v14182_v13, %v7187_v55  ;;  %v7136_v63 = vadd.f32 %v7120_v2, %v7084_v31  ;;  %v6810_v41 = vmul.f32 %v14116_v38, %v6660_v42  ;;  %v6965_v40 = vmul.f32 %v14142_v60, %v6660_v42 }
 0x91d   : > { %6683 = vst [vmem:[#allocation2 + $0x121] sm:$0xff] %v14331_v7  ;;  %v14340_v43 = vmax.f32 %v6637_v26, 0.0  ;;  %v6968_v3 = vmul.f32 %v14142_v60, %v14331_v7 }
 0x91e   : > { %v7225_v21 = vmax.f32 %v7209_v14, 0.0  ;;  %v7188_v53 = vadd.f32 %v7172_v49, %v7136_v63 }
 0x91f   : > { %6681 = vst [vmem:[#allocation2 + $0x101] sm:$0xff] %v14340_v43  ;;  %v6966_v35 = vmul.f32 %v14142_v60, %v14340_v43  ;;  %v6811_v31 = vmul.f32 %v14116_v38, %v14340_v43 }
 0x920   : > { %v7253_v62 = vpack.c.bf16 %v7225_v21, %v7224_v56  ;;  %v7051_v29 = vld [vmem:[#allocation2 + $0x110] sm:$0xff]  ;;  %v7210_v4 = vadd.f32 %v14182_v13, %v7188_v53 }
 0x921   : > { %v14346_v20 = vld [vmem:[#allocation2 + $0x112] sm:$0xff]  ;;  %v6760_v44 = vmul.f32 %v7051_v29, %v14109_v22 }
 0x922   : > { %10223 = vmatprep.mubr.bf16.mxu0 %v7253_v62  ;;  %v7049_v32 = vld [vmem:[#allocation2 + $0xf0] sm:$0xff]  ;;  %v6864_v1 = vmul.f32 %v14346_v20, %v14126_v24  ;;  %v7226_v49 = vmax.f32 %v7210_v4, 0.0 }
 0x923   : > { %v7153_v48 = vld [vmem:[#allocation2 + $0xf2] sm:$0xff]  ;;  %v7069_v9 = vmul.f32 %v14153_v33, %v7049_v32  ;;  %v6758_v11 = vmul.f32 %v7049_v32, %v14109_v22  ;;  %v6913_v30 = vmul.f32 %v7049_v32, %v14135_v45  ;;  %v6828_v57 = vadd.f32 %v6812_v18, %v6760_v44 }
 0x924   : > { %v6896_v54 = vld [vmem:[#allocation2 + $0x120] sm:$0xff]  ;;  %v6862_v61 = vmul.f32 %v7153_v48, %v14126_v24  ;;  %v7173_v37 = vmul.f32 %v14161_v27, %v7153_v48  ;;  %v7017_v10 = vmul.f32 %v7153_v48, %v14145_v47 }
 0x925   : > { %v7085_v55 = vadd.f32 %v7069_v9, %v7032_v12  ;;  %v6826_v0 = vadd.f32 %v6810_v41, %v6758_v11  ;;  %v6916_v25 = vmul.f32 %v14135_v45, %v6896_v54  ;;  %v6929_v42 = vadd.f32 %v6913_v30, %v6877_v39  ;;  %v7000_v14 = vld [vmem:[#allocation2 + $0x122] sm:$0xff] }
 0x926   : > { %v6894_v26 = vld [vmem:[#allocation2 + $0x100] sm:$0xff]  ;;  %v6880_v2 = vadd.f32 %v6864_v1, %v6828_v57  ;;  %v7020_v38 = vmul.f32 %v14145_v47, %v7000_v14  ;;  %v7071_v57 = vmul.f32 %v14153_v33, %v7051_v29 }
 0x927   : > { %v7137_v36 = vadd.f32 %v7121_v19, %v7085_v55  ;;  %v6878_v63 = vadd.f32 %v6862_v61, %v6826_v0  ;;  %v6914_v56 = vmul.f32 %v14135_v45, %v6894_v26  ;;  %v6998_v21 = vld [vmem:[#allocation2 + $0x102] sm:$0xff]  ;;  %v6981_v58 = vadd.f32 %v6965_v40, %v6929_v42  ;;  %v7157_v55 = vld [vmem:[#allocation2 + $0x132] sm:$0xff] }
 0x928   : > { %v6759_v8 = vmul.f32 %v6894_v26, %v14109_v22  ;;  %v6932_v34 = vadd.f32 %v6916_v25, %v6880_v2  ;;  %v7070_v44 = vmul.f32 %v14153_v33, %v6894_v26  ;;  %v6863_v19 = vmul.f32 %v6998_v21, %v14126_v24 }
 0x929   : > { %v7189_v62 = vadd.f32 %v7173_v37, %v7137_v36  ;;  %v6930_v53 = vadd.f32 %v6914_v56, %v6878_v63  ;;  %v7033_v12 = vadd.f32 %v7017_v10, %v6981_v58  ;;  %v7018_v18 = vmul.f32 %v14145_v47, %v6998_v21 }
 0x92a   : > { %v6827_v32 = vadd.f32 %v6811_v31, %v6759_v8  ;;  %v6984_v9 = vadd.f32 %v6968_v3, %v6932_v34  ;;  %v7122_v22 = vmul.f32 %v14156_v28, %v14340_v43  ;;  %v6915_v40 = vmul.f32 %v7051_v29, %v14135_v45 }
 0x92b   : > { %v7211_v41 = vadd.f32 %v14182_v13, %v7189_v62  ;;  %v6982_v39 = vadd.f32 %v6966_v35, %v6930_v53  ;;  %v7086_v48 = vadd.f32 %v7070_v44, %v7033_v12  ;;  %v7174_v0 = vmul.f32 %v14161_v27, %v6998_v21  ;;  %v9716_v44 = vld [vmem:[#allocation42] ss:$0 sm:$0xff] }
 0x92c   : > { %v6879_v11 = vadd.f32 %v6863_v19, %v6827_v32  ;;  %v7036_v1 = vadd.f32 %v7020_v38, %v6984_v9  ;;  %v6967_v3 = vmul.f32 %v14142_v60, %v14319_v59  ;;  %v7123_v43 = vmul.f32 %v14156_v28, %v14319_v59 }
 0x92d   : > { %v7227_v4 = vmax.f32 %v7211_v41, 0.0  ;;  %v7034_v30 = vadd.f32 %v7018_v18, %v6982_v39  ;;  %v7138_v24 = vadd.f32 %v7122_v22, %v7086_v48  ;;  %v7019_v29 = vmul.f32 %v14346_v20, %v14145_v47 }
 0x92e   : > { %v6931_v61 = vadd.f32 %v6915_v40, %v6879_v11  ;;  %v7089_v45 = vadd.f32 %v14200_v17, %v7036_v1  ;;  %v7177_v31 = vmul.f32 %v14161_v27, %v7157_v55  ;;  %v7175_v36 = vmul.f32 %v14161_v27, %v14346_v20 }
 0x92f   : > { %v7254_v25 = vpack.c.bf16 %v7227_v4, %v7226_v49  ;;  %v7087_v26 = vadd.f32 %v7071_v57, %v7034_v30  ;;  %v7190_v42 = vadd.f32 %v7174_v0, %v7138_v24  ;;  %v7072_v63 = vmul.f32 %v14153_v33, %v6896_v54 }
 0x930   : > { %v6983_v35 = vadd.f32 %v6967_v3, %v6931_v61  ;;  %v7141_v60 = vadd.f32 %v14350_v15, %v7089_v45  ;;  %v7124_v21 = vmul.f32 %v14156_v28, %v14331_v7  ;;  %v7176_v10 = vmul.f32 %v14161_v27, %v7000_v14  ;;  %v10792_v28 = vld [vmem:[#allocation43 + $0x10] sm:$0xff]   ;;  %v10793_v7 = vld [vmem:[#allocation43 + $0x8] sm:$0xff]   ;;  %v10794_v27 = vld [vmem:[#allocation43] sm:$0xff]  }
 0x931   : > { %10224 = vmatmul.mubr.bf16.gmra.mxu0 %v7254_v25  ;;  %v7139_v2 = vadd.f32 %v7123_v43, %v7087_v26  ;;  %v7212_v17 = vadd.f32 %v14182_v13, %v7190_v42  ;;  %10241 = vmatprep.subr.bf16.mxu1 %v10792_v28  ;;  %v14880_v9 = vmax.f32 %v14027_v52, 0.0  ;;  %v14881_v22 = vmax.f32 %v14025_v16, 0.0 }
 0x932   : > { %v7035_v37 = vadd.f32 %v7019_v29, %v6983_v35  ;;  %v7193_v47 = vadd.f32 %v7177_v31, %v7141_v60  ;;  %10242 = vmatpush3.bf16.msra.mxu1 %v10792_v28  ;;  %v14882_v40 = vmax.f32 %v14031_v50, 0.0  ;;  %v14883_v30 = vmax.f32 %v14029_v51, 0.0 }
 0x933   : > { %v7191_v59 = vadd.f32 %v7175_v36, %v7139_v2  ;;  %v7228_v8 = vmax.f32 %v7212_v17, 0.0  ;;  %10243 = vmatprep.subr.bf16.mxu1 %v10793_v7  ;;  %v14884_v16 = vmax.f32 %v14047_v5, 0.0  ;;  %v14885_v50 = vmax.f32 %v14045_v46, 0.0  ;;  %v14888_v46 = vld [vmem:[#allocation121_spill] sm:$0xff] }
 0x934   : > { %v7088_v56 = vadd.f32 %v7072_v63, %v7035_v37  ;;  %v7215_v15 = vadd.f32 %v14182_v13, %v7193_v47  ;;  %v14886_v51 = vmax.f32 %v14051_v6, 0.0  ;;  %v14887_v29 = vmax.f32 %v14049_v23, 0.0  ;;  %v14890_v6 = vld [vmem:[#allocation120_spill] sm:$0xff]  ;;  %v14892_v23 = vld [vmem:[#allocation123_spill] sm:$0xff] }
 0x935   : > { %v7213_v49 = vadd.f32 %v14182_v13, %v7191_v59  ;;  %v14889_v47 = vmax.f32 %v14888_v46, 0.0  ;;  %v10833_v46 = vld [vmem:[#allocation49 + $0x40] ss:$16 sps:$4 sm:$0xff]  }
 0x936   : > { %v7140_v58 = vadd.f32 %v7124_v21, %v7088_v56  ;;  %v7231_v34 = vmax.f32 %v7215_v15, 0.0  ;;  %10244 = vmatpush3.bf16.msra.mxu1 %v10793_v7 }
 0x937   : > { %v7229_v20 = vmax.f32 %v7213_v49, 0.0  ;;  %10245 = vmatprep.subr.bf16.mxu1 %v10794_v27 }
 0x938   : > { %v7192_v62 = vadd.f32 %v7176_v10, %v7140_v58  ;;  %v14891_v58 = vmax.f32 %v14890_v6, 0.0 }
 0x939   : > { %v7255_v53 = vpack.c.bf16 %v7229_v20, %v7228_v8  ;;  %v14893_v8 = vmax.f32 %v14892_v23, 0.0 }
 0x93a   : > { %v7214_v33 = vadd.f32 %v14182_v13, %v7192_v62  ;;  %10246 = vmatpush3.bf16.msra.mxu1 %v10794_v27  ;;  %v14894_v62 = vld [vmem:[#allocation122_spill] sm:$0xff] }
 0x93b   : > { %10227 = vmatprep.mubr.bf16.mxu0 %v7255_v53  ;;  %v14895_v15 = vmax.f32 %v14894_v62, 0.0 }
 0x93c   : > { %v7230_v54 = vmax.f32 %v7214_v33, 0.0 }
 0x93e   : > { %v7256_v38 = vpack.c.bf16 %v7231_v34, %v7230_v54 }
 0x940   : > { %10228 = vmatmul.mubr.bf16.gmra.mxu0 %v7256_v38 }
 0x9c2   : > { %v10217_v14 = vpop.f32.mrf.mxu0 }
 0x9c3   : > { %v7354_v41 = vadd.f32 %v10217_v14, %v9716_v44 }
 0x9c4   : > { %v7345_v12 = vpop.f32.mrf.mxu0 }
 0x9c5   : > { %v7346_v19 = vadd.f32 %v9716_v44, %v7345_v12  ;;  %v7410_v57 = vadd.f32 %v7354_v41, %v14883_v30 }
 0x9c6   : > { %v10218_v32 = vpop.f32.mrf.mxu0 }
 0x9c7   : > { %v7357_v13 = vadd.f32 %v10218_v32, %v9716_v44  ;;  %v7408_v11 = vadd.f32 %v7346_v19, %v14881_v22  ;;  %v14896_v19 = vld [vmem:[#allocation125_spill] sm:$0xff] }
 0x9c8   : > { %v7348_v39 = vpop.f32.mrf.mxu0 }
 0x9c9   : > { %v7349_v18 = vadd.f32 %v9716_v44, %v7348_v39  ;;  %v7411_v48 = vadd.f32 %v7357_v13, %v14880_v9  ;;  %v14897_v13 = vmax.f32 %v14896_v19, 0.0  ;;  %v14898_v39 = vld [vmem:[#allocation124_spill] sm:$0xff]  ;;  %v14907_v19 = vld [vmem:[#allocation113_spill] sm:$0xff] }
 0x9cb   : > { %v7409_v4 = vadd.f32 %v7349_v18, %v14882_v40  ;;  %v7442_v55 = vpack.c.bf16 %v7411_v48, %v7410_v57  ;;  %v14899_v18 = vmax.f32 %v14898_v39, 0.0  ;;  %v14900_v48 = vld [vmem:[#allocation127_spill] sm:$0xff]  ;;  %v14902_v40 = vld [vmem:[#allocation126_spill] sm:$0xff] }
 0x9cc   : > { %v14901_v22 = vmax.f32 %v14900_v48, 0.0  ;;  %v7859_v39 = vld [vmem:[#allocation4] sm:$0xf] }
 0x9cd   : > { %v7441_v1 = vpack.c.bf16 %v7409_v4, %v7408_v11  ;;  %v14903_v4 = vmax.f32 %v14902_v40, 0.0  ;;  %v14908_v40 = vld [vmem:[#allocation114_spill] sm:$0xff] }
 0x9cf   : > { %10247 = vmatprep.mubr.bf16.mxu1 %v7441_v1 }
 0x9d0   : > { %10248 = vmatmul.mubr.bf16.vlgmr.msra.gmra.mxu1 %v7442_v55  ;;  %v10795_v55 = vld [vmem:[#allocation48 + $0x38] sm:$0xff]  }
 0x9d1   : > { %v10221_v24 = vpop.f32.mrf.mxu0  ;;  %10263 = vmatprep.subr.bf16.mxu0 %v10795_v55 }
 0x9d2   : > { %v7370_v52 = vadd.f32 %v10221_v24, %v9716_v44  ;;  %v10796_v24 = vld [vmem:[#allocation48 + $0x30] sm:$0xff]   ;;  %10264 = vmatpush3.bf16.msra.mxu0 %v10795_v55 }
 0x9d3   : > { %v7361_v0 = vpop.f32.mrf.mxu0  ;;  %10265 = vmatprep.subr.bf16.mxu0 %v10796_v24 }
 0x9d4   : > { %v7362_v3 = vadd.f32 %v9716_v44, %v7361_v0  ;;  %v7414_v31 = vadd.f32 %v7370_v52, %v14887_v29  ;;  %v10798_v0 = vld [vmem:[#allocation48 + $0x20] sm:$0xff]   ;;  %v11841_v29 = vmov 1966171168  }
 0x9d5   : > { %v10222_v61 = vpop.f32.mrf.mxu0  ;;  %v10802_v52 = vld [vmem:[#allocation48] sm:$0xff]  }
 0x9d6   : > { %v7373_v25 = vadd.f32 %v10222_v61, %v9716_v44  ;;  %v7412_v42 = vadd.f32 %v7362_v3, %v14885_v50  ;;  %10266 = vmatpush3.bf16.msra.mxu0 %v10796_v24  ;;  %v10799_v61 = vld [vmem:[#allocation48 + $0x18] sm:$0xff]   ;;  %v10800_v3 = vld [vmem:[#allocation48 + $0x10] sm:$0xff]  }
 0x9d7   : > { %v7364_v26 = vpop.f32.mrf.mxu0  ;;  %v10809_v50 = vld [vmem:[#allocation49 + $0xc0] ss:$16 sps:$4 sm:$0xff]  }
 0x9d8   : > { %v7365_v43 = vadd.f32 %v9716_v44, %v7364_v26  ;;  %v7415_v45 = vadd.f32 %v7373_v25, %v14884_v16  ;;  %v10801_v25 = vld [vmem:[#allocation48 + $0x8] sm:$0xff]   ;;  %v10803_v26 = vld [vmem:[#allocation49 + $0xe0] ss:$16 sps:$4 sm:$0xff]  }
 0x9d9   : > { %v10808_v16 = vld [vmem:[#allocation49 + $0xec] ss:$16 sps:$4 sm:$0xff]  }
 0x9da   : > { %v7413_v35 = vadd.f32 %v7365_v43, %v14886_v51  ;;  %v7444_v36 = vpack.c.bf16 %v7415_v45, %v7414_v31  ;;  %v10805_v43 = vld [vmem:[#allocation49 + $0xe4] ss:$16 sps:$4 sm:$0xff]   ;;  %v10815_v51 = vld [vmem:[#allocation49 + $0xa0] ss:$16 sps:$4 sm:$0xff]   ;;  %v7620_v31 = vunpack.c.l.s4 %v11841_v29 }
 0x9db   : > { %v10811_v45 = vld [vmem:[#allocation49 + $0xc4] ss:$16 sps:$4 sm:$0xff]   ;;  %8459 = vmatprep.subr.bf16.mxu1 %v10805_v43 }
 0x9dc   : > { %v7443_v2 = vpack.c.bf16 %v7413_v35, %v7412_v42  ;;  %8460 = vmatpush1.bf16.msra.mxu1 %v10803_v26  ;;  %v10817_v42 = vld [vmem:[#allocation49 + $0xa4] ss:$16 sps:$4 sm:$0xff]  }
 0x9dd   : > { %8461 = vmatprep.subr.bf16.mxu1 %v10811_v45  ;;  %v10823_v35 = vld [vmem:[#allocation49 + $0x84] ss:$16 sps:$4 sm:$0xff]  }
 0x9de   : > { %10251 = vmatprep.mubr.bf16.mxu1 %v7443_v2  ;;  %v10821_v2 = vld [vmem:[#allocation49 + $0x80] ss:$16 sps:$4 sm:$0xff]  }
 0x9df   : > { %10252 = vmatmul.mubr.bf16.gmra.mxu1 %v7444_v36  ;;  %v10829_v36 = vld [vmem:[#allocation49 + $0x64] ss:$16 sps:$4 sm:$0xff]  }
 0x9e0   : > { %8462 = vmatpush1.bf16.msra.mxu1 %v10809_v50 }
 0x9e1   : > { %8463 = vmatprep.subr.bf16.mxu1 %v10817_v42 }
 0x9e4   : > { %8464 = vmatpush1.bf16.msra.mxu1 %v10815_v51 }
 0x9e5   : > { %8465 = vmatprep.subr.bf16.mxu1 %v10823_v35 }
 0x9e8   : > { %8466 = vmatpush1.bf16.msra.mxu1 %v10821_v2  ;;  %v14909_v2 = vld [vmem:[#allocation115_spill] sm:$0xff] }
 0x9e9   : > { %8467 = vmatprep.subr.bf16.mxu1 %v10829_v36 }
 0x9f1   : > { %v10225_v60 = vpop.f32.mrf.mxu0 }
 0x9f2   : > { %v7386_v5 = vadd.f32 %v10225_v60, %v9716_v44  ;;  %v7621_v60 = vunpack.c.0.s8 %v7620_v31 }
 0x9f3   : > { %v7377_v37 = vpop.f32.mrf.mxu0 }
 0x9f4   : > { %v7378_v59 = vadd.f32 %v9716_v44, %v7377_v37  ;;  %v7418_v53 = vadd.f32 %v7386_v5, %v14895_v15  ;;  %v10827_v37 = vld [vmem:[#allocation49 + $0x60] ss:$16 sps:$4 sm:$0xff]  }
 0x9f5   : > { %v10226_v63 = vpop.f32.mrf.mxu0  ;;  %8468 = vmatpush1.bf16.msra.mxu1 %v10827_v37 }
 0x9f6   : > { %v7389_v17 = vadd.f32 %v10226_v63, %v9716_v44  ;;  %v7416_v10 = vadd.f32 %v7378_v59, %v14891_v58  ;;  %v14436_v63 = vld [vmem:[#allocation45] ss:$0 sm:$0xff]  ;;  %v10835_v59 = vld [vmem:[#allocation49 + $0x44] ss:$16 sps:$4 sm:$0xff]  }
 0x9f7   : > { %v7380_v56 = vpop.f32.mrf.mxu0  ;;  %8469 = vmatprep.subr.bf16.mxu1 %v10835_v59 }
 0x9f8   : > { %v7381_v21 = vadd.f32 %v9716_v44, %v7380_v56  ;;  %v7419_v49 = vadd.f32 %v7389_v17, %v14889_v47  ;;  %v14904_v56 = vld [vmem:[#allocation111_spill] sm:$0xff] }
 0x9f9   : > { %8470 = vmatpush1.bf16.msra.mxu1 %v10833_v46 }
 0x9fa   : > { %v7417_v20 = vadd.f32 %v7381_v21, %v14893_v8  ;;  %v7446_v54 = vpack.c.bf16 %v7419_v49, %v7418_v53  ;;  %v14440_v21 = vsub.s32 %v7621_v60, %v14904_v56 }
 0x9fc   : > { %v7445_v33 = vpack.c.bf16 %v7417_v20, %v7416_v10 }
 0x9fe   : > { %10255 = vmatprep.mubr.bf16.mxu1 %v7445_v33 }
 0x9ff   : > { %10256 = vmatmul.mubr.bf16.gmra.mxu1 %v7446_v54 }
 0xa00   : > { %v10229_v34 = vpop.f32.mrf.mxu0 }
 0xa01   : > { %v7402_v14 = vadd.f32 %v10229_v34, %v9716_v44 }
 0xa02   : > { %v7393_v38 = vpop.f32.mrf.mxu0 }
 0xa03   : > { %v7394_v7 = vadd.f32 %v9716_v44, %v7393_v38  ;;  %v7422_v30 = vadd.f32 %v7402_v14, %v14903_v4 }
 0xa04   : > { %v10230_v28 = vpop.f32.mrf.mxu0 }
 0xa05   : > { %v7405_v27 = vadd.f32 %v10230_v28, %v9716_v44  ;;  %v7420_v9 = vadd.f32 %v7394_v7, %v14899_v18 }
 0xa06   : > { %v7396_v12 = vpop.f32.mrf.mxu0 }
 0xa07   : > { %v7397_v32 = vadd.f32 %v9716_v44, %v7396_v12  ;;  %v7423_v41 = vadd.f32 %v7405_v27, %v14897_v13  ;;  %v10797_v44 = vld [vmem:[#allocation48 + $0x28] sm:$0xff]   ;;  %v14450_v27 = vld [vmem:[%s14905_s15] sm:$0xff] }
 0xa08   : > { %10267 = vmatprep.subr.bf16.mxu0 %v10797_v44  ;;  %v14906_v12 = vld [vmem:[#allocation112_spill] sm:$0xff]  ;;  %v14458_v13 = vrot.slane %v14450_v27, %v14907_v19  ;;  %v14465_v4 = vrot.slane %v14450_v27, %v14908_v40  ;;  %v14477_v36 = vrot.slane %v14450_v27, %v14909_v2 }
 0xa09   : > { %v7421_v11 = vadd.f32 %v7397_v32, %v14901_v22  ;;  %v7448_v1 = vpack.c.bf16 %v7423_v41, %v7422_v30  ;;  %10268 = vmatpush3.bf16.msra.mxu0 %v10797_v44  ;;  %v14454_v32 = vrot.slane %v14450_v27, %v14906_v12  ;;  %v7831_v41 = vld [vmem:[#allocation3] sm:$0xf] }
 0xa0a   : > { %10269 = vmatprep.subr.bf16.mxu0 %v10798_v0 }
 0xa0b   : > { %v7447_v57 = vpack.c.bf16 %v7421_v11, %v7420_v9  ;;  %v7843_v22 = vmul.f32 %v14454_v32, %v7831_v41  ;;  %v7871_v11 = vmul.f32 %v14458_v13, %v7859_v39 }
 0xa0d   : > { %10259 = vmatprep.mubr.bf16.mxu1 %v7447_v57  ;;  %10270 = vmatpush3.bf16.msra.mxu0 %v10798_v0 }
 0xa0e   : > { %10260 = vmatmul.mubr.bf16.gmra.mxu1 %v7448_v1  ;;  %10271 = vmatprep.subr.bf16.mxu0 %v10799_v61  ;;  %v7887_v1 = vld [vmem:[#allocation3 + $0x1] sm:$0xf] }
 0xa11   : > { %10272 = vmatpush3.bf16.msra.mxu0 %v10799_v61 }
 0xa12   : > { %10273 = vmatprep.subr.bf16.mxu0 %v10800_v3 }
 0xa15   : > { %10274 = vmatpush3.bf16.msra.mxu0 %v10800_v3 }
 0xa16   : > { %10275 = vmatprep.subr.bf16.mxu0 %v10801_v25 }
 0xa19   : > { %10276 = vmatpush3.bf16.msra.mxu0 %v10801_v25  ;;  %v7879_v25 = vadd.f32 %v7871_v11, %v7843_v22 }
 0xa1a   : > { %10277 = vmatprep.subr.bf16.mxu0 %v10802_v52 }
 0xa1d   : > { %10278 = vmatpush3.bf16.msra.mxu0 %v10802_v52  ;;  %v7899_v52 = vmul.f32 %v14465_v4, %v7887_v1 }
 0xa1e   : > { %8512 = vmatprep.subr.bf16.mxu0 %v10808_v16 }
 0xa90   : > { %v10249_v17 = vpop.f32.mrf.mxu1 }
 0xa91   : > { %v7546_v5 = vadd.f32 %v10249_v17, %v14436_v63 }
 0xa92   : > { %v7537_v47 = vpop.f32.mrf.mxu1 }
 0xa93   : > { %v7602_v49 = vmax.f32 %v7546_v5, 0.0  ;;  %v7538_v6 = vadd.f32 %v14436_v63, %v7537_v47  ;;  %v14910_v5 = vld [vmem:[#allocation116_spill] sm:$0xff] }
 0xa94   : > { %v10250_v58 = vpop.f32.mrf.mxu1  ;;  %v14482_v56 = vrot.slane %v14450_v27, %v14910_v5 }
 0xa95   : > { %v7632_v10 = vrot.slane %v7602_v49, %v14440_v21  ;;  %9743 = vst.sshfl [vmem:[#allocation6 + $0x10] sm:$0x55 pattern:$0x73625140] %v7602_v49  ;;  %v7600_v23 = vmax.f32 %v7538_v6, 0.0  ;;  %v7549_v8 = vadd.f32 %v10250_v58, %v14436_v63  ;;  %v7907_v6 = vadd.f32 %v7899_v52, %v7879_v25 }
 0xa96   : > { %v7540_v20 = vpop.f32.mrf.mxu1 }
 0xa97   : > { %v7792_v62 = vcombine.high %v7632_v10, %v7632_v10  ;;  %v7625_v15 = vrot.slane %v7600_v23, %v14440_v21  ;;  %9742 = vst.sshfl [vmem:[#allocation6] sm:$0x55 pattern:$0x73625140] %v7600_v23  ;;  %v7603_v53 = vmax.f32 %v7549_v8, 0.0  ;;  %v7541_v33 = vadd.f32 %v14436_v63, %v7540_v20 }
 0xa99   : > { %7808 = vst [vmem:[#allocation5 + $0x11] sm:$0xf] %v7792_v62  ;;  %v7791_v54 = vcombine.high %v7625_v15, %v7625_v15  ;;  %v7688_v34 = vrot.slane %v7603_v53, %v14440_v21  ;;  %9735 = vst.sshfl [vmem:[#allocation4 + $0x20] sm:$0x55 pattern:$0x73625140] %v7603_v53 }
 0xa9a   : > { %v7601_v38 = vmax.f32 %v7541_v33, 0.0 }
 0xa9b   : > { %7807 = vst [vmem:[#allocation5 + $0x1] sm:$0xf] %v7791_v54  ;;  %v7740_v28 = vcombine.high %v7688_v34, %v7688_v34 }
 0xa9c   : > { %v7681_v7 = vrot.slane %v7601_v38, %v14440_v21  ;;  %9734 = vst.sshfl [vmem:[#allocation4 + $0x10] sm:$0x55 pattern:$0x73625140] %v7601_v38  ;;  %v7944_v20 = vld [vmem:[#allocation6 + $0x10] sm:$0xf] }
 0xa9d   : > { %7756 = vst [vmem:[#allocation3 + $0x21] sm:$0xf] %v7740_v28 }
 0xa9e   : > { %v7739_v14 = vcombine.high %v7681_v7, %v7681_v7  ;;  %v7943_v54 = vld [vmem:[#allocation6] sm:$0xf]  ;;  %v7956_v7 = vmul.f32 %v14482_v56, %v7944_v20 }
 0xa9f   : > { %v10253_v18 = vpop.f32.mrf.mxu1 }
 0xaa0   : > { %7755 = vst [vmem:[#allocation3 + $0x11] sm:$0xf] %v7739_v14  ;;  %v7562_v9 = vadd.f32 %v10253_v18, %v14436_v63  ;;  %v7916_v17 = vld [vmem:[#allocation5 + $0x10] sm:$0xf]  ;;  %v7861_v46 = vld [vmem:[#allocation4 + $0x20] sm:$0xf] }
 0xaa1   : > { %v7553_v48 = vpop.f32.mrf.mxu1  ;;  %v7928_v15 = vmul.f32 %v14477_v36, %v7916_v17  ;;  %v7873_v33 = vmul.f32 %v14458_v13, %v7861_v46  ;;  %v14911_v14 = vld [vmem:[#allocation117_spill] sm:$0xff] }
 0xaa2   : > { %v7606_v30 = vmax.f32 %v7562_v9, 0.0  ;;  %v7554_v57 = vadd.f32 %v14436_v63, %v7553_v48  ;;  %v7915_v26 = vld [vmem:[#allocation5] sm:$0xf]  ;;  %v14493_v41 = vrot.slane %v14450_v27, %v14911_v14  ;;  %v7972_v18 = vld [vmem:[#allocation5 + $0x11] sm:$0xf]  ;;  %v7955_v9 = vmul.f32 %v14482_v56, %v7943_v54 }
 0xaa3   : > { %v10254_v55 = vpop.f32.mrf.mxu1  ;;  %v7860_v61 = vld [vmem:[#allocation4 + $0x10] sm:$0xf]  ;;  %v7927_v58 = vmul.f32 %v14477_v36, %v7915_v26  ;;  %v7971_v11 = vld [vmem:[#allocation5 + $0x1] sm:$0xf] }
 0xaa4   : > { %v7646_v24 = vrot.slane %v7606_v30, %v14440_v21  ;;  %9745 = vst.sshfl [vmem:[#allocation6 + $0x30] sm:$0x55 pattern:$0x73625140] %v7606_v30  ;;  %v7604_v44 = vmax.f32 %v7554_v57, 0.0  ;;  %v7565_v0 = vadd.f32 %v10254_v55, %v14436_v63  ;;  %v7872_v31 = vmul.f32 %v14458_v13, %v7860_v61 }
 0xaa5   : > { %v7556_v3 = vpop.f32.mrf.mxu1  ;;  %v7833_v35 = vld [vmem:[#allocation3 + $0x20] sm:$0xf]  ;;  %v7935_v38 = vadd.f32 %v7927_v58, %v7907_v6  ;;  %v7984_v55 = vmul.f32 %v14493_v41, %v7972_v18  ;;  %v7983_v26 = vmul.f32 %v14493_v41, %v7971_v11 }
 0xaa6   : > { %v7794_v43 = vcombine.high %v7646_v24, %v7646_v24  ;;  %v7639_v16 = vrot.slane %v7604_v44, %v14440_v21  ;;  %9744 = vst.sshfl [vmem:[#allocation6 + $0x20] sm:$0x55 pattern:$0x73625140] %v7604_v44  ;;  %v7607_v45 = vmax.f32 %v7565_v0, 0.0  ;;  %v7557_v50 = vadd.f32 %v14436_v63, %v7556_v3  ;;  %v14912_v24 = vld [vmem:[#allocation118_spill] sm:$0xff] }
 0xaa7   : > { %v7832_v42 = vld [vmem:[#allocation3 + $0x10] sm:$0xf]  ;;  %v7845_v8 = vmul.f32 %v14454_v32, %v7833_v35  ;;  %v7889_v34 = vld [vmem:[#allocation3 + $0x21] sm:$0xf]  ;;  %v7963_v1 = vadd.f32 %v7955_v9, %v7935_v38  ;;  %v14500_v44 = vrot.slane %v14450_v27, %v14912_v24 }
 0xaa8   : > { %v7888_v51 = vld [vmem:[#allocation3 + $0x11] sm:$0xf]  ;;  %v7844_v29 = vmul.f32 %v14454_v32, %v7832_v42  ;;  %7810 = vst [vmem:[#allocation5 + $0x31] sm:$0xf] %v7794_v43  ;;  %v7793_v60 = vcombine.high %v7639_v16, %v7639_v16  ;;  %v7702_v37 = vrot.slane %v7607_v45, %v14440_v21  ;;  %v7605_v59 = vmax.f32 %v7557_v50, 0.0 }
 0xaa9   : > { %9737 = vst.sshfl [vmem:[#allocation4 + $0x40] sm:$0x55 pattern:$0x73625140] %v7607_v45  ;;  %v7900_v49 = vmul.f32 %v14465_v4, %v7888_v51  ;;  %v7881_v39 = vadd.f32 %v7873_v33, %v7845_v8  ;;  %v7901_v22 = vmul.f32 %v14465_v4, %v7889_v34  ;;  %v8000_v3 = vld [vmem:[#allocation3 + $0x20] sm:$0xf]  ;;  %v7991_v35 = vadd.f32 %v7983_v26, %v7963_v1 }
 0xaaa   : > { %v7880_v47 = vadd.f32 %v7872_v31, %v7844_v29  ;;  %7809 = vst [vmem:[#allocation5 + $0x21] sm:$0xf] %v7793_v60  ;;  %v7742_v10 = vcombine.high %v7702_v37, %v7702_v37  ;;  %v7695_v23 = vrot.slane %v7605_v59, %v14440_v21  ;;  %9736 = vst.sshfl [vmem:[#allocation4 + $0x30] sm:$0x55 pattern:$0x73625140] %v7605_v59 }
 0xaab   : > { %v7909_v0 = vadd.f32 %v7901_v22, %v7881_v39  ;;  %v7999_v50 = vld [vmem:[#allocation3 + $0x10] sm:$0xf]  ;;  %v8012_v31 = vmul.f32 %v14500_v44, %v8000_v3  ;;  %v14913_v60 = vld [vmem:[#allocation119_spill] sm:$0xff] }
 0xaac   : > { %v7908_v62 = vadd.f32 %v7900_v49, %v7880_v47  ;;  %7758 = vst [vmem:[#allocation3 + $0x41] sm:$0xf] %v7742_v10  ;;  %v7741_v53 = vcombine.high %v7695_v23, %v7695_v23  ;;  %v14508_v37 = vrot.slane %v14450_v27, %v14913_v60  ;;  %v7617_v59 = vld [vmem:[%s14905_s15 + $0x8] sm:$0xff]  ;;  %v8028_v49 = vld [vmem:[#allocation4 + $0x20] sm:$0xf]  ;;  %v8011_v58 = vmul.f32 %v14500_v44, %v7999_v50 }
 0xaad   : > { %v7945_v57 = vld [vmem:[#allocation6 + $0x20] sm:$0xf]  ;;  %v14519_v54 = vrot.slane %v7617_v59, %v14906_v12 }
 0xaae   : > { %v7936_v28 = vadd.f32 %v7928_v15, %v7908_v62  ;;  %7757 = vst [vmem:[#allocation3 + $0x31] sm:$0xf] %v7741_v53  ;;  %v7957_v45 = vmul.f32 %v14482_v56, %v7945_v57  ;;  %v8027_v62 = vld [vmem:[#allocation4 + $0x10] sm:$0xf]  ;;  %v8040_v33 = vmul.f32 %v14508_v37, %v8028_v49  ;;  %v8056_v14 = vld [vmem:[#allocation3 + $0x21] sm:$0xf] }
 0xaaf   : > { %v7918_v6 = vld [vmem:[#allocation5 + $0x30] sm:$0xf]  ;;  %v8039_v18 = vmul.f32 %v14508_v37, %v8027_v62 }
 0xab0   : > { %v7964_v48 = vadd.f32 %v7956_v7, %v7936_v28  ;;  %v7946_v15 = vld [vmem:[#allocation6 + $0x30] sm:$0xf]  ;;  %v7930_v38 = vmul.f32 %v14477_v36, %v7918_v6  ;;  %v8019_v28 = vadd.f32 %v8011_v58, %v7991_v35  ;;  %v8030_v26 = vld [vmem:[#allocation4 + $0x40] sm:$0xf]  ;;  %v14535_v58 = vld [vmem:[#allocation46] ss:$0 sm:$0xff] }
 0xab1   : > { %v7917_v30 = vld [vmem:[#allocation5 + $0x20] sm:$0xf]  ;;  %v7862_v25 = vld [vmem:[#allocation4 + $0x30] sm:$0xf] }
 0xab2   : > { %v7929_v61 = vmul.f32 %v14477_v36, %v7917_v30  ;;  %v7973_v52 = vld [vmem:[#allocation5 + $0x21] sm:$0xf]  ;;  %v7992_v43 = vadd.f32 %v7984_v55, %v7964_v48  ;;  %v7874_v5 = vmul.f32 %v14458_v13, %v7862_v25  ;;  %v8029_v53 = vld [vmem:[#allocation4 + $0x30] sm:$0xf]  ;;  %v7958_v48 = vmul.f32 %v14482_v56, %v7946_v15 }
 0xab3   : > { %v7985_v47 = vmul.f32 %v14493_v41, %v7973_v52  ;;  %v7974_v39 = vld [vmem:[#allocation5 + $0x31] sm:$0xf]  ;;  %v8041_v22 = vmul.f32 %v14508_v37, %v8029_v53  ;;  %v8002_v57 = vld [vmem:[#allocation3 + $0x40] sm:$0xf]  ;;  %v8068_v55 = vmul.f32 %v14519_v54, %v8056_v14  ;;  %v8047_v3 = vadd.f32 %v8039_v18, %v8019_v28 }
 0xab4   : > { %v7937_v16 = vadd.f32 %v7929_v61, %v7909_v0  ;;  %v8020_v10 = vadd.f32 %v8012_v31, %v7992_v43  ;;  %v8055_v30 = vld [vmem:[#allocation3 + $0x11] sm:$0xf]  ;;  %v7986_v61 = vmul.f32 %v14493_v41, %v7974_v39  ;;  %v8014_v50 = vmul.f32 %v14500_v44, %v8002_v57  ;;  %v8058_v31 = vld [vmem:[#allocation3 + $0x41] sm:$0xf] }
 0xab5   : > { %v7834_v42 = vld [vmem:[#allocation3 + $0x30] sm:$0xf]  ;;  %v8067_v43 = vmul.f32 %v14519_v54, %v8055_v30 }
 0xab6   : > { %v7890_v51 = vld [vmem:[#allocation3 + $0x31] sm:$0xf]  ;;  %v7846_v17 = vmul.f32 %v14454_v32, %v7834_v42  ;;  %v7965_v46 = vadd.f32 %v7957_v45, %v7937_v16  ;;  %v8048_v11 = vadd.f32 %v8040_v33, %v8020_v10 }
 0xab7   : > { %v8001_v29 = vld [vmem:[#allocation3 + $0x30] sm:$0xf]  ;;  %v7902_v8 = vmul.f32 %v14465_v4, %v7890_v51 }
 0xab8   : > { %v7882_v23 = vadd.f32 %v7874_v5, %v7846_v17  ;;  %v7993_v20 = vadd.f32 %v7985_v47, %v7965_v46  ;;  %v8013_v27 = vmul.f32 %v14500_v44, %v8001_v29  ;;  %v8057_v1 = vld [vmem:[#allocation3 + $0x31] sm:$0xf]  ;;  %v8076_v51 = vadd.f32 %v8068_v55, %v8048_v11 }
 0xab9   : > { %v8069_v42 = vmul.f32 %v14519_v54, %v8057_v1  ;;  %v8042_v17 = vmul.f32 %v14508_v37, %v8030_v26  ;;  %v8075_v5 = vadd.f32 %v8067_v43, %v8047_v3 }
 0xaba   : > { %v7910_v34 = vadd.f32 %v7902_v8, %v7882_v23  ;;  %v8021_v7 = vadd.f32 %v8013_v27, %v7993_v20  ;;  %v8070_v8 = vmul.f32 %v14519_v54, %v8058_v31  ;;  %v8090_v20 = vadd.f32 %v14535_v58, %v8076_v51 }
 0xabc   : > { %v7938_v9 = vadd.f32 %v7930_v38, %v7910_v34  ;;  %v8049_v25 = vadd.f32 %v8041_v22, %v8021_v7  ;;  %v8089_v34 = vadd.f32 %v14535_v58, %v8075_v5  ;;  %v8098_v18 = vmax.f32 %v8090_v20, 0.0 }
 0xabe   : > { %v7966_v0 = vadd.f32 %v7958_v48, %v7938_v9  ;;  %v8077_v46 = vadd.f32 %v8069_v42, %v8049_v25  ;;  %v8097_v22 = vmax.f32 %v8089_v34, 0.0 }
 0xabf   : > { %v10257_v24 = vpop.f32.mrf.mxu1 }
 0xac0   : > { %v7578_v52 = vadd.f32 %v10257_v24, %v14436_v63  ;;  %v7994_v45 = vadd.f32 %v7986_v61, %v7966_v0  ;;  %v8091_v38 = vadd.f32 %v14535_v58, %v8077_v46  ;;  %v8130_v1 = vcombine.low %v8097_v22, %v8098_v18  ;;  %v7835_v24 = vld [vmem:[#allocation3 + $0x90] sm:$0xf] }
 0xac1   : > { %v7569_v16 = vpop.f32.mrf.mxu1  ;;  %v7863_v0 = vld [vmem:[#allocation4 + $0x90] sm:$0xf]  ;;  %v7847_v26 = vmul.f32 %v14454_v32, %v7835_v24 }
 0xac2   : > { %v7610_v35 = vmax.f32 %v7578_v52, 0.0  ;;  %v7570_v29 = vadd.f32 %v14436_v63, %v7569_v16  ;;  %v8022_v59 = vadd.f32 %v8014_v50, %v7994_v45  ;;  %v8099_v11 = vmax.f32 %v8091_v38, 0.0  ;;  %v7891_v50 = vld [vmem:[#allocation3 + $0x91] sm:$0xf] }
 0xac3   : > { %v10258_v60 = vpop.f32.mrf.mxu1  ;;  %v7875_v43 = vmul.f32 %v14458_v13, %v7863_v0 }
 0xac4   : > { %v7660_v47 = vrot.slane %v7610_v35, %v14440_v21  ;;  %9747 = vst.sshfl [vmem:[#allocation6 + $0xa0] sm:$0x55 pattern:$0x73625140] %v7610_v35  ;;  %v7608_v49 = vmax.f32 %v7570_v29, 0.0  ;;  %v7581_v6 = vadd.f32 %v10258_v60, %v14436_v63  ;;  %v8050_v23 = vadd.f32 %v8042_v17, %v8022_v59 }
 0xac5   : > { %v7572_v10 = vpop.f32.mrf.mxu1  ;;  %v7883_v59 = vadd.f32 %v7875_v43, %v7847_v26  ;;  %v7903_v17 = vmul.f32 %v14465_v4, %v7891_v50 }
 0xac6   : > { %v7796_v27 = vcombine.high %v7660_v47, %v7660_v47  ;;  %v7653_v62 = vrot.slane %v7608_v49, %v14440_v21  ;;  %9746 = vst.sshfl [vmem:[#allocation6 + $0x90] sm:$0x55 pattern:$0x73625140] %v7608_v49  ;;  %v7611_v15 = vmax.f32 %v7581_v6, 0.0  ;;  %v7573_v53 = vadd.f32 %v14436_v63, %v7572_v10 }
 0xac7   : > { %v8078_v33 = vadd.f32 %v8070_v8, %v8050_v23 }
 0xac8   : > { %7812 = vst [vmem:[#allocation5 + $0xa1] sm:$0xf] %v7796_v27  ;;  %v7795_v28 = vcombine.high %v7653_v62, %v7653_v62  ;;  %v7716_v7 = vrot.slane %v7611_v15, %v14440_v21  ;;  %9739 = vst.sshfl [vmem:[#allocation4 + $0xb0] sm:$0x55 pattern:$0x73625140] %v7611_v15 }
 0xac9   : > { %v7609_v14 = vmax.f32 %v7573_v53, 0.0  ;;  %v8092_v39 = vadd.f32 %v14535_v58, %v8078_v33 }
 0xaca   : > { %7811 = vst [vmem:[#allocation5 + $0x91] sm:$0xf] %v7795_v28  ;;  %v7744_v9 = vcombine.high %v7716_v7, %v7716_v7  ;;  %v7911_v7 = vadd.f32 %v7903_v17, %v7883_v59 }
 0xacb   : > { %v7709_v48 = vrot.slane %v7609_v14, %v14440_v21  ;;  %9738 = vst.sshfl [vmem:[#allocation4 + $0xa0] sm:$0x55 pattern:$0x73625140] %v7609_v14  ;;  %v8100_v30 = vmax.f32 %v8092_v39, 0.0 }
 0xacc   : > { %7760 = vst [vmem:[#allocation3 + $0xb1] sm:$0xf] %v7744_v9  ;;  %v7948_v9 = vld [vmem:[#allocation6 + $0xa0] sm:$0xf] }
 0xacd   : > { %v7743_v57 = vcombine.high %v7709_v48, %v7709_v48  ;;  %v8131_v55 = vcombine.low %v8099_v11, %v8100_v30  ;;  %v7960_v0 = vmul.f32 %v14482_v56, %v7948_v9 }
 0xace   : > { %v10261_v61 = vpop.f32.mrf.mxu1 }
 0xacf   : > { %7759 = vst [vmem:[#allocation3 + $0xa1] sm:$0xf] %v7743_v57  ;;  %v7594_v3 = vadd.f32 %v10261_v61, %v14436_v63  ;;  %v8138_v25 = vpack.c.bf16 %v8131_v55, %v8130_v1  ;;  %v7920_v33 = vld [vmem:[#allocation5 + $0xa0] sm:$0xf]  ;;  %v7865_v34 = vld [vmem:[#allocation4 + $0xb0] sm:$0xf] }
 0xad0   : > { %v7585_v52 = vpop.f32.mrf.mxu1  ;;  %v7932_v22 = vmul.f32 %v14477_v36, %v7920_v33  ;;  %v7877_v30 = vmul.f32 %v14458_v13, %v7865_v34  ;;  %v7947_v57 = vld [vmem:[#allocation6 + $0x90] sm:$0xf] }
 0xad1   : > { %v7614_v16 = vmax.f32 %v7594_v3, 0.0  ;;  %v7586_v45 = vadd.f32 %v14436_v63, %v7585_v52  ;;  %10279 = vmatprep.mubr.bf16.mxu0 %v8138_v25  ;;  %v7919_v5 = vld [vmem:[#allocation5 + $0x90] sm:$0xf]  ;;  %v7959_v3 = vmul.f32 %v14482_v56, %v7947_v57 }
 0xad2   : > { %v10262_v42 = vpop.f32.mrf.mxu1  ;;  %v7864_v31 = vld [vmem:[#allocation4 + $0xa0] sm:$0xf]  ;;  %v7975_v26 = vld [vmem:[#allocation5 + $0x91] sm:$0xf] }
 0xad3   : > { %v7674_v51 = vrot.slane %v7614_v16, %v14440_v21  ;;  %9749 = vst.sshfl [vmem:[#allocation6 + $0xc0] sm:$0x55 pattern:$0x73625140] %v7614_v16  ;;  %v7612_v35 = vmax.f32 %v7586_v45, 0.0  ;;  %v7597_v29 = vadd.f32 %v10262_v42, %v14436_v63  ;;  %v7876_v27 = vmul.f32 %v14458_v13, %v7864_v31 }
 0xad4   : > { %v7588_v60 = vpop.f32.mrf.mxu1  ;;  %v7837_v8 = vld [vmem:[#allocation3 + $0xb0] sm:$0xf] }
 0xad5   : > { %v7798_v46 = vcombine.high %v7674_v51, %v7674_v51  ;;  %v7667_v47 = vrot.slane %v7612_v35, %v14440_v21  ;;  %9748 = vst.sshfl [vmem:[#allocation6 + $0xb0] sm:$0x55 pattern:$0x73625140] %v7612_v35  ;;  %v7615_v49 = vmax.f32 %v7597_v29, 0.0  ;;  %v7589_v6 = vadd.f32 %v14436_v63, %v7588_v60 }
 0xad6   : > { %v7836_v10 = vld [vmem:[#allocation3 + $0xa0] sm:$0xf]  ;;  %v7931_v63 = vmul.f32 %v14477_v36, %v7919_v5  ;;  %v7849_v18 = vmul.f32 %v14454_v32, %v7837_v8  ;;  %v7893_v1 = vld [vmem:[#allocation3 + $0xb1] sm:$0xf]  ;;  %v7987_v60 = vmul.f32 %v14493_v41, %v7975_v26 }
 0xad7   : > { %v7892_v23 = vld [vmem:[#allocation3 + $0xa1] sm:$0xf]  ;;  %v7848_v20 = vmul.f32 %v14454_v32, %v7836_v10  ;;  %7814 = vst [vmem:[#allocation5 + $0xc1] sm:$0xf] %v7798_v46  ;;  %v7797_v62 = vcombine.high %v7667_v47, %v7667_v47  ;;  %v7730_v15 = vrot.slane %v7615_v49, %v14440_v21  ;;  %v7613_v53 = vmax.f32 %v7589_v6, 0.0 }
 0xad8   : > { %9741 = vst.sshfl [vmem:[#allocation4 + $0xd0] sm:$0x55 pattern:$0x73625140] %v7615_v49  ;;  %v7904_v28 = vmul.f32 %v14465_v4, %v7892_v23  ;;  %v7939_v55 = vadd.f32 %v7931_v63, %v7911_v7  ;;  %v7885_v61 = vadd.f32 %v7877_v30, %v7849_v18  ;;  %v7905_v52 = vmul.f32 %v14465_v4, %v7893_v1  ;;  %v8004_v35 = vld [vmem:[#allocation3 + $0xb0] sm:$0xf] }
 0xad9   : > { %v7884_v38 = vadd.f32 %v7876_v27, %v7848_v20  ;;  %7813 = vst [vmem:[#allocation5 + $0xb1] sm:$0xf] %v7797_v62  ;;  %v7746_v14 = vcombine.high %v7730_v15, %v7730_v15  ;;  %v7723_v39 = vrot.slane %v7613_v53, %v14440_v21  ;;  %9740 = vst.sshfl [vmem:[#allocation4 + $0xc0] sm:$0x55 pattern:$0x73625140] %v7613_v53 }
 0xada   : > { %v7976_v21 = vld [vmem:[#allocation5 + $0xa1] sm:$0xf]  ;;  %v7967_v45 = vadd.f32 %v7959_v3, %v7939_v55  ;;  %v7913_v42 = vadd.f32 %v7905_v52, %v7885_v61  ;;  %v8016_v23 = vmul.f32 %v14500_v44, %v8004_v35  ;;  %v8032_v15 = vld [vmem:[#allocation4 + $0xb0] sm:$0xf] }
 0xadb   : > { %v7912_v48 = vadd.f32 %v7904_v28, %v7884_v38  ;;  %7762 = vst [vmem:[#allocation3 + $0xd1] sm:$0xf] %v7746_v14  ;;  %v7745_v11 = vcombine.high %v7723_v39, %v7723_v39  ;;  %v7988_v50 = vmul.f32 %v14493_v41, %v7976_v21  ;;  %v8003_v46 = vld [vmem:[#allocation3 + $0xa0] sm:$0xf] }
 0xadc   : > { %v7949_v16 = vld [vmem:[#allocation6 + $0xb0] sm:$0xf]  ;;  %v7995_v6 = vadd.f32 %v7987_v60, %v7967_v45  ;;  %v8015_v33 = vmul.f32 %v14500_v44, %v8003_v46  ;;  %v8031_v14 = vld [vmem:[#allocation4 + $0xa0] sm:$0xf] }
 0xadd   : > { %v7940_v24 = vadd.f32 %v7932_v22, %v7912_v48  ;;  %7761 = vst [vmem:[#allocation3 + $0xc1] sm:$0xf] %v7745_v11  ;;  %v7961_v5 = vmul.f32 %v14482_v56, %v7949_v16  ;;  %v7950_v39 = vld [vmem:[#allocation6 + $0xc0] sm:$0xf]  ;;  %v8060_v11 = vld [vmem:[#allocation3 + $0xb1] sm:$0xf]  ;;  %v8043_v57 = vmul.f32 %v14508_v37, %v8031_v14 }
 0xade   : > { %v7922_v53 = vld [vmem:[#allocation5 + $0xc0] sm:$0xf]  ;;  %v8023_v48 = vadd.f32 %v8015_v33, %v7995_v6  ;;  %v8072_v3 = vmul.f32 %v14519_v54, %v8060_v11  ;;  %v10826_v33 = vld [vmem:[#allocation49 + $0x8c] ss:$16 sps:$4 sm:$0xff]  }
 0xadf   : > { %v7968_v25 = vadd.f32 %v7960_v0, %v7940_v24  ;;  %v7934_v9 = vmul.f32 %v14477_v36, %v7922_v53  ;;  %v7978_v30 = vld [vmem:[#allocation5 + $0xc1] sm:$0xf]  ;;  %v10818_v53 = vld [vmem:[#allocation49 + $0xa8] ss:$16 sps:$4 sm:$0xff]   ;;  %v10844_v14 = vld [vmem:[#allocation49 + $0x2c] ss:$16 sps:$4 sm:$0xff]  }
 0xae0   : > { %v7921_v43 = vld [vmem:[#allocation5 + $0xb0] sm:$0xf]  ;;  %v7866_v29 = vld [vmem:[#allocation4 + $0xc0] sm:$0xf]  ;;  %v8051_v52 = vadd.f32 %v8043_v57, %v8023_v48  ;;  %v10848_v48 = vld [vmem:[#allocation49 + $0x8] ss:$16 sps:$4 sm:$0xff]  }
 0xae1   : > { %v7933_v51 = vmul.f32 %v14477_v36, %v7921_v43  ;;  %v7977_v31 = vld [vmem:[#allocation5 + $0xb1] sm:$0xf]  ;;  %v7996_v59 = vadd.f32 %v7988_v50, %v7968_v25  ;;  %v7878_v20 = vmul.f32 %v14458_v13, %v7866_v29  ;;  %v8033_v18 = vld [vmem:[#allocation4 + $0xc0] sm:$0xf]  ;;  %v7990_v36 = vmul.f32 %v14493_v41, %v7978_v30 }
 0xae2   : > { %v7989_v62 = vmul.f32 %v14493_v41, %v7977_v31  ;;  %v8045_v55 = vmul.f32 %v14508_v37, %v8033_v18  ;;  %v8059_v0 = vld [vmem:[#allocation3 + $0xa1] sm:$0xf]  ;;  %v8006_v61 = vld [vmem:[#allocation3 + $0xd0] sm:$0xf]  ;;  %v10842_v18 = vld [vmem:[#allocation49 + $0x28] ss:$16 sps:$4 sm:$0xff]  }
 0xae3   : > { %v7941_v17 = vadd.f32 %v7933_v51, %v7913_v42  ;;  %v8024_v34 = vadd.f32 %v8016_v23, %v7996_v59  ;;  %v8034_v43 = vld [vmem:[#allocation4 + $0xd0] sm:$0xf]  ;;  %v8071_v16 = vmul.f32 %v14519_v54, %v8059_v0  ;;  %v8018_v50 = vmul.f32 %v14500_v44, %v8006_v61 }
 0xae4   : > { %v7838_v47 = vld [vmem:[#allocation3 + $0xc0] sm:$0xf]  ;;  %v8062_v51 = vld [vmem:[#allocation3 + $0xd1] sm:$0xf]  ;;  %v8046_v29 = vmul.f32 %v14508_v37, %v8034_v43 }
 0xae5   : > { %v7894_v49 = vld [vmem:[#allocation3 + $0xc1] sm:$0xf]  ;;  %v7850_v8 = vmul.f32 %v14454_v32, %v7838_v47  ;;  %v7969_v27 = vadd.f32 %v7961_v5, %v7941_v17  ;;  %v8044_v32 = vmul.f32 %v14508_v37, %v8032_v15  ;;  %v8079_v31 = vadd.f32 %v8071_v16, %v8051_v52  ;;  %v10820_v15 = vld [vmem:[#allocation49 + $0xac] ss:$16 sps:$4 sm:$0xff]   ;;  %v10855_v43 = vld [vmem:[#allocation51 + $0x70] sm:$0xff]  }
 0xae6   : > { %v8005_v10 = vld [vmem:[#allocation3 + $0xc0] sm:$0xf]  ;;  %v7906_v28 = vmul.f32 %v14465_v4, %v7894_v49  ;;  %v7962_v4 = vmul.f32 %v14482_v56, %v7950_v39  ;;  %v8074_v41 = vmul.f32 %v14519_v54, %v8062_v51  ;;  %v10853_v52 = vld [vmem:[#allocation51 + $0x38] sm:$0xff]   ;;  %v10856_v16 = vld [vmem:[#allocation51 + $0xf0] sm:$0xff]  }
 0xae7   : > { %v7886_v38 = vadd.f32 %v7878_v20, %v7850_v8  ;;  %v7997_v7 = vadd.f32 %v7989_v62, %v7969_v27  ;;  %v8017_v63 = vmul.f32 %v14500_v44, %v8005_v10  ;;  %v8052_v24 = vadd.f32 %v8044_v32, %v8024_v34  ;;  %v8061_v21 = vld [vmem:[#allocation3 + $0xc1] sm:$0xf]  ;;  %v10806_v20 = vld [vmem:[#allocation49 + $0xe8] ss:$16 sps:$4 sm:$0xff]   ;;  %v10814_v62 = vld [vmem:[#allocation49 + $0xcc] ss:$16 sps:$4 sm:$0xff]  }
 0xae8   : > { %v8073_v56 = vmul.f32 %v14519_v54, %v8061_v21  ;;  %v8093_v46 = vadd.f32 %v14535_v58, %v8079_v31  ;;  %v10812_v54 = vld [vmem:[#allocation49 + $0xc8] ss:$16 sps:$4 sm:$0xff]   ;;  %v10832_v34 = vld [vmem:[#allocation49 + $0x6c] ss:$16 sps:$4 sm:$0xff]   ;;  %v10839_v39 = vld [vmem:[#allocation49 + $0x20] ss:$16 sps:$4 sm:$0xff]  }
 0xae9   : > { %v7914_v13 = vadd.f32 %v7906_v28, %v7886_v38  ;;  %v8025_v22 = vadd.f32 %v8017_v63, %v7997_v7  ;;  %v8080_v42 = vadd.f32 %v8072_v3, %v8052_v24  ;;  %v10830_v38 = vld [vmem:[#allocation49 + $0x68] ss:$16 sps:$4 sm:$0xff]   ;;  %v10838_v28 = vld [vmem:[#allocation49 + $0x4c] ss:$16 sps:$4 sm:$0xff]   ;;  %v10841_v63 = vld [vmem:[#allocation49 + $0x24] ss:$16 sps:$4 sm:$0xff]  }
 0xaea   : > { %v8101_v6 = vmax.f32 %v8093_v46, 0.0  ;;  %v10836_v7 = vld [vmem:[#allocation49 + $0x48] ss:$16 sps:$4 sm:$0xff]   ;;  %8471 = vmatprep.subr.bf16.mxu1 %v10841_v63  ;;  %v10847_v32 = vld [vmem:[#allocation49 + $0x4] ss:$16 sps:$4 sm:$0xff]  }
 0xaeb   : > { %v7942_v1 = vadd.f32 %v7934_v9, %v7914_v13  ;;  %v8053_v26 = vadd.f32 %v8045_v55, %v8025_v22  ;;  %v8094_v17 = vadd.f32 %v14535_v58, %v8080_v42  ;;  %8472 = vmatpush1.bf16.msra.mxu1 %v10839_v39  ;;  %v10850_v13 = vld [vmem:[#allocation49 + $0xc] ss:$16 sps:$4 sm:$0xff]   ;;  %v10845_v9 = vld [vmem:[#allocation49] ss:$16 sps:$4 sm:$0xff]   ;;  %v11842_v22 = vmov 0  }
 0xaec   : > { %8473 = vmatprep.subr.bf16.mxu1 %v10847_v32  ;;  %8491 = vmatprep.mubr.bf16.mxu1 %v11842_v22  ;;  %v10860_v42 = vld [vmem:[#allocation51 + $0xe8] sm:$0xff]   ;;  %v10864_v31 = vld [vmem:[#allocation51 + $0xe0] sm:$0xff]   ;;  %v10870_v46 = vld [vmem:[#allocation51 + $0x98] sm:$0xff]  }
 0xaed   : > { %v7970_v25 = vadd.f32 %v7962_v4, %v7942_v1  ;;  %v8081_v60 = vadd.f32 %v8073_v56, %v8053_v26  ;;  %v8102_v49 = vmax.f32 %v8094_v17, 0.0  ;;  %v9751_v1 = vld [vmem:[%s14914_s8] ss:$0 sm:$0xff]  ;;  %v10854_v26 = vld [vmem:[#allocation51 + $0xb8] sm:$0xff]   ;;  %v10859_v56 = vld [vmem:[#allocation51 + $0x68] sm:$0xff]  }
 0xaee   : > { %v10861_v51 = vld [vmem:[#allocation51 + $0x28] sm:$0xff]   ;;  %v10868_v17 = vld [vmem:[#allocation51 + $0xd8] sm:$0xff]  }
 0xaef   : > { %v7998_v45 = vadd.f32 %v7990_v36, %v7970_v25  ;;  %v8095_v47 = vadd.f32 %v14535_v58, %v8081_v60  ;;  %v8132_v8 = vcombine.low %v8101_v6, %v8102_v49  ;;  %8474 = vmatpush1.bf16.msra.mxu1 %v10845_v9  ;;  %v10851_v25 = vld [vmem:[#allocation51 + $0x78] sm:$0xff]   ;;  %v10865_v60 = vld [vmem:[#allocation51 + $0x20] sm:$0xff]   ;;  %v10873_v49 = vld [vmem:[#allocation51 + $0x10] sm:$0xff]  }
 0xaf0   : > { %v10852_v36 = vld [vmem:[#allocation51 + $0xf8] sm:$0xff]   ;;  %9995 = vmatprep.subr.bf16.mxu1 %v10851_v25  ;;  %v10874_v6 = vld [vmem:[#allocation51 + $0x90] sm:$0xff]  }
 0xaf1   : > { %v8026_v35 = vadd.f32 %v8018_v50, %v7998_v45  ;;  %v8103_v10 = vmax.f32 %v8095_v47, 0.0  ;;  %v10857_v45 = vld [vmem:[#allocation51 + $0x30] sm:$0xff]  }
 0xaf2   : > { %v10858_v50 = vld [vmem:[#allocation51 + $0xb0] sm:$0xff]  }
 0xaf3   : > { %v8054_v59 = vadd.f32 %v8046_v29, %v8026_v35  ;;  %v10862_v35 = vld [vmem:[#allocation51 + $0xa8] sm:$0xff]   ;;  %v10863_v29 = vld [vmem:[#allocation51 + $0x60] sm:$0xff]   ;;  %v10871_v47 = vld [vmem:[#allocation51 + $0x50] sm:$0xff]  }
 0xaf5   : > { %v8082_v5 = vadd.f32 %v8074_v41, %v8054_v59  ;;  %v10866_v59 = vld [vmem:[#allocation51 + $0xa0] sm:$0xff]   ;;  %v10867_v41 = vld [vmem:[#allocation51 + $0x58] sm:$0xff]  }
 0xaf7   : > { %v8096_v44 = vadd.f32 %v14535_v58, %v8082_v5  ;;  %v10824_v58 = vld [vmem:[#allocation49 + $0x88] ss:$16 sps:$4 sm:$0xff]  }
 0xaf8   : > { %v10869_v5 = vld [vmem:[#allocation51 + $0x18] sm:$0xff]  }
 0xaf9   : > { %v8104_v23 = vmax.f32 %v8096_v44, 0.0  ;;  %v10872_v44 = vld [vmem:[#allocation51 + $0xd0] sm:$0xff]  }
 0xafb   : > { %v8133_v37 = vcombine.low %v8103_v10, %v8104_v23  ;;  %v10875_v10 = vld [vmem:[#allocation51 + $0x48] sm:$0xff]  }
 0xafc   : > { %v10876_v23 = vld [vmem:[#allocation51 + $0xc8] sm:$0xff]  }
 0xafd   : > { %v8139_v27 = vpack.c.bf16 %v8133_v37, %v8132_v8  ;;  %v10877_v8 = vld [vmem:[#allocation51 + $0x8] sm:$0xff]  }
 0xafe   : > { %v10878_v37 = vld [vmem:[#allocation51 + $0x88] sm:$0xff]  }
 0xaff   : > { %10280 = vmatmul.mubr.bf16.vlgmr.msra.gmra.mxu0 %v8139_v27  ;;  %v10880_v27 = vld [vmem:[#allocation51 + $0xc0] sm:$0xff]  }
 0xb00   : > { %8513 = vmatpush1.bf16.msra.mxu0 %v10806_v20  ;;  %8544 = vmatprep.mubr.bf16.mxu0 %v11842_v22  ;;  %v10879_v20 = vld [vmem:[#allocation51 + $0x40] sm:$0xff]  }
 0xb01   : > { %8514 = vmatprep.subr.bf16.mxu0 %v10814_v62  ;;  %v10881_v62 = vld [vmem:[#allocation51] sm:$0xff]  }
 0xb04   : > { %8515 = vmatpush1.bf16.msra.mxu0 %v10812_v54  ;;  %v10882_v54 = vld [vmem:[#allocation51 + $0x80] sm:$0xff]  }
 0xb05   : > { %8516 = vmatprep.subr.bf16.mxu0 %v10820_v15  ;;  %v8275_v15 = vld [vmem:[%s14915_s16] sm:$0xf] }
 0xb08   : > { %8517 = vmatpush1.bf16.msra.mxu0 %v10818_v53  ;;  %v8282_v53 = vrot.slane %v8275_v15, %v14906_v12 }
 0xb09   : > { %8518 = vmatprep.subr.bf16.mxu0 %v10826_v33  ;;  %v8290_v33 = vrot.slane %v8275_v15, %v14908_v40 }
 0xb0c   : > { %8519 = vmatpush1.bf16.msra.mxu0 %v10824_v58 }
 0xb0d   : > { %8520 = vmatprep.subr.bf16.mxu0 %v10832_v34 }
 0xb10   : > { %8521 = vmatpush1.bf16.msra.mxu0 %v10830_v38  ;;  %v8286_v38 = vrot.slane %v8275_v15, %v14907_v19 }
 0xb11   : > { %8522 = vmatprep.subr.bf16.mxu0 %v10838_v28  ;;  %v8294_v28 = vrot.slane %v8275_v15, %v14909_v2 }
 0xb14   : > { %8523 = vmatpush1.bf16.msra.mxu0 %v10836_v7 }
 0xb15   : > { %8524 = vmatprep.subr.bf16.mxu0 %v10844_v14 }
 0xb18   : > { %8525 = vmatpush1.bf16.msra.mxu0 %v10842_v18 }
 0xb19   : > { %8526 = vmatprep.subr.bf16.mxu0 %v10850_v13 }
 0xb1c   : > { %8527 = vmatpush1.bf16.msra.mxu0 %v10848_v48 }
 0xb1d   : > { %10017 = vmatprep.subr.bf16.mxu0 %v10852_v36 }
 0xbbf   : > { %v10281_v11 = vpop.f32.mrf.mxu0 }
 0xbc0   : > { %v8237_v21 = vadd.f32 %v10281_v11, %v9751_v1 }
 0xbc1   : > { %v8228_v30 = vpop.f32.mrf.mxu0 }
 0xbc2   : > { %v8229_v55 = vadd.f32 %v9751_v1, %v8228_v30 }
 0xbc3   : > { %v10282_v57 = vpop.f32.mrf.mxu0 }
 0xbc4   : > { %v8240_v61 = vadd.f32 %v10282_v57, %v9751_v1 }
 0xbc5   : > { %v8231_v4 = vpop.f32.mrf.mxu0 }
 0xbc6   : > { %v8232_v24 = vadd.f32 %v9751_v1, %v8231_v4  ;;  %v8277_v3 = vpack.c.bf16 %v8240_v61, %v8237_v21 }
 0xbc8   : > { %v8276_v0 = vpack.c.bf16 %v8232_v24, %v8229_v55 }
 0xbca   : > { %8492 = vmatmul.mubr.bf16.vlgmr.msra.gmra.mxu1 %v8276_v0  ;;  %8545 = vmatmul.mubr.bf16.vlgmr.msra.gmra.mxu0 %v8276_v0 }
 0xbcb   : > { %8501 = vmatprep.mubr.bf16.mxu1 %v11842_v22  ;;  %8554 = vmatprep.mubr.bf16.mxu0 %v11842_v22 }
 0xbcc   : > { %9996 = vmatpush3.bf16.msra.mxu1 %v10853_v52  ;;  %10018 = vmatpush3.bf16.msra.mxu0 %v10854_v26 }
 0xbcd   : > { %9997 = vmatprep.subr.bf16.mxu1 %v10855_v43  ;;  %10019 = vmatprep.subr.bf16.mxu0 %v10856_v16 }
 0xbd0   : > { %9998 = vmatpush3.bf16.msra.mxu1 %v10857_v45  ;;  %10020 = vmatpush3.bf16.msra.mxu0 %v10858_v50 }
 0xbd1   : > { %9999 = vmatprep.subr.bf16.mxu1 %v10859_v56  ;;  %10021 = vmatprep.subr.bf16.mxu0 %v10860_v42 }
 0xbd2   : > { %8502 = vmatmul.mubr.bf16.gmra.mxu1 %v8277_v3  ;;  %8555 = vmatmul.mubr.bf16.gmra.mxu0 %v8277_v3 }
 0xbd4   : > { %10000 = vmatpush3.bf16.msra.mxu1 %v10861_v51  ;;  %10022 = vmatpush3.bf16.msra.mxu0 %v10862_v35 }
 0xbd5   : > { %10001 = vmatprep.subr.bf16.mxu1 %v10863_v29  ;;  %10023 = vmatprep.subr.bf16.mxu0 %v10864_v31 }
 0xbd8   : > { %10002 = vmatpush3.bf16.msra.mxu1 %v10865_v60  ;;  %10024 = vmatpush3.bf16.msra.mxu0 %v10866_v59 }
 0xbd9   : > { %10003 = vmatprep.subr.bf16.mxu1 %v10867_v41  ;;  %10025 = vmatprep.subr.bf16.mxu0 %v10868_v17 }
 0xbdc   : > { %10004 = vmatpush3.bf16.msra.mxu1 %v10869_v5  ;;  %10026 = vmatpush3.bf16.msra.mxu0 %v10870_v46 }
 0xbdd   : > { %10005 = vmatprep.subr.bf16.mxu1 %v10871_v47  ;;  %10027 = vmatprep.subr.bf16.mxu0 %v10872_v44 }
 0xbe0   : > { %10006 = vmatpush3.bf16.msra.mxu1 %v10873_v49  ;;  %10028 = vmatpush3.bf16.msra.mxu0 %v10874_v6 }
 0xbe1   : > { %10007 = vmatprep.subr.bf16.mxu1 %v10875_v10  ;;  %10029 = vmatprep.subr.bf16.mxu0 %v10876_v23 }
 0xbe4   : > { %10008 = vmatpush3.bf16.msra.mxu1 %v10877_v8  ;;  %10030 = vmatpush3.bf16.msra.mxu0 %v10878_v37 }
 0xbe5   : > { %10009 = vmatprep.subr.bf16.mxu1 %v10879_v20  ;;  %10031 = vmatprep.subr.bf16.mxu0 %v10880_v27 }
 0xbe8   : > { %10010 = vmatpush3.bf16.msra.mxu1 %v10881_v62  ;;  %10032 = vmatpush3.bf16.msra.mxu0 %v10882_v54 }
 0xc8a   : > { %v8493_v58 = vpop.f32.mrf.mxu1  ;;  %v8546_v34 = vpop.f32.mrf.mxu0 }
 0xc8b   : > { %v8494_v7 = vadd.f32 %v8493_v58, %v8282_v53  ;;  %v8547_v63 = vadd.f32 %v8546_v34, %v8290_v33 }
 0xc8c   : > { %v8495_v14 = vpop.f32.mrf.mxu1  ;;  %v8548_v39 = vpop.f32.mrf.mxu0 }
 0xc8d   : > { %v8496_v18 = vadd.f32 %v8495_v14, %v8286_v38  ;;  %v8549_v32 = vadd.f32 %v8548_v39, %v8294_v28  ;;  %v8565_v11 = vmax.f32 %v8494_v7, 0.0  ;;  %v8567_v12 = vmax.f32 %v8547_v63, 0.0 }
 0xc8e   : > { %v8497_v13 = vpop.f32.mrf.mxu1  ;;  %v8550_v9 = vpop.f32.mrf.mxu0 }
 0xc8f   : > { %v8498_v48 = vadd.f32 %v8497_v13, %v8282_v53  ;;  %v8551_v22 = vadd.f32 %v8550_v9, %v8290_v33  ;;  %v8566_v55 = vmax.f32 %v8496_v18, 0.0  ;;  %v8568_v2 = vmax.f32 %v8549_v32, 0.0 }
 0xc90   : > { %v8499_v30 = vpop.f32.mrf.mxu1  ;;  %v8552_v40 = vpop.f32.mrf.mxu0 }
 0xc91   : > { %v8569_v57 = vmax.f32 %v8498_v48, 0.0  ;;  %v8571_v1 = vmax.f32 %v8551_v22, 0.0  ;;  %v8500_v4 = vadd.f32 %v8499_v30, %v8286_v38  ;;  %v8553_v19 = vadd.f32 %v8552_v40, %v8294_v28 }
 0xc92   : > { %v8503_v24 = vpop.f32.mrf.mxu1  ;;  %v8556_v0 = vpop.f32.mrf.mxu0 }
 0xc93   : > { %v8581_v61 = vadd.f32 %v8569_v57, %v8565_v11  ;;  %v8595_v21 = vadd.f32 %v8571_v1, %v8567_v12  ;;  %v8570_v3 = vmax.f32 %v8500_v4, 0.0  ;;  %v8572_v25 = vmax.f32 %v8553_v19, 0.0 }
 0xc94   : > { %v8504_v36 = vadd.f32 %v8503_v24, %v8282_v53  ;;  %v8557_v52 = vadd.f32 %v8556_v0, %v8290_v33  ;;  %v8505_v26 = vpop.f32.mrf.mxu1  ;;  %v8558_v43 = vpop.f32.mrf.mxu0 }
 0xc95   : > { %v8582_v16 = vrot.slane %v8581_v61, 4  ;;  %v8596_v45 = vrot.slane %v8595_v21, 4  ;;  %v8588_v50 = vadd.f32 %v8570_v3, %v8566_v55  ;;  %v8602_v56 = vadd.f32 %v8572_v25, %v8568_v2 }
 0xc96   : > { %v8506_v42 = vadd.f32 %v8505_v26, %v8286_v38  ;;  %v8559_v51 = vadd.f32 %v8558_v43, %v8294_v28  ;;  %v8507_v35 = vpop.f32.mrf.mxu1  ;;  %v8560_v29 = vpop.f32.mrf.mxu0  ;;  %v8573_v17 = vmax.f32 %v8504_v36, 0.0  ;;  %v8575_v5 = vmax.f32 %v8557_v52, 0.0 }
 0xc97   : > { %v8583_v31 = vadd.f32 %v8582_v16, %v8581_v61  ;;  %v8597_v60 = vadd.f32 %v8596_v45, %v8595_v21  ;;  %v8589_v59 = vrot.slane %v8588_v50, 4  ;;  %v8603_v41 = vrot.slane %v8602_v56, 4 }
 0xc98   : > { %v8508_v46 = vadd.f32 %v8507_v35, %v8282_v53  ;;  %v8561_v47 = vadd.f32 %v8560_v29, %v8290_v33  ;;  %v8509_v44 = vpop.f32.mrf.mxu1  ;;  %v8562_v49 = vpop.f32.mrf.mxu0  ;;  %v8574_v58 = vmax.f32 %v8506_v42, 0.0  ;;  %v8576_v34 = vmax.f32 %v8559_v51, 0.0 }
 0xc99   : > { %v8584_v6 = vrot.slane %v8583_v31, 2  ;;  %v8598_v10 = vrot.slane %v8597_v60, 2  ;;  %v8590_v23 = vadd.f32 %v8589_v59, %v8588_v50  ;;  %v8604_v8 = vadd.f32 %v8603_v41, %v8602_v56 }
 0xc9a   : > { %v8577_v37 = vmax.f32 %v8508_v46, 0.0  ;;  %v8579_v20 = vmax.f32 %v8561_v47, 0.0  ;;  %v8510_v27 = vadd.f32 %v8509_v44, %v8286_v38  ;;  %v8563_v62 = vadd.f32 %v8562_v49, %v8294_v28 }
 0xc9b   : > { %v8591_v54 = vrot.slane %v8590_v23, 2  ;;  %v8605_v15 = vrot.slane %v8604_v8, 2  ;;  %v8585_v53 = vadd.f32 %v8584_v6, %v8583_v31  ;;  %v8599_v33 = vadd.f32 %v8598_v10, %v8597_v60 }
 0xc9c   : > { %v8609_v7 = vadd.f32 %v8577_v37, %v8573_v17  ;;  %v8623_v63 = vadd.f32 %v8579_v20, %v8575_v5  ;;  %v8578_v14 = vmax.f32 %v8510_v27, 0.0  ;;  %v8580_v39 = vmax.f32 %v8563_v62, 0.0 }
 0xc9d   : > { %v8592_v18 = vadd.f32 %v8591_v54, %v8590_v23  ;;  %v8606_v32 = vadd.f32 %v8605_v15, %v8604_v8  ;;  %v8586_v30 = vrot.slane %v8585_v53, 1  ;;  %v8600_v40 = vrot.slane %v8599_v33, 1 }
 0xc9e   : > { %v8610_v13 = vrot.slane %v8609_v7, 4  ;;  %v8624_v9 = vrot.slane %v8623_v63, 4  ;;  %v8616_v48 = vadd.f32 %v8578_v14, %v8574_v58  ;;  %v8630_v22 = vadd.f32 %v8580_v39, %v8576_v34 }
 0xc9f   : > { %v8593_v57 = vrot.slane %v8592_v18, 1  ;;  %v8607_v1 = vrot.slane %v8606_v32, 1  ;;  %v8587_v3 = vadd.f32 %v8586_v30, %v8585_v53  ;;  %v8601_v25 = vadd.f32 %v8600_v40, %v8599_v33  ;;  %v9792_v53 = vld [vmem:[%s14916_s18] ss:$0 sm:$0xff] }
 0xca0   : > { %v8611_v11 = vadd.f32 %v8610_v13, %v8609_v7  ;;  %v8625_v12 = vadd.f32 %v8624_v9, %v8623_v63  ;;  %v8617_v38 = vrot.slane %v8616_v48, 4  ;;  %v8631_v28 = vrot.slane %v8630_v22, 4 }
 0xca1   : > { %v8594_v36 = vadd.f32 %v8593_v57, %v8592_v18  ;;  %v8608_v52 = vadd.f32 %v8607_v1, %v8606_v32  ;;  %v8702_v35 = vpack.c.bf16 %v8587_v3, %v8587_v3  ;;  %v8704_v29 = vpack.c.bf16 %v8601_v25, %v8601_v25 }
 0xca2   : > { %v8612_v4 = vrot.slane %v8611_v11, 2  ;;  %v8626_v19 = vrot.slane %v8625_v12, 2  ;;  %v8618_v55 = vadd.f32 %v8617_v38, %v8616_v48  ;;  %v8632_v2 = vadd.f32 %v8631_v28, %v8630_v22 }
 0xca3   : > { %v8703_v31 = vpack.c.bf16 %v8594_v36, %v8594_v36  ;;  %v8705_v60 = vpack.c.bf16 %v8608_v52, %v8608_v52  ;;  %v8724_v6 = vunpack.c.l.b16 %v8702_v35  ;;  %v8726_v10 = vunpack.c.l.b16 %v8704_v29 }
 0xca4   : > { %v8613_v24 = vadd.f32 %v8612_v4, %v8611_v11  ;;  %v8627_v0 = vadd.f32 %v8626_v19, %v8625_v12  ;;  %v8619_v61 = vrot.slane %v8618_v55, 2  ;;  %v8633_v21 = vrot.slane %v8632_v2, 2  ;;  %v9017_v11 = vld [vmem:[%s1297_s13] sm:$0x3] }
 0xca5   : > { %v8725_v23 = vunpack.c.l.b16 %v8703_v31  ;;  %v8727_v37 = vunpack.c.l.b16 %v8705_v60 }
 0xca6   : > { %v8614_v26 = vrot.slane %v8613_v24, 1  ;;  %v8628_v43 = vrot.slane %v8627_v0, 1  ;;  %v8620_v16 = vadd.f32 %v8619_v61, %v8618_v55  ;;  %v8634_v45 = vadd.f32 %v8633_v21, %v8632_v2 }
 0xca8   : > { %v8615_v50 = vadd.f32 %v8614_v26, %v8613_v24  ;;  %v8629_v56 = vadd.f32 %v8628_v43, %v8627_v0  ;;  %v8621_v42 = vrot.slane %v8620_v16, 1  ;;  %v8635_v51 = vrot.slane %v8634_v45, 1 }
 0xcaa   : > { %v8706_v59 = vpack.c.bf16 %v8615_v50, %v8615_v50  ;;  %v8708_v41 = vpack.c.bf16 %v8629_v56, %v8629_v56  ;;  %v8622_v17 = vadd.f32 %v8621_v42, %v8620_v16  ;;  %v8636_v5 = vadd.f32 %v8635_v51, %v8634_v45 }
 0xcac   : > { %v8728_v46 = vunpack.c.l.b16 %v8706_v59  ;;  %v8730_v47 = vunpack.c.l.b16 %v8708_v41  ;;  %v8707_v44 = vpack.c.bf16 %v8622_v17, %v8622_v17  ;;  %v8709_v49 = vpack.c.bf16 %v8636_v5, %v8636_v5 }
 0xcae   : > { %v8729_v8 = vunpack.c.l.b16 %v8707_v44  ;;  %v8731_v20 = vunpack.c.l.b16 %v8709_v49  ;;  %v8733_v27 = vsel %vm8732_vm1, %v8728_v46, %v8724_v6  ;;  %v8735_v62 = vsel %vm8732_vm1, %v8730_v47, %v8726_v10 }
 0xcaf   : > { %v8737_v7 = vpack.c.b16 %v8733_v27, %v8733_v27  ;;  %v8739_v63 = vpack.c.b16 %v8735_v62, %v8735_v62 }
 0xcb0   : > { %v8734_v54 = vsel %vm8732_vm1, %v8729_v8, %v8725_v23  ;;  %v8736_v15 = vsel %vm8732_vm1, %v8731_v20, %v8727_v37 }
 0xcb1   : > { %v8738_v58 = vpack.c.b16 %v8734_v54, %v8734_v54  ;;  %v8740_v34 = vpack.c.b16 %v8736_v15, %v8736_v15 }
 0xcb3   : > { %8969 = vmatprep.mubr.bf16.mxu1 %v8738_v58  ;;  %9009 = vmatprep.mubr.bf16.mxu0 %v8740_v34 }
 0xcb4   : > { %8970 = vmatmul.mubr.bf16.vlgmr.msra.gmra.mxu1 %v8737_v7  ;;  %9010 = vmatmul.mubr.bf16.vlgmr.msra.gmra.mxu0 %v8739_v63 }
 0xd74   : > { %v10011_v14 = vpop.f32.mrf.mxu1  ;;  %v10033_v39 = vpop.f32.mrf.mxu0 }
 0xd76   : > { %v10012_v33 = vpop.f32.mrf.mxu1  ;;  %v10034_v18 = vpop.f32.mrf.mxu0 }
 0xd77   : > { %v10013_v32 = vadd.f32 %v10012_v33, %v10011_v14  ;;  %v10035_v22 = vadd.f32 %v10034_v18, %v10033_v39 }
 0xd78   : > { %v10014_v13 = vpop.f32.mrf.mxu1  ;;  %v10036_v9 = vpop.f32.mrf.mxu0 }
 0xd79   : > { %v8972_v48 = vadd.f32 %v10013_v32, %v9792_v53 }
 0xd7a   : > { %v10015_v12 = vpop.f32.mrf.mxu1  ;;  %v10037_v38 = vpop.f32.mrf.mxu0 }
 0xd7b   : > { %v9012_v28 = vadd.f32 %v10035_v22, %v8972_v48 }
 0xd7d   : > { %v9018_v30 = vmul.f32 %v9017_v11, %v9012_v28 }
 0xd7f   : > { %9019 = vst [vmem:[%s12404_s10] sm:$0x3] %v9018_v30 }
 0xd80 PF: > { %s14917_s14 = sld [smem:[#allocation98_spill]]  ;;  %s9826_s9 = sshll.u32 %s12055_s7, 5 }
 0xd81   : > { %s9034_s8 = sshll.u32 %s12404_s10, 4  ;;  %s9021_s16 = scalar_lea.sflag [#allocation9], %s1295_s22  ;;  %s9035_s8 = int_to_ptr.vmem [resolvable:$true] %s9034_s8 }
 0xd82   : > { %s11641_s18 = scalar_lea.vmem %s9035_s8, 32  ;;  %p14918_p7 = scmp.ne.s32.totalorder %s14784_s6, 0 }
 0xd83   : > { %p11642_p9 = scmp.ne.s32.totalorder %s9035_s8, %s11641_s18  ;;  %s11843_s23 = smov [#allocation52]  }
 0xd84   : > { %s11645_s13 = sshll.u32 %s11843_s23, 4  ;;  %s11646_s13 = int_to_ptr.vmem [resolvable:$false] %s11645_s13 }
 0xd85   : > { %p11643_p11 = pnand %p11642_p9, %p14918_p7  ;;  %s11647_s4 = scalar_lea.vmem %s11646_s13, 64 }
 0xd86   : > { %s9032_s26 = scalar_lea.hbm %s14917_s14, %s9826_s9  ;;  %p11648_p10 = scmp.lt.s32.totalorder %s9035_s8, %s11646_s13 }
 0xd87   : > { %p11644_p13 = pneg %p11643_p11  ;;  %p11649_p0 = scmp.lt.s32.totalorder %s11647_s4, %s11641_s18 }
 0xd89   : > { %p11650_p5 = por %p11649_p0, %p11648_p10 }
 0xd8b   : > { %p11651_p1 = pnand %p11650_p5, %p11644_p13 }
 0xd8d   : > { %11654 = shalt.err (!%p11651_p1)
}
 0xd8e   : > { %s11655_s7 = scalar_lea.hbm %s9032_s26, 32  ;;  %s11659_s22 = scalar_lea.hbm %s14917_s14, 64 }
 0xd8f   : > { %p11656_p3 = scmp.ne.s32.totalorder %s9032_s26, %s11655_s7  ;;  %p11660_p12 = scmp.lt.s32.totalorder %s9032_s26, %s14917_s14 }
 0xd90   : > { %p11661_p2 = scmp.lt.s32.totalorder %s11659_s22, %s11655_s7 }
 0xd91   : > { %p11657_p4 = pnand %p11656_p3, %p14918_p7 }
 0xd92   : > { %p11662_p6 = por %p11661_p2, %p11660_p12 }
 0xd93   : > { %p11658_p8 = pneg %p11657_p4 }
 0xd95   : > { %p11663_p9 = pnand %p11662_p6, %p11658_p8 }
 0xd97   : > { %11666 = shalt.err (!%p11663_p9)
}
 0xd98   : > { %10397 = dma.vmem_to_hbm [thread:$0]  (%p14918_p7), %s9035_s8, 32, %s9032_s26, %s9021_s16  }
 0xd99 PF: > { %s9046_s4 = sand.u32 1, %s11753_s0   ;;  %p14919_p11 = scmp.ne.s32.totalorder %s14785_s21, 0 }
 0xd9a   : > { %p14920_p13 = scmp.ge.s32.totalorder %s11765_s2, 2  ;;  %s9047_s10 = scalar_lea.sflag [#allocation9], %s9046_s4 }
 0xd9c   : > { %p10489_p10 = pnand %p14920_p13, %p14919_p11 }
 0xd9e   : > { %p10490_p0 = pneg %p10489_p10 }
 0xda0   : > { %11748 = dma.done.wait (%p10490_p0), %s9047_s10, 32  }
 0xda1   : > { %11750 = vsyncadd (%p10490_p0), %s9047_s10, 4294967264  ;;  %p100_p5 = scmp.ge.s32.totalorder %s12275_s11, 4   ;;  %s14921_s0 = smov %s11757_s28 }
 0xda2   : > { %s14922_s28 = smov %s11761_s1  ;;  %s14923_s1 = smov %s12286_s3 }
 0xda3   : > { %s14924_s2 = smov %s12275_s11  ;;  %102 = sbr.rel (!%p100_p5) target bundleno = 90 (0x5a), region = 376 }
 0xda8   :  { %9052 = vsyncpa [#allocation8], 1 }
 0xda9   :  { %9054 = vsyncpa [#allocation8 + $0x1], 1 }
 0xdaa   :  { %9055 = vsyncpa [#allocation11], 1 }
 0xdab   :  { %9057 = vsyncpa [#allocation11 + $0x1], 1 }
 0xdac   :  { %9058 = vsyncpa [#allocation14], 1 }
 0xdad   :  { %9059 = vsyncpa [#allocation17], 1 }
 0xdae   :  { %9060 = vsyncpa [#allocation20], 1 }
 0xdaf   :  { %9061 = vsyncpa [#allocation23], 1 }
 0xdb0   :  { %9062 = vsyncpa [#allocation26], 1 }
 0xdb1   :  { %9063 = vsyncpa [#allocation29], 1 }
 0xdb2   :  { %9064 = vsyncpa [#allocation32], 1 }
 0xdb3   :  { %9065 = vsyncpa [#allocation35], 1 }
 0xdb4   :  { %9066 = vsyncpa [#allocation38], 1 }
 0xdb5   :  { %9067 = vsyncpa [#allocation41], 1 }
 0xdb6   :  { %9068 = vsyncpa [#allocation44], 1 }
 0xdb7   :  { %9069 = vsyncpa [#allocation47], 1 }
 0xdb8   :  { %9070 = vsyncpa [#allocation50], 1 }
 0xdb9   :  { %9071 = vsyncpa [#allocation9], 1 }
 0xdba   :  { %9073 = vsyncpa [#allocation9 + $0x1], 1 }

</bundles_post_ra>
